<compile_context>
chip_gen: v7x
topology: tpu7x:2x2x1
jax: 0.10.0
libtpu: 0.0.40
codegen_flags: <defaults>
</compile_context>

<pallas_src>
import jax
import jax.numpy as jnp
import numpy as np
from jax.experimental import pallas as pl
from jax.experimental.pallas import tpu as pltpu


# ------------------------------ small helpers --------------------------------
def _round_up(x, m):
    return ((x + m - 1) // m) * m


def _pad_axis(a, axis, new_size):
    pad_amt = new_size - a.shape[axis]
    if pad_amt == 0:
        return a
    pad = [(0, 0)] * a.ndim
    pad[axis] = (0, pad_amt)
    return jnp.pad(a, pad)


def _pad_gate_axis(w, h, h_pad, axis):
    """Pad a 4H-sized axis per PyTorch gate block [i|f|g|o] -> 4*h_pad."""
    if h_pad == h:
        return w
    shape = list(w.shape)
    assert shape[axis] == 4 * h
    w4 = w.reshape(shape[:axis] + [4, h] + shape[axis + 1:])
    pad = [(0, 0)] * w4.ndim
    pad[axis + 1] = (0, h_pad - h)
    w4 = jnp.pad(w4, pad)
    return w4.reshape(shape[:axis] + [4 * h_pad] + shape[axis + 1:])


def _pick_tile(total, cap, unit):
    """Largest multiple of `unit` <= cap that divides `total` (total % unit == 0)."""
    t = min(total, max(cap, unit))
    t = max(unit, (t // unit) * unit)
    while total % t:
        t -= unit
    return t


# ------------------------- recurrent (serial) kernel --------------------------
def _make_lstm_kernel(time_chunk, t_real, h_pad, needs_mask):
    TC, H = time_chunk, h_pad

    def kernel(
        pre0_ref,          # (TC, Bp, 4Hp)  hoisted x@Wih0 + b0 for this chunk
        whh0_ref,          # (Hp, 4Hp)
        wih1_ref,          # (Hp, 4Hp)
        whh1_ref,          # (Hp, 4Hp)
        b1_ref,            # (1, 4Hp)
        h1seq_ref,         # (TC, Bp, Hp)   layer-1 hidden per step (to epilogue)
        hn_ref,            # (2, Bp, Hp)    final hidden state
        cn_ref,            # (2, Bp, Hp)    final cell state
        h0_sc, c0_sc, h1_sc, c1_sc,   # VMEM scratch (Bp, Hp) f32 each
    ):
        chunk = pl.program_id(0)

        @pl.when(chunk == 0)
        def _():
            # lstm_hidden=None in the PyTorch forward -> zero initial states.
            h0_sc[...] = jnp.zeros_like(h0_sc)
            c0_sc[...] = jnp.zeros_like(c0_sc)
            h1_sc[...] = jnp.zeros_like(h1_sc)
            c1_sc[...] = jnp.zeros_like(c1_sc)

        def gates_to_hc(g, c_prev):
            # PyTorch gate order i, f, g, o; H is a multiple of 128 so these
            # slices are lane-tile aligned (free).
            i = jax.nn.sigmoid(g[:, 0 * H:1 * H])
            f = jax.nn.sigmoid(g[:, 1 * H:2 * H])
            gg = jnp.tanh(g[:, 2 * H:3 * H])
            o = jax.nn.sigmoid(g[:, 3 * H:4 * H])
            c_new = f * c_prev + i * gg
            h_new = o * jnp.tanh(c_new)
            return h_new, c_new

        def step(t, carry):
            h0, c0, h1, c1 = carry
            # Layer 0: input projection already hoisted; only recurrent matmul here.
            g0 = pre0_ref[t] + jnp.dot(
                h0, whh0_ref[...], preferred_element_type=jnp.float32)
            h0n, c0n = gates_to_hc(g0, c0)
            # Layer 1 (input = layer-0 hidden).
            g1 = (jnp.dot(h0n, wih1_ref[...], preferred_element_type=jnp.float32)
                  + jnp.dot(h1, whh1_ref[...], preferred_element_type=jnp.float32)
                  + b1_ref[...])
            h1n, c1n = gates_to_hc(g1, c1)
            if needs_mask:   # only traced when T was padded to a chunk multiple
                valid = (chunk * TC + t) < t_real
                h0n = jnp.where(valid, h0n, h0)
                c0n = jnp.where(valid, c0n, c0)
                h1n = jnp.where(valid, h1n, h1)
                c1n = jnp.where(valid, c1n, c1)
            h1seq_ref[t] = h1n
            return (h0n, c0n, h1n, c1n)

        h0, c0, h1, c1 = jax.lax.fori_loop(
            0, TC, step,
            (h0_sc[...], c0_sc[...], h1_sc[...], c1_sc[...]),
            unroll=True)

        h0_sc[...] = h0
        c0_sc[...] = c0
        h1_sc[...] = h1
        c1_sc[...] = c1

        @pl.when(chunk == pl.num_programs(0) - 1)
        def _():
            hn_ref[0, :, :] = h0.astype(hn_ref.dtype)
            hn_ref[1, :, :] = h1.astype(hn_ref.dtype)
            cn_ref[0, :, :] = c0.astype(cn_ref.dtype)
            cn_ref[1, :, :] = c1.astype(cn_ref.dtype)

    return kernel


# --------------------- fused h2h + h2o epilogue kernel -------------------------
def _proj_kernel(h_ref, wh2h_ref, bh2h_ref, wh2o_ref, bh2o_ref, out_ref, z_sc):
    # Grid: (row_tiles, vocab_tiles); vocab axis is inner ("arbitrary") so the
    # h2h intermediate z is computed once per row tile and reused.
    @pl.when(pl.program_id(1) == 0)
    def _():
        z_sc[...] = (jnp.dot(h_ref[...], wh2h_ref[...],
                             preferred_element_type=jnp.float32)
                     + bh2h_ref[...])

    out_ref[...] = (jnp.dot(z_sc[...], wh2o_ref[...],
                            preferred_element_type=jnp.float32)
                    + bh2o_ref[...]).astype(out_ref.dtype)


# ---------------------------------- wrapper -----------------------------------
def lyrics_net_forward(word_ids, params, *, time_chunk=8):
    """word_ids: (B, T) int32.  Returns (logits (B,T,V), (h_n, c_n)) like PyTorch."""
    emb = params["embedding"]                      # (V, E)
    B, T = word_ids.shape
    V, E = emb.shape
    H = params["whh0"].shape[0]

    # Tile-friendly padded sizes (sublane=8, lane=128).
    B_pad = _round_up(B, 8)
    H_pad = _round_up(H, 128)
    V_pad = _round_up(V, 128)
    TC = min(time_chunk, T)
    T_pad = _round_up(T, TC)
    needs_mask = (T_pad != T)
    G = 4 * H_pad

    # --- pad parameters (gate-wise on the 4H axes; zero padding is exact) ----
    wih0 = _pad_gate_axis(params["wih0"], H, H_pad, axis=1)            # (E, 4Hp)
    b0 = _pad_gate_axis(params["b0"], H, H_pad, axis=1)                # (1, 4Hp)
    whh0 = _pad_axis(_pad_gate_axis(params["whh0"], H, H_pad, 1), 0, H_pad)
    wih1 = _pad_axis(_pad_gate_axis(params["wih1"], H, H_pad, 1), 0, H_pad)
    whh1 = _pad_axis(_pad_gate_axis(params["whh1"], H, H_pad, 1), 0, H_pad)
    b1 = _pad_gate_axis(params["b1"], H, H_pad, axis=1)
    wh2h = _pad_axis(_pad_axis(params["wh2h"], 0, H_pad), 1, H_pad)
    bh2h = _pad_axis(params["bh2h"], 1, H_pad)
    wh2o = _pad_axis(_pad_axis(params["wh2o"], 0, H_pad), 1, V_pad)
    bh2o = _pad_axis(params["bh2o"], 1, V_pad)

    # --- embedding gather + hoisted layer-0 input projection (XLA glue) ------
    x = jnp.take(emb, word_ids, axis=0)            # (B, T, E)
    x_tm = jnp.transpose(x, (1, 0, 2))             # (T, B, E) time-major
    pre0 = jnp.einsum("tbe,eg->tbg", x_tm, wih0) + b0       # (T, B, 4Hp)
    pre0 = _pad_axis(pre0, 1, B_pad)               # pad batch (independent rows)
    pre0 = _pad_axis(pre0, 0, T_pad)               # pad time (masked in kernel)

    # --- recurrent Pallas kernel: grid over time chunks -----------------------
    n_chunks = T_pad // TC
    lstm_kernel = _make_lstm_kernel(TC, T, H_pad, needs_mask)

    h1_seq, h_n_pad, c_n_pad = pl.pallas_call(
        lstm_kernel,
        grid_spec=pltpu.PrefetchScalarGridSpec(
            num_scalar_prefetch=0,
            grid=(n_chunks,),
            in_specs=[
                pl.BlockSpec((TC, B_pad, G), lambda c: (c, 0, 0)),   # pre-gates
                pl.BlockSpec((H_pad, G), lambda c: (0, 0)),          # whh0
                pl.BlockSpec((H_pad, G), lambda c: (0, 0)),          # wih1
                pl.BlockSpec((H_pad, G), lambda c: (0, 0)),          # whh1
                pl.BlockSpec((1, G), lambda c: (0, 0)),              # b1
            ],
            out_specs=[
                pl.BlockSpec((TC, B_pad, H_pad), lambda c: (c, 0, 0)),  # h1 seq
                pl.BlockSpec((2, B_pad, H_pad), lambda c: (0, 0, 0)),   # h_n
                pl.BlockSpec((2, B_pad, H_pad), lambda c: (0, 0, 0)),   # c_n
            ],
            scratch_shapes=[pltpu.VMEM((B_pad, H_pad), jnp.float32)] * 4,
        ),
        out_shape=(
            jax.ShapeDtypeStruct((T_pad, B_pad, H_pad), jnp.float32),
            jax.ShapeDtypeStruct((2, B_pad, H_pad), jnp.float32),
            jax.ShapeDtypeStruct((2, B_pad, H_pad), jnp.float32),
        ),
        compiler_params=pltpu.CompilerParams(
            dimension_semantics=("arbitrary",),   # serial recurrence over chunks
        ),
    )(pre0, whh0, wih1, whh1, b1)

    # --- fused h2h + h2o epilogue (parallel, MXU-saturating) -------------------
    R = T_pad * B_pad
    RT = B_pad * TC                       # row tile; divides R, multiple of 8
    TV = _pick_tile(V_pad, 512, 128)      # vocab tile; multiple of 128
    rows = h1_seq.reshape(R, H_pad)

    logits_rows = pl.pallas_call(
        _proj_kernel,
        grid_spec=pltpu.PrefetchScalarGridSpec(
            num_scalar_prefetch=0,
            grid=(R // RT, V_pad // TV),
            in_specs=[
                pl.BlockSpec((RT, H_pad), lambda r, v: (r, 0)),     # h1 rows
                pl.BlockSpec((H_pad, H_pad), lambda r, v: (0, 0)),  # wh2h
                pl.BlockSpec((1, H_pad), lambda r, v: (0, 0)),      # bh2h
                pl.BlockSpec((H_pad, TV), lambda r, v: (0, v)),     # wh2o tile
                pl.BlockSpec((1, TV), lambda r, v: (0, v)),         # bh2o tile
            ],
            out_specs=pl.BlockSpec((RT, TV), lambda r, v: (r, v)),
            scratch_shapes=[pltpu.VMEM((RT, H_pad), jnp.float32)],
        ),
        out_shape=jax.ShapeDtypeStruct((R, V_pad), jnp.float32),
        compiler_params=pltpu.CompilerParams(
            dimension_semantics=("parallel", "arbitrary"),
        ),
    )(rows, wh2h, bh2h, wh2o, bh2o)

    logits = logits_rows.reshape(T_pad, B_pad, V_pad)
    logits = jnp.transpose(logits, (1, 0, 2))[:B, :T, :V]   # (B, T, V) batch_first
    h_n = h_n_pad[:, :B, :H]
    c_n = c_n_pad[:, :B, :H]
    return logits, (h_n, c_n)


# ----------------------------- pure-JAX reference ------------------------------
def lyrics_net_reference(word_ids, params):
    emb = params["embedding"]
    H = params["whh0"].shape[0]
    x = jnp.take(emb, word_ids, axis=0)            # (B, T, E)
    B, T, _ = x.shape

    def cell(x_t, h, c, wih, whh, b):
        gates = x_t @ wih + h @ whh + b
        i = jax.nn.sigmoid(gates[:, 0 * H:1 * H])
        f = jax.nn.sigmoid(gates[:, 1 * H:2 * H])
        g = jnp.tanh(gates[:, 2 * H:3 * H])
        o = jax.nn.sigmoid(gates[:, 3 * H:4 * H])
        c_new = f * c + i * g
        h_new = o * jnp.tanh(c_new)
        return h_new, c_new

    h0 = jnp.zeros((B, H)); c0 = jnp.zeros((B, H))
    h1 = jnp.zeros((B, H)); c1 = jnp.zeros((B, H))
    outs = []
    for t in range(T):
        h0, c0 = cell(x[:, t, :], h0, c0, params["wih0"], params["whh0"], params["b0"][0])
        h1, c1 = cell(h0, h1, c1, params["wih1"], params["whh1"], params["b1"][0])
        z = h1 @ params["wh2h"] + params["bh2h"][0]
        outs.append(z @ params["wh2o"] + params["bh2o"][0])
    logits = jnp.stack(outs, axis=1)
    h_n = jnp.stack([h0, h1], axis=0)
    c_n = jnp.stack([c0, c1], axis=0)
    return logits, (h_n, c_n)


# --------------------------------- param init ----------------------------------
def init_params(key, vocab_size, embed_size, hidden_size):
    H, E, V = hidden_size, embed_size, vocab_size
    k = 1.0 / np.sqrt(H)
    keys = jax.random.split(key, 13)
    u = lambda kk, shape: jax.random.uniform(kk, shape, jnp.float32, -k, k)
    return {
        "embedding": jax.random.normal(keys[0], (V, E), jnp.float32),
        # LSTM layer 0: weight_ih_l0 (4H,E) / weight_hh_l0 (4H,H) stored transposed.
        "wih0": u(keys[1], (E, 4 * H)),
        "whh0": u(keys[2], (H, 4 * H)),
        "b0": u(keys[3], (1, 4 * H)) + u(keys[4], (1, 4 * H)),   # b_ih + b_hh
        # LSTM layer 1
        "wih1": u(keys[5], (H, 4 * H)),
        "whh1": u(keys[6], (H, 4 * H)),
        "b1": u(keys[7], (1, 4 * H)) + u(keys[8], (1, 4 * H)),
        # h2h Linear (W^T), h2o Linear (W^T)
        "wh2h": u(keys[9], (H, H)),
        "bh2h": u(keys[10], (1, H)),
        "wh2o": u(keys[11], (H, V)),
        "bh2o": u(keys[12], (1, V)),
    }


if __name__ == "__main__":
    # Small shapes consistent with the module (vocab / embed / hidden scaled down).
    B, T = 2, 8
    VOCAB, EMBED, HIDDEN = 32, 32, 32

    key = jax.random.PRNGKey(0)
    pkey, dkey = jax.random.split(key)
    params = init_params(pkey, VOCAB, EMBED, HIDDEN)
    word_ids = jax.random.randint(dkey, (B, T), 0, VOCAB, dtype=jnp.int32)

    logits, (h_n, c_n) = jax.jit(lyrics_net_forward)(word_ids, params)
    jax.block_until_ready((logits, h_n, c_n))

    # Correctness check against a pure-JAX reference of the PyTorch semantics.
    ref_logits, (ref_h, ref_c) = lyrics_net_reference(word_ids, params)
    np.testing.assert_allclose(np.asarray(logits), np.asarray(ref_logits), rtol=1e-4, atol=1e-5)
    np.testing.assert_allclose(np.asarray(h_n), np.asarray(ref_h), rtol=1e-4, atol=1e-5)
    np.testing.assert_allclose(np.asarray(c_n), np.asarray(ref_c), rtol=1e-4, atol=1e-5)

    print("KERNEL_OK")
</pallas_src>

<mosaic_0001>
module attributes {stable_mosaic.version = 11 : i64} {
  func.func @_proj_kernel(%arg0: i32, %arg1: i32, %arg2: memref<64x128xf32, #tpu.memory_space<vmem>>, %arg3: memref<128x128xf32, #tpu.memory_space<vmem>>, %arg4: memref<1x128xf32, #tpu.memory_space<vmem>>, %arg5: memref<128x128xf32, #tpu.memory_space<vmem>>, %arg6: memref<1x128xf32, #tpu.memory_space<vmem>>, %arg7: memref<64x128xf32, #tpu.memory_space<vmem>>, %arg8: memref<64x128xf32, #tpu.memory_space<vmem>>) attributes {dimension_semantics = [#tpu.dimension_semantics<parallel>, #tpu.dimension_semantics<arbitrary>], iteration_bounds = array<i64: 1, 1>, scalar_prefetch = 0 : i64, scratch_operands = 1 : i64, tpu.core_type = #tpu.core_type<tc>, window_params = [{transform_indices = @transform_0, window_bounds = array<i64: 64, 128>}, {pipeline_mode = #tpu.pipeline_mode<synchronous>, transform_indices = @transform_1, window_bounds = array<i64: 128, 128>}, {pipeline_mode = #tpu.pipeline_mode<synchronous>, transform_indices = @transform_2, window_bounds = array<i64: 1, 128>}, {transform_indices = @transform_3, window_bounds = array<i64: 128, 128>}, {transform_indices = @transform_4, window_bounds = array<i64: 1, 128>}, {transform_indices = @transform_5, window_bounds = array<i64: 64, 128>}]} {
    %c0_i32 = arith.constant 0 : i32
    %0 = arith.cmpi eq, %arg1, %c0_i32 : i32
    %1 = arith.extui %0 : i1 to i32
    %c0_i32_0 = arith.constant 0 : i32
    %2 = arith.cmpi ne, %1, %c0_i32_0 : i32
    scf.if %2 {
      %c0_8 = arith.constant 0 : index
      %c0_9 = arith.constant 0 : index
      %10 = vector.load %arg2[%c0_8, %c0_9] : memref<64x128xf32, #tpu.memory_space<vmem>>, vector<64x128xf32>
      %c0_10 = arith.constant 0 : index
      %c0_11 = arith.constant 0 : index
      %11 = vector.load %arg3[%c0_10, %c0_11] : memref<128x128xf32, #tpu.memory_space<vmem>>, vector<128x128xf32>
      %cst_12 = arith.constant dense<0.000000e+00> : vector<64x128xf32>
      %12 = tpu.matmul %10, %11, %cst_12 {dimension_numbers = #tpu.dot_dimension_numbers<[1], [0], [0], [1], [0, 0, 1, 1], [], []>} : vector<64x128xf32>, vector<128x128xf32>, vector<64x128xf32> -> vector<64x128xf32>
      %c0_13 = arith.constant 0 : index
      %c0_14 = arith.constant 0 : index
      %13 = vector.load %arg4[%c0_13, %c0_14] : memref<1x128xf32, #tpu.memory_space<vmem>>, vector<1x128xf32>
      %14 = vector.broadcast %13 : vector<1x128xf32> to vector<64x128xf32>
      %15 = arith.addf %12, %14 : vector<64x128xf32>
      %c0_15 = arith.constant 0 : index
      %c0_16 = arith.constant 0 : index
      %16 = vector.load %arg8[%c0_15, %c0_16] : memref<64x128xf32, #tpu.memory_space<vmem>>, vector<64x128xf32>
      tpu.vector_store %arg8[%c0_15, %c0_16], %15 {strides = array<i32>} : memref<64x128xf32, #tpu.memory_space<vmem>>, vector<64x128xf32>,
    } else {
    }
    %c0 = arith.constant 0 : index
    %c0_1 = arith.constant 0 : index
    %3 = vector.load %arg8[%c0, %c0_1] : memref<64x128xf32, #tpu.memory_space<vmem>>, vector<64x128xf32>
    %c0_2 = arith.constant 0 : index
    %c0_3 = arith.constant 0 : index
    %4 = vector.load %arg5[%c0_2, %c0_3] : memref<128x128xf32, #tpu.memory_space<vmem>>, vector<128x128xf32>
    %cst = arith.constant dense<0.000000e+00> : vector<64x128xf32>
    %5 = tpu.matmul %3, %4, %cst {dimension_numbers = #tpu.dot_dimension_numbers<[1], [0], [0], [1], [0, 0, 1, 1], [], []>} : vector<64x128xf32>, vector<128x128xf32>, vector<64x128xf32> -> vector<64x128xf32>
    %c0_4 = arith.constant 0 : index
    %c0_5 = arith.constant 0 : index
    %6 = vector.load %arg6[%c0_4, %c0_5] : memref<1x128xf32, #tpu.memory_space<vmem>>, vector<1x128xf32>
    %7 = vector.broadcast %6 : vector<1x128xf32> to vector<64x128xf32>
    %8 = arith.addf %5, %7 : vector<64x128xf32>
    %c0_6 = arith.constant 0 : index
    %c0_7 = arith.constant 0 : index
    %9 = vector.load %arg7[%c0_6, %c0_7] : memref<64x128xf32, #tpu.memory_space<vmem>>, vector<64x128xf32>
    tpu.vector_store %arg7[%c0_6, %c0_7], %8 {strides = array<i32>} : memref<64x128xf32, #tpu.memory_space<vmem>>, vector<64x128xf32>,
    return
  }
  func.func @transform_0(%arg0: i32, %arg1: i32) -> (i32, i32) {
    %c0_i32 = arith.constant 0 : i32
    %c0_i32_0 = arith.constant 0 : i32
    return %arg0, %c0_i32 : i32, i32
  }
  func.func @transform_1(%arg0: i32, %arg1: i32) -> (i32, i32) {
    %c0_i32 = arith.constant 0 : i32
    %c0_i32_0 = arith.constant 0 : i32
    %c0_i32_1 = arith.constant 0 : i32
    return %c0_i32, %c0_i32_0 : i32, i32
  }
  func.func @transform_2(%arg0: i32, %arg1: i32) -> (i32, i32) {
    %c0_i32 = arith.constant 0 : i32
    %c0_i32_0 = arith.constant 0 : i32
    %c0_i32_1 = arith.constant 0 : i32
    return %c0_i32, %c0_i32_0 : i32, i32
  }
  func.func @transform_3(%arg0: i32, %arg1: i32) -> (i32, i32) {
    %c0_i32 = arith.constant 0 : i32
    %c0_i32_0 = arith.constant 0 : i32
    return %c0_i32, %arg1 : i32, i32
  }
  func.func @transform_4(%arg0: i32, %arg1: i32) -> (i32, i32) {
    %c0_i32 = arith.constant 0 : i32
    %c0_i32_0 = arith.constant 0 : i32
    return %c0_i32, %arg1 : i32, i32
  }
  func.func @transform_5(%arg0: i32, %arg1: i32) -> (i32, i32) {
    %c0_i32 = arith.constant 0 : i32
    return %arg0, %arg1 : i32, i32
  }
}

module attributes {stable_mosaic.version = 11 : i64} {
  func.func @kernel(%arg0: i32, %arg1: memref<8x8x512xf32, #tpu.memory_space<vmem>>, %arg2: memref<128x512xf32, #tpu.memory_space<vmem>>, %arg3: memref<128x512xf32, #tpu.memory_space<vmem>>, %arg4: memref<128x512xf32, #tpu.memory_space<vmem>>, %arg5: memref<1x512xf32, #tpu.memory_space<vmem>>, %arg6: memref<8x8x128xf32, #tpu.memory_space<vmem>>, %arg7: memref<2x8x128xf32, #tpu.memory_space<vmem>>, %arg8: memref<2x8x128xf32, #tpu.memory_space<vmem>>, %arg9: memref<8x128xf32, #tpu.memory_space<vmem>>, %arg10: memref<8x128xf32, #tpu.memory_space<vmem>>, %arg11: memref<8x128xf32, #tpu.memory_space<vmem>>, %arg12: memref<8x128xf32, #tpu.memory_space<vmem>>) attributes {dimension_semantics = [#tpu.dimension_semantics<arbitrary>], iteration_bounds = array<i64: 1>, scalar_prefetch = 0 : i64, scratch_operands = 4 : i64, tpu.core_type = #tpu.core_type<tc>, window_params = [{transform_indices = @transform_0, window_bounds = array<i64: 8, 8, 512>}, {pipeline_mode = #tpu.pipeline_mode<synchronous>, transform_indices = @transform_1, window_bounds = array<i64: 128, 512>}, {pipeline_mode = #tpu.pipeline_mode<synchronous>, transform_indices = @transform_2, window_bounds = array<i64: 128, 512>}, {pipeline_mode = #tpu.pipeline_mode<synchronous>, transform_indices = @transform_3, window_bounds = array<i64: 128, 512>}, {pipeline_mode = #tpu.pipeline_mode<synchronous>, transform_indices = @transform_4, window_bounds = array<i64: 1, 512>}, {transform_indices = @transform_5, window_bounds = array<i64: 8, 8, 128>}, {pipeline_mode = #tpu.pipeline_mode<synchronous>, transform_indices = @transform_6, window_bounds = array<i64: 2, 8, 128>}, {pipeline_mode = #tpu.pipeline_mode<synchronous>, transform_indices = @transform_7, window_bounds = array<i64: 2, 8, 128>}]} {
    %c0_i32 = arith.constant 0 : i32
    %0 = arith.cmpi eq, %arg0, %c0_i32 : i32
    %1 = arith.extui %0 : i1 to i32
    %c0_i32_0 = arith.constant 0 : i32
    %2 = arith.cmpi ne, %1, %c0_i32_0 : i32
    scf.if %2 {
      %cst_186 = arith.constant 0.000000e+00 : f32
      %558 = vector.broadcast %cst_186 : f32 to vector<8x128xf32>
      %c0_187 = arith.constant 0 : index
      %c0_188 = arith.constant 0 : index
      %559 = vector.load %arg9[%c0_187, %c0_188] : memref<8x128xf32, #tpu.memory_space<vmem>>, vector<8x128xf32>
      tpu.vector_store %arg9[%c0_187, %c0_188], %558 {strides = array<i32>} : memref<8x128xf32, #tpu.memory_space<vmem>>, vector<8x128xf32>,
      %cst_189 = arith.constant 0.000000e+00 : f32
      %560 = vector.broadcast %cst_189 : f32 to vector<8x128xf32>
      %c0_190 = arith.constant 0 : index
      %c0_191 = arith.constant 0 : index
      %561 = vector.load %arg10[%c0_190, %c0_191] : memref<8x128xf32, #tpu.memory_space<vmem>>, vector<8x128xf32>
      tpu.vector_store %arg10[%c0_190, %c0_191], %560 {strides = array<i32>} : memref<8x128xf32, #tpu.memory_space<vmem>>, vector<8x128xf32>,
      %cst_192 = arith.constant 0.000000e+00 : f32
      %562 = vector.broadcast %cst_192 : f32 to vector<8x128xf32>
      %c0_193 = arith.constant 0 : index
      %c0_194 = arith.constant 0 : index
      %563 = vector.load %arg11[%c0_193, %c0_194] : memref<8x128xf32, #tpu.memory_space<vmem>>, vector<8x128xf32>
      tpu.vector_store %arg11[%c0_193, %c0_194], %562 {strides = array<i32>} : memref<8x128xf32, #tpu.memory_space<vmem>>, vector<8x128xf32>,
      %cst_195 = arith.constant 0.000000e+00 : f32
      %564 = vector.broadcast %cst_195 : f32 to vector<8x128xf32>
      %c0_196 = arith.constant 0 : index
      %c0_197 = arith.constant 0 : index
      %565 = vector.load %arg12[%c0_196, %c0_197] : memref<8x128xf32, #tpu.memory_space<vmem>>, vector<8x128xf32>
      tpu.vector_store %arg12[%c0_196, %c0_197], %564 {strides = array<i32>} : memref<8x128xf32, #tpu.memory_space<vmem>>, vector<8x128xf32>,
    } else {
    }
    %c0 = arith.constant 0 : index
    %c0_1 = arith.constant 0 : index
    %3 = vector.load %arg9[%c0, %c0_1] : memref<8x128xf32, #tpu.memory_space<vmem>>, vector<8x128xf32>
    %c0_2 = arith.constant 0 : index
    %c0_3 = arith.constant 0 : index
    %4 = vector.load %arg10[%c0_2, %c0_3] : memref<8x128xf32, #tpu.memory_space<vmem>>, vector<8x128xf32>
    %c0_4 = arith.constant 0 : index
    %c0_5 = arith.constant 0 : index
    %5 = vector.load %arg11[%c0_4, %c0_5] : memref<8x128xf32, #tpu.memory_space<vmem>>, vector<8x128xf32>
    %c0_6 = arith.constant 0 : index
    %c0_7 = arith.constant 0 : index
    %6 = vector.load %arg12[%c0_6, %c0_7] : memref<8x128xf32, #tpu.memory_space<vmem>>, vector<8x128xf32>
    %c0_i32_8 = arith.constant 0 : i32
    %7 = arith.index_cast %c0_i32_8 : i32 to index
    %c0_9 = arith.constant 0 : index
    %c0_10 = arith.constant 0 : index
    %8 = vector.load %arg1[%7, %c0_9, %c0_10] : memref<8x8x512xf32, #tpu.memory_space<vmem>>, vector<1x8x512xf32>
    %9 = vector.shape_cast %8 : vector<1x8x512xf32> to vector<8x512xf32>
    %c0_11 = arith.constant 0 : index
    %c0_12 = arith.constant 0 : index
    %10 = vector.load %arg2[%c0_11, %c0_12] : memref<128x512xf32, #tpu.memory_space<vmem>>, vector<128x512xf32>
    %cst = arith.constant dense<0.000000e+00> : vector<8x512xf32>
    %11 = tpu.matmul %3, %10, %cst {dimension_numbers = #tpu.dot_dimension_numbers<[1], [0], [0], [1], [0, 0, 1, 1], [], []>} : vector<8x128xf32>, vector<128x512xf32>, vector<8x512xf32> -> vector<8x512xf32>
    %12 = arith.addf %9, %11 : vector<8x512xf32>
    %13 = vector.extract_strided_slice %12 {offsets = [0, 0], sizes = [8, 128], strides = [1, 1]} : vector<8x512xf32> to vector<8x128xf32>
    %14 = arith.negf %13 : vector<8x128xf32>
    %15 = math.exp %14 : vector<8x128xf32>
    %cst_13 = arith.constant 1.000000e+00 : f32
    %16 = vector.broadcast %cst_13 : f32 to vector<8x128xf32>
    %17 = arith.addf %16, %15 : vector<8x128xf32>
    %18 = arith.divf %16, %17 : vector<8x128xf32>
    %19 = vector.extract_strided_slice %12 {offsets = [0, 128], sizes = [8, 128], strides = [1, 1]} : vector<8x512xf32> to vector<8x128xf32>
    %20 = arith.negf %19 : vector<8x128xf32>
    %21 = math.exp %20 : vector<8x128xf32>
    %cst_14 = arith.constant 1.000000e+00 : f32
    %22 = vector.broadcast %cst_14 : f32 to vector<8x128xf32>
    %23 = arith.addf %22, %21 : vector<8x128xf32>
    %24 = arith.divf %22, %23 : vector<8x128xf32>
    %25 = vector.extract_strided_slice %12 {offsets = [0, 256], sizes = [8, 128], strides = [1, 1]} : vector<8x512xf32> to vector<8x128xf32>
    %26 = math.tanh %25 : vector<8x128xf32>
    %27 = vector.extract_strided_slice %12 {offsets = [0, 384], sizes = [8, 128], strides = [1, 1]} : vector<8x512xf32> to vector<8x128xf32>
    %28 = arith.negf %27 : vector<8x128xf32>
    %29 = math.exp %28 : vector<8x128xf32>
    %cst_15 = arith.constant 1.000000e+00 : f32
    %30 = vector.broadcast %cst_15 : f32 to vector<8x128xf32>
    %31 = arith.addf %30, %29 : vector<8x128xf32>
    %32 = arith.divf %30, %31 : vector<8x128xf32>
    %33 = arith.mulf %24, %4 : vector<8x128xf32>
    %34 = arith.mulf %18, %26 : vector<8x128xf32>
    %35 = arith.addf %33, %34 : vector<8x128xf32>
    %36 = math.tanh %35 : vector<8x128xf32>
    %37 = arith.mulf %32, %36 : vector<8x128xf32>
    %c0_16 = arith.constant 0 : index
    %c0_17 = arith.constant 0 : index
    %38 = vector.load %arg3[%c0_16, %c0_17] : memref<128x512xf32, #tpu.memory_space<vmem>>, vector<128x512xf32>
    %cst_18 = arith.constant dense<0.000000e+00> : vector<8x512xf32>
    %39 = tpu.matmul %37, %38, %cst_18 {dimension_numbers = #tpu.dot_dimension_numbers<[1], [0], [0], [1], [0, 0, 1, 1], [], []>} : vector<8x128xf32>, vector<128x512xf32>, vector<8x512xf32> -> vector<8x512xf32>
    %c0_19 = arith.constant 0 : index
    %c0_20 = arith.constant 0 : index
    %40 = vector.load %arg4[%c0_19, %c0_20] : memref<128x512xf32, #tpu.memory_space<vmem>>, vector<128x512xf32>
    %cst_21 = arith.constant dense<0.000000e+00> : vector<8x512xf32>
    %41 = tpu.matmul %5, %40, %cst_21 {dimension_numbers = #tpu.dot_dimension_numbers<[1], [0], [0], [1], [0, 0, 1, 1], [], []>} : vector<8x128xf32>, vector<128x512xf32>, vector<8x512xf32> -> vector<8x512xf32>
    %42 = arith.addf %39, %41 : vector<8x512xf32>
    %c0_22 = arith.constant 0 : index
    %c0_23 = arith.constant 0 : index
    %43 = vector.load %arg5[%c0_22, %c0_23] : memref<1x512xf32, #tpu.memory_space<vmem>>, vector<1x512xf32>
    %44 = vector.broadcast %43 : vector<1x512xf32> to vector<8x512xf32>
    %45 = arith.addf %42, %44 : vector<8x512xf32>
    %46 = vector.extract_strided_slice %45 {offsets = [0, 0], sizes = [8, 128], strides = [1, 1]} : vector<8x512xf32> to vector<8x128xf32>
    %47 = arith.negf %46 : vector<8x128xf32>
    %48 = math.exp %47 : vector<8x128xf32>
    %cst_24 = arith.constant 1.000000e+00 : f32
    %49 = vector.broadcast %cst_24 : f32 to vector<8x128xf32>
    %50 = arith.addf %49, %48 : vector<8x128xf32>
    %51 = arith.divf %49, %50 : vector<8x128xf32>
    %52 = vector.extract_strided_slice %45 {offsets = [0, 128], sizes = [8, 128], strides = [1, 1]} : vector<8x512xf32> to vector<8x128xf32>
    %53 = arith.negf %52 : vector<8x128xf32>
    %54 = math.exp %53 : vector<8x128xf32>
    %cst_25 = arith.constant 1.000000e+00 : f32
    %55 = vector.broadcast %cst_25 : f32 to vector<8x128xf32>
    %56 = arith.addf %55, %54 : vector<8x128xf32>
    %57 = arith.divf %55, %56 : vector<8x128xf32>
    %58 = vector.extract_strided_slice %45 {offsets = [0, 256], sizes = [8, 128], strides = [1, 1]} : vector<8x512xf32> to vector<8x128xf32>
    %59 = math.tanh %58 : vector<8x128xf32>
    %60 = vector.extract_strided_slice %45 {offsets = [0, 384], sizes = [8, 128], strides = [1, 1]} : vector<8x512xf32> to vector<8x128xf32>
    %61 = arith.negf %60 : vector<8x128xf32>
    %62 = math.exp %61 : vector<8x128xf32>
    %cst_26 = arith.constant 1.000000e+00 : f32
    %63 = vector.broadcast %cst_26 : f32 to vector<8x128xf32>
    %64 = arith.addf %63, %62 : vector<8x128xf32>
    %65 = arith.divf %63, %64 : vector<8x128xf32>
    %66 = arith.mulf %57, %6 : vector<8x128xf32>
    %67 = arith.mulf %51, %59 : vector<8x128xf32>
    %68 = arith.addf %66, %67 : vector<8x128xf32>
    %69 = math.tanh %68 : vector<8x128xf32>
    %70 = arith.mulf %65, %69 : vector<8x128xf32>
    %71 = arith.index_cast %c0_i32_8 : i32 to index
    %c0_27 = arith.constant 0 : index
    %c0_28 = arith.constant 0 : index
    %72 = vector.load %arg6[%71, %c0_27, %c0_28] : memref<8x8x128xf32, #tpu.memory_space<vmem>>, vector<1x8x128xf32>
    %73 = vector.shape_cast %72 : vector<1x8x128xf32> to vector<8x128xf32>
    %74 = vector.shape_cast %70 : vector<8x128xf32> to vector<1x8x128xf32>
    tpu.vector_store %arg6[%71, %c0_27, %c0_28], %74 {strides = array<i32>} : memref<8x8x128xf32, #tpu.memory_space<vmem>>, vector<1x8x128xf32>,
    %c1_i32 = arith.constant 1 : i32
    %75 = arith.index_cast %c1_i32 : i32 to index
    %c0_29 = arith.constant 0 : index
    %c0_30 = arith.constant 0 : index
    %76 = vector.load %arg1[%75, %c0_29, %c0_30] : memref<8x8x512xf32, #tpu.memory_space<vmem>>, vector<1x8x512xf32>
    %77 = vector.shape_cast %76 : vector<1x8x512xf32> to vector<8x512xf32>
    %c0_31 = arith.constant 0 : index
    %c0_32 = arith.constant 0 : index
    %78 = vector.load %arg2[%c0_31, %c0_32] : memref<128x512xf32, #tpu.memory_space<vmem>>, vector<128x512xf32>
    %cst_33 = arith.constant dense<0.000000e+00> : vector<8x512xf32>
    %79 = tpu.matmul %37, %78, %cst_33 {dimension_numbers = #tpu.dot_dimension_numbers<[1], [0], [0], [1], [0, 0, 1, 1], [], []>} : vector<8x128xf32>, vector<128x512xf32>, vector<8x512xf32> -> vector<8x512xf32>
    %80 = arith.addf %77, %79 : vector<8x512xf32>
    %81 = vector.extract_strided_slice %80 {offsets = [0, 0], sizes = [8, 128], strides = [1, 1]} : vector<8x512xf32> to vector<8x128xf32>
    %82 = arith.negf %81 : vector<8x128xf32>
    %83 = math.exp %82 : vector<8x128xf32>
    %cst_34 = arith.constant 1.000000e+00 : f32
    %84 = vector.broadcast %cst_34 : f32 to vector<8x128xf32>
    %85 = arith.addf %84, %83 : vector<8x128xf32>
    %86 = arith.divf %84, %85 : vector<8x128xf32>
    %87 = vector.extract_strided_slice %80 {offsets = [0, 128], sizes = [8, 128], strides = [1, 1]} : vector<8x512xf32> to vector<8x128xf32>
    %88 = arith.negf %87 : vector<8x128xf32>
    %89 = math.exp %88 : vector<8x128xf32>
    %cst_35 = arith.constant 1.000000e+00 : f32
    %90 = vector.broadcast %cst_35 : f32 to vector<8x128xf32>
    %91 = arith.addf %90, %89 : vector<8x128xf32>
    %92 = arith.divf %90, %91 : vector<8x128xf32>
    %93 = vector.extract_strided_slice %80 {offsets = [0, 256], sizes = [8, 128], strides = [1, 1]} : vector<8x512xf32> to vector<8x128xf32>
    %94 = math.tanh %93 : vector<8x128xf32>
    %95 = vector.extract_strided_slice %80 {offsets = [0, 384], sizes = [8, 128], strides = [1, 1]} : vector<8x512xf32> to vector<8x128xf32>
    %96 = arith.negf %95 : vector<8x128xf32>
    %97 = math.exp %96 : vector<8x128xf32>
    %cst_36 = arith.constant 1.000000e+00 : f32
    %98 = vector.broadcast %cst_36 : f32 to vector<8x128xf32>
    %99 = arith.addf %98, %97 : vector<8x128xf32>
    %100 = arith.divf %98, %99 : vector<8x128xf32>
    %101 = arith.mulf %92, %35 : vector<8x128xf32>
    %102 = arith.mulf %86, %94 : vector<8x128xf32>
    %103 = arith.addf %101, %102 : vector<8x128xf32>
    %104 = math.tanh %103 : vector<8x128xf32>
    %105 = arith.mulf %100, %104 : vector<8x128xf32>
    %c0_37 = arith.constant 0 : index
    %c0_38 = arith.constant 0 : index
    %106 = vector.load %arg3[%c0_37, %c0_38] : memref<128x512xf32, #tpu.memory_space<vmem>>, vector<128x512xf32>
    %cst_39 = arith.constant dense<0.000000e+00> : vector<8x512xf32>
    %107 = tpu.matmul %105, %106, %cst_39 {dimension_numbers = #tpu.dot_dimension_numbers<[1], [0], [0], [1], [0, 0, 1, 1], [], []>} : vector<8x128xf32>, vector<128x512xf32>, vector<8x512xf32> -> vector<8x512xf32>
    %c0_40 = arith.constant 0 : index
    %c0_41 = arith.constant 0 : index
    %108 = vector.load %arg4[%c0_40, %c0_41] : memref<128x512xf32, #tpu.memory_space<vmem>>, vector<128x512xf32>
    %cst_42 = arith.constant dense<0.000000e+00> : vector<8x512xf32>
    %109 = tpu.matmul %70, %108, %cst_42 {dimension_numbers = #tpu.dot_dimension_numbers<[1], [0], [0], [1], [0, 0, 1, 1], [], []>} : vector<8x128xf32>, vector<128x512xf32>, vector<8x512xf32> -> vector<8x512xf32>
    %110 = arith.addf %107, %109 : vector<8x512xf32>
    %c0_43 = arith.constant 0 : index
    %c0_44 = arith.constant 0 : index
    %111 = vector.load %arg5[%c0_43, %c0_44] : memref<1x512xf32, #tpu.memory_space<vmem>>, vector<1x512xf32>
    %112 = vector.broadcast %111 : vector<1x512xf32> to vector<8x512xf32>
    %113 = arith.addf %110, %112 : vector<8x512xf32>
    %114 = vector.extract_strided_slice %113 {offsets = [0, 0], sizes = [8, 128], strides = [1, 1]} : vector<8x512xf32> to vector<8x128xf32>
    %115 = arith.negf %114 : vector<8x128xf32>
    %116 = math.exp %115 : vector<8x128xf32>
    %cst_45 = arith.constant 1.000000e+00 : f32
    %117 = vector.broadcast %cst_45 : f32 to vector<8x128xf32>
    %118 = arith.addf %117, %116 : vector<8x128xf32>
    %119 = arith.divf %117, %118 : vector<8x128xf32>
    %120 = vector.extract_strided_slice %113 {offsets = [0, 128], sizes = [8, 128], strides = [1, 1]} : vector<8x512xf32> to vector<8x128xf32>
    %121 = arith.negf %120 : vector<8x128xf32>
    %122 = math.exp %121 : vector<8x128xf32>
    %cst_46 = arith.constant 1.000000e+00 : f32
    %123 = vector.broadcast %cst_46 : f32 to vector<8x128xf32>
    %124 = arith.addf %123, %122 : vector<8x128xf32>
    %125 = arith.divf %123, %124 : vector<8x128xf32>
    %126 = vector.extract_strided_slice %113 {offsets = [0, 256], sizes = [8, 128], strides = [1, 1]} : vector<8x512xf32> to vector<8x128xf32>
    %127 = math.tanh %126 : vector<8x128xf32>
    %128 = vector.extract_strided_slice %113 {offsets = [0, 384], sizes = [8, 128], strides = [1, 1]} : vector<8x512xf32> to vector<8x128xf32>
    %129 = arith.negf %128 : vector<8x128xf32>
    %130 = math.exp %129 : vector<8x128xf32>
    %cst_47 = arith.constant 1.000000e+00 : f32
    %131 = vector.broadcast %cst_47 : f32 to vector<8x128xf32>
    %132 = arith.addf %131, %130 : vector<8x128xf32>
    %133 = arith.divf %131, %132 : vector<8x128xf32>
    %134 = arith.mulf %125, %68 : vector<8x128xf32>
    %135 = arith.mulf %119, %127 : vector<8x128xf32>
    %136 = arith.addf %134, %135 : vector<8x128xf32>
    %137 = math.tanh %136 : vector<8x128xf32>
    %138 = arith.mulf %133, %137 : vector<8x128xf32>
    %139 = arith.index_cast %c1_i32 : i32 to index
    %c0_48 = arith.constant 0 : index
    %c0_49 = arith.constant 0 : index
    %140 = vector.load %arg6[%139, %c0_48, %c0_49] : memref<8x8x128xf32, #tpu.memory_space<vmem>>, vector<1x8x128xf32>
    %141 = vector.shape_cast %140 : vector<1x8x128xf32> to vector<8x128xf32>
    %142 = vector.shape_cast %138 : vector<8x128xf32> to vector<1x8x128xf32>
    tpu.vector_store %arg6[%139, %c0_48, %c0_49], %142 {strides = array<i32>} : memref<8x8x128xf32, #tpu.memory_space<vmem>>, vector<1x8x128xf32>,
    %c2_i32 = arith.constant 2 : i32
    %143 = arith.index_cast %c2_i32 : i32 to index
    %c0_50 = arith.constant 0 : index
    %c0_51 = arith.constant 0 : index
    %144 = vector.load %arg1[%143, %c0_50, %c0_51] : memref<8x8x512xf32, #tpu.memory_space<vmem>>, vector<1x8x512xf32>
    %145 = vector.shape_cast %144 : vector<1x8x512xf32> to vector<8x512xf32>
    %c0_52 = arith.constant 0 : index
    %c0_53 = arith.constant 0 : index
    %146 = vector.load %arg2[%c0_52, %c0_53] : memref<128x512xf32, #tpu.memory_space<vmem>>, vector<128x512xf32>
    %cst_54 = arith.constant dense<0.000000e+00> : vector<8x512xf32>
    %147 = tpu.matmul %105, %146, %cst_54 {dimension_numbers = #tpu.dot_dimension_numbers<[1], [0], [0], [1], [0, 0, 1, 1], [], []>} : vector<8x128xf32>, vector<128x512xf32>, vector<8x512xf32> -> vector<8x512xf32>
    %148 = arith.addf %145, %147 : vector<8x512xf32>
    %149 = vector.extract_strided_slice %148 {offsets = [0, 0], sizes = [8, 128], strides = [1, 1]} : vector<8x512xf32> to vector<8x128xf32>
    %150 = arith.negf %149 : vector<8x128xf32>
    %151 = math.exp %150 : vector<8x128xf32>
    %cst_55 = arith.constant 1.000000e+00 : f32
    %152 = vector.broadcast %cst_55 : f32 to vector<8x128xf32>
    %153 = arith.addf %152, %151 : vector<8x128xf32>
    %154 = arith.divf %152, %153 : vector<8x128xf32>
    %155 = vector.extract_strided_slice %148 {offsets = [0, 128], sizes = [8, 128], strides = [1, 1]} : vector<8x512xf32> to vector<8x128xf32>
    %156 = arith.negf %155 : vector<8x128xf32>
    %157 = math.exp %156 : vector<8x128xf32>
    %cst_56 = arith.constant 1.000000e+00 : f32
    %158 = vector.broadcast %cst_56 : f32 to vector<8x128xf32>
    %159 = arith.addf %158, %157 : vector<8x128xf32>
    %160 = arith.divf %158, %159 : vector<8x128xf32>
    %161 = vector.extract_strided_slice %148 {offsets = [0, 256], sizes = [8, 128], strides = [1, 1]} : vector<8x512xf32> to vector<8x128xf32>
    %162 = math.tanh %161 : vector<8x128xf32>
    %163 = vector.extract_strided_slice %148 {offsets = [0, 384], sizes = [8, 128], strides = [1, 1]} : vector<8x512xf32> to vector<8x128xf32>
    %164 = arith.negf %163 : vector<8x128xf32>
    %165 = math.exp %164 : vector<8x128xf32>
    %cst_57 = arith.constant 1.000000e+00 : f32
    %166 = vector.broadcast %cst_57 : f32 to vector<8x128xf32>
    %167 = arith.addf %166, %165 : vector<8x128xf32>
    %168 = arith.divf %166, %167 : vector<8x128xf32>
    %169 = arith.mulf %160, %103 : vector<8x128xf32>
    %170 = arith.mulf %154, %162 : vector<8x128xf32>
    %171 = arith.addf %169, %170 : vector<8x128xf32>
    %172 = math.tanh %171 : vector<8x128xf32>
    %173 = arith.mulf %168, %172 : vector<8x128xf32>
    %c0_58 = arith.constant 0 : index
    %c0_59 = arith.constant 0 : index
    %174 = vector.load %arg3[%c0_58, %c0_59] : memref<128x512xf32, #tpu.memory_space<vmem>>, vector<128x512xf32>
    %cst_60 = arith.constant dense<0.000000e+00> : vector<8x512xf32>
    %175 = tpu.matmul %173, %174, %cst_60 {dimension_numbers = #tpu.dot_dimension_numbers<[1], [0], [0], [1], [0, 0, 1, 1], [], []>} : vector<8x128xf32>, vector<128x512xf32>, vector<8x512xf32> -> vector<8x512xf32>
    %c0_61 = arith.constant 0 : index
    %c0_62 = arith.constant 0 : index
    %176 = vector.load %arg4[%c0_61, %c0_62] : memref<128x512xf32, #tpu.memory_space<vmem>>, vector<128x512xf32>
    %cst_63 = arith.constant dense<0.000000e+00> : vector<8x512xf32>
    %177 = tpu.matmul %138, %176, %cst_63 {dimension_numbers = #tpu.dot_dimension_numbers<[1], [0], [0], [1], [0, 0, 1, 1], [], []>} : vector<8x128xf32>, vector<128x512xf32>, vector<8x512xf32> -> vector<8x512xf32>
    %178 = arith.addf %175, %177 : vector<8x512xf32>
    %c0_64 = arith.constant 0 : index
    %c0_65 = arith.constant 0 : index
    %179 = vector.load %arg5[%c0_64, %c0_65] : memref<1x512xf32, #tpu.memory_space<vmem>>, vector<1x512xf32>
    %180 = vector.broadcast %179 : vector<1x512xf32> to vector<8x512xf32>
    %181 = arith.addf %178, %180 : vector<8x512xf32>
    %182 = vector.extract_strided_slice %181 {offsets = [0, 0], sizes = [8, 128], strides = [1, 1]} : vector<8x512xf32> to vector<8x128xf32>
    %183 = arith.negf %182 : vector<8x128xf32>
    %184 = math.exp %183 : vector<8x128xf32>
    %cst_66 = arith.constant 1.000000e+00 : f32
    %185 = vector.broadcast %cst_66 : f32 to vector<8x128xf32>
    %186 = arith.addf %185, %184 : vector<8x128xf32>
    %187 = arith.divf %185, %186 : vector<8x128xf32>
    %188 = vector.extract_strided_slice %181 {offsets = [0, 128], sizes = [8, 128], strides = [1, 1]} : vector<8x512xf32> to vector<8x128xf32>
    %189 = arith.negf %188 : vector<8x128xf32>
    %190 = math.exp %189 : vector<8x128xf32>
    %cst_67 = arith.constant 1.000000e+00 : f32
    %191 = vector.broadcast %cst_67 : f32 to vector<8x128xf32>
    %192 = arith.addf %191, %190 : vector<8x128xf32>
    %193 = arith.divf %191, %192 : vector<8x128xf32>
    %194 = vector.extract_strided_slice %181 {offsets = [0, 256], sizes = [8, 128], strides = [1, 1]} : vector<8x512xf32> to vector<8x128xf32>
    %195 = math.tanh %194 : vector<8x128xf32>
    %196 = vector.extract_strided_slice %181 {offsets = [0, 384], sizes = [8, 128], strides = [1, 1]} : vector<8x512xf32> to vector<8x128xf32>
    %197 = arith.negf %196 : vector<8x128xf32>
    %198 = math.exp %197 : vector<8x128xf32>
    %cst_68 = arith.constant 1.000000e+00 : f32
    %199 = vector.broadcast %cst_68 : f32 to vector<8x128xf32>
    %200 = arith.addf %199, %198 : vector<8x128xf32>
    %201 = arith.divf %199, %200 : vector<8x128xf32>
    %202 = arith.mulf %193, %136 : vector<8x128xf32>
    %203 = arith.mulf %187, %195 : vector<8x128xf32>
    %204 = arith.addf %202, %203 : vector<8x128xf32>
    %205 = math.tanh %204 : vector<8x128xf32>
    %206 = arith.mulf %201, %205 : vector<8x128xf32>
    %207 = arith.index_cast %c2_i32 : i32 to index
    %c0_69 = arith.constant 0 : index
    %c0_70 = arith.constant 0 : index
    %208 = vector.load %arg6[%207, %c0_69, %c0_70] : memref<8x8x128xf32, #tpu.memory_space<vmem>>, vector<1x8x128xf32>
    %209 = vector.shape_cast %208 : vector<1x8x128xf32> to vector<8x128xf32>
    %210 = vector.shape_cast %206 : vector<8x128xf32> to vector<1x8x128xf32>
    tpu.vector_store %arg6[%207, %c0_69, %c0_70], %210 {strides = array<i32>} : memref<8x8x128xf32, #tpu.memory_space<vmem>>, vector<1x8x128xf32>,
    %c3_i32 = arith.constant 3 : i32
    %211 = arith.index_cast %c3_i32 : i32 to index
    %c0_71 = arith.constant 0 : index
    %c0_72 = arith.constant 0 : index
    %212 = vector.load %arg1[%211, %c0_71, %c0_72] : memref<8x8x512xf32, #tpu.memory_space<vmem>>, vector<1x8x512xf32>
    %213 = vector.shape_cast %212 : vector<1x8x512xf32> to vector<8x512xf32>
    %c0_73 = arith.constant 0 : index
    %c0_74 = arith.constant 0 : index
    %214 = vector.load %arg2[%c0_73, %c0_74] : memref<128x512xf32, #tpu.memory_space<vmem>>, vector<128x512xf32>
    %cst_75 = arith.constant dense<0.000000e+00> : vector<8x512xf32>
    %215 = tpu.matmul %173, %214, %cst_75 {dimension_numbers = #tpu.dot_dimension_numbers<[1], [0], [0], [1], [0, 0, 1, 1], [], []>} : vector<8x128xf32>, vector<128x512xf32>, vector<8x512xf32> -> vector<8x512xf32>
    %216 = arith.addf %213, %215 : vector<8x512xf32>
    %217 = vector.extract_strided_slice %216 {offsets = [0, 0], sizes = [8, 128], strides = [1, 1]} : vector<8x512xf32> to vector<8x128xf32>
    %218 = arith.negf %217 : vector<8x128xf32>
    %219 = math.exp %218 : vector<8x128xf32>
    %cst_76 = arith.constant 1.000000e+00 : f32
    %220 = vector.broadcast %cst_76 : f32 to vector<8x128xf32>
    %221 = arith.addf %220, %219 : vector<8x128xf32>
    %222 = arith.divf %220, %221 : vector<8x128xf32>
    %223 = vector.extract_strided_slice %216 {offsets = [0, 128], sizes = [8, 128], strides = [1, 1]} : vector<8x512xf32> to vector<8x128xf32>
    %224 = arith.negf %223 : vector<8x128xf32>
    %225 = math.exp %224 : vector<8x128xf32>
    %cst_77 = arith.constant 1.000000e+00 : f32
    %226 = vector.broadcast %cst_77 : f32 to vector<8x128xf32>
    %227 = arith.addf %226, %225 : vector<8x128xf32>
    %228 = arith.divf %226, %227 : vector<8x128xf32>
    %229 = vector.extract_strided_slice %216 {offsets = [0, 256], sizes = [8, 128], strides = [1, 1]} : vector<8x512xf32> to vector<8x128xf32>
    %230 = math.tanh %229 : vector<8x128xf32>
    %231 = vector.extract_strided_slice %216 {offsets = [0, 384], sizes = [8, 128], strides = [1, 1]} : vector<8x512xf32> to vector<8x128xf32>
    %232 = arith.negf %231 : vector<8x128xf32>
    %233 = math.exp %232 : vector<8x128xf32>
    %cst_78 = arith.constant 1.000000e+00 : f32
    %234 = vector.broadcast %cst_78 : f32 to vector<8x128xf32>
    %235 = arith.addf %234, %233 : vector<8x128xf32>
    %236 = arith.divf %234, %235 : vector<8x128xf32>
    %237 = arith.mulf %228, %171 : vector<8x128xf32>
    %238 = arith.mulf %222, %230 : vector<8x128xf32>
    %239 = arith.addf %237, %238 : vector<8x128xf32>
    %240 = math.tanh %239 : vector<8x128xf32>
    %241 = arith.mulf %236, %240 : vector<8x128xf32>
    %c0_79 = arith.constant 0 : index
    %c0_80 = arith.constant 0 : index
    %242 = vector.load %arg3[%c0_79, %c0_80] : memref<128x512xf32, #tpu.memory_space<vmem>>, vector<128x512xf32>
    %cst_81 = arith.constant dense<0.000000e+00> : vector<8x512xf32>
    %243 = tpu.matmul %241, %242, %cst_81 {dimension_numbers = #tpu.dot_dimension_numbers<[1], [0], [0], [1], [0, 0, 1, 1], [], []>} : vector<8x128xf32>, vector<128x512xf32>, vector<8x512xf32> -> vector<8x512xf32>
    %c0_82 = arith.constant 0 : index
    %c0_83 = arith.constant 0 : index
    %244 = vector.load %arg4[%c0_82, %c0_83] : memref<128x512xf32, #tpu.memory_space<vmem>>, vector<128x512xf32>
    %cst_84 = arith.constant dense<0.000000e+00> : vector<8x512xf32>
    %245 = tpu.matmul %206, %244, %cst_84 {dimension_numbers = #tpu.dot_dimension_numbers<[1], [0], [0], [1], [0, 0, 1, 1], [], []>} : vector<8x128xf32>, vector<128x512xf32>, vector<8x512xf32> -> vector<8x512xf32>
    %246 = arith.addf %243, %245 : vector<8x512xf32>
    %c0_85 = arith.constant 0 : index
    %c0_86 = arith.constant 0 : index
    %247 = vector.load %arg5[%c0_85, %c0_86] : memref<1x512xf32, #tpu.memory_space<vmem>>, vector<1x512xf32>
    %248 = vector.broadcast %247 : vector<1x512xf32> to vector<8x512xf32>
    %249 = arith.addf %246, %248 : vector<8x512xf32>
    %250 = vector.extract_strided_slice %249 {offsets = [0, 0], sizes = [8, 128], strides = [1, 1]} : vector<8x512xf32> to vector<8x128xf32>
    %251 = arith.negf %250 : vector<8x128xf32>
    %252 = math.exp %251 : vector<8x128xf32>
    %cst_87 = arith.constant 1.000000e+00 : f32
    %253 = vector.broadcast %cst_87 : f32 to vector<8x128xf32>
    %254 = arith.addf %253, %252 : vector<8x128xf32>
    %255 = arith.divf %253, %254 : vector<8x128xf32>
    %256 = vector.extract_strided_slice %249 {offsets = [0, 128], sizes = [8, 128], strides = [1, 1]} : vector<8x512xf32> to vector<8x128xf32>
    %257 = arith.negf %256 : vector<8x128xf32>
    %258 = math.exp %257 : vector<8x128xf32>
    %cst_88 = arith.constant 1.000000e+00 : f32
    %259 = vector.broadcast %cst_88 : f32 to vector<8x128xf32>
    %260 = arith.addf %259, %258 : vector<8x128xf32>
    %261 = arith.divf %259, %260 : vector<8x128xf32>
    %262 = vector.extract_strided_slice %249 {offsets = [0, 256], sizes = [8, 128], strides = [1, 1]} : vector<8x512xf32> to vector<8x128xf32>
    %263 = math.tanh %262 : vector<8x128xf32>
    %264 = vector.extract_strided_slice %249 {offsets = [0, 384], sizes = [8, 128], strides = [1, 1]} : vector<8x512xf32> to vector<8x128xf32>
    %265 = arith.negf %264 : vector<8x128xf32>
    %266 = math.exp %265 : vector<8x128xf32>
    %cst_89 = arith.constant 1.000000e+00 : f32
    %267 = vector.broadcast %cst_89 : f32 to vector<8x128xf32>
    %268 = arith.addf %267, %266 : vector<8x128xf32>
    %269 = arith.divf %267, %268 : vector<8x128xf32>
    %270 = arith.mulf %261, %204 : vector<8x128xf32>
    %271 = arith.mulf %255, %263 : vector<8x128xf32>
    %272 = arith.addf %270, %271 : vector<8x128xf32>
    %273 = math.tanh %272 : vector<8x128xf32>
    %274 = arith.mulf %269, %273 : vector<8x128xf32>
    %275 = arith.index_cast %c3_i32 : i32 to index
    %c0_90 = arith.constant 0 : index
    %c0_91 = arith.constant 0 : index
    %276 = vector.load %arg6[%275, %c0_90, %c0_91] : memref<8x8x128xf32, #tpu.memory_space<vmem>>, vector<1x8x128xf32>
    %277 = vector.shape_cast %276 : vector<1x8x128xf32> to vector<8x128xf32>
    %278 = vector.shape_cast %274 : vector<8x128xf32> to vector<1x8x128xf32>
    tpu.vector_store %arg6[%275, %c0_90, %c0_91], %278 {strides = array<i32>} : memref<8x8x128xf32, #tpu.memory_space<vmem>>, vector<1x8x128xf32>,
    %c4_i32 = arith.constant 4 : i32
    %279 = arith.index_cast %c4_i32 : i32 to index
    %c0_92 = arith.constant 0 : index
    %c0_93 = arith.constant 0 : index
    %280 = vector.load %arg1[%279, %c0_92, %c0_93] : memref<8x8x512xf32, #tpu.memory_space<vmem>>, vector<1x8x512xf32>
    %281 = vector.shape_cast %280 : vector<1x8x512xf32> to vector<8x512xf32>
    %c0_94 = arith.constant 0 : index
    %c0_95 = arith.constant 0 : index
    %282 = vector.load %arg2[%c0_94, %c0_95] : memref<128x512xf32, #tpu.memory_space<vmem>>, vector<128x512xf32>
    %cst_96 = arith.constant dense<0.000000e+00> : vector<8x512xf32>
    %283 = tpu.matmul %241, %282, %cst_96 {dimension_numbers = #tpu.dot_dimension_numbers<[1], [0], [0], [1], [0, 0, 1, 1], [], []>} : vector<8x128xf32>, vector<128x512xf32>, vector<8x512xf32> -> vector<8x512xf32>
    %284 = arith.addf %281, %283 : vector<8x512xf32>
    %285 = vector.extract_strided_slice %284 {offsets = [0, 0], sizes = [8, 128], strides = [1, 1]} : vector<8x512xf32> to vector<8x128xf32>
    %286 = arith.negf %285 : vector<8x128xf32>
    %287 = math.exp %286 : vector<8x128xf32>
    %cst_97 = arith.constant 1.000000e+00 : f32
    %288 = vector.broadcast %cst_97 : f32 to vector<8x128xf32>
    %289 = arith.addf %288, %287 : vector<8x128xf32>
    %290 = arith.divf %288, %289 : vector<8x128xf32>
    %291 = vector.extract_strided_slice %284 {offsets = [0, 128], sizes = [8, 128], strides = [1, 1]} : vector<8x512xf32> to vector<8x128xf32>
    %292 = arith.negf %291 : vector<8x128xf32>
    %293 = math.exp %292 : vector<8x128xf32>
    %cst_98 = arith.constant 1.000000e+00 : f32
    %294 = vector.broadcast %cst_98 : f32 to vector<8x128xf32>
    %295 = arith.addf %294, %293 : vector<8x128xf32>
    %296 = arith.divf %294, %295 : vector<8x128xf32>
    %297 = vector.extract_strided_slice %284 {offsets = [0, 256], sizes = [8, 128], strides = [1, 1]} : vector<8x512xf32> to vector<8x128xf32>
    %298 = math.tanh %297 : vector<8x128xf32>
    %299 = vector.extract_strided_slice %284 {offsets = [0, 384], sizes = [8, 128], strides = [1, 1]} : vector<8x512xf32> to vector<8x128xf32>
    %300 = arith.negf %299 : vector<8x128xf32>
    %301 = math.exp %300 : vector<8x128xf32>
    %cst_99 = arith.constant 1.000000e+00 : f32
    %302 = vector.broadcast %cst_99 : f32 to vector<8x128xf32>
    %303 = arith.addf %302, %301 : vector<8x128xf32>
    %304 = arith.divf %302, %303 : vector<8x128xf32>
    %305 = arith.mulf %296, %239 : vector<8x128xf32>
    %306 = arith.mulf %290, %298 : vector<8x128xf32>
    %307 = arith.addf %305, %306 : vector<8x128xf32>
    %308 = math.tanh %307 : vector<8x128xf32>
    %309 = arith.mulf %304, %308 : vector<8x128xf32>
    %c0_100 = arith.constant 0 : index
    %c0_101 = arith.constant 0 : index
    %310 = vector.load %arg3[%c0_100, %c0_101] : memref<128x512xf32, #tpu.memory_space<vmem>>, vector<128x512xf32>
    %cst_102 = arith.constant dense<0.000000e+00> : vector<8x512xf32>
    %311 = tpu.matmul %309, %310, %cst_102 {dimension_numbers = #tpu.dot_dimension_numbers<[1], [0], [0], [1], [0, 0, 1, 1], [], []>} : vector<8x128xf32>, vector<128x512xf32>, vector<8x512xf32> -> vector<8x512xf32>
    %c0_103 = arith.constant 0 : index
    %c0_104 = arith.constant 0 : index
    %312 = vector.load %arg4[%c0_103, %c0_104] : memref<128x512xf32, #tpu.memory_space<vmem>>, vector<128x512xf32>
    %cst_105 = arith.constant dense<0.000000e+00> : vector<8x512xf32>
    %313 = tpu.matmul %274, %312, %cst_105 {dimension_numbers = #tpu.dot_dimension_numbers<[1], [0], [0], [1], [0, 0, 1, 1], [], []>} : vector<8x128xf32>, vector<128x512xf32>, vector<8x512xf32> -> vector<8x512xf32>
    %314 = arith.addf %311, %313 : vector<8x512xf32>
    %c0_106 = arith.constant 0 : index
    %c0_107 = arith.constant 0 : index
    %315 = vector.load %arg5[%c0_106, %c0_107] : memref<1x512xf32, #tpu.memory_space<vmem>>, vector<1x512xf32>
    %316 = vector.broadcast %315 : vector<1x512xf32> to vector<8x512xf32>
    %317 = arith.addf %314, %316 : vector<8x512xf32>
    %318 = vector.extract_strided_slice %317 {offsets = [0, 0], sizes = [8, 128], strides = [1, 1]} : vector<8x512xf32> to vector<8x128xf32>
    %319 = arith.negf %318 : vector<8x128xf32>
    %320 = math.exp %319 : vector<8x128xf32>
    %cst_108 = arith.constant 1.000000e+00 : f32
    %321 = vector.broadcast %cst_108 : f32 to vector<8x128xf32>
    %322 = arith.addf %321, %320 : vector<8x128xf32>
    %323 = arith.divf %321, %322 : vector<8x128xf32>
    %324 = vector.extract_strided_slice %317 {offsets = [0, 128], sizes = [8, 128], strides = [1, 1]} : vector<8x512xf32> to vector<8x128xf32>
    %325 = arith.negf %324 : vector<8x128xf32>
    %326 = math.exp %325 : vector<8x128xf32>
    %cst_109 = arith.constant 1.000000e+00 : f32
    %327 = vector.broadcast %cst_109 : f32 to vector<8x128xf32>
    %328 = arith.addf %327, %326 : vector<8x128xf32>
    %329 = arith.divf %327, %328 : vector<8x128xf32>
    %330 = vector.extract_strided_slice %317 {offsets = [0, 256], sizes = [8, 128], strides = [1, 1]} : vector<8x512xf32> to vector<8x128xf32>
    %331 = math.tanh %330 : vector<8x128xf32>
    %332 = vector.extract_strided_slice %317 {offsets = [0, 384], sizes = [8, 128], strides = [1, 1]} : vector<8x512xf32> to vector<8x128xf32>
    %333 = arith.negf %332 : vector<8x128xf32>
    %334 = math.exp %333 : vector<8x128xf32>
    %cst_110 = arith.constant 1.000000e+00 : f32
    %335 = vector.broadcast %cst_110 : f32 to vector<8x128xf32>
    %336 = arith.addf %335, %334 : vector<8x128xf32>
    %337 = arith.divf %335, %336 : vector<8x128xf32>
    %338 = arith.mulf %329, %272 : vector<8x128xf32>
    %339 = arith.mulf %323, %331 : vector<8x128xf32>
    %340 = arith.addf %338, %339 : vector<8x128xf32>
    %341 = math.tanh %340 : vector<8x128xf32>
    %342 = arith.mulf %337, %341 : vector<8x128xf32>
    %343 = arith.index_cast %c4_i32 : i32 to index
    %c0_111 = arith.constant 0 : index
    %c0_112 = arith.constant 0 : index
    %344 = vector.load %arg6[%343, %c0_111, %c0_112] : memref<8x8x128xf32, #tpu.memory_space<vmem>>, vector<1x8x128xf32>
    %345 = vector.shape_cast %344 : vector<1x8x128xf32> to vector<8x128xf32>
    %346 = vector.shape_cast %342 : vector<8x128xf32> to vector<1x8x128xf32>
    tpu.vector_store %arg6[%343, %c0_111, %c0_112], %346 {strides = array<i32>} : memref<8x8x128xf32, #tpu.memory_space<vmem>>, vector<1x8x128xf32>,
    %c5_i32 = arith.constant 5 : i32
    %347 = arith.index_cast %c5_i32 : i32 to index
    %c0_113 = arith.constant 0 : index
    %c0_114 = arith.constant 0 : index
    %348 = vector.load %arg1[%347, %c0_113, %c0_114] : memref<8x8x512xf32, #tpu.memory_space<vmem>>, vector<1x8x512xf32>
    %349 = vector.shape_cast %348 : vector<1x8x512xf32> to vector<8x512xf32>
    %c0_115 = arith.constant 0 : index
    %c0_116 = arith.constant 0 : index
    %350 = vector.load %arg2[%c0_115, %c0_116] : memref<128x512xf32, #tpu.memory_space<vmem>>, vector<128x512xf32>
    %cst_117 = arith.constant dense<0.000000e+00> : vector<8x512xf32>
    %351 = tpu.matmul %309, %350, %cst_117 {dimension_numbers = #tpu.dot_dimension_numbers<[1], [0], [0], [1], [0, 0, 1, 1], [], []>} : vector<8x128xf32>, vector<128x512xf32>, vector<8x512xf32> -> vector<8x512xf32>
    %352 = arith.addf %349, %351 : vector<8x512xf32>
    %353 = vector.extract_strided_slice %352 {offsets = [0, 0], sizes = [8, 128], strides = [1, 1]} : vector<8x512xf32> to vector<8x128xf32>
    %354 = arith.negf %353 : vector<8x128xf32>
    %355 = math.exp %354 : vector<8x128xf32>
    %cst_118 = arith.constant 1.000000e+00 : f32
    %356 = vector.broadcast %cst_118 : f32 to vector<8x128xf32>
    %357 = arith.addf %356, %355 : vector<8x128xf32>
    %358 = arith.divf %356, %357 : vector<8x128xf32>
    %359 = vector.extract_strided_slice %352 {offsets = [0, 128], sizes = [8, 128], strides = [1, 1]} : vector<8x512xf32> to vector<8x128xf32>
    %360 = arith.negf %359 : vector<8x128xf32>
    %361 = math.exp %360 : vector<8x128xf32>
    %cst_119 = arith.constant 1.000000e+00 : f32
    %362 = vector.broadcast %cst_119 : f32 to vector<8x128xf32>
    %363 = arith.addf %362, %361 : vector<8x128xf32>
    %364 = arith.divf %362, %363 : vector<8x128xf32>
    %365 = vector.extract_strided_slice %352 {offsets = [0, 256], sizes = [8, 128], strides = [1, 1]} : vector<8x512xf32> to vector<8x128xf32>
    %366 = math.tanh %365 : vector<8x128xf32>
    %367 = vector.extract_strided_slice %352 {offsets = [0, 384], sizes = [8, 128], strides = [1, 1]} : vector<8x512xf32> to vector<8x128xf32>
    %368 = arith.negf %367 : vector<8x128xf32>
    %369 = math.exp %368 : vector<8x128xf32>
    %cst_120 = arith.constant 1.000000e+00 : f32
    %370 = vector.broadcast %cst_120 : f32 to vector<8x128xf32>
    %371 = arith.addf %370, %369 : vector<8x128xf32>
    %372 = arith.divf %370, %371 : vector<8x128xf32>
    %373 = arith.mulf %364, %307 : vector<8x128xf32>
    %374 = arith.mulf %358, %366 : vector<8x128xf32>
    %375 = arith.addf %373, %374 : vector<8x128xf32>
    %376 = math.tanh %375 : vector<8x128xf32>
    %377 = arith.mulf %372, %376 : vector<8x128xf32>
    %c0_121 = arith.constant 0 : index
    %c0_122 = arith.constant 0 : index
    %378 = vector.load %arg3[%c0_121, %c0_122] : memref<128x512xf32, #tpu.memory_space<vmem>>, vector<128x512xf32>
    %cst_123 = arith.constant dense<0.000000e+00> : vector<8x512xf32>
    %379 = tpu.matmul %377, %378, %cst_123 {dimension_numbers = #tpu.dot_dimension_numbers<[1], [0], [0], [1], [0, 0, 1, 1], [], []>} : vector<8x128xf32>, vector<128x512xf32>, vector<8x512xf32> -> vector<8x512xf32>
    %c0_124 = arith.constant 0 : index
    %c0_125 = arith.constant 0 : index
    %380 = vector.load %arg4[%c0_124, %c0_125] : memref<128x512xf32, #tpu.memory_space<vmem>>, vector<128x512xf32>
    %cst_126 = arith.constant dense<0.000000e+00> : vector<8x512xf32>
    %381 = tpu.matmul %342, %380, %cst_126 {dimension_numbers = #tpu.dot_dimension_numbers<[1], [0], [0], [1], [0, 0, 1, 1], [], []>} : vector<8x128xf32>, vector<128x512xf32>, vector<8x512xf32> -> vector<8x512xf32>
    %382 = arith.addf %379, %381 : vector<8x512xf32>
    %c0_127 = arith.constant 0 : index
    %c0_128 = arith.constant 0 : index
    %383 = vector.load %arg5[%c0_127, %c0_128] : memref<1x512xf32, #tpu.memory_space<vmem>>, vector<1x512xf32>
    %384 = vector.broadcast %383 : vector<1x512xf32> to vector<8x512xf32>
    %385 = arith.addf %382, %384 : vector<8x512xf32>
    %386 = vector.extract_strided_slice %385 {offsets = [0, 0], sizes = [8, 128], strides = [1, 1]} : vector<8x512xf32> to vector<8x128xf32>
    %387 = arith.negf %386 : vector<8x128xf32>
    %388 = math.exp %387 : vector<8x128xf32>
    %cst_129 = arith.constant 1.000000e+00 : f32
    %389 = vector.broadcast %cst_129 : f32 to vector<8x128xf32>
    %390 = arith.addf %389, %388 : vector<8x128xf32>
    %391 = arith.divf %389, %390 : vector<8x128xf32>
    %392 = vector.extract_strided_slice %385 {offsets = [0, 128], sizes = [8, 128], strides = [1, 1]} : vector<8x512xf32> to vector<8x128xf32>
    %393 = arith.negf %392 : vector<8x128xf32>
    %394 = math.exp %393 : vector<8x128xf32>
    %cst_130 = arith.constant 1.000000e+00 : f32
    %395 = vector.broadcast %cst_130 : f32 to vector<8x128xf32>
    %396 = arith.addf %395, %394 : vector<8x128xf32>
    %397 = arith.divf %395, %396 : vector<8x128xf32>
    %398 = vector.extract_strided_slice %385 {offsets = [0, 256], sizes = [8, 128], strides = [1, 1]} : vector<8x512xf32> to vector<8x128xf32>
    %399 = math.tanh %398 : vector<8x128xf32>
    %400 = vector.extract_strided_slice %385 {offsets = [0, 384], sizes = [8, 128], strides = [1, 1]} : vector<8x512xf32> to vector<8x128xf32>
    %401 = arith.negf %400 : vector<8x128xf32>
    %402 = math.exp %401 : vector<8x128xf32>
    %cst_131 = arith.constant 1.000000e+00 : f32
    %403 = vector.broadcast %cst_131 : f32 to vector<8x128xf32>
    %404 = arith.addf %403, %402 : vector<8x128xf32>
    %405 = arith.divf %403, %404 : vector<8x128xf32>
    %406 = arith.mulf %397, %340 : vector<8x128xf32>
    %407 = arith.mulf %391, %399 : vector<8x128xf32>
    %408 = arith.addf %406, %407 : vector<8x128xf32>
    %409 = math.tanh %408 : vector<8x128xf32>
    %410 = arith.mulf %405, %409 : vector<8x128xf32>
    %411 = arith.index_cast %c5_i32 : i32 to index
    %c0_132 = arith.constant 0 : index
    %c0_133 = arith.constant 0 : index
    %412 = vector.load %arg6[%411, %c0_132, %c0_133] : memref<8x8x128xf32, #tpu.memory_space<vmem>>, vector<1x8x128xf32>
    %413 = vector.shape_cast %412 : vector<1x8x128xf32> to vector<8x128xf32>
    %414 = vector.shape_cast %410 : vector<8x128xf32> to vector<1x8x128xf32>
    tpu.vector_store %arg6[%411, %c0_132, %c0_133], %414 {strides = array<i32>} : memref<8x8x128xf32, #tpu.memory_space<vmem>>, vector<1x8x128xf32>,
    %c6_i32 = arith.constant 6 : i32
    %415 = arith.index_cast %c6_i32 : i32 to index
    %c0_134 = arith.constant 0 : index
    %c0_135 = arith.constant 0 : index
    %416 = vector.load %arg1[%415, %c0_134, %c0_135] : memref<8x8x512xf32, #tpu.memory_space<vmem>>, vector<1x8x512xf32>
    %417 = vector.shape_cast %416 : vector<1x8x512xf32> to vector<8x512xf32>
    %c0_136 = arith.constant 0 : index
    %c0_137 = arith.constant 0 : index
    %418 = vector.load %arg2[%c0_136, %c0_137] : memref<128x512xf32, #tpu.memory_space<vmem>>, vector<128x512xf32>
    %cst_138 = arith.constant dense<0.000000e+00> : vector<8x512xf32>
    %419 = tpu.matmul %377, %418, %cst_138 {dimension_numbers = #tpu.dot_dimension_numbers<[1], [0], [0], [1], [0, 0, 1, 1], [], []>} : vector<8x128xf32>, vector<128x512xf32>, vector<8x512xf32> -> vector<8x512xf32>
    %420 = arith.addf %417, %419 : vector<8x512xf32>
    %421 = vector.extract_strided_slice %420 {offsets = [0, 0], sizes = [8, 128], strides = [1, 1]} : vector<8x512xf32> to vector<8x128xf32>
    %422 = arith.negf %421 : vector<8x128xf32>
    %423 = math.exp %422 : vector<8x128xf32>
    %cst_139 = arith.constant 1.000000e+00 : f32
    %424 = vector.broadcast %cst_139 : f32 to vector<8x128xf32>
    %425 = arith.addf %424, %423 : vector<8x128xf32>
    %426 = arith.divf %424, %425 : vector<8x128xf32>
    %427 = vector.extract_strided_slice %420 {offsets = [0, 128], sizes = [8, 128], strides = [1, 1]} : vector<8x512xf32> to vector<8x128xf32>
    %428 = arith.negf %427 : vector<8x128xf32>
    %429 = math.exp %428 : vector<8x128xf32>
    %cst_140 = arith.constant 1.000000e+00 : f32
    %430 = vector.broadcast %cst_140 : f32 to vector<8x128xf32>
    %431 = arith.addf %430, %429 : vector<8x128xf32>
    %432 = arith.divf %430, %431 : vector<8x128xf32>
    %433 = vector.extract_strided_slice %420 {offsets = [0, 256], sizes = [8, 128], strides = [1, 1]} : vector<8x512xf32> to vector<8x128xf32>
    %434 = math.tanh %433 : vector<8x128xf32>
    %435 = vector.extract_strided_slice %420 {offsets = [0, 384], sizes = [8, 128], strides = [1, 1]} : vector<8x512xf32> to vector<8x128xf32>
    %436 = arith.negf %435 : vector<8x128xf32>
    %437 = math.exp %436 : vector<8x128xf32>
    %cst_141 = arith.constant 1.000000e+00 : f32
    %438 = vector.broadcast %cst_141 : f32 to vector<8x128xf32>
    %439 = arith.addf %438, %437 : vector<8x128xf32>
    %440 = arith.divf %438, %439 : vector<8x128xf32>
    %441 = arith.mulf %432, %375 : vector<8x128xf32>
    %442 = arith.mulf %426, %434 : vector<8x128xf32>
    %443 = arith.addf %441, %442 : vector<8x128xf32>
    %444 = math.tanh %443 : vector<8x128xf32>
    %445 = arith.mulf %440, %444 : vector<8x128xf32>
    %c0_142 = arith.constant 0 : index
    %c0_143 = arith.constant 0 : index
    %446 = vector.load %arg3[%c0_142, %c0_143] : memref<128x512xf32, #tpu.memory_space<vmem>>, vector<128x512xf32>
    %cst_144 = arith.constant dense<0.000000e+00> : vector<8x512xf32>
    %447 = tpu.matmul %445, %446, %cst_144 {dimension_numbers = #tpu.dot_dimension_numbers<[1], [0], [0], [1], [0, 0, 1, 1], [], []>} : vector<8x128xf32>, vector<128x512xf32>, vector<8x512xf32> -> vector<8x512xf32>
    %c0_145 = arith.constant 0 : index
    %c0_146 = arith.constant 0 : index
    %448 = vector.load %arg4[%c0_145, %c0_146] : memref<128x512xf32, #tpu.memory_space<vmem>>, vector<128x512xf32>
    %cst_147 = arith.constant dense<0.000000e+00> : vector<8x512xf32>
    %449 = tpu.matmul %410, %448, %cst_147 {dimension_numbers = #tpu.dot_dimension_numbers<[1], [0], [0], [1], [0, 0, 1, 1], [], []>} : vector<8x128xf32>, vector<128x512xf32>, vector<8x512xf32> -> vector<8x512xf32>
    %450 = arith.addf %447, %449 : vector<8x512xf32>
    %c0_148 = arith.constant 0 : index
    %c0_149 = arith.constant 0 : index
    %451 = vector.load %arg5[%c0_148, %c0_149] : memref<1x512xf32, #tpu.memory_space<vmem>>, vector<1x512xf32>
    %452 = vector.broadcast %451 : vector<1x512xf32> to vector<8x512xf32>
    %453 = arith.addf %450, %452 : vector<8x512xf32>
    %454 = vector.extract_strided_slice %453 {offsets = [0, 0], sizes = [8, 128], strides = [1, 1]} : vector<8x512xf32> to vector<8x128xf32>
    %455 = arith.negf %454 : vector<8x128xf32>
    %456 = math.exp %455 : vector<8x128xf32>
    %cst_150 = arith.constant 1.000000e+00 : f32
    %457 = vector.broadcast %cst_150 : f32 to vector<8x128xf32>
    %458 = arith.addf %457, %456 : vector<8x128xf32>
    %459 = arith.divf %457, %458 : vector<8x128xf32>
    %460 = vector.extract_strided_slice %453 {offsets = [0, 128], sizes = [8, 128], strides = [1, 1]} : vector<8x512xf32> to vector<8x128xf32>
    %461 = arith.negf %460 : vector<8x128xf32>
    %462 = math.exp %461 : vector<8x128xf32>
    %cst_151 = arith.constant 1.000000e+00 : f32
    %463 = vector.broadcast %cst_151 : f32 to vector<8x128xf32>
    %464 = arith.addf %463, %462 : vector<8x128xf32>
    %465 = arith.divf %463, %464 : vector<8x128xf32>
    %466 = vector.extract_strided_slice %453 {offsets = [0, 256], sizes = [8, 128], strides = [1, 1]} : vector<8x512xf32> to vector<8x128xf32>
    %467 = math.tanh %466 : vector<8x128xf32>
    %468 = vector.extract_strided_slice %453 {offsets = [0, 384], sizes = [8, 128], strides = [1, 1]} : vector<8x512xf32> to vector<8x128xf32>
    %469 = arith.negf %468 : vector<8x128xf32>
    %470 = math.exp %469 : vector<8x128xf32>
    %cst_152 = arith.constant 1.000000e+00 : f32
    %471 = vector.broadcast %cst_152 : f32 to vector<8x128xf32>
    %472 = arith.addf %471, %470 : vector<8x128xf32>
    %473 = arith.divf %471, %472 : vector<8x128xf32>
    %474 = arith.mulf %465, %408 : vector<8x128xf32>
    %475 = arith.mulf %459, %467 : vector<8x128xf32>
    %476 = arith.addf %474, %475 : vector<8x128xf32>
    %477 = math.tanh %476 : vector<8x128xf32>
    %478 = arith.mulf %473, %477 : vector<8x128xf32>
    %479 = arith.index_cast %c6_i32 : i32 to index
    %c0_153 = arith.constant 0 : index
    %c0_154 = arith.constant 0 : index
    %480 = vector.load %arg6[%479, %c0_153, %c0_154] : memref<8x8x128xf32, #tpu.memory_space<vmem>>, vector<1x8x128xf32>
    %481 = vector.shape_cast %480 : vector<1x8x128xf32> to vector<8x128xf32>
    %482 = vector.shape_cast %478 : vector<8x128xf32> to vector<1x8x128xf32>
    tpu.vector_store %arg6[%479, %c0_153, %c0_154], %482 {strides = array<i32>} : memref<8x8x128xf32, #tpu.memory_space<vmem>>, vector<1x8x128xf32>,
    %c7_i32 = arith.constant 7 : i32
    %483 = arith.index_cast %c7_i32 : i32 to index
    %c0_155 = arith.constant 0 : index
    %c0_156 = arith.constant 0 : index
    %484 = vector.load %arg1[%483, %c0_155, %c0_156] : memref<8x8x512xf32, #tpu.memory_space<vmem>>, vector<1x8x512xf32>
    %485 = vector.shape_cast %484 : vector<1x8x512xf32> to vector<8x512xf32>
    %c0_157 = arith.constant 0 : index
    %c0_158 = arith.constant 0 : index
    %486 = vector.load %arg2[%c0_157, %c0_158] : memref<128x512xf32, #tpu.memory_space<vmem>>, vector<128x512xf32>
    %cst_159 = arith.constant dense<0.000000e+00> : vector<8x512xf32>
    %487 = tpu.matmul %445, %486, %cst_159 {dimension_numbers = #tpu.dot_dimension_numbers<[1], [0], [0], [1], [0, 0, 1, 1], [], []>} : vector<8x128xf32>, vector<128x512xf32>, vector<8x512xf32> -> vector<8x512xf32>
    %488 = arith.addf %485, %487 : vector<8x512xf32>
    %489 = vector.extract_strided_slice %488 {offsets = [0, 0], sizes = [8, 128], strides = [1, 1]} : vector<8x512xf32> to vector<8x128xf32>
    %490 = arith.negf %489 : vector<8x128xf32>
    %491 = math.exp %490 : vector<8x128xf32>
    %cst_160 = arith.constant 1.000000e+00 : f32
    %492 = vector.broadcast %cst_160 : f32 to vector<8x128xf32>
    %493 = arith.addf %492, %491 : vector<8x128xf32>
    %494 = arith.divf %492, %493 : vector<8x128xf32>
    %495 = vector.extract_strided_slice %488 {offsets = [0, 128], sizes = [8, 128], strides = [1, 1]} : vector<8x512xf32> to vector<8x128xf32>
    %496 = arith.negf %495 : vector<8x128xf32>
    %497 = math.exp %496 : vector<8x128xf32>
    %cst_161 = arith.constant 1.000000e+00 : f32
    %498 = vector.broadcast %cst_161 : f32 to vector<8x128xf32>
    %499 = arith.addf %498, %497 : vector<8x128xf32>
    %500 = arith.divf %498, %499 : vector<8x128xf32>
    %501 = vector.extract_strided_slice %488 {offsets = [0, 256], sizes = [8, 128], strides = [1, 1]} : vector<8x512xf32> to vector<8x128xf32>
    %502 = math.tanh %501 : vector<8x128xf32>
    %503 = vector.extract_strided_slice %488 {offsets = [0, 384], sizes = [8, 128], strides = [1, 1]} : vector<8x512xf32> to vector<8x128xf32>
    %504 = arith.negf %503 : vector<8x128xf32>
    %505 = math.exp %504 : vector<8x128xf32>
    %cst_162 = arith.constant 1.000000e+00 : f32
    %506 = vector.broadcast %cst_162 : f32 to vector<8x128xf32>
    %507 = arith.addf %506, %505 : vector<8x128xf32>
    %508 = arith.divf %506, %507 : vector<8x128xf32>
    %509 = arith.mulf %500, %443 : vector<8x128xf32>
    %510 = arith.mulf %494, %502 : vector<8x128xf32>
    %511 = arith.addf %509, %510 : vector<8x128xf32>
    %512 = math.tanh %511 : vector<8x128xf32>
    %513 = arith.mulf %508, %512 : vector<8x128xf32>
    %c0_163 = arith.constant 0 : index
    %c0_164 = arith.constant 0 : index
    %514 = vector.load %arg3[%c0_163, %c0_164] : memref<128x512xf32, #tpu.memory_space<vmem>>, vector<128x512xf32>
    %cst_165 = arith.constant dense<0.000000e+00> : vector<8x512xf32>
    %515 = tpu.matmul %513, %514, %cst_165 {dimension_numbers = #tpu.dot_dimension_numbers<[1], [0], [0], [1], [0, 0, 1, 1], [], []>} : vector<8x128xf32>, vector<128x512xf32>, vector<8x512xf32> -> vector<8x512xf32>
    %c0_166 = arith.constant 0 : index
    %c0_167 = arith.constant 0 : index
    %516 = vector.load %arg4[%c0_166, %c0_167] : memref<128x512xf32, #tpu.memory_space<vmem>>, vector<128x512xf32>
    %cst_168 = arith.constant dense<0.000000e+00> : vector<8x512xf32>
    %517 = tpu.matmul %478, %516, %cst_168 {dimension_numbers = #tpu.dot_dimension_numbers<[1], [0], [0], [1], [0, 0, 1, 1], [], []>} : vector<8x128xf32>, vector<128x512xf32>, vector<8x512xf32> -> vector<8x512xf32>
    %518 = arith.addf %515, %517 : vector<8x512xf32>
    %c0_169 = arith.constant 0 : index
    %c0_170 = arith.constant 0 : index
    %519 = vector.load %arg5[%c0_169, %c0_170] : memref<1x512xf32, #tpu.memory_space<vmem>>, vector<1x512xf32>
    %520 = vector.broadcast %519 : vector<1x512xf32> to vector<8x512xf32>
    %521 = arith.addf %518, %520 : vector<8x512xf32>
    %522 = vector.extract_strided_slice %521 {offsets = [0, 0], sizes = [8, 128], strides = [1, 1]} : vector<8x512xf32> to vector<8x128xf32>
    %523 = arith.negf %522 : vector<8x128xf32>
    %524 = math.exp %523 : vector<8x128xf32>
    %cst_171 = arith.constant 1.000000e+00 : f32
    %525 = vector.broadcast %cst_171 : f32 to vector<8x128xf32>
    %526 = arith.addf %525, %524 : vector<8x128xf32>
    %527 = arith.divf %525, %526 : vector<8x128xf32>
    %528 = vector.extract_strided_slice %521 {offsets = [0, 128], sizes = [8, 128], strides = [1, 1]} : vector<8x512xf32> to vector<8x128xf32>
    %529 = arith.negf %528 : vector<8x128xf32>
    %530 = math.exp %529 : vector<8x128xf32>
    %cst_172 = arith.constant 1.000000e+00 : f32
    %531 = vector.broadcast %cst_172 : f32 to vector<8x128xf32>
    %532 = arith.addf %531, %530 : vector<8x128xf32>
    %533 = arith.divf %531, %532 : vector<8x128xf32>
    %534 = vector.extract_strided_slice %521 {offsets = [0, 256], sizes = [8, 128], strides = [1, 1]} : vector<8x512xf32> to vector<8x128xf32>
    %535 = math.tanh %534 : vector<8x128xf32>
    %536 = vector.extract_strided_slice %521 {offsets = [0, 384], sizes = [8, 128], strides = [1, 1]} : vector<8x512xf32> to vector<8x128xf32>
    %537 = arith.negf %536 : vector<8x128xf32>
    %538 = math.exp %537 : vector<8x128xf32>
    %cst_173 = arith.constant 1.000000e+00 : f32
    %539 = vector.broadcast %cst_173 : f32 to vector<8x128xf32>
    %540 = arith.addf %539, %538 : vector<8x128xf32>
    %541 = arith.divf %539, %540 : vector<8x128xf32>
    %542 = arith.mulf %533, %476 : vector<8x128xf32>
    %543 = arith.mulf %527, %535 : vector<8x128xf32>
    %544 = arith.addf %542, %543 : vector<8x128xf32>
    %545 = math.tanh %544 : vector<8x128xf32>
    %546 = arith.mulf %541, %545 : vector<8x128xf32>
    %547 = arith.index_cast %c7_i32 : i32 to index
    %c0_174 = arith.constant 0 : index
    %c0_175 = arith.constant 0 : index
    %548 = vector.load %arg6[%547, %c0_174, %c0_175] : memref<8x8x128xf32, #tpu.memory_space<vmem>>, vector<1x8x128xf32>
    %549 = vector.shape_cast %548 : vector<1x8x128xf32> to vector<8x128xf32>
    %550 = vector.shape_cast %546 : vector<8x128xf32> to vector<1x8x128xf32>
    tpu.vector_store %arg6[%547, %c0_174, %c0_175], %550 {strides = array<i32>} : memref<8x8x128xf32, #tpu.memory_space<vmem>>, vector<1x8x128xf32>,
    %c8_i32 = arith.constant 8 : i32
    %c0_176 = arith.constant 0 : index
    %c0_177 = arith.constant 0 : index
    %551 = vector.load %arg9[%c0_176, %c0_177] : memref<8x128xf32, #tpu.memory_space<vmem>>, vector<8x128xf32>
    tpu.vector_store %arg9[%c0_176, %c0_177], %513 {strides = array<i32>} : memref<8x128xf32, #tpu.memory_space<vmem>>, vector<8x128xf32>,
    %c0_178 = arith.constant 0 : index
    %c0_179 = arith.constant 0 : index
    %552 = vector.load %arg10[%c0_178, %c0_179] : memref<8x128xf32, #tpu.memory_space<vmem>>, vector<8x128xf32>
    tpu.vector_store %arg10[%c0_178, %c0_179], %511 {strides = array<i32>} : memref<8x128xf32, #tpu.memory_space<vmem>>, vector<8x128xf32>,
    %c0_180 = arith.constant 0 : index
    %c0_181 = arith.constant 0 : index
    %553 = vector.load %arg11[%c0_180, %c0_181] : memref<8x128xf32, #tpu.memory_space<vmem>>, vector<8x128xf32>
    tpu.vector_store %arg11[%c0_180, %c0_181], %546 {strides = array<i32>} : memref<8x128xf32, #tpu.memory_space<vmem>>, vector<8x128xf32>,
    %c0_182 = arith.constant 0 : index
    %c0_183 = arith.constant 0 : index
    %554 = vector.load %arg12[%c0_182, %c0_183] : memref<8x128xf32, #tpu.memory_space<vmem>>, vector<8x128xf32>
    tpu.vector_store %arg12[%c0_182, %c0_183], %544 {strides = array<i32>} : memref<8x128xf32, #tpu.memory_space<vmem>>, vector<8x128xf32>,
    %c0_i32_184 = arith.constant 0 : i32
    %555 = arith.cmpi eq, %arg0, %c0_i32_184 : i32
    %556 = arith.extui %555 : i1 to i32
    %c0_i32_185 = arith.constant 0 : i32
    %557 = arith.cmpi ne, %556, %c0_i32_185 : i32
    scf.if %557 {
      %c0_186 = arith.constant 0 : index
      %c0_187 = arith.constant 0 : index
      %c0_188 = arith.constant 0 : index
      %558 = vector.load %arg7[%c0_186, %c0_187, %c0_188] : memref<2x8x128xf32, #tpu.memory_space<vmem>>, vector<1x8x128xf32>
      %559 = vector.shape_cast %558 : vector<1x8x128xf32> to vector<8x128xf32>
      %560 = vector.shape_cast %513 : vector<8x128xf32> to vector<1x8x128xf32>
      tpu.vector_store %arg7[%c0_186, %c0_187, %c0_188], %560 {strides = array<i32>} : memref<2x8x128xf32, #tpu.memory_space<vmem>>, vector<1x8x128xf32>,
      %c1 = arith.constant 1 : index
      %c0_189 = arith.constant 0 : index
      %c0_190 = arith.constant 0 : index
      %561 = vector.load %arg7[%c1, %c0_189, %c0_190] : memref<2x8x128xf32, #tpu.memory_space<vmem>>, vector<1x8x128xf32>
      %562 = vector.shape_cast %561 : vector<1x8x128xf32> to vector<8x128xf32>
      %563 = vector.shape_cast %546 : vector<8x128xf32> to vector<1x8x128xf32>
      tpu.vector_store %arg7[%c1, %c0_189, %c0_190], %563 {strides = array<i32>} : memref<2x8x128xf32, #tpu.memory_space<vmem>>, vector<1x8x128xf32>,
      %c0_191 = arith.constant 0 : index
      %c0_192 = arith.constant 0 : index
      %c0_193 = arith.constant 0 : index
      %564 = vector.load %arg8[%c0_191, %c0_192, %c0_193] : memref<2x8x128xf32, #tpu.memory_space<vmem>>, vector<1x8x128xf32>
      %565 = vector.shape_cast %564 : vector<1x8x128xf32> to vector<8x128xf32>
      %566 = vector.shape_cast %511 : vector<8x128xf32> to vector<1x8x128xf32>
      tpu.vector_store %arg8[%c0_191, %c0_192, %c0_193], %566 {strides = array<i32>} : memref<2x8x128xf32, #tpu.memory_space<vmem>>, vector<1x8x128xf32>,
      %c1_194 = arith.constant 1 : index
      %c0_195 = arith.constant 0 : index
      %c0_196 = arith.constant 0 : index
      %567 = vector.load %arg8[%c1_194, %c0_195, %c0_196] : memref<2x8x128xf32, #tpu.memory_space<vmem>>, vector<1x8x128xf32>
      %568 = vector.shape_cast %567 : vector<1x8x128xf32> to vector<8x128xf32>
      %569 = vector.shape_cast %544 : vector<8x128xf32> to vector<1x8x128xf32>
      tpu.vector_store %arg8[%c1_194, %c0_195, %c0_196], %569 {strides = array<i32>} : memref<2x8x128xf32, #tpu.memory_space<vmem>>, vector<1x8x128xf32>,
    } else {
    }
    return
  }
  func.func @transform_0(%arg0: i32) -> (i32, i32, i32) {
    %c0_i32 = arith.constant 0 : i32
    %c0_i32_0 = arith.constant 0 : i32
    %c0_i32_1 = arith.constant 0 : i32
    return %arg0, %c0_i32, %c0_i32_0 : i32, i32, i32
  }
  func.func @transform_1(%arg0: i32) -> (i32, i32) {
    %c0_i32 = arith.constant 0 : i32
    %c0_i32_0 = arith.constant 0 : i32
    %c0_i32_1 = arith.constant 0 : i32
    return %c0_i32, %c0_i32_0 : i32, i32
  }
  func.func @transform_2(%arg0: i32) -> (i32, i32) {
    %c0_i32 = arith.constant 0 : i32
    %c0_i32_0 = arith.constant 0 : i32
    %c0_i32_1 = arith.constant 0 : i32
    return %c0_i32, %c0_i32_0 : i32, i32
  }
  func.func @transform_3(%arg0: i32) -> (i32, i32) {
    %c0_i32 = arith.constant 0 : i32
    %c0_i32_0 = arith.constant 0 : i32
    %c0_i32_1 = arith.constant 0 : i32
    return %c0_i32, %c0_i32_0 : i32, i32
  }
  func.func @transform_4(%arg0: i32) -> (i32, i32) {
    %c0_i32 = arith.constant 0 : i32
    %c0_i32_0 = arith.constant 0 : i32
    %c0_i32_1 = arith.constant 0 : i32
    return %c0_i32, %c0_i32_0 : i32, i32
  }
  func.func @transform_5(%arg0: i32) -> (i32, i32, i32) {
    %c0_i32 = arith.constant 0 : i32
    %c0_i32_0 = arith.constant 0 : i32
    %c0_i32_1 = arith.constant 0 : i32
    return %arg0, %c0_i32, %c0_i32_0 : i32, i32, i32
  }
  func.func @transform_6(%arg0: i32) -> (i32, i32, i32) {
    %c0_i32 = arith.constant 0 : i32
    %c0_i32_0 = arith.constant 0 : i32
    %c0_i32_1 = arith.constant 0 : i32
    %c0_i32_2 = arith.constant 0 : i32
    return %c0_i32, %c0_i32_0, %c0_i32_1 : i32, i32, i32
  }
  func.func @transform_7(%arg0: i32) -> (i32, i32, i32) {
    %c0_i32 = arith.constant 0 : i32
    %c0_i32_0 = arith.constant 0 : i32
    %c0_i32_1 = arith.constant 0 : i32
    %c0_i32_2 = arith.constant 0 : i32
    return %c0_i32, %c0_i32_0, %c0_i32_1 : i32, i32, i32
  }
}

</mosaic_0001>

<bundles_post_ra>
// kernel: lyrics_net_forward.3
= control target key start
LH: loop header
LB: loop body
LE: loop exit
PB: predicated region body
PF: predicated region fallthrough
CT: control target
= control target key end

     0   :  { %s698_s1 = inlined_call_operand.vmem [shape: f32[128,128], index: 1, kind: input, shape index: {}]   ;;  %s699_s0 = inlined_call_operand.vmem [shape: f32[64,128], index: 0, kind: input, shape index: {}]   ;;  %s700_s3 = inlined_call_operand.vmem [shape: f32[128,128], index: 3, kind: input, shape index: {}]   ;;  %s701_s2 = inlined_call_operand.vmem [shape: f32[1,128], index: 2, kind: input, shape index: {}]   ;;  %s702_s4 = inlined_call_operand.vmem [shape: f32[1,128], index: 4, kind: input, shape index: {}]   ;;  %s703_s5 = inlined_call_operand.vmem [shape: f32[64,128], index: 5, kind: output, shape index: {}]  }
   0x1   :  { %v32_v0 = vld [vmem:[%s698_s1] sm:$0xff]  ;;  %v33_v1 = vld [vmem:[%s698_s1 + $0x8] sm:$0xff]  ;;  %v34_v2 = vld [vmem:[%s698_s1 + $0x10] sm:$0xff] }
   0x2   :  { %v454_v3 = vpack.c.bf16 %v33_v1, %v32_v0  ;;  %v35_v4 = vld [vmem:[%s698_s1 + $0x18] sm:$0xff]  ;;  %v36_v6 = vld [vmem:[%s698_s1 + $0x20] sm:$0xff]  ;;  %v37_v7 = vld [vmem:[%s698_s1 + $0x28] sm:$0xff] }
   0x3   :  { %v458_v5 = vpack.c.bf16 %v35_v4, %v34_v2  ;;  %v462_v8 = vpack.c.bf16 %v37_v7, %v36_v6  ;;  %v24_v9 = vld [vmem:[%s699_s0] sm:$0xff]  ;;  %v38_v10 = vld [vmem:[%s698_s1 + $0x30] sm:$0xff]  ;;  %v39_v11 = vld [vmem:[%s698_s1 + $0x38] sm:$0xff] }
   0x4   :  { %455 = vmatprep.subr.bf16.mxu0 %v454_v3  ;;  %398 = vmatprep.mubr.f32.mxu0 %v24_v9  ;;  %v176_v12 = vld [vmem:[%s700_s3] sm:$0xff]  ;;  %v177_v13 = vld [vmem:[%s700_s3 + $0x8] sm:$0xff]  ;;  %v178_v14 = vld [vmem:[%s700_s3 + $0x10] sm:$0xff]  ;;  %v466_v15 = vpack.c.bf16 %v39_v11, %v38_v10 }
   0x5   :  { %457 = vmatpush3.bf16.msra.mxu0 %v454_v3  ;;  %v40_v16 = vld [vmem:[%s698_s1 + $0x40] sm:$0xff]  ;;  %v486_v17 = vpack.c.bf16 %v177_v13, %v176_v12  ;;  %v179_v18 = vld [vmem:[%s700_s3 + $0x18] sm:$0xff]  ;;  %v41_v19 = vld [vmem:[%s698_s1 + $0x48] sm:$0xff] }
   0x6   :  { %459 = vmatprep.subr.bf16.mxu0 %v458_v5  ;;  %v490_v20 = vpack.c.bf16 %v179_v18, %v178_v14  ;;  %v180_v21 = vld [vmem:[%s700_s3 + $0x20] sm:$0xff]  ;;  %v181_v22 = vld [vmem:[%s700_s3 + $0x28] sm:$0xff]  ;;  %v470_v23 = vpack.c.bf16 %v41_v19, %v40_v16  ;;  %v42_v24 = vld [vmem:[%s698_s1 + $0x50] sm:$0xff] }
   0x7   :  { %487 = vmatprep.subr.bf16.mxu1 %v486_v17  ;;  %v494_v25 = vpack.c.bf16 %v181_v22, %v180_v21  ;;  %v43_v26 = vld [vmem:[%s698_s1 + $0x58] sm:$0xff]  ;;  %v182_v27 = vld [vmem:[%s700_s3 + $0x30] sm:$0xff]  ;;  %v44_v30 = vld [vmem:[%s698_s1 + $0x60] sm:$0xff] }
   0x8   :  { %489 = vmatpush3.bf16.msra.mxu1 %v486_v17  ;;  %v183_v28 = vld [vmem:[%s700_s3 + $0x38] sm:$0xff]  ;;  %v474_v29 = vpack.c.bf16 %v43_v26, %v42_v24  ;;  %v45_v32 = vld [vmem:[%s698_s1 + $0x68] sm:$0xff]  ;;  %v184_v33 = vld [vmem:[%s700_s3 + $0x40] sm:$0xff] }
   0x9   :  { %461 = vmatpush3.bf16.msra.mxu0 %v458_v5  ;;  %491 = vmatprep.subr.bf16.mxu1 %v490_v20  ;;  %v498_v31 = vpack.c.bf16 %v183_v28, %v182_v27  ;;  %v185_v34 = vld [vmem:[%s700_s3 + $0x48] sm:$0xff]  ;;  %v478_v35 = vpack.c.bf16 %v45_v32, %v44_v30  ;;  %v46_v36 = vld [vmem:[%s698_s1 + $0x70] sm:$0xff]  ;;  %v47_v38 = vld [vmem:[%s698_s1 + $0x78] sm:$0xff] }
   0xa   :  { %463 = vmatprep.subr.bf16.mxu0 %v462_v8  ;;  %v502_v37 = vpack.c.bf16 %v185_v34, %v184_v33  ;;  %v186_v39 = vld [vmem:[%s700_s3 + $0x50] sm:$0xff]  ;;  %v187_v40 = vld [vmem:[%s700_s3 + $0x58] sm:$0xff]  ;;  %v482_v41 = vpack.c.bf16 %v47_v38, %v46_v36  ;;  %v188_v43 = vld [vmem:[%s700_s3 + $0x60] sm:$0xff] }
   0xb   :  { %v506_v42 = vpack.c.bf16 %v187_v40, %v186_v39  ;;  %v189_v44 = vld [vmem:[%s700_s3 + $0x68] sm:$0xff]  ;;  %v26_v47 = vld [vmem:[%s699_s0 + $0x10] sm:$0xff]  ;;  %v27_v48 = vld [vmem:[%s699_s0 + $0x18] sm:$0xff] }
   0xc   :  { %493 = vmatpush3.bf16.msra.mxu1 %v490_v20  ;;  %v510_v45 = vpack.c.bf16 %v189_v44, %v188_v43  ;;  %v25_v46 = vld [vmem:[%s699_s0 + $0x8] sm:$0xff]  ;;  %v28_v49 = vld [vmem:[%s699_s0 + $0x20] sm:$0xff]  ;;  %v30_v51 = vld [vmem:[%s699_s0 + $0x30] sm:$0xff] }
   0xd   :  { %465 = vmatpush3.bf16.msra.mxu0 %v462_v8  ;;  %495 = vmatprep.subr.bf16.mxu1 %v494_v25  ;;  %v29_v50 = vld [vmem:[%s699_s0 + $0x28] sm:$0xff]  ;;  %v31_v52 = vld [vmem:[%s699_s0 + $0x38] sm:$0xff]  ;;  %v190_v53 = vld [vmem:[%s700_s3 + $0x70] sm:$0xff] }
   0xe   :  { %467 = vmatprep.subr.bf16.mxu0 %v466_v15  ;;  %v191_v54 = vld [vmem:[%s700_s3 + $0x78] sm:$0xff]  ;;  %v316_v56 = vld [vmem:[%s701_s2] ss:$0 sm:$0xff] }
   0xf   :  { %v514_v55 = vpack.c.bf16 %v191_v54, %v190_v53  ;;  %v317_v9 = vld [vmem:[%s702_s4] ss:$0 sm:$0xff] }
  0x10   :  { %497 = vmatpush3.bf16.msra.mxu1 %v494_v25 }
  0x11   :  { %469 = vmatpush3.bf16.msra.mxu0 %v466_v15  ;;  %499 = vmatprep.subr.bf16.mxu1 %v498_v31 }
  0x12   :  { %471 = vmatprep.subr.bf16.mxu0 %v470_v23 }
  0x14   :  { %501 = vmatpush3.bf16.msra.mxu1 %v498_v31 }
  0x15   :  { %473 = vmatpush3.bf16.msra.mxu0 %v470_v23  ;;  %503 = vmatprep.subr.bf16.mxu1 %v502_v37 }
  0x16   :  { %475 = vmatprep.subr.bf16.mxu0 %v474_v29 }
  0x18   :  { %505 = vmatpush3.bf16.msra.mxu1 %v502_v37 }
  0x19   :  { %477 = vmatpush3.bf16.msra.mxu0 %v474_v29  ;;  %507 = vmatprep.subr.bf16.mxu1 %v506_v42 }
  0x1a   :  { %479 = vmatprep.subr.bf16.mxu0 %v478_v35 }
  0x1c   :  { %509 = vmatpush3.bf16.msra.mxu1 %v506_v42 }
  0x1d   :  { %481 = vmatpush3.bf16.msra.mxu0 %v478_v35  ;;  %511 = vmatprep.subr.bf16.mxu1 %v510_v45 }
  0x1e   :  { %483 = vmatprep.subr.bf16.mxu0 %v482_v41 }
  0x20   :  { %513 = vmatpush3.bf16.msra.mxu1 %v510_v45 }
  0x21   :  { %485 = vmatpush3.bf16.msra.mxu0 %v482_v41  ;;  %515 = vmatprep.subr.bf16.mxu1 %v514_v55 }
  0x24   :  { %399 = vmatmul.mubr.f32.vlgmr.msra.gmra.mrb[0].mxu0 %v25_v46  ;;  %517 = vmatpush3.bf16.msra.mxu1 %v514_v55 }
  0x25   :  { %401 = vmatprep.mubr.f32.mxu0 %v26_v47 }
  0x28   :  { %402 = vmatmul.mubr.f32.gmra.mrb[2].mxu0 %v27_v48 }
  0x29   :  { %404 = vmatprep.mubr.f32.mxu0 %v28_v49 }
  0x2c   :  { %405 = vmatmul.mubr.f32.gmra.mrb[4].mxu0 %v29_v50 }
  0x2d   :  { %407 = vmatprep.mubr.f32.mxu0 %v30_v51 }
  0x30   :  { %408 = vmatmul.mubr.f32.gmra.mrb[6].mxu0 %v31_v52 }
  0xf7   :  { %v400_v57 = vpop.f32.mrb[0].mxu0 }
  0xf8   :  { %v121_v58 = vpop.f32.mrb[1].mxu0  ;;  %v127_v60 = vadd.f32 %v400_v57, %v316_v56 }
  0xf9   :  { %v122_v59 = vadd.f32 %v316_v56, %v121_v58 }
  0xfb   :  { %v403_v61 = vpop.f32.mrb[2].mxu0  ;;  %442 = vmatprep.mubr.f32.mxu1 %v122_v59 }
  0xfc   :  { %v131_v62 = vpop.f32.mrb[3].mxu0  ;;  %443 = vmatmul.mubr.f32.vlgmr.msra.gmra.mrb[0].mxu1 %v127_v60  ;;  %v137_v0 = vadd.f32 %v403_v61, %v316_v56 }
  0xfd   :  { %v132_v63 = vadd.f32 %v316_v56, %v131_v62 }
  0xff   :  { %v406_v1 = vpop.f32.mrb[4].mxu0  ;;  %445 = vmatprep.mubr.f32.mxu1 %v132_v63 }
 0x100   :  { %v141_v2 = vpop.f32.mrb[5].mxu0  ;;  %446 = vmatmul.mubr.f32.gmra.mrb[2].mxu1 %v137_v0  ;;  %v147_v4 = vadd.f32 %v406_v1, %v316_v56 }
 0x101   :  { %v142_v3 = vadd.f32 %v316_v56, %v141_v2 }
 0x103   :  { %v409_v5 = vpop.f32.mrb[6].mxu0  ;;  %448 = vmatprep.mubr.f32.mxu1 %v142_v3 }
 0x104   :  { %v151_v6 = vpop.f32.mrb[7].mxu0  ;;  %449 = vmatmul.mubr.f32.gmra.mrb[4].mxu1 %v147_v4  ;;  %v157_v8 = vadd.f32 %v409_v5, %v316_v56 }
 0x105   :  { %v152_v7 = vadd.f32 %v316_v56, %v151_v6 }
 0x107   :  { %451 = vmatprep.mubr.f32.mxu1 %v152_v7 }
 0x108   :  { %452 = vmatmul.mubr.f32.gmra.mrb[6].mxu1 %v157_v8 }
 0x1cf   :  { %v444_v10 = vpop.f32.mrb[0].mxu1 }
 0x1d0   :  { %v271_v11 = vadd.f32 %v444_v10, %v317_v9  ;;  %v265_v12 = vpop.f32.mrb[1].mxu1 }
 0x1d1   :  { %v266_v13 = vadd.f32 %v317_v9, %v265_v12 }
 0x1d2   :  { %305 = vst [vmem:[%s703_s5 + $0x8] sm:$0xff] %v271_v11 }
 0x1d3   :  { %304 = vst [vmem:[%s703_s5] sm:$0xff] %v266_v13  ;;  %v447_v14 = vpop.f32.mrb[2].mxu1 }
 0x1d4   :  { %v281_v15 = vadd.f32 %v447_v14, %v317_v9  ;;  %v275_v16 = vpop.f32.mrb[3].mxu1 }
 0x1d5   :  { %v276_v17 = vadd.f32 %v317_v9, %v275_v16 }
 0x1d6   :  { %307 = vst [vmem:[%s703_s5 + $0x18] sm:$0xff] %v281_v15 }
 0x1d7   :  { %306 = vst [vmem:[%s703_s5 + $0x10] sm:$0xff] %v276_v17  ;;  %v450_v18 = vpop.f32.mrb[4].mxu1 }
 0x1d8   :  { %v291_v19 = vadd.f32 %v450_v18, %v317_v9  ;;  %v285_v20 = vpop.f32.mrb[5].mxu1 }
 0x1d9   :  { %v286_v21 = vadd.f32 %v317_v9, %v285_v20 }
 0x1da   :  { %309 = vst [vmem:[%s703_s5 + $0x28] sm:$0xff] %v291_v19 }
 0x1db   :  { %308 = vst [vmem:[%s703_s5 + $0x20] sm:$0xff] %v286_v21  ;;  %v453_v22 = vpop.f32.mrb[6].mxu1 }
 0x1dc   :  { %v301_v23 = vadd.f32 %v453_v22, %v317_v9  ;;  %v295_v24 = vpop.f32.mrb[7].mxu1 }
 0x1dd   :  { %v296_v25 = vadd.f32 %v317_v9, %v295_v24 }
 0x1de   :  { %311 = vst [vmem:[%s703_s5 + $0x38] sm:$0xff] %v301_v23 }
 0x1df   :  { %310 = vst [vmem:[%s703_s5 + $0x30] sm:$0xff] %v296_v25 }

// kernel: lyrics_net_forward.2
= control target key start
LH: loop header
LB: loop body
LE: loop exit
PB: predicated region body
PF: predicated region fallthrough
CT: control target
= control target key end

     0   :  { %v11803_v3 = vmov 0.0   ;;  %s11795_s1 = inlined_call_operand.vmem [shape: f32[128,512], index: 1, kind: input, shape index: {}]   ;;  %s11796_s3 = inlined_call_operand.vmem [shape: f32[128,512], index: 3, kind: input, shape index: {}]   ;;  %s11797_s2 = inlined_call_operand.vmem [shape: f32[128,512], index: 2, kind: input, shape index: {}]   ;;  %s11798_s0 = inlined_call_operand.vmem [shape: f32[8,8,512], index: 0, kind: input, shape index: {}]   ;;  %s11799_s4 = inlined_call_operand.vmem [shape: f32[1,512], index: 4, kind: input, shape index: {}]   ;;  %s11800_s5 = inlined_call_operand.vmem [shape: f32[8,8,128], index: 5, kind: output, shape index: {0}]   ;;  %s11801_s7 = inlined_call_operand.vmem [shape: f32[2,8,128], index: 7, kind: output, shape index: {2}]   ;;  %s11802_s6 = inlined_call_operand.vmem [shape: f32[2,8,128], index: 6, kind: output, shape index: {1}]  }
   0x1   :  { %v40_v0 = vld [vmem:[%s11795_s1 + $0x8] sm:$0xff]  ;;  %v39_v2 = vld [vmem:[%s11795_s1] sm:$0xff]  ;;  %167 = vmatprep.mubr.f32.mxu0 %v11803_v3  ;;  %238 = vmatprep.mubr.f32.mxu1 %v11803_v3  ;;  %v42_v19 = vld [vmem:[%s11795_s1 + $0x18] sm:$0xff] }
   0x2   :  { %v44_v1 = vld [vmem:[%s11795_s1 + $0x28] sm:$0xff]  ;;  %v43_v5 = vld [vmem:[%s11795_s1 + $0x20] sm:$0xff]  ;;  %v46_v20 = vld [vmem:[%s11795_s1 + $0x38] sm:$0xff] }
   0x3   :  { %v7644_v4 = vpack.c.bf16 %v44_v1, %v40_v0  ;;  %v48_v6 = vld [vmem:[%s11795_s1 + $0x48] sm:$0xff]  ;;  %v7655_v8 = vpack.c.bf16 %v43_v5, %v39_v2  ;;  %v47_v10 = vld [vmem:[%s11795_s1 + $0x40] sm:$0xff]  ;;  %v7696_v22 = vpack.c.bf16 %v46_v20, %v42_v19  ;;  %v41_v23 = vld [vmem:[%s11795_s1 + $0x10] sm:$0xff] }
   0x4   :  { %v52_v7 = vld [vmem:[%s11795_s1 + $0x68] sm:$0xff]  ;;  %v51_v11 = vld [vmem:[%s11795_s1 + $0x60] sm:$0xff]  ;;  %v45_v24 = vld [vmem:[%s11795_s1 + $0x30] sm:$0xff] }
   0x5   :  { %v7657_v9 = vpack.c.bf16 %v52_v7, %v48_v6  ;;  %v56_v12 = vld [vmem:[%s11795_s1 + $0x88] sm:$0xff]  ;;  %5768 = vmatprep.subr.bf16.mxu0 %v7644_v4  ;;  %v7673_v14 = vpack.c.bf16 %v51_v11, %v47_v10  ;;  %v55_v15 = vld [vmem:[%s11795_s1 + $0x80] sm:$0xff]  ;;  %v7704_v25 = vpack.c.bf16 %v45_v24, %v41_v23  ;;  %5800 = vmatprep.subr.bf16.mxu1 %v7696_v22  ;;  %v50_v27 = vld [vmem:[%s11795_s1 + $0x58] sm:$0xff] }
   0x6   :  { %v60_v13 = vld [vmem:[%s11795_s1 + $0xa8] sm:$0xff]  ;;  %5770 = vmatpush1.bf16.msra.mxu0 %v7655_v8  ;;  %v59_v16 = vld [vmem:[%s11795_s1 + $0xa0] sm:$0xff]  ;;  %v54_v28 = vld [vmem:[%s11795_s1 + $0x78] sm:$0xff] }
   0x7   :  { %5772 = vmatprep.subr.bf16.mxu0 %v7657_v9  ;;  %v7682_v17 = vpack.c.bf16 %v60_v13, %v56_v12  ;;  %v64_v18 = vld [vmem:[%s11795_s1 + $0xc8] sm:$0xff]  ;;  %v7707_v26 = vpack.c.bf16 %v59_v16, %v55_v15  ;;  %v49_v29 = vld [vmem:[%s11795_s1 + $0x50] sm:$0xff]  ;;  %v63_v31 = vld [vmem:[%s11795_s1 + $0xc0] sm:$0xff]  ;;  %5802 = vmatpush1.bf16.msra.mxu1 %v7704_v25  ;;  %v7729_v33 = vpack.c.bf16 %v54_v28, %v50_v27 }
   0x8   :  { %v68_v21 = vld [vmem:[%s11795_s1 + $0xe8] sm:$0xff]  ;;  %v67_v32 = vld [vmem:[%s11795_s1 + $0xe0] sm:$0xff]  ;;  %v53_v34 = vld [vmem:[%s11795_s1 + $0x70] sm:$0xff] }
   0x9   :  { %v7720_v30 = vpack.c.bf16 %v68_v21, %v64_v18  ;;  %v72_v35 = vld [vmem:[%s11795_s1 + $0x108] sm:$0xff]  ;;  %v7740_v37 = vpack.c.bf16 %v53_v34, %v49_v29  ;;  %v58_v38 = vld [vmem:[%s11795_s1 + $0x98] sm:$0xff]  ;;  %5804 = vmatprep.subr.bf16.mxu1 %v7729_v33  ;;  %v57_v40 = vld [vmem:[%s11795_s1 + $0x90] sm:$0xff]  ;;  %v7756_v42 = vpack.c.bf16 %v67_v32, %v63_v31 }
   0xa   :  { %5774 = vmatpush1.bf16.msra.mxu0 %v7673_v14  ;;  %v76_v36 = vld [vmem:[%s11795_s1 + $0x128] sm:$0xff]  ;;  %v62_v39 = vld [vmem:[%s11795_s1 + $0xb8] sm:$0xff]  ;;  %v61_v41 = vld [vmem:[%s11795_s1 + $0xb0] sm:$0xff] }
   0xb   :  { %5776 = vmatprep.subr.bf16.mxu0 %v7682_v17  ;;  %v71_v43 = vld [vmem:[%s11795_s1 + $0x100] sm:$0xff]  ;;  %v7764_v45 = vpack.c.bf16 %v62_v39, %v58_v38  ;;  %v7767_v46 = vpack.c.bf16 %v76_v36, %v72_v35  ;;  %5806 = vmatpush1.bf16.msra.mxu1 %v7740_v37  ;;  %v80_v47 = vld [vmem:[%s11795_s1 + $0x148] sm:$0xff]  ;;  %v7773_v48 = vpack.c.bf16 %v61_v41, %v57_v40  ;;  %v66_v49 = vld [vmem:[%s11795_s1 + $0xd8] sm:$0xff] }
   0xc   :  { %v75_v44 = vld [vmem:[%s11795_s1 + $0x120] sm:$0xff]  ;;  %v70_v50 = vld [vmem:[%s11795_s1 + $0xf8] sm:$0xff]  ;;  %v84_v51 = vld [vmem:[%s11795_s1 + $0x168] sm:$0xff] }
   0xd   :  { %5808 = vmatprep.subr.bf16.mxu1 %v7764_v45  ;;  %v7785_v52 = vpack.c.bf16 %v70_v50, %v66_v49  ;;  %v65_v53 = vld [vmem:[%s11795_s1 + $0xd0] sm:$0xff]  ;;  %v7794_v55 = vpack.c.bf16 %v75_v44, %v71_v43  ;;  %v74_v56 = vld [vmem:[%s11795_s1 + $0x118] sm:$0xff]  ;;  %v7803_v58 = vpack.c.bf16 %v84_v51, %v80_v47  ;;  %v79_v59 = vld [vmem:[%s11795_s1 + $0x140] sm:$0xff] }
   0xe   :  { %5778 = vmatpush1.bf16.msra.mxu0 %v7707_v26  ;;  %v69_v54 = vld [vmem:[%s11795_s1 + $0xf0] sm:$0xff]  ;;  %v78_v57 = vld [vmem:[%s11795_s1 + $0x138] sm:$0xff]  ;;  %v83_v60 = vld [vmem:[%s11795_s1 + $0x160] sm:$0xff] }
   0xf   :  { %5780 = vmatprep.subr.bf16.mxu0 %v7720_v30  ;;  %5810 = vmatpush1.bf16.msra.mxu1 %v7773_v48  ;;  %v88_v61 = vld [vmem:[%s11795_s1 + $0x188] sm:$0xff]  ;;  %v7815_v62 = vpack.c.bf16 %v69_v54, %v65_v53  ;;  %v7821_v0 = vpack.c.bf16 %v78_v57, %v74_v56  ;;  %v73_v1 = vld [vmem:[%s11795_s1 + $0x110] sm:$0xff]  ;;  %v82_v5 = vld [vmem:[%s11795_s1 + $0x158] sm:$0xff]  ;;  %v7836_v7 = vpack.c.bf16 %v83_v60, %v79_v59 }
  0x10   :  { %v92_v63 = vld [vmem:[%s11795_s1 + $0x1a8] sm:$0xff]  ;;  %5812 = vmatprep.subr.bf16.mxu1 %v7785_v52  ;;  %v77_v2 = vld [vmem:[%s11795_s1 + $0x130] sm:$0xff]  ;;  %v86_v6 = vld [vmem:[%s11795_s1 + $0x178] sm:$0xff] }
  0x11   :  { %v7839_v10 = vpack.c.bf16 %v92_v63, %v88_v61  ;;  %v87_v11 = vld [vmem:[%s11795_s1 + $0x180] sm:$0xff]  ;;  %v96_v13 = vld [vmem:[%s11795_s1 + $0x1c8] sm:$0xff]  ;;  %v7851_v15 = vpack.c.bf16 %v77_v2, %v73_v1  ;;  %v7857_v18 = vpack.c.bf16 %v86_v6, %v82_v5  ;;  %v81_v19 = vld [vmem:[%s11795_s1 + $0x150] sm:$0xff] }
  0x12   :  { %5782 = vmatpush1.bf16.msra.mxu0 %v7756_v42  ;;  %v91_v12 = vld [vmem:[%s11795_s1 + $0x1a0] sm:$0xff]  ;;  %v100_v16 = vld [vmem:[%s11795_s1 + $0x1e8] sm:$0xff]  ;;  %v85_v20 = vld [vmem:[%s11795_s1 + $0x170] sm:$0xff] }
  0x13   :  { %5784 = vmatprep.subr.bf16.mxu0 %v7767_v46  ;;  %5814 = vmatpush1.bf16.msra.mxu1 %v7815_v62  ;;  %v90_v21 = vld [vmem:[%s11795_s1 + $0x198] sm:$0xff]  ;;  %v7872_v24 = vpack.c.bf16 %v91_v12, %v87_v11  ;;  %v7875_v27 = vpack.c.bf16 %v100_v16, %v96_v13  ;;  %v95_v28 = vld [vmem:[%s11795_s1 + $0x1c0] sm:$0xff]  ;;  %v7884_v31 = vpack.c.bf16 %v85_v20, %v81_v19  ;;  %v89_v32 = vld [vmem:[%s11795_s1 + $0x190] sm:$0xff] }
  0x14   :  { %5816 = vmatprep.subr.bf16.mxu1 %v7821_v0  ;;  %v94_v23 = vld [vmem:[%s11795_s1 + $0x1b8] sm:$0xff]  ;;  %v99_v29 = vld [vmem:[%s11795_s1 + $0x1e0] sm:$0xff]  ;;  %v93_v35 = vld [vmem:[%s11795_s1 + $0x1b0] sm:$0xff] }
  0x15   :  { %v7890_v34 = vpack.c.bf16 %v94_v23, %v90_v21  ;;  %v338_v36 = vld [vmem:[%s11796_s3 + $0x8] sm:$0xff]  ;;  %v98_v39 = vld [vmem:[%s11795_s1 + $0x1d8] sm:$0xff]  ;;  %v7908_v41 = vpack.c.bf16 %v99_v29, %v95_v28  ;;  %v7912_v43 = vpack.c.bf16 %v93_v35, %v89_v32  ;;  %v97_v44 = vld [vmem:[%s11795_s1 + $0x1d0] sm:$0xff] }
  0x16   :  { %5786 = vmatpush1.bf16.msra.mxu0 %v7794_v55  ;;  %v342_v38 = vld [vmem:[%s11796_s3 + $0x28] sm:$0xff]  ;;  %v102_v40 = vld [vmem:[%s11795_s1 + $0x1f8] sm:$0xff]  ;;  %v337_v49 = vld [vmem:[%s11796_s3] sm:$0xff] }
  0x17   :  { %5788 = vmatprep.subr.bf16.mxu0 %v7803_v58  ;;  %5818 = vmatpush1.bf16.msra.mxu1 %v7851_v15  ;;  %v7917_v47 = vpack.c.bf16 %v342_v38, %v338_v36  ;;  %v341_v50 = vld [vmem:[%s11796_s3 + $0x20] sm:$0xff]  ;;  %v7926_v51 = vpack.c.bf16 %v102_v40, %v98_v39  ;;  %v101_v53 = vld [vmem:[%s11795_s1 + $0x1f0] sm:$0xff]  ;;  %v346_v54 = vld [vmem:[%s11796_s3 + $0x48] sm:$0xff] }
  0x18   :  { %5820 = vmatprep.subr.bf16.mxu1 %v7857_v18  ;;  %v350_v56 = vld [vmem:[%s11796_s3 + $0x68] sm:$0xff]  ;;  %v340_v57 = vld [vmem:[%s11796_s3 + $0x18] sm:$0xff]  ;;  %v7944_v60 = vpack.c.bf16 %v341_v50, %v337_v49  ;;  %v7947_v61 = vpack.c.bf16 %v101_v53, %v97_v44  ;;  %v339_v63 = vld [vmem:[%s11796_s3 + $0x10] sm:$0xff] }
  0x19   :  { %v344_v59 = vld [vmem:[%s11796_s3 + $0x38] sm:$0xff]  ;;  %v7953_v1 = vpack.c.bf16 %v350_v56, %v346_v54  ;;  %v345_v2 = vld [vmem:[%s11796_s3 + $0x40] sm:$0xff]  ;;  %v343_v11 = vld [vmem:[%s11796_s3 + $0x30] sm:$0xff] }
  0x1a   :  { %5790 = vmatpush1.bf16.msra.mxu0 %v7836_v7  ;;  %v349_v5 = vld [vmem:[%s11796_s3 + $0x60] sm:$0xff]  ;;  %v7962_v6 = vpack.c.bf16 %v344_v59, %v340_v57  ;;  %v354_v12 = vld [vmem:[%s11796_s3 + $0x88] sm:$0xff]  ;;  %v348_v16 = vld [vmem:[%s11796_s3 + $0x58] sm:$0xff]  ;;  %v7985_v21 = vpack.c.bf16 %v343_v11, %v339_v63 }
  0x1b   :  { %5792 = vmatprep.subr.bf16.mxu0 %v7839_v10  ;;  %5822 = vmatpush1.bf16.msra.mxu1 %v7884_v31  ;;  %v358_v13 = vld [vmem:[%s11796_s3 + $0xa8] sm:$0xff]  ;;  %v352_v19 = vld [vmem:[%s11796_s3 + $0x78] sm:$0xff]  ;;  %v7981_v20 = vpack.c.bf16 %v349_v5, %v345_v2  ;;  %v347_v23 = vld [vmem:[%s11796_s3 + $0x50] sm:$0xff] }
  0x1c   :  { %5824 = vmatprep.subr.bf16.mxu1 %v7890_v34  ;;  %v7991_v28 = vpack.c.bf16 %v358_v13, %v354_v12  ;;  %v353_v29 = vld [vmem:[%s11796_s3 + $0x80] sm:$0xff]  ;;  %v8000_v35 = vpack.c.bf16 %v352_v19, %v348_v16  ;;  %v351_v36 = vld [vmem:[%s11796_s3 + $0x70] sm:$0xff]  ;;  %v362_v38 = vld [vmem:[%s11796_s3 + $0xc8] sm:$0xff] }
  0x1d   :  { %v357_v32 = vld [vmem:[%s11796_s3 + $0xa0] sm:$0xff]  ;;  %v366_v39 = vld [vmem:[%s11796_s3 + $0xe8] sm:$0xff]  ;;  %v356_v40 = vld [vmem:[%s11796_s3 + $0x98] sm:$0xff]  ;;  %v8022_v50 = vpack.c.bf16 %v351_v36, %v347_v23 }
  0x1e   :  { %5794 = vmatpush1.bf16.msra.mxu0 %v7872_v24  ;;  %v360_v44 = vld [vmem:[%s11796_s3 + $0xb8] sm:$0xff]  ;;  %v8019_v49 = vpack.c.bf16 %v357_v32, %v353_v29  ;;  %v355_v53 = vld [vmem:[%s11796_s3 + $0x90] sm:$0xff]  ;;  %v8028_v54 = vpack.c.bf16 %v366_v39, %v362_v38  ;;  %v361_v56 = vld [vmem:[%s11796_s3 + $0xc0] sm:$0xff] }
  0x1f   :  { %5796 = vmatprep.subr.bf16.mxu0 %v7875_v27  ;;  %5826 = vmatpush1.bf16.msra.mxu1 %v7912_v43  ;;  %v365_v57 = vld [vmem:[%s11796_s3 + $0xe0] sm:$0xff]  ;;  %v8037_v59 = vpack.c.bf16 %v360_v44, %v356_v40  ;;  %v359_v63 = vld [vmem:[%s11796_s3 + $0xb0] sm:$0xff]  ;;  %v370_v2 = vld [vmem:[%s11796_s3 + $0x108] sm:$0xff] }
  0x20   :  { %5828 = vmatprep.subr.bf16.mxu1 %v7926_v51  ;;  %v374_v5 = vld [vmem:[%s11796_s3 + $0x128] sm:$0xff]  ;;  %v364_v11 = vld [vmem:[%s11796_s3 + $0xd8] sm:$0xff]  ;;  %v8056_v13 = vpack.c.bf16 %v365_v57, %v361_v56  ;;  %v8059_v16 = vpack.c.bf16 %v359_v63, %v355_v53  ;;  %v369_v23 = vld [vmem:[%s11796_s3 + $0x100] sm:$0xff] }
  0x21   :  { %v368_v12 = vld [vmem:[%s11796_s3 + $0xf8] sm:$0xff]  ;;  %v8062_v19 = vpack.c.bf16 %v374_v5, %v370_v2  ;;  %v373_v29 = vld [vmem:[%s11796_s3 + $0x120] sm:$0xff]  ;;  %v363_v36 = vld [vmem:[%s11796_s3 + $0xd0] sm:$0xff] }
  0x22   :  { %5798 = vmatpush1.bf16.msra.mxu0 %v7908_v41  ;;  %v8071_v32 = vpack.c.bf16 %v368_v12, %v364_v11  ;;  %v367_v38 = vld [vmem:[%s11796_s3 + $0xf0] sm:$0xff]  ;;  %v372_v39 = vld [vmem:[%s11796_s3 + $0x118] sm:$0xff]  ;;  %v8086_v44 = vpack.c.bf16 %v373_v29, %v369_v23  ;;  %v378_v5 = vld [vmem:[%s11796_s3 + $0x148] sm:$0xff] }
  0x23   :  { %5832 = vmatprep.subr.bf16.mxu0 %v7917_v47  ;;  %5830 = vmatpush1.bf16.msra.mxu1 %v7947_v61  ;;  %11998 = vst [vmem:[#allocation6_spill] sm:$0xff] %v8062_v19  ;;  %v376_v40 = vld [vmem:[%s11796_s3 + $0x138] sm:$0xff]  ;;  %v8089_v53 = vpack.c.bf16 %v367_v38, %v363_v36  ;;  %v371_v57 = vld [vmem:[%s11796_s3 + $0x110] sm:$0xff]  ;;  %v382_v11 = vld [vmem:[%s11796_s3 + $0x168] sm:$0xff] }
  0x24   :  { %5864 = vmatprep.subr.bf16.mxu1 %v7962_v6  ;;  %11999 = vst [vmem:[#allocation7_spill] sm:$0xff] %v8086_v44  ;;  %v8093_v56 = vpack.c.bf16 %v376_v40, %v372_v39  ;;  %v375_v63 = vld [vmem:[%s11796_s3 + $0x130] sm:$0xff]  ;;  %v380_v12 = vld [vmem:[%s11796_s3 + $0x158] sm:$0xff]  ;;  %v8116_v23 = vpack.c.bf16 %v382_v11, %v378_v5  ;;  %v377_v36 = vld [vmem:[%s11796_s3 + $0x140] sm:$0xff] }
  0x25   :  { %168 = vmatmul.mubr.f32.vlgmr.msra.gmra.mrb[0].mxu0 %v11803_v3  ;;  %v8103_v2 = vpack.c.bf16 %v375_v63, %v371_v57  ;;  %v384_v29 = vld [vmem:[%s11796_s3 + $0x178] sm:$0xff]  ;;  %v381_v38 = vld [vmem:[%s11796_s3 + $0x160] sm:$0xff]  ;;  %v379_v57 = vld [vmem:[%s11796_s3 + $0x150] sm:$0xff] }
  0x26   :  { %5834 = vmatpush1.bf16.msra.mxu0 %v7944_v60  ;;  %465 = vmatprep.mubr.f32.mxu0 %v11803_v3  ;;  %12000 = vst [vmem:[#allocation8_spill] sm:$0xff] %v8093_v56  ;;  %12002 = vst [vmem:[#allocation10_spill] sm:$0xff] %v8116_v23  ;;  %v8127_v39 = vpack.c.bf16 %v384_v29, %v380_v12  ;;  %v8129_v40 = vpack.c.bf16 %v381_v38, %v377_v36  ;;  %v383_v63 = vld [vmem:[%s11796_s3 + $0x170] sm:$0xff]  ;;  %v386_v11 = vld [vmem:[%s11796_s3 + $0x188] sm:$0xff] }
  0x27   :  { %5836 = vmatprep.subr.bf16.mxu0 %v7953_v1  ;;  %239 = vmatmul.mubr.f32.vlgmr.msra.gmra.mrb[0].mxu1 %v11803_v3  ;;  %12001 = vst [vmem:[#allocation9_spill] sm:$0xff] %v8103_v2  ;;  %v8138_v5 = vpack.c.bf16 %v383_v63, %v379_v57  ;;  %v390_v12 = vld [vmem:[%s11796_s3 + $0x1a8] sm:$0xff]  ;;  %v388_v29 = vld [vmem:[%s11796_s3 + $0x198] sm:$0xff]  ;;  %v385_v57 = vld [vmem:[%s11796_s3 + $0x180] sm:$0xff] }
  0x28   :  { %5866 = vmatpush1.bf16.msra.mxu1 %v7985_v21  ;;  %536 = vmatprep.mubr.f32.mxu1 %v11803_v3  ;;  %12003 = vst [vmem:[#allocation11_spill] sm:$0xff] %v8127_v39  ;;  %12004 = vst [vmem:[#allocation12_spill] sm:$0xff] %v8129_v40  ;;  %v8152_v36 = vpack.c.bf16 %v390_v12, %v386_v11  ;;  %v392_v38 = vld [vmem:[%s11796_s3 + $0x1b8] sm:$0xff]  ;;  %v389_v63 = vld [vmem:[%s11796_s3 + $0x1a0] sm:$0xff] }
  0x29   :  { %5868 = vmatprep.subr.bf16.mxu1 %v8000_v35  ;;  %12005 = vst [vmem:[#allocation13_spill] sm:$0xff] %v8138_v5  ;;  %v8163_v3 = vpack.c.bf16 %v392_v38, %v388_v29  ;;  %v387_v11 = vld [vmem:[%s11796_s3 + $0x190] sm:$0xff]  ;;  %v394_v29 = vld [vmem:[%s11796_s3 + $0x1c8] sm:$0xff] }
  0x2a   :  { %5838 = vmatpush1.bf16.msra.mxu0 %v7981_v20  ;;  %12006 = vst [vmem:[#allocation14_spill] sm:$0xff] %v8152_v36  ;;  %v391_v12 = vld [vmem:[%s11796_s3 + $0x1b0] sm:$0xff]  ;;  %v398_v38 = vld [vmem:[%s11796_s3 + $0x1e8] sm:$0xff] }
  0x2b   :  { %5840 = vmatprep.subr.bf16.mxu0 %v7991_v28  ;;  %12007 = vst [vmem:[#allocation15_spill] sm:$0xff] %v8163_v3 }
  0x2c   :  { %5870 = vmatpush1.bf16.msra.mxu1 %v8022_v50 }
  0x2d   :  { %5872 = vmatprep.subr.bf16.mxu1 %v8037_v59 }
  0x2e   :  { %5842 = vmatpush1.bf16.msra.mxu0 %v8019_v49 }
  0x2f   :  { %5844 = vmatprep.subr.bf16.mxu0 %v8028_v54 }
  0x30   :  { %5874 = vmatpush1.bf16.msra.mxu1 %v8059_v16 }
  0x31   :  { %5876 = vmatprep.subr.bf16.mxu1 %v8071_v32 }
  0x32   :  { %5846 = vmatpush1.bf16.msra.mxu0 %v8056_v13 }
  0x33   :  { %5848 = vmatprep.subr.bf16.mxu0 %v8062_v19 }
  0x34   :  { %5878 = vmatpush1.bf16.msra.mxu1 %v8089_v53 }
  0x35   :  { %5880 = vmatprep.subr.bf16.mxu1 %v8093_v56 }
  0x36   :  { %5850 = vmatpush1.bf16.msra.mxu0 %v8086_v44 }
  0x37   :  { %5852 = vmatprep.subr.bf16.mxu0 %v8116_v23 }
  0x38   :  { %5882 = vmatpush1.bf16.msra.mxu1 %v8103_v2 }
  0x39   :  { %5884 = vmatprep.subr.bf16.mxu1 %v8127_v39 }
  0x3a   :  { %5854 = vmatpush1.bf16.msra.mxu0 %v8129_v40  ;;  %v8165_v40 = vpack.c.bf16 %v389_v63, %v385_v57  ;;  %v396_v57 = vld [vmem:[%s11796_s3 + $0x1d8] sm:$0xff]  ;;  %v8188_v63 = vpack.c.bf16 %v398_v38, %v394_v29  ;;  %v395_v29 = vld [vmem:[%s11796_s3 + $0x1d0] sm:$0xff] }
  0x3b   :  { %5856 = vmatprep.subr.bf16.mxu0 %v8152_v36  ;;  %v399_v38 = vld [vmem:[%s11796_s3 + $0x1f0] sm:$0xff] }
  0x3c   :  { %5886 = vmatpush1.bf16.msra.mxu1 %v8138_v5  ;;  %12008 = vst [vmem:[#allocation16_spill] sm:$0xff] %v8165_v40  ;;  %v8174_v5 = vpack.c.bf16 %v391_v12, %v387_v11  ;;  %12010 = vst [vmem:[#allocation18_spill] sm:$0xff] %v8188_v63  ;;  %v400_v11 = vld [vmem:[%s11796_s3 + $0x1f8] sm:$0xff]  ;;  %v393_v12 = vld [vmem:[%s11796_s3 + $0x1c0] sm:$0xff] }
  0x3d   :  { %5888 = vmatprep.subr.bf16.mxu1 %v8163_v3  ;;  %v8199_v3 = vpack.c.bf16 %v400_v11, %v396_v57  ;;  %v278_v57 = vld [vmem:[%s11797_s2 + $0x28] sm:$0xff]  ;;  %v276_v11 = vld [vmem:[%s11797_s2 + $0x18] sm:$0xff] }
  0x3e   :  { %12009 = vst [vmem:[#allocation17_spill] sm:$0xff] %v8174_v5  ;;  %5858 = vmatpush1.bf16.msra.mxu0 %v8165_v40  ;;  %v397_v40 = vld [vmem:[%s11796_s3 + $0x1e0] sm:$0xff] }
  0x3f   :  { %12011 = vst [vmem:[#allocation19_spill] sm:$0xff] %v8199_v3  ;;  %v8201_v36 = vpack.c.bf16 %v397_v40, %v393_v12  ;;  %5860 = vmatprep.subr.bf16.mxu0 %v8188_v63  ;;  %v274_v40 = vld [vmem:[%s11797_s2 + $0x8] sm:$0xff] }
  0x40   :  { %5890 = vmatpush1.bf16.msra.mxu1 %v8174_v5  ;;  %v8210_v5 = vpack.c.bf16 %v399_v38, %v395_v29  ;;  %v8224_v12 = vpack.c.bf16 %v278_v57, %v274_v40  ;;  %v280_v29 = vld [vmem:[%s11797_s2 + $0x38] sm:$0xff]  ;;  %v273_v38 = vld [vmem:[%s11797_s2] sm:$0xff]  ;;  %v275_v40 = vld [vmem:[%s11797_s2 + $0x10] sm:$0xff] }
  0x41   :  { %12012 = vst [vmem:[#allocation20_spill] sm:$0xff] %v8201_v36  ;;  %5892 = vmatprep.subr.bf16.mxu1 %v8199_v3  ;;  %v8235_v3 = vpack.c.bf16 %v280_v29, %v276_v11  ;;  %v279_v57 = vld [vmem:[%s11797_s2 + $0x30] sm:$0xff]  ;;  %v286_v11 = vld [vmem:[%s11797_s2 + $0x68] sm:$0xff]  ;;  %v284_v29 = vld [vmem:[%s11797_s2 + $0x58] sm:$0xff] }
  0x42   :  { %12013 = vst [vmem:[#allocation21_spill] sm:$0xff] %v8210_v5  ;;  %5862 = vmatpush1.bf16.msra.mxu0 %v8201_v36  ;;  %12014 = vst [vmem:[#allocation22_spill] sm:$0xff] %v8224_v12  ;;  %v277_v36 = vld [vmem:[%s11797_s2 + $0x20] sm:$0xff]  ;;  %v8247_v39 = vpack.c.bf16 %v279_v57, %v275_v40 }
  0x43   :  { %12015 = vst [vmem:[#allocation23_spill] sm:$0xff] %v8235_v3  ;;  %v8237_v63 = vpack.c.bf16 %v277_v36, %v273_v38  ;;  %5896 = vmatprep.subr.bf16.mxu0 %v8224_v12  ;;  %v282_v36 = vld [vmem:[%s11797_s2 + $0x48] sm:$0xff]  ;;  %v288_v38 = vld [vmem:[%s11797_s2 + $0x78] sm:$0xff] }
  0x44   :  { %5894 = vmatpush1.bf16.msra.mxu1 %v8210_v5  ;;  %v12017_v5 = vmov 0.0   ;;  %12018 = vst [vmem:[#allocation25_spill] sm:$0xff] %v8247_v39  ;;  %v8265_v40 = vpack.c.bf16 %v286_v11, %v282_v36  ;;  %v8267_v57 = vpack.c.bf16 %v288_v38, %v284_v29  ;;  %v287_v11 = vld [vmem:[%s11797_s2 + $0x70] sm:$0xff]  ;;  %v290_v38 = vld [vmem:[%s11797_s2 + $0x88] sm:$0xff] }
  0x45   :  { %12016 = vst [vmem:[#allocation24_spill] sm:$0xff] %v8237_v63  ;;  %466 = vmatmul.mubr.f32.vlgmr.msra.gmra.mrb[2].mxu0 %v12017_v5  ;;  %5928 = vmatprep.subr.bf16.mxu1 %v8235_v3  ;;  %v283_v3 = vld [vmem:[%s11797_s2 + $0x50] sm:$0xff]  ;;  %v294_v12 = vld [vmem:[%s11797_s2 + $0xa8] sm:$0xff] }
  0x46   :  { %5898 = vmatpush1.bf16.msra.mxu0 %v8237_v63  ;;  %12019 = vst [vmem:[#allocation26_spill] sm:$0xff] %v8265_v40  ;;  %12020 = vst [vmem:[#allocation27_spill] sm:$0xff] %v8267_v57  ;;  %v285_v63 = vld [vmem:[%s11797_s2 + $0x60] sm:$0xff]  ;;  %607 = vmatprep.mubr.f32.mxu0 %v12017_v5  ;;  %v8287_v29 = vpack.c.bf16 %v287_v11, %v283_v3  ;;  %v296_v3 = vld [vmem:[%s11797_s2 + $0xb8] sm:$0xff] }
  0x47   :  { %537 = vmatmul.mubr.f32.vlgmr.msra.gmra.mrb[2].mxu1 %v12017_v5  ;;  %5900 = vmatprep.subr.bf16.mxu0 %v8265_v40  ;;  %v289_v11 = vld [vmem:[%s11797_s2 + $0x80] sm:$0xff] }
  0x48   :  { %5930 = vmatpush1.bf16.msra.mxu1 %v8247_v39  ;;  %v281_v39 = vld [vmem:[%s11797_s2 + $0x40] sm:$0xff]  ;;  %678 = vmatprep.mubr.f32.mxu1 %v12017_v5  ;;  %12022 = vst [vmem:[#allocation29_spill] sm:$0xff] %v8287_v29 }
  0x49   :  { %v8280_v36 = vpack.c.bf16 %v285_v63, %v281_v39  ;;  %5932 = vmatprep.subr.bf16.mxu1 %v8267_v57  ;;  %v292_v39 = vld [vmem:[%s11797_s2 + $0x98] sm:$0xff]  ;;  %v8299_v63 = vpack.c.bf16 %v294_v12, %v290_v38  ;;  %v293_v57 = vld [vmem:[%s11797_s2 + $0xa0] sm:$0xff]  ;;  %v291_v12 = vld [vmem:[%s11797_s2 + $0x90] sm:$0xff] }
  0x4a   :  { %v8311_v40 = vpack.c.bf16 %v296_v3, %v292_v39  ;;  %v8313_v23 = vpack.c.bf16 %v293_v57, %v289_v11  ;;  %v295_v38 = vld [vmem:[%s11797_s2 + $0xb0] sm:$0xff]  ;;  %v298_v39 = vld [vmem:[%s11797_s2 + $0xc8] sm:$0xff]  ;;  %v300_v3 = vld [vmem:[%s11797_s2 + $0xd8] sm:$0xff] }
  0x4b   :  { %12021 = vst [vmem:[#allocation28_spill] sm:$0xff] %v8280_v36  ;;  %5902 = vmatpush1.bf16.msra.mxu0 %v8280_v36  ;;  %12023 = vst [vmem:[#allocation30_spill] sm:$0xff] %v8299_v63  ;;  %v8322_v36 = vpack.c.bf16 %v295_v38, %v291_v12  ;;  %v302_v57 = vld [vmem:[%s11797_s2 + $0xe8] sm:$0xff]  ;;  %v304_v12 = vld [vmem:[%s11797_s2 + $0xf8] sm:$0xff] }
  0x4c   :  { %5934 = vmatpush1.bf16.msra.mxu1 %v8287_v29  ;;  %12024 = vst [vmem:[#allocation31_spill] sm:$0xff] %v8311_v40  ;;  %12025 = vst [vmem:[#allocation32_spill] sm:$0xff] %v8313_v23  ;;  %5904 = vmatprep.subr.bf16.mxu0 %v8299_v63  ;;  %v8335_v11 = vpack.c.bf16 %v302_v57, %v298_v39  ;;  %v297_v38 = vld [vmem:[%s11797_s2 + $0xc0] sm:$0xff]  ;;  %v8347_v63 = vpack.c.bf16 %v304_v12, %v300_v3  ;;  %v299_v39 = vld [vmem:[%s11797_s2 + $0xd0] sm:$0xff] }
  0x4d   :  { %12026 = vst [vmem:[#allocation33_spill] sm:$0xff] %v8322_v36  ;;  %5936 = vmatprep.subr.bf16.mxu1 %v8311_v40  ;;  %v301_v40 = vld [vmem:[%s11797_s2 + $0xe0] sm:$0xff]  ;;  %v303_v57 = vld [vmem:[%s11797_s2 + $0xf0] sm:$0xff]  ;;  %v306_v3 = vld [vmem:[%s11797_s2 + $0x108] sm:$0xff] }
  0x4e   :  { %12027 = vst [vmem:[#allocation34_spill] sm:$0xff] %v8335_v11  ;;  %12028 = vst [vmem:[#allocation35_spill] sm:$0xff] %v8347_v63  ;;  %v8349_v29 = vpack.c.bf16 %v301_v40, %v297_v38  ;;  %v310_v40 = vld [vmem:[%s11797_s2 + $0x128] sm:$0xff]  ;;  %v308_v12 = vld [vmem:[%s11797_s2 + $0x118] sm:$0xff] }
  0x4f   :  { %5906 = vmatpush1.bf16.msra.mxu0 %v8313_v23  ;;  %v8358_v23 = vpack.c.bf16 %v303_v57, %v299_v39  ;;  %v8371_v38 = vpack.c.bf16 %v310_v40, %v306_v3  ;;  %v312_v39 = vld [vmem:[%s11797_s2 + $0x138] sm:$0xff]  ;;  %v305_v57 = vld [vmem:[%s11797_s2 + $0x100] sm:$0xff]  ;;  %v307_v3 = vld [vmem:[%s11797_s2 + $0x110] sm:$0xff] }
  0x50   :  { %5938 = vmatpush1.bf16.msra.mxu1 %v8322_v36  ;;  %12029 = vst [vmem:[#allocation36_spill] sm:$0xff] %v8349_v29  ;;  %5908 = vmatprep.subr.bf16.mxu0 %v8335_v11  ;;  %v8383_v11 = vpack.c.bf16 %v312_v39, %v308_v12  ;;  %v311_v40 = vld [vmem:[%s11797_s2 + $0x130] sm:$0xff]  ;;  %v314_v12 = vld [vmem:[%s11797_s2 + $0x148] sm:$0xff]  ;;  %v316_v39 = vld [vmem:[%s11797_s2 + $0x158] sm:$0xff] }
  0x51   :  { %12030 = vst [vmem:[#allocation37_spill] sm:$0xff] %v8358_v23  ;;  %5940 = vmatprep.subr.bf16.mxu1 %v8347_v63  ;;  %12031 = vst [vmem:[#allocation38_spill] sm:$0xff] %v8371_v38  ;;  %v309_v63 = vld [vmem:[%s11797_s2 + $0x120] sm:$0xff] }
  0x52   :  { %12032 = vst [vmem:[#allocation39_spill] sm:$0xff] %v8383_v11  ;;  %v8385_v36 = vpack.c.bf16 %v309_v63, %v305_v57  ;;  %v318_v63 = vld [vmem:[%s11797_s2 + $0x168] sm:$0xff] }
  0x53   :  { %5910 = vmatpush1.bf16.msra.mxu0 %v8349_v29  ;;  %v8394_v29 = vpack.c.bf16 %v311_v40, %v307_v3  ;;  %v8407_v57 = vpack.c.bf16 %v318_v63, %v314_v12  ;;  %v320_v3 = vld [vmem:[%s11797_s2 + $0x178] sm:$0xff]  ;;  %v313_v40 = vld [vmem:[%s11797_s2 + $0x140] sm:$0xff]  ;;  %v315_v12 = vld [vmem:[%s11797_s2 + $0x150] sm:$0xff] }
  0x54   :  { %5942 = vmatpush1.bf16.msra.mxu1 %v8358_v23  ;;  %12033 = vst [vmem:[#allocation40_spill] sm:$0xff] %v8385_v36  ;;  %5912 = vmatprep.subr.bf16.mxu0 %v8371_v38  ;;  %v8419_v38 = vpack.c.bf16 %v320_v3, %v316_v39  ;;  %v319_v63 = vld [vmem:[%s11797_s2 + $0x170] sm:$0xff]  ;;  %v324_v39 = vld [vmem:[%s11797_s2 + $0x198] sm:$0xff] }
  0x55   :  { %12034 = vst [vmem:[#allocation41_spill] sm:$0xff] %v8394_v29  ;;  %5944 = vmatprep.subr.bf16.mxu1 %v8383_v11  ;;  %12035 = vst [vmem:[#allocation42_spill] sm:$0xff] %v8407_v57  ;;  %v317_v11 = vld [vmem:[%s11797_s2 + $0x160] sm:$0xff] }
  0x56   :  { %12036 = vst [vmem:[#allocation43_spill] sm:$0xff] %v8419_v38  ;;  %v8421_v23 = vpack.c.bf16 %v317_v11, %v313_v40  ;;  %v326_v11 = vld [vmem:[%s11797_s2 + $0x1a8] sm:$0xff]  ;;  %v328_v40 = vld [vmem:[%s11797_s2 + $0x1b8] sm:$0xff] }
  0x57   :  { %5914 = vmatpush1.bf16.msra.mxu0 %v8385_v36  ;;  %v8430_v36 = vpack.c.bf16 %v319_v63, %v315_v12  ;;  %v321_v12 = vld [vmem:[%s11797_s2 + $0x180] sm:$0xff] }
  0x58   :  { %5946 = vmatpush1.bf16.msra.mxu1 %v8394_v29  ;;  %12037 = vst [vmem:[#allocation44_spill] sm:$0xff] %v8421_v23  ;;  %5916 = vmatprep.subr.bf16.mxu0 %v8407_v57  ;;  %v322_v29 = vld [vmem:[%s11797_s2 + $0x188] sm:$0xff]  ;;  %v325_v63 = vld [vmem:[%s11797_s2 + $0x1a0] sm:$0xff]  ;;  %v8454_v57 = vpack.c.bf16 %v328_v40, %v324_v39 }
  0x59   :  { %12038 = vst [vmem:[#allocation45_spill] sm:$0xff] %v8430_v36  ;;  %5948 = vmatprep.subr.bf16.mxu1 %v8419_v38  ;;  %v8442_v3 = vpack.c.bf16 %v326_v11, %v322_v29  ;;  %v8456_v2 = vpack.c.bf16 %v325_v63, %v321_v12  ;;  %v323_v29 = vld [vmem:[%s11797_s2 + $0x190] sm:$0xff]  ;;  %v330_v38 = vld [vmem:[%s11797_s2 + $0x1c8] sm:$0xff]  ;;  %v332_v12 = vld [vmem:[%s11797_s2 + $0x1d8] sm:$0xff] }
  0x5a   :  { %12040 = vst [vmem:[#allocation47_spill] sm:$0xff] %v8454_v57  ;;  %v327_v11 = vld [vmem:[%s11797_s2 + $0x1b0] sm:$0xff]  ;;  %v334_v40 = vld [vmem:[%s11797_s2 + $0x1e8] sm:$0xff]  ;;  %v336_v63 = vld [vmem:[%s11797_s2 + $0x1f8] sm:$0xff] }
  0x5b   :  { %12039 = vst [vmem:[#allocation46_spill] sm:$0xff] %v8442_v3  ;;  %5918 = vmatpush1.bf16.msra.mxu0 %v8421_v23  ;;  %12041 = vst [vmem:[#allocation48_spill] sm:$0xff] %v8456_v2  ;;  %v8469_v39 = vpack.c.bf16 %v327_v11, %v323_v29  ;;  %v8481_v23 = vpack.c.bf16 %v334_v40, %v330_v38  ;;  %v329_v29 = vld [vmem:[%s11797_s2 + $0x1c0] sm:$0xff] }
  0x5c   :  { %5950 = vmatpush1.bf16.msra.mxu1 %v8430_v36  ;;  %5920 = vmatprep.subr.bf16.mxu0 %v8442_v3  ;;  %v8483_v36 = vpack.c.bf16 %v336_v63, %v332_v12  ;;  %v333_v11 = vld [vmem:[%s11797_s2 + $0x1e0] sm:$0xff]  ;;  %v331_v3 = vld [vmem:[%s11797_s2 + $0x1d0] sm:$0xff]  ;;  %v36_v63 = vld [vmem:[%s11798_s0 + $0x8] sm:$0xff] }
  0x5d   :  { %12042 = vst [vmem:[#allocation49_spill] sm:$0xff] %v8469_v39  ;;  %5952 = vmatprep.subr.bf16.mxu1 %v8454_v57  ;;  %12043 = vst [vmem:[#allocation50_spill] sm:$0xff] %v8481_v23  ;;  %v335_v57 = vld [vmem:[%s11797_s2 + $0x1f0] sm:$0xff]  ;;  %v8498_v38 = vpack.c.bf16 %v333_v11, %v329_v29  ;;  %v35_v12 = vld [vmem:[%s11798_s0] sm:$0xff] }
  0x5e   :  { %12044 = vst [vmem:[#allocation51_spill] sm:$0xff] %v8483_v36  ;;  %v8502_v40 = vpack.c.bf16 %v335_v57, %v331_v3 }
  0x5f   :  { %5922 = vmatpush1.bf16.msra.mxu0 %v8456_v2  ;;  %12045 = vst [vmem:[#allocation52_spill] sm:$0xff] %v8498_v38 }
  0x60   :  { %5954 = vmatpush1.bf16.msra.mxu1 %v8469_v39  ;;  %5924 = vmatprep.subr.bf16.mxu0 %v8481_v23  ;;  %12046 = vst [vmem:[#allocation53_spill] sm:$0xff] %v8502_v40  ;;  %v37_v39 = vld [vmem:[%s11798_s0 + $0x10] sm:$0xff] }
  0x61   :  { %5956 = vmatprep.subr.bf16.mxu1 %v8483_v36 }
  0x63   :  { %5926 = vmatpush1.bf16.msra.mxu0 %v8498_v38 }
  0x64   :  { %5958 = vmatpush1.bf16.msra.mxu1 %v8502_v40  ;;  %5960 = vmatprep.subr.bf16.mxu0 %v7644_v4  ;;  %v38_v4 = vld [vmem:[%s11798_s0 + $0x18] sm:$0xff] }
  0x65   :  { %5992 = vmatprep.subr.bf16.mxu1 %v7696_v22 }
  0xf8   :  { %v169_v57 = vpop.f32.mrb[0].mxu0 }
  0xf9   :  { %v245_v3 = vadd.f32 %v169_v57, %v35_v12  ;;  %v171_v29 = vpop.f32.mrb[1].mxu0 }
  0xfa   :  { %v246_v11 = vadd.f32 %v171_v29, %v36_v63  ;;  %v240_v22 = vpop.f32.mrb[0].mxu1 }
  0xfb   :  { %v5682_v36 = vmul.f32 -1.442695, %v245_v3  ;;  %v242_v40 = vpop.f32.mrb[1].mxu1  ;;  %v247_v44 = vadd.f32 %v240_v22, %v37_v39 }
  0xfc   :  { %v5683_v38 = vmul.f32 -1.442695, %v246_v11  ;;  %v248_v23 = vadd.f32 %v242_v40, %v38_v4 }
  0xfd   :  { %7336 = vpow2.f32 %v5682_v36 }
  0xfe   :  { %7338 = vpow2.f32 %v5683_v38  ;;  %v5684_v2 = vmul.f32 -1.442695, %v248_v23 }
 0x100   :  { %7340 = vpow2.f32 %v5684_v2 }
 0x101   :  { %7342 = vtanh.f32 %v247_v44 }
 0x107   :  { %v7337_v12 = vpop.eup %7336 }
 0x108   :  { %v7339_v63 = vpop.eup %7338  ;;  %v252_v57 = vadd.f32 1.0, %v7337_v12 }
 0x109   :  { %v258_v3 = vadd.f32 1.0, %v7339_v63 }
 0x10a   :  { %7344 = vrcp.f32 %v252_v57  ;;  %v7341_v29 = vpop.eup %7340  ;;  %v5688_v57 = vld [vmem:[%s11798_s0 + $0x20] sm:$0xff] }
 0x10b   :  { %7346 = vrcp.f32 %v258_v3  ;;  %v7343_v36 = vpop.eup %7342  ;;  %v265_v38 = vadd.f32 1.0, %v7341_v29  ;;  %v5689_v3 = vld [vmem:[%s11798_s0 + $0x28] sm:$0xff] }
 0x10d   :  { %7348 = vrcp.f32 %v265_v38 }
 0x114   :  { %v7345_v11 = vpop.eup %7344 }
 0x115   :  { %v7347_v56 = vpop.eup %7346  ;;  %v269_v40 = vmul.f32 %v7345_v11, %v7343_v36 }
 0x116   :  { %v268_v4 = vmul.f32 0.0, %v7347_v56 }
 0x117   :  { %v7349_v23 = vpop.eup %7348 }
 0x118   :  { %v8521_v19 = vadd.f32 %v269_v40, %v268_v4 }
 0x11a   :  { %7350 = vtanh.f32 %v8521_v19 }
 0x124   :  { %v7351_v2 = vpop.eup %7350 }
 0x125   :  { %v272_v39 = vmul.f32 %v7351_v2, %v7349_v23 }
 0x127   :  { %608 = vmatmul.mubr.f32.vlgmr.msra.gmra.mrb[2].mxu0 %v272_v39  ;;  %679 = vmatmul.mubr.f32.vlgmr.msra.gmra.mrb[2].mxu1 %v272_v39 }
 0x128   :  { %5962 = vmatpush1.bf16.msra.mxu0 %v7655_v8  ;;  %5994 = vmatpush1.bf16.msra.mxu1 %v7704_v25  ;;  %v12047_v8 = vld [vmem:[#allocation6_spill] sm:$0xff] }
 0x129   :  { %5964 = vmatprep.subr.bf16.mxu0 %v7657_v9  ;;  %5996 = vmatprep.subr.bf16.mxu1 %v7729_v33  ;;  %v12048_v9 = vld [vmem:[#allocation8_spill] sm:$0xff]  ;;  %v12051_v25 = vld [vmem:[#allocation10_spill] sm:$0xff]  ;;  %v12054_v33 = vld [vmem:[#allocation13_spill] sm:$0xff] }
 0x12a   :  { %869 = vmatprep.mubr.f32.mxu0 %v12017_v5  ;;  %940 = vmatprep.mubr.f32.mxu1 %v12017_v5 }
 0x12c   :  { %5966 = vmatpush1.bf16.msra.mxu0 %v7673_v14  ;;  %5998 = vmatpush1.bf16.msra.mxu1 %v7740_v37  ;;  %v12049_v14 = vld [vmem:[#allocation7_spill] sm:$0xff]  ;;  %v12055_v37 = vld [vmem:[#allocation14_spill] sm:$0xff] }
 0x12d   :  { %5968 = vmatprep.subr.bf16.mxu0 %v7682_v17  ;;  %6000 = vmatprep.subr.bf16.mxu1 %v7764_v45  ;;  %v12050_v17 = vld [vmem:[#allocation9_spill] sm:$0xff]  ;;  %v12057_v45 = vld [vmem:[#allocation16_spill] sm:$0xff] }
 0x130   :  { %5970 = vmatpush1.bf16.msra.mxu0 %v7707_v26  ;;  %6002 = vmatpush1.bf16.msra.mxu1 %v7773_v48  ;;  %v12052_v26 = vld [vmem:[#allocation11_spill] sm:$0xff]  ;;  %v12059_v48 = vld [vmem:[#allocation18_spill] sm:$0xff] }
 0x131   :  { %5972 = vmatprep.subr.bf16.mxu0 %v7720_v30  ;;  %6004 = vmatprep.subr.bf16.mxu1 %v7785_v52  ;;  %v12053_v30 = vld [vmem:[#allocation12_spill] sm:$0xff]  ;;  %v12060_v52 = vld [vmem:[#allocation19_spill] sm:$0xff] }
 0x134   :  { %5974 = vmatpush1.bf16.msra.mxu0 %v7756_v42  ;;  %6006 = vmatpush1.bf16.msra.mxu1 %v7815_v62  ;;  %v12056_v42 = vld [vmem:[#allocation15_spill] sm:$0xff]  ;;  %v12063_v62 = vld [vmem:[#allocation22_spill] sm:$0xff] }
 0x135   :  { %5976 = vmatprep.subr.bf16.mxu0 %v7767_v46  ;;  %6008 = vmatprep.subr.bf16.mxu1 %v7821_v0  ;;  %v12058_v46 = vld [vmem:[#allocation17_spill] sm:$0xff]  ;;  %v12064_v0 = vld [vmem:[#allocation23_spill] sm:$0xff] }
 0x138   :  { %5978 = vmatpush1.bf16.msra.mxu0 %v7794_v55  ;;  %6010 = vmatpush1.bf16.msra.mxu1 %v7851_v15  ;;  %v12061_v55 = vld [vmem:[#allocation20_spill] sm:$0xff] }
 0x139   :  { %5980 = vmatprep.subr.bf16.mxu0 %v7803_v58  ;;  %6012 = vmatprep.subr.bf16.mxu1 %v7857_v18  ;;  %v12062_v58 = vld [vmem:[#allocation21_spill] sm:$0xff]  ;;  %v685_v18 = vld [vmem:[%s11799_s4] sm:$0xf] }
 0x13c   :  { %5982 = vmatpush1.bf16.msra.mxu0 %v7836_v7  ;;  %6014 = vmatpush1.bf16.msra.mxu1 %v7884_v31  ;;  %v687_v7 = vlaneseq }
 0x13d   :  { %5984 = vmatprep.subr.bf16.mxu0 %v7839_v10  ;;  %6016 = vmatprep.subr.bf16.mxu1 %v7890_v34 }
 0x13e   :  { %v688_v10 = vshrl.u32 %v687_v7, 7  ;;  %v12075_v7 = vld [vmem:[#allocation30_spill] sm:$0xff] }
 0x140   :  { %5986 = vmatpush1.bf16.msra.mxu0 %v7872_v24  ;;  %6018 = vmatpush1.bf16.msra.mxu1 %v7912_v43  ;;  %v8592_v15 = vsub.s32 0, %v688_v10  ;;  %v8597_v24 = vsub.s32 1, %v688_v10  ;;  %v8601_v43 = vsub.s32 3, %v688_v10 }
 0x141   :  { %5988 = vmatprep.subr.bf16.mxu0 %v7875_v27  ;;  %6020 = vmatprep.subr.bf16.mxu1 %v7926_v51 }
 0x142   :  { %12065 = vst [vmem:[#allocation6_spill] sm:$0xff] %v8592_v15  ;;  %12066 = vst [vmem:[#allocation8_spill] sm:$0xff] %v8597_v24  ;;  %v690_v27 = vrot.slane %v685_v18, %v8592_v15  ;;  %v694_v31 = vrot.slane %v685_v18, %v8597_v24 }
 0x143   :  { %12067 = vst [vmem:[#allocation7_spill] sm:$0xff] %v8601_v43 }
 0x144   :  { %5990 = vmatpush1.bf16.msra.mxu0 %v7908_v41  ;;  %6022 = vmatpush1.bf16.msra.mxu1 %v7947_v61 }
 0x145   :  { %6024 = vmatprep.subr.bf16.mxu0 %v7917_v47  ;;  %6056 = vmatprep.subr.bf16.mxu1 %v7962_v6 }
 0x147   :  { %870 = vmatmul.mubr.f32.vlgmr.msra.gmra.mrb[4].mxu0 %v272_v39  ;;  %941 = vmatmul.mubr.f32.vlgmr.msra.gmra.mrb[4].mxu1 %v272_v39 }
 0x148   :  { %6026 = vmatpush1.bf16.msra.mxu0 %v7944_v60  ;;  %6058 = vmatpush1.bf16.msra.mxu1 %v7985_v21  ;;  %v8604_v21 = vsub.s32 2, %v688_v10  ;;  %v12076_v10 = vld [vmem:[#allocation31_spill] sm:$0xff] }
 0x149   :  { %6028 = vmatprep.subr.bf16.mxu0 %v7953_v1  ;;  %6060 = vmatprep.subr.bf16.mxu1 %v8000_v35 }
 0x14a   :  { %1167 = vmatprep.mubr.f32.mxu0 %v12017_v5  ;;  %1238 = vmatprep.mubr.f32.mxu1 %v12017_v5  ;;  %12068 = vst [vmem:[#allocation9_spill] sm:$0xff] %v8604_v21  ;;  %v698_v35 = vrot.slane %v685_v18, %v8604_v21 }
 0x14c   :  { %6030 = vmatpush1.bf16.msra.mxu0 %v7981_v20  ;;  %6062 = vmatpush1.bf16.msra.mxu1 %v8022_v50  ;;  %v702_v20 = vrot.slane %v685_v18, %v8601_v43  ;;  %v12077_v18 = vld [vmem:[#allocation32_spill] sm:$0xff] }
 0x14d   :  { %6032 = vmatprep.subr.bf16.mxu0 %v7991_v28  ;;  %6064 = vmatprep.subr.bf16.mxu1 %v8037_v59 }
 0x150   :  { %6034 = vmatpush1.bf16.msra.mxu0 %v8019_v49  ;;  %6066 = vmatpush1.bf16.msra.mxu1 %v8059_v16 }
 0x151   :  { %6036 = vmatprep.subr.bf16.mxu0 %v8028_v54  ;;  %6068 = vmatprep.subr.bf16.mxu1 %v8071_v32 }
 0x154   :  { %6038 = vmatpush1.bf16.msra.mxu0 %v8056_v13  ;;  %6070 = vmatpush1.bf16.msra.mxu1 %v8089_v53 }
 0x155   :  { %6040 = vmatprep.subr.bf16.mxu0 %v12047_v8  ;;  %6072 = vmatprep.subr.bf16.mxu1 %v12048_v9  ;;  %v5691_v8 = vld [vmem:[%s11798_s0 + $0x38] sm:$0xff] }
 0x158   :  { %6042 = vmatpush1.bf16.msra.mxu0 %v12049_v14  ;;  %6074 = vmatpush1.bf16.msra.mxu1 %v12050_v17  ;;  %v5690_v14 = vld [vmem:[%s11798_s0 + $0x30] sm:$0xff] }
 0x159   :  { %6044 = vmatprep.subr.bf16.mxu0 %v12051_v25  ;;  %6076 = vmatprep.subr.bf16.mxu1 %v12052_v26 }
 0x15c   :  { %6046 = vmatpush1.bf16.msra.mxu0 %v12053_v30  ;;  %6078 = vmatpush1.bf16.msra.mxu1 %v12054_v33 }
 0x15d   :  { %6048 = vmatprep.subr.bf16.mxu0 %v12055_v37  ;;  %6080 = vmatprep.subr.bf16.mxu1 %v12056_v42 }
 0x160   :  { %6050 = vmatpush1.bf16.msra.mxu0 %v12057_v45  ;;  %6082 = vmatpush1.bf16.msra.mxu1 %v12058_v46  ;;  %v12069_v46 = vld [vmem:[#allocation24_spill] sm:$0xff] }
 0x161   :  { %6052 = vmatprep.subr.bf16.mxu0 %v12059_v48  ;;  %6084 = vmatprep.subr.bf16.mxu1 %v12060_v52  ;;  %v12070_v48 = vld [vmem:[#allocation25_spill] sm:$0xff] }
 0x164   :  { %6054 = vmatpush1.bf16.msra.mxu0 %v12061_v55  ;;  %6086 = vmatpush1.bf16.msra.mxu1 %v12062_v58  ;;  %v12071_v55 = vld [vmem:[#allocation26_spill] sm:$0xff]  ;;  %v12072_v58 = vld [vmem:[#allocation27_spill] sm:$0xff] }
 0x165   :  { %6088 = vmatprep.subr.bf16.mxu0 %v12063_v62  ;;  %6120 = vmatprep.subr.bf16.mxu1 %v12064_v0  ;;  %v12073_v62 = vld [vmem:[#allocation28_spill] sm:$0xff]  ;;  %v12074_v0 = vld [vmem:[#allocation29_spill] sm:$0xff] }
 0x1fa   :  { %v609_v34 = vpop.f32.mrb[2].mxu0  ;;  %v680_v41 = vpop.f32.mrb[2].mxu1 }
 0x1fb   :  { %v707_v47 = vadd.f32 %v690_v27, %v609_v34  ;;  %v611_v51 = vpop.f32.mrb[3].mxu0  ;;  %v682_v60 = vpop.f32.mrb[3].mxu1  ;;  %v709_v50 = vadd.f32 %v698_v35, %v680_v41  ;;  %v12078_v27 = vld [vmem:[#allocation33_spill] sm:$0xff]  ;;  %v12080_v34 = vld [vmem:[#allocation35_spill] sm:$0xff] }
 0x1fc   :  { %v708_v61 = vadd.f32 %v694_v31, %v611_v51  ;;  %v710_v28 = vadd.f32 %v702_v20, %v682_v60  ;;  %v12079_v31 = vld [vmem:[#allocation34_spill] sm:$0xff]  ;;  %v12081_v60 = vld [vmem:[#allocation36_spill] sm:$0xff]  ;;  %v12084_v35 = vld [vmem:[#allocation39_spill] sm:$0xff] }
 0x1fd   :  { %v5685_v1 = vmul.f32 -1.442695, %v707_v47 }
 0x1fe   :  { %v5686_v6 = vmul.f32 -1.442695, %v708_v61  ;;  %v5687_v49 = vmul.f32 -1.442695, %v710_v28  ;;  %v12082_v61 = vld [vmem:[#allocation37_spill] sm:$0xff]  ;;  %v12083_v28 = vld [vmem:[#allocation38_spill] sm:$0xff] }
 0x1ff   :  { %7352 = vpow2.f32 %v5685_v1 }
 0x200   :  { %7354 = vpow2.f32 %v5686_v6 }
 0x201   :  { %7356 = vpow2.f32 %v5687_v49 }
 0x202   :  { %7358 = vtanh.f32 %v709_v50 }
 0x209   :  { %v7353_v54 = vpop.eup %7352 }
 0x20a   :  { %v7355_v59 = vpop.eup %7354  ;;  %v714_v13 = vadd.f32 1.0, %v7353_v54  ;;  %v12085_v54 = vld [vmem:[#allocation40_spill] sm:$0xff] }
 0x20b   :  { %v720_v16 = vadd.f32 1.0, %v7355_v59  ;;  %v7357_v32 = vpop.eup %7356  ;;  %v12086_v59 = vld [vmem:[#allocation41_spill] sm:$0xff] }
 0x20c   :  { %7360 = vrcp.f32 %v714_v13  ;;  %v7359_v44 = vpop.eup %7358  ;;  %v727_v12 = vadd.f32 1.0, %v7357_v32  ;;  %v12087_v13 = vld [vmem:[#allocation42_spill] sm:$0xff]  ;;  %v12089_v32 = vld [vmem:[#allocation44_spill] sm:$0xff] }
 0x20d   :  { %7362 = vrcp.f32 %v720_v16  ;;  %v12088_v16 = vld [vmem:[#allocation43_spill] sm:$0xff] }
 0x20e   :  { %7364 = vrcp.f32 %v727_v12  ;;  %v1447_v12 = vld [vmem:[%s11795_s1 + $0x18] sm:$0xff] }
 0x216   :  { %v7361_v53 = vpop.eup %7360 }
 0x217   :  { %v7363_v56 = vpop.eup %7362  ;;  %v731_v22 = vmul.f32 %v7361_v53, %v7359_v44  ;;  %v12090_v44 = vld [vmem:[#allocation45_spill] sm:$0xff]  ;;  %v12091_v53 = vld [vmem:[#allocation46_spill] sm:$0xff] }
 0x218   :  { %v730_v63 = vmul.f32 0.0, %v7363_v56  ;;  %v7365_v17 = vpop.eup %7364  ;;  %v1445_v56 = vld [vmem:[%s11795_s1 + $0x8] sm:$0xff] }
 0x21a   :  { %v8613_v29 = vadd.f32 %v731_v22, %v730_v63  ;;  %v871_v36 = vpop.f32.mrb[4].mxu0  ;;  %v942_v11 = vpop.f32.mrb[4].mxu1  ;;  %v1449_v22 = vld [vmem:[%s11795_s1 + $0x28] sm:$0xff]  ;;  %v1451_v63 = vld [vmem:[%s11795_s1 + $0x38] sm:$0xff] }
 0x21b   :  { %v947_v38 = vadd.f32 %v5688_v57, %v871_v36  ;;  %v873_v40 = vpop.f32.mrb[5].mxu0  ;;  %v944_v4 = vpop.f32.mrb[5].mxu1  ;;  %v949_v30 = vadd.f32 %v5690_v14, %v942_v11  ;;  %v12093_v57 = vld [vmem:[#allocation48_spill] sm:$0xff]  ;;  %v1444_v36 = vld [vmem:[%s11795_s1] sm:$0xff]  ;;  %v1455_v14 = vld [vmem:[%s11795_s1 + $0x58] sm:$0xff] }
 0x21c   :  { %7366 = vtanh.f32 %v8613_v29  ;;  %v948_v23 = vadd.f32 %v5689_v3, %v873_v40  ;;  %v950_v9 = vadd.f32 %v5691_v8, %v944_v4  ;;  %v12094_v3 = vld [vmem:[#allocation49_spill] sm:$0xff]  ;;  %v1448_v11 = vld [vmem:[%s11795_s1 + $0x20] sm:$0xff]  ;;  %v12096_v40 = vld [vmem:[#allocation51_spill] sm:$0xff]  ;;  %v8677_v4 = vpack.c.bf16 %v1449_v22, %v1445_v56 }
 0x21d   :  { %v5692_v2 = vmul.f32 -1.442695, %v947_v38  ;;  %v12095_v38 = vld [vmem:[#allocation50_spill] sm:$0xff]  ;;  %v1453_v8 = vld [vmem:[%s11795_s1 + $0x48] sm:$0xff]  ;;  %v1479_v56 = vld [vmem:[%s11795_s1 + $0x118] sm:$0xff] }
 0x21e   :  { %v5693_v39 = vmul.f32 -1.442695, %v948_v23  ;;  %v5694_v26 = vmul.f32 -1.442695, %v950_v9  ;;  %v8679_v23 = vpack.c.bf16 %v1451_v63, %v1447_v12  ;;  %v1457_v9 = vld [vmem:[%s11795_s1 + $0x68] sm:$0xff]  ;;  %v1483_v22 = vld [vmem:[%s11795_s1 + $0x138] sm:$0xff] }
 0x21f   :  { %7368 = vpow2.f32 %v5692_v2  ;;  %v1446_v2 = vld [vmem:[%s11795_s1 + $0x10] sm:$0xff] }
 0x220   :  { %7370 = vpow2.f32 %v5693_v39  ;;  %v1450_v39 = vld [vmem:[%s11795_s1 + $0x30] sm:$0xff] }
 0x221   :  { %7372 = vpow2.f32 %v5694_v26 }
 0x222   :  { %7374 = vtanh.f32 %v949_v30  ;;  %v12097_v30 = vld [vmem:[#allocation52_spill] sm:$0xff] }
 0x226   :  { %v7367_v25 = vpop.eup %7366 }
 0x227   :  { %v734_v33 = vmul.f32 %v7367_v25, %v7365_v17  ;;  %v1459_v17 = vld [vmem:[%s11795_s1 + $0x78] sm:$0xff] }
 0x229   :  { %v7369_v37 = vpop.eup %7368  ;;  %735 = vst [vmem:[%s11800_s5] sm:$0xff] %v734_v33  ;;  %1168 = vmatmul.mubr.f32.vlgmr.msra.gmra.mrb[6].mxu0 %v734_v33  ;;  %1239 = vmatmul.mubr.f32.vlgmr.msra.gmra.mrb[6].mxu1 %v734_v33  ;;  %v12098_v33 = vld [vmem:[#allocation53_spill] sm:$0xff] }
 0x22a   :  { %v7371_v42 = vpop.eup %7370  ;;  %v954_v45 = vadd.f32 1.0, %v7369_v37  ;;  %6090 = vmatpush1.bf16.msra.mxu0 %v12069_v46  ;;  %6122 = vmatpush1.bf16.msra.mxu1 %v12070_v48  ;;  %v8701_v37 = vpack.c.bf16 %v1448_v11, %v1444_v36  ;;  %v1456_v46 = vld [vmem:[%s11795_s1 + $0x60] sm:$0xff]  ;;  %v8829_v11 = vpack.c.bf16 %v1483_v22, %v1479_v56 }
 0x22b   :  { %v960_v52 = vadd.f32 1.0, %v7371_v42  ;;  %6092 = vmatprep.subr.bf16.mxu0 %v12071_v55  ;;  %6124 = vmatprep.subr.bf16.mxu1 %v12072_v58  ;;  %v7373_v41 = vpop.eup %7372  ;;  %v8703_v42 = vpack.c.bf16 %v1450_v39, %v1446_v2  ;;  %v8717_v55 = vpack.c.bf16 %v1459_v17, %v1455_v14  ;;  %v1454_v58 = vld [vmem:[%s11795_s1 + $0x50] sm:$0xff]  ;;  %v1485_v2 = vld [vmem:[%s11795_s1 + $0x148] sm:$0xff]  ;;  %v1504_v22 = vld [vmem:[%s11795_s1 + $0x1e0] sm:$0xff] }
 0x22c   :  { %7376 = vrcp.f32 %v954_v45  ;;  %1309 = vmatprep.mubr.f32.mxu0 %v12017_v5  ;;  %1380 = vmatprep.mubr.f32.mxu1 %v12017_v5  ;;  %v7375_v47 = vpop.eup %7374  ;;  %v967_v20 = vadd.f32 1.0, %v7373_v41  ;;  %v1452_v45 = vld [vmem:[%s11795_s1 + $0x40] sm:$0xff]  ;;  %v1489_v39 = vld [vmem:[%s11795_s1 + $0x168] sm:$0xff] }
 0x22d   :  { %7378 = vrcp.f32 %v960_v52  ;;  %v8715_v52 = vpack.c.bf16 %v1457_v9, %v1453_v8  ;;  %v1464_v41 = vld [vmem:[%s11795_s1 + $0xa0] sm:$0xff]  ;;  %v1487_v8 = vld [vmem:[%s11795_s1 + $0x158] sm:$0xff] }
 0x22e   :  { %6094 = vmatpush1.bf16.msra.mxu0 %v12073_v62  ;;  %6126 = vmatpush1.bf16.msra.mxu1 %v12074_v0  ;;  %7380 = vrcp.f32 %v967_v20  ;;  %v1458_v62 = vld [vmem:[%s11795_s1 + $0x70] sm:$0xff]  ;;  %v1461_v0 = vld [vmem:[%s11795_s1 + $0x88] sm:$0xff]  ;;  %v1471_v20 = vld [vmem:[%s11795_s1 + $0xd8] sm:$0xff] }
 0x22f   :  { %6096 = vmatprep.subr.bf16.mxu0 %v12075_v7  ;;  %6128 = vmatprep.subr.bf16.mxu1 %v12076_v10  ;;  %v1465_v7 = vld [vmem:[%s11795_s1 + $0xa8] sm:$0xff]  ;;  %v1463_v10 = vld [vmem:[%s11795_s1 + $0x98] sm:$0xff] }
 0x230   :  { %v1491_v9 = vld [vmem:[%s11795_s1 + $0x178] sm:$0xff] }
 0x232   :  { %6098 = vmatpush1.bf16.msra.mxu0 %v12077_v18  ;;  %6130 = vmatpush1.bf16.msra.mxu1 %v12078_v27  ;;  %v1467_v18 = vld [vmem:[%s11795_s1 + $0xb8] sm:$0xff]  ;;  %v8741_v27 = vpack.c.bf16 %v1456_v46, %v1452_v45  ;;  %v1486_v45 = vld [vmem:[%s11795_s1 + $0x150] sm:$0xff] }
 0x233   :  { %6100 = vmatprep.subr.bf16.mxu0 %v12079_v31  ;;  %6132 = vmatprep.subr.bf16.mxu1 %v12080_v34  ;;  %v8743_v31 = vpack.c.bf16 %v1458_v62, %v1454_v58  ;;  %v1460_v34 = vld [vmem:[%s11795_s1 + $0x80] sm:$0xff]  ;;  %v1490_v46 = vld [vmem:[%s11795_s1 + $0x170] sm:$0xff]  ;;  %v1493_v58 = vld [vmem:[%s11795_s1 + $0x188] sm:$0xff] }
 0x234   :  { %v1497_v62 = vld [vmem:[%s11795_s1 + $0x1a8] sm:$0xff] }
 0x236   :  { %v7377_v51 = vpop.eup %7376  ;;  %6102 = vmatpush1.bf16.msra.mxu0 %v12081_v60  ;;  %6134 = vmatpush1.bf16.msra.mxu1 %v12082_v61  ;;  %v1462_v60 = vld [vmem:[%s11795_s1 + $0x90] sm:$0xff] }
 0x237   :  { %v7379_v1 = vpop.eup %7378  ;;  %v971_v6 = vmul.f32 %v7377_v51, %v7375_v47  ;;  %6104 = vmatprep.subr.bf16.mxu0 %v12083_v28  ;;  %6136 = vmatprep.subr.bf16.mxu1 %v12084_v35  ;;  %v8753_v47 = vpack.c.bf16 %v1465_v7, %v1461_v0  ;;  %v8755_v51 = vpack.c.bf16 %v1467_v18, %v1463_v10  ;;  %v1466_v61 = vld [vmem:[%s11795_s1 + $0xb0] sm:$0xff]  ;;  %v1475_v28 = vld [vmem:[%s11795_s1 + $0xf8] sm:$0xff] }
 0x238   :  { %v970_v49 = vmul.f32 %v7379_v1, %v8521_v19  ;;  %v12092_v19 = vld [vmem:[#allocation47_spill] sm:$0xff]  ;;  %v7381_v25 = vpop.eup %7380  ;;  %v8779_v35 = vpack.c.bf16 %v1464_v41, %v1460_v34  ;;  %v1495_v0 = vld [vmem:[%s11795_s1 + $0x198] sm:$0xff]  ;;  %v8889_v18 = vpack.c.bf16 %v1490_v46, %v1486_v45  ;;  %v1492_v34 = vld [vmem:[%s11795_s1 + $0x180] sm:$0xff] }
 0x239   :  { %v1469_v1 = vld [vmem:[%s11795_s1 + $0xc8] sm:$0xff]  ;;  %v1499_v7 = vld [vmem:[%s11795_s1 + $0x1b8] sm:$0xff]  ;;  %v1496_v41 = vld [vmem:[%s11795_s1 + $0x1a0] sm:$0xff] }
 0x23a   :  { %v8644_v50 = vadd.f32 %v971_v6, %v970_v49  ;;  %6106 = vmatpush1.bf16.msra.mxu0 %v12085_v54  ;;  %6138 = vmatpush1.bf16.msra.mxu1 %v12086_v59  ;;  %v1473_v6 = vld [vmem:[%s11795_s1 + $0xe8] sm:$0xff]  ;;  %v8781_v49 = vpack.c.bf16 %v1466_v61, %v1462_v60  ;;  %v1468_v54 = vld [vmem:[%s11795_s1 + $0xc0] sm:$0xff]  ;;  %v8899_v60 = vpack.c.bf16 %v1497_v62, %v1493_v58  ;;  %v1744_v58 = vld [vmem:[%s11796_s3 + $0x10] sm:$0xff] }
 0x23b   :  { %6108 = vmatprep.subr.bf16.mxu0 %v12087_v13  ;;  %6140 = vmatprep.subr.bf16.mxu1 %v12088_v16  ;;  %v1472_v59 = vld [vmem:[%s11795_s1 + $0xe0] sm:$0xff]  ;;  %v8791_v13 = vpack.c.bf16 %v1473_v6, %v1469_v1  ;;  %v8793_v16 = vpack.c.bf16 %v1475_v28, %v1471_v20  ;;  %v8901_v61 = vpack.c.bf16 %v1499_v7, %v1495_v0  ;;  %v1494_v1 = vld [vmem:[%s11795_s1 + $0x190] sm:$0xff]  ;;  %v1501_v20 = vld [vmem:[%s11795_s1 + $0x1c8] sm:$0xff] }
 0x23c   :  { %7382 = vtanh.f32 %v8644_v50  ;;  %v8815_v12 = vpack.c.bf16 %v1472_v59, %v1468_v54  ;;  %v1498_v6 = vld [vmem:[%s11795_s1 + $0x1b0] sm:$0xff]  ;;  %v1505_v28 = vld [vmem:[%s11795_s1 + $0x1e8] sm:$0xff]  ;;  %v1503_v54 = vld [vmem:[%s11795_s1 + $0x1d8] sm:$0xff] }
 0x23d   :  { %v1507_v59 = vld [vmem:[%s11795_s1 + $0x1f8] sm:$0xff]  ;;  %v1748_v62 = vld [vmem:[%s11796_s3 + $0x30] sm:$0xff]  ;;  %v1751_v7 = vld [vmem:[%s11796_s3 + $0x48] sm:$0xff] }
 0x23e   :  { %6110 = vmatpush1.bf16.msra.mxu0 %v12089_v32  ;;  %6142 = vmatpush1.bf16.msra.mxu1 %v12090_v44  ;;  %v1470_v32 = vld [vmem:[%s11795_s1 + $0xd0] sm:$0xff]  ;;  %v8934_v56 = vpack.c.bf16 %v1507_v59, %v1503_v54  ;;  %v8990_v0 = vpack.c.bf16 %v1748_v62, %v1744_v58 }
 0x23f   :  { %6112 = vmatprep.subr.bf16.mxu0 %v12091_v53  ;;  %6144 = vmatprep.subr.bf16.mxu1 %v12092_v19  ;;  %v1474_v44 = vld [vmem:[%s11795_s1 + $0xf0] sm:$0xff]  ;;  %v1477_v53 = vld [vmem:[%s11795_s1 + $0x108] sm:$0xff] }
 0x240   :  { %v1481_v19 = vld [vmem:[%s11795_s1 + $0x128] sm:$0xff]  ;;  %v8817_v63 = vpack.c.bf16 %v1474_v44, %v1470_v32  ;;  %v8923_v32 = vpack.c.bf16 %v1496_v41, %v1492_v34  ;;  %v8925_v44 = vpack.c.bf16 %v1498_v6, %v1494_v1  ;;  %v1753_v41 = vld [vmem:[%s11796_s3 + $0x58] sm:$0xff] }
 0x241   :  { %v8827_v36 = vpack.c.bf16 %v1481_v19, %v1477_v53  ;;  %v1500_v53 = vld [vmem:[%s11795_s1 + $0x1c0] sm:$0xff]  ;;  %v8932_v19 = vpack.c.bf16 %v1505_v28, %v1501_v20  ;;  %v1755_v34 = vld [vmem:[%s11796_s3 + $0x68] sm:$0xff]  ;;  %v1757_v6 = vld [vmem:[%s11796_s3 + $0x78] sm:$0xff] }
 0x242   :  { %6114 = vmatpush1.bf16.msra.mxu0 %v12093_v57  ;;  %6146 = vmatpush1.bf16.msra.mxu1 %v12094_v3  ;;  %v1476_v57 = vld [vmem:[%s11795_s1 + $0x100] sm:$0xff]  ;;  %v9004_v1 = vpack.c.bf16 %v1755_v34, %v1751_v7  ;;  %v9015_v54 = vpack.c.bf16 %v1757_v6, %v1753_v41  ;;  %v1760_v7 = vld [vmem:[%s11796_s3 + $0x90] sm:$0xff]  ;;  %v1767_v6 = vld [vmem:[%s11796_s3 + $0xc8] sm:$0xff] }
 0x243   :  { %6116 = vmatprep.subr.bf16.mxu0 %v12095_v38  ;;  %6148 = vmatprep.subr.bf16.mxu1 %v12096_v40  ;;  %v1480_v3 = vld [vmem:[%s11795_s1 + $0x120] sm:$0xff]  ;;  %v1478_v38 = vld [vmem:[%s11795_s1 + $0x110] sm:$0xff] }
 0x244   :  { %v1482_v40 = vld [vmem:[%s11795_s1 + $0x130] sm:$0xff]  ;;  %v8851_v14 = vpack.c.bf16 %v1480_v3, %v1476_v57  ;;  %v1750_v20 = vld [vmem:[%s11796_s3 + $0x40] sm:$0xff] }
 0x245   :  { %v8853_v17 = vpack.c.bf16 %v1482_v40, %v1478_v38  ;;  %v1502_v57 = vld [vmem:[%s11795_s1 + $0x1d0] sm:$0xff]  ;;  %v8947_v38 = vpack.c.bf16 %v1504_v22, %v1500_v53  ;;  %v1754_v28 = vld [vmem:[%s11796_s3 + $0x60] sm:$0xff] }
 0x246   :  { %v7383_v26 = vpop.eup %7382  ;;  %6118 = vmatpush1.bf16.msra.mxu0 %v12097_v30  ;;  %6150 = vmatpush1.bf16.msra.mxu1 %v12098_v33  ;;  %v8863_v30 = vpack.c.bf16 %v1489_v39, %v1485_v2  ;;  %v8865_v33 = vpack.c.bf16 %v1491_v9, %v1487_v8  ;;  %v1506_v3 = vld [vmem:[%s11795_s1 + $0x1f0] sm:$0xff]  ;;  %v1743_v2 = vld [vmem:[%s11796_s3 + $0x8] sm:$0xff]  ;;  %v1745_v8 = vld [vmem:[%s11796_s3 + $0x18] sm:$0xff]  ;;  %v9017_v59 = vpack.c.bf16 %v1754_v28, %v1750_v20 }
 0x247   :  { %v8711_v48 = vmul.f32 %v7383_v26, %v7381_v25  ;;  %6152 = vmatprep.subr.bf16.mxu0 %v8677_v4  ;;  %6184 = vmatprep.subr.bf16.mxu1 %v8679_v23  ;;  %v1484_v25 = vld [vmem:[%s11795_s1 + $0x140] sm:$0xff]  ;;  %v8949_v40 = vpack.c.bf16 %v1506_v3, %v1502_v57  ;;  %v1747_v39 = vld [vmem:[%s11796_s3 + $0x28] sm:$0xff]  ;;  %v1752_v53 = vld [vmem:[%s11796_s3 + $0x50] sm:$0xff] }
 0x248   :  { %v1488_v26 = vld [vmem:[%s11795_s1 + $0x160] sm:$0xff]  ;;  %v8968_v9 = vpack.c.bf16 %v1747_v39, %v1743_v2  ;;  %v1756_v22 = vld [vmem:[%s11796_s3 + $0x70] sm:$0xff]  ;;  %v1759_v3 = vld [vmem:[%s11796_s3 + $0x88] sm:$0xff] }
 0x249   :  { %1310 = vmatmul.mubr.f32.vlgmr.msra.gmra.mrb[6].mxu0 %v8711_v48  ;;  %1381 = vmatmul.mubr.f32.vlgmr.msra.gmra.mrb[6].mxu1 %v8711_v48  ;;  %v8887_v10 = vpack.c.bf16 %v1488_v26, %v1484_v25  ;;  %v1742_v25 = vld [vmem:[%s11796_s3] sm:$0xff]  ;;  %v9026_v57 = vpack.c.bf16 %v1756_v22, %v1752_v53  ;;  %v1763_v2 = vld [vmem:[%s11796_s3 + $0xa8] sm:$0xff]  ;;  %v1761_v39 = vld [vmem:[%s11796_s3 + $0x98] sm:$0xff] }
 0x24a   :  { %6154 = vmatpush1.bf16.msra.mxu0 %v8701_v37  ;;  %6186 = vmatpush1.bf16.msra.mxu1 %v8703_v42  ;;  %v1746_v26 = vld [vmem:[%s11796_s3 + $0x20] sm:$0xff]  ;;  %v1764_v34 = vld [vmem:[%s11796_s3 + $0xb0] sm:$0xff]  ;;  %v1771_v20 = vld [vmem:[%s11796_s3 + $0xe8] sm:$0xff] }
 0x24b   :  { %6156 = vmatprep.subr.bf16.mxu0 %v8715_v52  ;;  %6188 = vmatprep.subr.bf16.mxu1 %v8717_v55  ;;  %v8981_v46 = vpack.c.bf16 %v1746_v26, %v1742_v25  ;;  %v1758_v25 = vld [vmem:[%s11796_s3 + $0x80] sm:$0xff]  ;;  %v9062_v41 = vpack.c.bf16 %v1764_v34, %v1760_v7  ;;  %v1769_v28 = vld [vmem:[%s11796_s3 + $0xd8] sm:$0xff]  ;;  %v9076_v53 = vpack.c.bf16 %v1771_v20, %v1767_v6  ;;  %v1775_v34 = vld [vmem:[%s11796_s3 + $0x108] sm:$0xff] }
 0x24c   :  { %1572 = vmatprep.mubr.f32.mxu0 %v12017_v5  ;;  %1643 = vmatprep.mubr.f32.mxu1 %v12017_v5  ;;  %v1762_v26 = vld [vmem:[%s11796_s3 + $0xa0] sm:$0xff]  ;;  %v1773_v22 = vld [vmem:[%s11796_s3 + $0xf8] sm:$0xff]  ;;  %v1779_v6 = vld [vmem:[%s11796_s3 + $0x128] sm:$0xff] }
 0x24d   :  { %v9053_v62 = vpack.c.bf16 %v1762_v26, %v1758_v25  ;;  %12102 = vst [vmem:[#allocation13_spill] sm:$0xff] %v9062_v41  ;;  %12103 = vst [vmem:[#allocation14_spill] sm:$0xff] %v9076_v53  ;;  %v1768_v25 = vld [vmem:[%s11796_s3 + $0xd0] sm:$0xff]  ;;  %v1777_v20 = vld [vmem:[%s11796_s3 + $0x118] sm:$0xff] }
 0x24e   :  { %6158 = vmatpush1.bf16.msra.mxu0 %v8741_v27  ;;  %6190 = vmatpush1.bf16.msra.mxu1 %v8743_v31  ;;  %v1772_v26 = vld [vmem:[%s11796_s3 + $0xf0] sm:$0xff] }
 0x24f   :  { %6160 = vmatprep.subr.bf16.mxu0 %v8753_v47  ;;  %6192 = vmatprep.subr.bf16.mxu1 %v8755_v51  ;;  %12101 = vst [vmem:[#allocation12_spill] sm:$0xff] %v9053_v62  ;;  %v9098_v7 = vpack.c.bf16 %v1772_v26, %v1768_v25 }
 0x251   :  { %12106 = vst [vmem:[#allocation17_spill] sm:$0xff] %v9098_v7 }
 0x252   :  { %6162 = vmatpush1.bf16.msra.mxu0 %v8779_v35  ;;  %6194 = vmatpush1.bf16.msra.mxu1 %v8781_v49 }
 0x253   :  { %6164 = vmatprep.subr.bf16.mxu0 %v8791_v13  ;;  %6196 = vmatprep.subr.bf16.mxu1 %v8793_v16 }
 0x256   :  { %6166 = vmatpush1.bf16.msra.mxu0 %v8815_v12  ;;  %6198 = vmatpush1.bf16.msra.mxu1 %v8817_v63 }
 0x257   :  { %6168 = vmatprep.subr.bf16.mxu0 %v8827_v36  ;;  %6200 = vmatprep.subr.bf16.mxu1 %v8829_v11 }
 0x25a   :  { %6170 = vmatpush1.bf16.msra.mxu0 %v8851_v14  ;;  %6202 = vmatpush1.bf16.msra.mxu1 %v8853_v17 }
 0x25b   :  { %6172 = vmatprep.subr.bf16.mxu0 %v8863_v30  ;;  %6204 = vmatprep.subr.bf16.mxu1 %v8865_v33 }
 0x25e   :  { %6174 = vmatpush1.bf16.msra.mxu0 %v8887_v10  ;;  %6206 = vmatpush1.bf16.msra.mxu1 %v8889_v18 }
 0x25f   :  { %6176 = vmatprep.subr.bf16.mxu0 %v8899_v60  ;;  %6208 = vmatprep.subr.bf16.mxu1 %v8901_v61 }
 0x262   :  { %6178 = vmatpush1.bf16.msra.mxu0 %v8923_v32  ;;  %6210 = vmatpush1.bf16.msra.mxu1 %v8925_v44 }
 0x263   :  { %6180 = vmatprep.subr.bf16.mxu0 %v8932_v19  ;;  %6212 = vmatprep.subr.bf16.mxu1 %v8934_v56 }
 0x266   :  { %6182 = vmatpush1.bf16.msra.mxu0 %v8947_v38  ;;  %6214 = vmatpush1.bf16.msra.mxu1 %v8949_v40 }
 0x267   :  { %6216 = vmatprep.subr.bf16.mxu0 %v8968_v9 }
 0x269   :  { %1573 = vmatmul.mubr.f32.vlgmr.msra.gmra.mrb[8].mxu0 %v8711_v48  ;;  %1644 = vmatmul.mubr.f32.vlgmr.msra.gmra.mrb[8].mxu1 %v8711_v48  ;;  %v1749_v48 = vld [vmem:[%s11796_s3 + $0x38] sm:$0xff] }
 0x26a   :  { %1870 = vmatprep.mubr.f32.mxu0 %v12017_v5  ;;  %1941 = vmatprep.mubr.f32.mxu1 %v12017_v5  ;;  %v8979_v45 = vpack.c.bf16 %v1749_v48, %v1745_v8  ;;  %v9040_v8 = vpack.c.bf16 %v1763_v2, %v1759_v3  ;;  %v1765_v48 = vld [vmem:[%s11796_s3 + $0xb8] sm:$0xff]  ;;  %v1766_v3 = vld [vmem:[%s11796_s3 + $0xc0] sm:$0xff] }
 0x26b   :  { %6218 = vmatpush1.bf16.msra.mxu0 %v8981_v46  ;;  %v9051_v58 = vpack.c.bf16 %v1765_v48, %v1761_v39  ;;  %v1770_v2 = vld [vmem:[%s11796_s3 + $0xe0] sm:$0xff]  ;;  %v9087_v39 = vpack.c.bf16 %v1773_v22, %v1769_v28  ;;  %v9112_v28 = vpack.c.bf16 %v1779_v6, %v1775_v34  ;;  %v1781_v22 = vld [vmem:[%s11796_s3 + $0x138] sm:$0xff]  ;;  %v1776_v34 = vld [vmem:[%s11796_s3 + $0x110] sm:$0xff] }
 0x26c   :  { %6248 = vmatprep.subr.bf16.mxu1 %v8979_v45  ;;  %6220 = vmatprep.subr.bf16.mxu0 %v9004_v1  ;;  %12099 = vst [vmem:[#allocation10_spill] sm:$0xff] %v9040_v8  ;;  %v9089_v48 = vpack.c.bf16 %v1770_v2, %v1766_v3  ;;  %v1774_v3 = vld [vmem:[%s11796_s3 + $0x100] sm:$0xff]  ;;  %v9123_v25 = vpack.c.bf16 %v1781_v22, %v1777_v20  ;;  %v1780_v6 = vld [vmem:[%s11796_s3 + $0x130] sm:$0xff]  ;;  %v1783_v20 = vld [vmem:[%s11796_s3 + $0x148] sm:$0xff] }
 0x26d   :  { %6250 = vmatpush1.bf16.msra.mxu1 %v8990_v0  ;;  %12100 = vst [vmem:[#allocation11_spill] sm:$0xff] %v9051_v58  ;;  %12104 = vst [vmem:[#allocation15_spill] sm:$0xff] %v9087_v39  ;;  %v1778_v2 = vld [vmem:[%s11796_s3 + $0x120] sm:$0xff]  ;;  %v1787_v22 = vld [vmem:[%s11796_s3 + $0x168] sm:$0xff] }
 0x26e   :  { %6252 = vmatprep.subr.bf16.mxu1 %v9015_v54  ;;  %12105 = vst [vmem:[#allocation16_spill] sm:$0xff] %v9089_v48  ;;  %12107 = vst [vmem:[#allocation18_spill] sm:$0xff] %v9112_v28  ;;  %v9125_v26 = vpack.c.bf16 %v1778_v2, %v1774_v3  ;;  %v9145_v3 = vpack.c.bf16 %v1787_v22, %v1783_v20  ;;  %v1785_v2 = vld [vmem:[%s11796_s3 + $0x158] sm:$0xff]  ;;  %v1786_v20 = vld [vmem:[%s11796_s3 + $0x160] sm:$0xff] }
 0x26f   :  { %6222 = vmatpush1.bf16.msra.mxu0 %v9017_v59  ;;  %12108 = vst [vmem:[#allocation19_spill] sm:$0xff] %v9123_v25  ;;  %v1784_v22 = vld [vmem:[%s11796_s3 + $0x150] sm:$0xff] }
 0x270   :  { %6224 = vmatprep.subr.bf16.mxu0 %v9040_v8  ;;  %12109 = vst [vmem:[#allocation20_spill] sm:$0xff] %v9125_v26  ;;  %12111 = vst [vmem:[#allocation22_spill] sm:$0xff] %v9145_v3 }
 0x271   :  { %6254 = vmatpush1.bf16.msra.mxu1 %v9026_v57 }
 0x272   :  { %6256 = vmatprep.subr.bf16.mxu1 %v9051_v58 }
 0x273   :  { %6226 = vmatpush1.bf16.msra.mxu0 %v9053_v62 }
 0x274   :  { %6228 = vmatprep.subr.bf16.mxu0 %v9076_v53 }
 0x275   :  { %6258 = vmatpush1.bf16.msra.mxu1 %v9062_v41 }
 0x276   :  { %6260 = vmatprep.subr.bf16.mxu1 %v9087_v39 }
 0x277   :  { %6230 = vmatpush1.bf16.msra.mxu0 %v9089_v48 }
 0x278   :  { %6232 = vmatprep.subr.bf16.mxu0 %v9112_v28  ;;  %v1793_v28 = vld [vmem:[%s11796_s3 + $0x198] sm:$0xff] }
 0x279   :  { %6262 = vmatpush1.bf16.msra.mxu1 %v9098_v7  ;;  %v9134_v7 = vpack.c.bf16 %v1780_v6, %v1776_v34  ;;  %v1789_v34 = vld [vmem:[%s11796_s3 + $0x178] sm:$0xff] }
 0x27a   :  { %6264 = vmatprep.subr.bf16.mxu1 %v9123_v25  ;;  %v9153_v6 = vpack.c.bf16 %v1789_v34, %v1785_v2  ;;  %v1795_v25 = vld [vmem:[%s11796_s3 + $0x1a8] sm:$0xff] }
 0x27b   :  { %12110 = vst [vmem:[#allocation21_spill] sm:$0xff] %v9134_v7  ;;  %6234 = vmatpush1.bf16.msra.mxu0 %v9125_v26  ;;  %v1782_v26 = vld [vmem:[%s11796_s3 + $0x140] sm:$0xff] }
 0x27c   :  { %12112 = vst [vmem:[#allocation23_spill] sm:$0xff] %v9153_v6  ;;  %6236 = vmatprep.subr.bf16.mxu0 %v9145_v3  ;;  %v9169_v2 = vpack.c.bf16 %v1786_v20, %v1782_v26  ;;  %v1791_v3 = vld [vmem:[%s11796_s3 + $0x188] sm:$0xff]  ;;  %v1797_v26 = vld [vmem:[%s11796_s3 + $0x1b8] sm:$0xff]  ;;  %v1794_v20 = vld [vmem:[%s11796_s3 + $0x1a0] sm:$0xff] }
 0x27d   :  { %6266 = vmatpush1.bf16.msra.mxu1 %v9134_v7  ;;  %v1788_v7 = vld [vmem:[%s11796_s3 + $0x170] sm:$0xff]  ;;  %v9182_v48 = vpack.c.bf16 %v1795_v25, %v1791_v3 }
 0x27e   :  { %6268 = vmatprep.subr.bf16.mxu1 %v9153_v6  ;;  %12113 = vst [vmem:[#allocation24_spill] sm:$0xff] %v9169_v2  ;;  %v9171_v34 = vpack.c.bf16 %v1788_v7, %v1784_v22  ;;  %v1790_v7 = vld [vmem:[%s11796_s3 + $0x180] sm:$0xff]  ;;  %v9195_v22 = vpack.c.bf16 %v1797_v26, %v1793_v28  ;;  %v1792_v3 = vld [vmem:[%s11796_s3 + $0x190] sm:$0xff]  ;;  %v1799_v28 = vld [vmem:[%s11796_s3 + $0x1c8] sm:$0xff] }
 0x27f   :  { %12115 = vst [vmem:[#allocation26_spill] sm:$0xff] %v9182_v48  ;;  %6238 = vmatpush1.bf16.msra.mxu0 %v9169_v2  ;;  %v9197_v25 = vpack.c.bf16 %v1794_v20, %v1790_v7  ;;  %v1796_v6 = vld [vmem:[%s11796_s3 + $0x1b0] sm:$0xff]  ;;  %v1803_v26 = vld [vmem:[%s11796_s3 + $0x1e8] sm:$0xff]  ;;  %v1801_v7 = vld [vmem:[%s11796_s3 + $0x1d8] sm:$0xff] }
 0x280   :  { %12114 = vst [vmem:[#allocation25_spill] sm:$0xff] %v9171_v34  ;;  %12116 = vst [vmem:[#allocation27_spill] sm:$0xff] %v9195_v22  ;;  %6240 = vmatprep.subr.bf16.mxu0 %v9182_v48  ;;  %v9206_v39 = vpack.c.bf16 %v1796_v6, %v1792_v3  ;;  %v9218_v20 = vpack.c.bf16 %v1803_v26, %v1799_v28  ;;  %v1805_v6 = vld [vmem:[%s11796_s3 + $0x1f8] sm:$0xff]  ;;  %v1798_v3 = vld [vmem:[%s11796_s3 + $0x1c0] sm:$0xff] }
 0x281   :  { %6270 = vmatpush1.bf16.msra.mxu1 %v9171_v34  ;;  %12117 = vst [vmem:[#allocation28_spill] sm:$0xff] %v9197_v25  ;;  %v9231_v48 = vpack.c.bf16 %v1805_v6, %v1801_v7  ;;  %v1800_v26 = vld [vmem:[%s11796_s3 + $0x1d0] sm:$0xff]  ;;  %v1679_v7 = vld [vmem:[%s11797_s2 + $0x8] sm:$0xff]  ;;  %v1681_v6 = vld [vmem:[%s11797_s2 + $0x18] sm:$0xff] }
 0x282   :  { %12118 = vst [vmem:[#allocation29_spill] sm:$0xff] %v9206_v39  ;;  %6272 = vmatprep.subr.bf16.mxu1 %v9195_v22  ;;  %12119 = vst [vmem:[#allocation30_spill] sm:$0xff] %v9218_v20  ;;  %v1802_v22 = vld [vmem:[%s11796_s3 + $0x1e0] sm:$0xff]  ;;  %v1804_v34 = vld [vmem:[%s11796_s3 + $0x1f0] sm:$0xff] }
 0x283   :  { %6242 = vmatpush1.bf16.msra.mxu0 %v9197_v25  ;;  %12120 = vst [vmem:[#allocation31_spill] sm:$0xff] %v9231_v48  ;;  %v9233_v28 = vpack.c.bf16 %v1802_v22, %v1798_v3  ;;  %v9242_v2 = vpack.c.bf16 %v1804_v34, %v1800_v26  ;;  %v1683_v22 = vld [vmem:[%s11797_s2 + $0x28] sm:$0xff]  ;;  %v1685_v34 = vld [vmem:[%s11797_s2 + $0x38] sm:$0xff] }
 0x284   :  { %6244 = vmatprep.subr.bf16.mxu0 %v9218_v20  ;;  %v9254_v3 = vpack.c.bf16 %v1683_v22, %v1679_v7  ;;  %v9261_v26 = vpack.c.bf16 %v1685_v34, %v1681_v6 }
 0x285   :  { %6274 = vmatpush1.bf16.msra.mxu1 %v9206_v39  ;;  %12121 = vst [vmem:[#allocation32_spill] sm:$0xff] %v9233_v28  ;;  %12122 = vst [vmem:[#allocation33_spill] sm:$0xff] %v9242_v2 }
 0x286   :  { %6276 = vmatprep.subr.bf16.mxu1 %v9231_v48  ;;  %12123 = vst [vmem:[#allocation34_spill] sm:$0xff] %v9254_v3  ;;  %12124 = vst [vmem:[#allocation35_spill] sm:$0xff] %v9261_v26  ;;  %v1387_v48 = vld [vmem:[%s11799_s4] sm:$0xf] }
 0x287   :  { %6246 = vmatpush1.bf16.msra.mxu0 %v9233_v28  ;;  %v1392_v7 = vrot.slane %v1387_v48, %v8592_v15  ;;  %v1396_v22 = vrot.slane %v1387_v48, %v8597_v24  ;;  %v1400_v41 = vrot.slane %v1387_v48, %v8604_v21 }
 0x288   :  { %6280 = vmatprep.subr.bf16.mxu0 %v9254_v3  ;;  %v1404_v3 = vrot.slane %v1387_v48, %v8601_v43 }
 0x289   :  { %6278 = vmatpush1.bf16.msra.mxu1 %v9242_v2 }
 0x28a   :  { %6312 = vmatprep.subr.bf16.mxu1 %v9261_v26 }
 0x31c   :  { %v1311_v20 = vpop.f32.mrb[6].mxu0  ;;  %v1382_v39 = vpop.f32.mrb[6].mxu1 }
 0x31d   :  { %v1409_v25 = vadd.f32 %v1392_v7, %v1311_v20  ;;  %v1313_v28 = vpop.f32.mrb[7].mxu0  ;;  %v1384_v53 = vpop.f32.mrb[7].mxu1  ;;  %v1411_v58 = vadd.f32 %v1400_v41, %v1382_v39  ;;  %v5699_v41 = vld [vmem:[%s11798_s0 + $0x40] sm:$0xff] }
 0x31e   :  { %v1410_v2 = vadd.f32 %v1396_v22, %v1313_v28  ;;  %v1412_v26 = vadd.f32 %v1404_v3, %v1384_v53 }
 0x31f   :  { %v5695_v6 = vmul.f32 -1.442695, %v1409_v25 }
 0x320   :  { %v5696_v34 = vmul.f32 -1.442695, %v1410_v2  ;;  %v5697_v62 = vmul.f32 -1.442695, %v1412_v26 }
 0x321   :  { %7384 = vpow2.f32 %v5695_v6 }
 0x322   :  { %7386 = vpow2.f32 %v5696_v34  ;;  %v5702_v34 = vld [vmem:[%s11798_s0 + $0x58] sm:$0xff] }
 0x323   :  { %7388 = vpow2.f32 %v5697_v62 }
 0x324   :  { %7390 = vtanh.f32 %v1411_v58 }
 0x32b   :  { %v7385_v15 = vpop.eup %7384 }
 0x32c   :  { %v7387_v8 = vpop.eup %7386  ;;  %v1416_v24 = vadd.f32 1.0, %v7385_v15  ;;  %v5700_v15 = vld [vmem:[%s11798_s0 + $0x48] sm:$0xff] }
 0x32d   :  { %v1422_v20 = vadd.f32 1.0, %v7387_v8  ;;  %v7389_v28 = vpop.eup %7388 }
 0x32e   :  { %7392 = vrcp.f32 %v1416_v24  ;;  %v7391_v25 = vpop.eup %7390  ;;  %v1429_v6 = vadd.f32 1.0, %v7389_v28 }
 0x32f   :  { %7394 = vrcp.f32 %v1422_v20  ;;  %v5701_v20 = vld [vmem:[%s11798_s0 + $0x50] sm:$0xff] }
 0x330   :  { %7396 = vrcp.f32 %v1429_v6  ;;  %v1687_v6 = vld [vmem:[%s11797_s2 + $0x48] sm:$0xff] }
 0x338   :  { %v7393_v2 = vpop.eup %7392 }
 0x339   :  { %v7395_v7 = vpop.eup %7394  ;;  %v1433_v22 = vmul.f32 %v7393_v2, %v7391_v25  ;;  %v1678_v25 = vld [vmem:[%s11797_s2] sm:$0xff] }
 0x33a   :  { %v1432_v53 = vmul.f32 %v7395_v7, %v8613_v29  ;;  %v1682_v2 = vld [vmem:[%s11797_s2 + $0x20] sm:$0xff]  ;;  %v1680_v7 = vld [vmem:[%s11797_s2 + $0x10] sm:$0xff] }
 0x33c   :  { %v9279_v58 = vadd.f32 %v1433_v22, %v1432_v53  ;;  %v1574_v24 = vpop.f32.mrb[8].mxu0  ;;  %v1645_v8 = vpop.f32.mrb[8].mxu1  ;;  %v1684_v22 = vld [vmem:[%s11797_s2 + $0x30] sm:$0xff]  ;;  %v1691_v53 = vld [vmem:[%s11797_s2 + $0x68] sm:$0xff] }
 0x33d   :  { %v1650_v62 = vadd.f32 %v5699_v41, %v1574_v24  ;;  %v1576_v39 = vpop.f32.mrb[9].mxu0  ;;  %v1647_v48 = vpop.f32.mrb[9].mxu1  ;;  %v1689_v41 = vld [vmem:[%s11797_s2 + $0x58] sm:$0xff]  ;;  %v9322_v21 = vpack.c.bf16 %v1691_v53, %v1687_v6 }
 0x33e   :  { %12125 = vst [vmem:[#allocation36_spill] sm:$0xff] %v9279_v58  ;;  %v1651_v3 = vadd.f32 %v5700_v15, %v1576_v39  ;;  %7398 = vtanh.f32 %v9279_v58  ;;  %v1653_v28 = vadd.f32 %v5702_v34, %v1647_v48  ;;  %v1693_v15 = vld [vmem:[%s11797_s2 + $0x78] sm:$0xff]  ;;  %v7397_v24 = vpop.eup %7396  ;;  %v9312_v48 = vpack.c.bf16 %v1682_v2, %v1678_v25  ;;  %v1692_v25 = vld [vmem:[%s11797_s2 + $0x70] sm:$0xff]  ;;  %v1695_v2 = vld [vmem:[%s11797_s2 + $0x88] sm:$0xff] }
 0x33f   :  { %v5703_v29 = vmul.f32 -1.442695, %v1650_v62  ;;  %v1652_v34 = vadd.f32 %v5701_v20, %v1645_v8  ;;  %12128 = vst [vmem:[#allocation39_spill] sm:$0xff] %v9322_v21  ;;  %v9324_v43 = vpack.c.bf16 %v1693_v15, %v1689_v41  ;;  %v1699_v8 = vld [vmem:[%s11797_s2 + $0xa8] sm:$0xff]  ;;  %v1697_v20 = vld [vmem:[%s11797_s2 + $0x98] sm:$0xff] }
 0x340   :  { %v5704_v26 = vmul.f32 -1.442695, %v1651_v3  ;;  %v5705_v39 = vmul.f32 -1.442695, %v1653_v28  ;;  %12126 = vst [vmem:[#allocation37_spill] sm:$0xff] %v9312_v48  ;;  %v9314_v3 = vpack.c.bf16 %v1684_v22, %v1680_v7  ;;  %v1688_v28 = vld [vmem:[%s11797_s2 + $0x50] sm:$0xff] }
 0x341   :  { %7400 = vpow2.f32 %v5703_v29  ;;  %v1686_v29 = vld [vmem:[%s11797_s2 + $0x40] sm:$0xff]  ;;  %12129 = vst [vmem:[#allocation40_spill] sm:$0xff] %v9324_v43  ;;  %v1701_v7 = vld [vmem:[%s11797_s2 + $0xb8] sm:$0xff]  ;;  %v9351_v15 = vpack.c.bf16 %v1692_v25, %v1688_v28  ;;  %v1700_v28 = vld [vmem:[%s11797_s2 + $0xb0] sm:$0xff] }
 0x342   :  { %7402 = vpow2.f32 %v5704_v26  ;;  %12127 = vst [vmem:[#allocation38_spill] sm:$0xff] %v9314_v3  ;;  %v1690_v26 = vld [vmem:[%s11797_s2 + $0x60] sm:$0xff]  ;;  %v1707_v25 = vld [vmem:[%s11797_s2 + $0xe8] sm:$0xff] }
 0x343   :  { %7404 = vpow2.f32 %v5705_v39  ;;  %v9349_v41 = vpack.c.bf16 %v1690_v26, %v1686_v29  ;;  %12131 = vst [vmem:[#allocation42_spill] sm:$0xff] %v9351_v15  ;;  %v9361_v39 = vpack.c.bf16 %v1699_v8, %v1695_v2  ;;  %v9363_v29 = vpack.c.bf16 %v1701_v7, %v1697_v20  ;;  %v1696_v26 = vld [vmem:[%s11797_s2 + $0x90] sm:$0xff]  ;;  %v1705_v2 = vld [vmem:[%s11797_s2 + $0xd8] sm:$0xff] }
 0x344   :  { %7406 = vtanh.f32 %v1652_v34  ;;  %v1703_v34 = vld [vmem:[%s11797_s2 + $0xc8] sm:$0xff]  ;;  %v1709_v8 = vld [vmem:[%s11797_s2 + $0xf8] sm:$0xff]  ;;  %v9389_v7 = vpack.c.bf16 %v1700_v28, %v1696_v26 }
 0x345   :  { %12130 = vst [vmem:[#allocation41_spill] sm:$0xff] %v9349_v41  ;;  %12132 = vst [vmem:[#allocation43_spill] sm:$0xff] %v9361_v39  ;;  %v1711_v26 = vld [vmem:[%s11797_s2 + $0x108] sm:$0xff] }
 0x346   :  { %12133 = vst [vmem:[#allocation44_spill] sm:$0xff] %v9363_v29  ;;  %12135 = vst [vmem:[#allocation46_spill] sm:$0xff] %v9389_v7  ;;  %v1715_v28 = vld [vmem:[%s11797_s2 + $0x128] sm:$0xff] }
 0x348   :  { %v7399_v62 = vpop.eup %7398 }
 0x349   :  { %v1436_v58 = vmul.f32 %v7399_v62, %v7397_v24  ;;  %v1694_v24 = vld [vmem:[%s11797_s2 + $0x80] sm:$0xff] }
 0x34a   :  { %v1698_v62 = vld [vmem:[%s11797_s2 + $0xa0] sm:$0xff] }
 0x34b   :  { %v7401_v22 = vpop.eup %7400  ;;  %5698 = vst [vmem:[%s11800_s5 + $0x8] sm:$0xff] %v1436_v58  ;;  %1871 = vmatmul.mubr.f32.vlgmr.msra.gmra.mrb[10].mxu0 %v1436_v58  ;;  %1942 = vmatmul.mubr.f32.vlgmr.msra.gmra.mrb[10].mxu1 %v1436_v58  ;;  %v9387_v20 = vpack.c.bf16 %v1698_v62, %v1694_v24  ;;  %v1704_v24 = vld [vmem:[%s11797_s2 + $0xd0] sm:$0xff] }
 0x34c   :  { %v7403_v6 = vpop.eup %7402  ;;  %v1657_v53 = vadd.f32 1.0, %v7401_v22  ;;  %6282 = vmatpush1.bf16.msra.mxu0 %v9312_v48  ;;  %6314 = vmatpush1.bf16.msra.mxu1 %v9314_v3  ;;  %v1702_v22 = vld [vmem:[%s11797_s2 + $0xc0] sm:$0xff]  ;;  %v1708_v62 = vld [vmem:[%s11797_s2 + $0xf0] sm:$0xff] }
 0x34d   :  { %v1663_v58 = vadd.f32 1.0, %v7403_v6  ;;  %6284 = vmatprep.subr.bf16.mxu0 %v9322_v21  ;;  %6316 = vmatprep.subr.bf16.mxu1 %v9324_v43  ;;  %12134 = vst [vmem:[#allocation45_spill] sm:$0xff] %v9387_v20  ;;  %v1706_v6 = vld [vmem:[%s11797_s2 + $0xe0] sm:$0xff] }
 0x34e   :  { %7408 = vrcp.f32 %v1657_v53  ;;  %2012 = vmatprep.mubr.f32.mxu0 %v12017_v5  ;;  %2083 = vmatprep.mubr.f32.mxu1 %v12017_v5  ;;  %v9399_v53 = vpack.c.bf16 %v1707_v25, %v1703_v34  ;;  %v1713_v34 = vld [vmem:[%s11797_s2 + $0x118] sm:$0xff]  ;;  %v1722_v43 = vld [vmem:[%s11797_s2 + $0x160] sm:$0xff] }
 0x34f   :  { %7410 = vrcp.f32 %v1663_v58  ;;  %v9401_v58 = vpack.c.bf16 %v1709_v8, %v1705_v2  ;;  %v1717_v25 = vld [vmem:[%s11797_s2 + $0x138] sm:$0xff]  ;;  %v9423_v2 = vpack.c.bf16 %v1706_v6, %v1702_v22  ;;  %v9425_v8 = vpack.c.bf16 %v1708_v62, %v1704_v24  ;;  %v1712_v22 = vld [vmem:[%s11797_s2 + $0x110] sm:$0xff]  ;;  %v1719_v24 = vld [vmem:[%s11797_s2 + $0x148] sm:$0xff]  ;;  %v7405_v62 = vpop.eup %7404 }
 0x350   :  { %6286 = vmatpush1.bf16.msra.mxu0 %v9349_v41  ;;  %6318 = vmatpush1.bf16.msra.mxu1 %v9351_v15  ;;  %12136 = vst [vmem:[#allocation47_spill] sm:$0xff] %v9399_v53  ;;  %v9435_v15 = vpack.c.bf16 %v1715_v28, %v1711_v26  ;;  %v1716_v6 = vld [vmem:[%s11797_s2 + $0x130] sm:$0xff]  ;;  %v1723_v26 = vld [vmem:[%s11797_s2 + $0x168] sm:$0xff]  ;;  %v1721_v28 = vld [vmem:[%s11797_s2 + $0x158] sm:$0xff]  ;;  %v1670_v48 = vadd.f32 1.0, %v7405_v62 }
 0x351   :  { %6288 = vmatprep.subr.bf16.mxu0 %v9361_v39  ;;  %6320 = vmatprep.subr.bf16.mxu1 %v9363_v29  ;;  %12137 = vst [vmem:[#allocation48_spill] sm:$0xff] %v9401_v58  ;;  %12138 = vst [vmem:[#allocation49_spill] sm:$0xff] %v9425_v8  ;;  %v1710_v29 = vld [vmem:[%s11797_s2 + $0x100] sm:$0xff]  ;;  %v1729_v62 = vld [vmem:[%s11797_s2 + $0x198] sm:$0xff] }
 0x352   :  { %v1714_v39 = vld [vmem:[%s11797_s2 + $0x120] sm:$0xff]  ;;  %7412 = vrcp.f32 %v1670_v48  ;;  %v1735_v48 = vld [vmem:[%s11797_s2 + $0x1c8] sm:$0xff] }
 0x353   :  { %v1718_v41 = vld [vmem:[%s11797_s2 + $0x140] sm:$0xff] }
 0x354   :  { %6290 = vmatpush1.bf16.msra.mxu0 %v9387_v20  ;;  %6322 = vmatpush1.bf16.msra.mxu1 %v9389_v7  ;;  %v9437_v20 = vpack.c.bf16 %v1717_v25, %v1713_v34  ;;  %v1725_v34 = vld [vmem:[%s11797_s2 + $0x178] sm:$0xff]  ;;  %v7407_v25 = vpop.eup %7406  ;;  %v9461_v7 = vpack.c.bf16 %v1716_v6, %v1712_v22  ;;  %v1724_v22 = vld [vmem:[%s11797_s2 + $0x170] sm:$0xff] }
 0x355   :  { %6292 = vmatprep.subr.bf16.mxu0 %v9399_v53  ;;  %6324 = vmatprep.subr.bf16.mxu1 %v9401_v58  ;;  %v9459_v53 = vpack.c.bf16 %v1714_v39, %v1710_v29  ;;  %v9473_v39 = vpack.c.bf16 %v1725_v34, %v1721_v28  ;;  %v1720_v29 = vld [vmem:[%s11797_s2 + $0x150] sm:$0xff]  ;;  %v9498_v34 = vpack.c.bf16 %v1722_v43, %v1718_v41 }
 0x356   :  { %v1728_v43 = vld [vmem:[%s11797_s2 + $0x190] sm:$0xff] }
 0x357   :  { %12140 = vst [vmem:[#allocation51_spill] sm:$0xff] %v9473_v39  ;;  %v1732_v41 = vld [vmem:[%s11797_s2 + $0x1b0] sm:$0xff] }
 0x358   :  { %v7409_v58 = vpop.eup %7408  ;;  %6294 = vmatpush1.bf16.msra.mxu0 %v9423_v2  ;;  %6326 = vmatpush1.bf16.msra.mxu1 %v9425_v8  ;;  %v9471_v8 = vpack.c.bf16 %v1723_v26, %v1719_v24  ;;  %v1731_v24 = vld [vmem:[%s11797_s2 + $0x1a8] sm:$0xff]  ;;  %v1733_v26 = vld [vmem:[%s11797_s2 + $0x1b8] sm:$0xff] }
 0x359   :  { %v7411_v21 = vpop.eup %7410  ;;  %v1674_v3 = vmul.f32 %v7409_v58, %v7407_v25  ;;  %6296 = vmatprep.subr.bf16.mxu0 %v9435_v15  ;;  %6328 = vmatprep.subr.bf16.mxu1 %v9437_v20  ;;  %v1727_v58 = vld [vmem:[%s11797_s2 + $0x188] sm:$0xff]  ;;  %v1730_v25 = vld [vmem:[%s11797_s2 + $0x1a0] sm:$0xff] }
 0x35a   :  { %12139 = vst [vmem:[#allocation50_spill] sm:$0xff] %v9471_v8  ;;  %v1673_v6 = vmul.f32 %v7411_v21, %v8644_v50  ;;  %v9500_v21 = vpack.c.bf16 %v1724_v22, %v1720_v29  ;;  %v1726_v50 = vld [vmem:[%s11797_s2 + $0x180] sm:$0xff]  ;;  %v1739_v29 = vld [vmem:[%s11797_s2 + $0x1e8] sm:$0xff]  ;;  %v1737_v22 = vld [vmem:[%s11797_s2 + $0x1d8] sm:$0xff] }
 0x35c   :  { %v9494_v28 = vadd.f32 %v1674_v3, %v1673_v6  ;;  %6298 = vmatpush1.bf16.msra.mxu0 %v9459_v53  ;;  %6330 = vmatpush1.bf16.msra.mxu1 %v9461_v7  ;;  %12141 = vst [vmem:[#allocation52_spill] sm:$0xff] %v9500_v21  ;;  %v9510_v3 = vpack.c.bf16 %v1731_v24, %v1727_v58  ;;  %v1741_v58 = vld [vmem:[%s11797_s2 + $0x1f8] sm:$0xff] }
 0x35d   :  { %6300 = vmatprep.subr.bf16.mxu0 %v9471_v8  ;;  %6332 = vmatprep.subr.bf16.mxu1 %v9473_v39  ;;  %v9512_v6 = vpack.c.bf16 %v1733_v26, %v1729_v62  ;;  %v9535_v24 = vpack.c.bf16 %v1730_v25, %v1726_v50  ;;  %v9537_v62 = vpack.c.bf16 %v1732_v41, %v1728_v43  ;;  %v1734_v26 = vld [vmem:[%s11797_s2 + $0x1c0] sm:$0xff]  ;;  %v1736_v50 = vld [vmem:[%s11797_s2 + $0x1d0] sm:$0xff] }
 0x35e   :  { %7414 = vtanh.f32 %v9494_v28  ;;  %v9544_v39 = vpack.c.bf16 %v1739_v29, %v1735_v48  ;;  %v9546_v8 = vpack.c.bf16 %v1741_v58, %v1737_v22  ;;  %v1740_v25 = vld [vmem:[%s11797_s2 + $0x1f0] sm:$0xff]  ;;  %v7413_v48 = vpop.eup %7412 }
 0x35f   :  { %v9561_v41 = vpack.c.bf16 %v1740_v25, %v1736_v50 }
 0x360   :  { %6302 = vmatpush1.bf16.msra.mxu0 %v9498_v34  ;;  %6334 = vmatpush1.bf16.msra.mxu1 %v9500_v21  ;;  %v1738_v21 = vld [vmem:[%s11797_s2 + $0x1e0] sm:$0xff] }
 0x361   :  { %6304 = vmatprep.subr.bf16.mxu0 %v9510_v3  ;;  %6336 = vmatprep.subr.bf16.mxu1 %v9512_v6  ;;  %v9559_v43 = vpack.c.bf16 %v1738_v21, %v1734_v26  ;;  %v12171_v26 = vld [vmem:[#allocation9_spill] sm:$0xff] }
 0x364   :  { %6306 = vmatpush1.bf16.msra.mxu0 %v9535_v24  ;;  %6338 = vmatpush1.bf16.msra.mxu1 %v9537_v62 }
 0x365   :  { %6308 = vmatprep.subr.bf16.mxu0 %v9544_v39  ;;  %6340 = vmatprep.subr.bf16.mxu1 %v9546_v8 }
 0x368   :  { %v7415_v29 = vpop.eup %7414  ;;  %6310 = vmatpush1.bf16.msra.mxu0 %v9559_v43  ;;  %6342 = vmatpush1.bf16.msra.mxu1 %v9561_v41 }
 0x369   :  { %6344 = vmatprep.subr.bf16.mxu0 %v8677_v4  ;;  %6376 = vmatprep.subr.bf16.mxu1 %v8679_v23  ;;  %v1677_v22 = vmul.f32 %v7415_v29, %v7413_v48  ;;  %v12142_v4 = vld [vmem:[#allocation10_spill] sm:$0xff]  ;;  %v12143_v23 = vld [vmem:[#allocation11_spill] sm:$0xff] }
 0x36b   :  { %2013 = vmatmul.mubr.f32.vlgmr.msra.gmra.mrb[10].mxu0 %v1677_v22  ;;  %2084 = vmatmul.mubr.f32.vlgmr.msra.gmra.mrb[10].mxu1 %v1677_v22 }
 0x36c   :  { %6346 = vmatpush1.bf16.msra.mxu0 %v8701_v37  ;;  %6378 = vmatpush1.bf16.msra.mxu1 %v8703_v42  ;;  %v12144_v37 = vld [vmem:[#allocation12_spill] sm:$0xff]  ;;  %v12145_v42 = vld [vmem:[#allocation13_spill] sm:$0xff] }
 0x36d   :  { %6348 = vmatprep.subr.bf16.mxu0 %v8715_v52  ;;  %6380 = vmatprep.subr.bf16.mxu1 %v8717_v55  ;;  %v12146_v52 = vld [vmem:[#allocation14_spill] sm:$0xff]  ;;  %v12147_v55 = vld [vmem:[#allocation15_spill] sm:$0xff] }
 0x36e   :  { %2275 = vmatprep.mubr.f32.mxu0 %v12017_v5  ;;  %2346 = vmatprep.mubr.f32.mxu1 %v12017_v5 }
 0x370   :  { %6350 = vmatpush1.bf16.msra.mxu0 %v8741_v27  ;;  %6382 = vmatpush1.bf16.msra.mxu1 %v8743_v31  ;;  %v12148_v27 = vld [vmem:[#allocation16_spill] sm:$0xff]  ;;  %v12149_v31 = vld [vmem:[#allocation17_spill] sm:$0xff] }
 0x371   :  { %6352 = vmatprep.subr.bf16.mxu0 %v8753_v47  ;;  %6384 = vmatprep.subr.bf16.mxu1 %v8755_v51  ;;  %v12150_v47 = vld [vmem:[#allocation18_spill] sm:$0xff]  ;;  %v12151_v51 = vld [vmem:[#allocation19_spill] sm:$0xff] }
 0x374   :  { %6354 = vmatpush1.bf16.msra.mxu0 %v8779_v35  ;;  %6386 = vmatpush1.bf16.msra.mxu1 %v8781_v49  ;;  %v12152_v35 = vld [vmem:[#allocation20_spill] sm:$0xff]  ;;  %v12153_v49 = vld [vmem:[#allocation21_spill] sm:$0xff] }
 0x375   :  { %6356 = vmatprep.subr.bf16.mxu0 %v8791_v13  ;;  %6388 = vmatprep.subr.bf16.mxu1 %v8793_v16  ;;  %v12154_v13 = vld [vmem:[#allocation22_spill] sm:$0xff]  ;;  %v12155_v16 = vld [vmem:[#allocation23_spill] sm:$0xff] }
 0x378   :  { %6358 = vmatpush1.bf16.msra.mxu0 %v8815_v12  ;;  %6390 = vmatpush1.bf16.msra.mxu1 %v8817_v63  ;;  %v12156_v12 = vld [vmem:[#allocation24_spill] sm:$0xff]  ;;  %v12157_v63 = vld [vmem:[#allocation25_spill] sm:$0xff] }
 0x379   :  { %6360 = vmatprep.subr.bf16.mxu0 %v8827_v36  ;;  %6392 = vmatprep.subr.bf16.mxu1 %v8829_v11  ;;  %v12158_v36 = vld [vmem:[#allocation26_spill] sm:$0xff]  ;;  %v12159_v11 = vld [vmem:[#allocation27_spill] sm:$0xff] }
 0x37c   :  { %6362 = vmatpush1.bf16.msra.mxu0 %v8851_v14  ;;  %6394 = vmatpush1.bf16.msra.mxu1 %v8853_v17  ;;  %v12160_v14 = vld [vmem:[#allocation28_spill] sm:$0xff]  ;;  %v12161_v17 = vld [vmem:[#allocation29_spill] sm:$0xff] }
 0x37d   :  { %6364 = vmatprep.subr.bf16.mxu0 %v8863_v30  ;;  %6396 = vmatprep.subr.bf16.mxu1 %v8865_v33  ;;  %v12162_v30 = vld [vmem:[#allocation30_spill] sm:$0xff]  ;;  %v12163_v33 = vld [vmem:[#allocation31_spill] sm:$0xff] }
 0x380   :  { %6366 = vmatpush1.bf16.msra.mxu0 %v8887_v10  ;;  %6398 = vmatpush1.bf16.msra.mxu1 %v8889_v18  ;;  %v12164_v10 = vld [vmem:[#allocation32_spill] sm:$0xff]  ;;  %v12165_v18 = vld [vmem:[#allocation33_spill] sm:$0xff] }
 0x381   :  { %6368 = vmatprep.subr.bf16.mxu0 %v8899_v60  ;;  %6400 = vmatprep.subr.bf16.mxu1 %v8901_v61  ;;  %v12166_v60 = vld [vmem:[#allocation34_spill] sm:$0xff]  ;;  %v12167_v61 = vld [vmem:[#allocation35_spill] sm:$0xff] }
 0x384   :  { %6370 = vmatpush1.bf16.msra.mxu0 %v8923_v32  ;;  %6402 = vmatpush1.bf16.msra.mxu1 %v8925_v44  ;;  %v2090_v32 = vld [vmem:[%s11799_s4] sm:$0xf] }
 0x385   :  { %6372 = vmatprep.subr.bf16.mxu0 %v8932_v19  ;;  %6404 = vmatprep.subr.bf16.mxu1 %v8934_v56  ;;  %v12168_v44 = vld [vmem:[#allocation6_spill] sm:$0xff]  ;;  %v12169_v56 = vld [vmem:[#allocation8_spill] sm:$0xff]  ;;  %v2103_v50 = vrot.slane %v2090_v32, %v12171_v26 }
 0x386   :  { %v2095_v19 = vrot.slane %v2090_v32, %v12168_v44 }
 0x388   :  { %6374 = vmatpush1.bf16.msra.mxu0 %v8947_v38  ;;  %6406 = vmatpush1.bf16.msra.mxu1 %v8949_v40  ;;  %v2099_v38 = vrot.slane %v2090_v32, %v12169_v56 }
 0x389   :  { %6408 = vmatprep.subr.bf16.mxu0 %v8968_v9  ;;  %6440 = vmatprep.subr.bf16.mxu1 %v8979_v45 }
 0x38b   :  { %2276 = vmatmul.mubr.f32.vlgmr.msra.gmra.mrb[12].mxu0 %v1677_v22  ;;  %2347 = vmatmul.mubr.f32.vlgmr.msra.gmra.mrb[12].mxu1 %v1677_v22 }
 0x38c   :  { %6410 = vmatpush1.bf16.msra.mxu0 %v8981_v46  ;;  %6442 = vmatpush1.bf16.msra.mxu1 %v8990_v0 }
 0x38d   :  { %6412 = vmatprep.subr.bf16.mxu0 %v9004_v1  ;;  %6444 = vmatprep.subr.bf16.mxu1 %v9015_v54 }
 0x38e   :  { %2573 = vmatprep.mubr.f32.mxu0 %v12017_v5  ;;  %2644 = vmatprep.mubr.f32.mxu1 %v12017_v5 }
 0x390   :  { %6414 = vmatpush1.bf16.msra.mxu0 %v9017_v59  ;;  %6446 = vmatpush1.bf16.msra.mxu1 %v9026_v57  ;;  %v12170_v57 = vld [vmem:[#allocation7_spill] sm:$0xff] }
 0x391   :  { %6416 = vmatprep.subr.bf16.mxu0 %v12142_v4  ;;  %6448 = vmatprep.subr.bf16.mxu1 %v12143_v23  ;;  %v2107_v21 = vrot.slane %v2090_v32, %v12170_v57 }
 0x394   :  { %6418 = vmatpush1.bf16.msra.mxu0 %v12144_v37  ;;  %6450 = vmatpush1.bf16.msra.mxu1 %v12145_v42 }
 0x395   :  { %6420 = vmatprep.subr.bf16.mxu0 %v12146_v52  ;;  %6452 = vmatprep.subr.bf16.mxu1 %v12147_v55 }
 0x398   :  { %6422 = vmatpush1.bf16.msra.mxu0 %v12148_v27  ;;  %6454 = vmatpush1.bf16.msra.mxu1 %v12149_v31 }
 0x399   :  { %6424 = vmatprep.subr.bf16.mxu0 %v12150_v47  ;;  %6456 = vmatprep.subr.bf16.mxu1 %v12151_v51  ;;  %v12172_v47 = vld [vmem:[#allocation36_spill] sm:$0xff] }
 0x39c   :  { %6426 = vmatpush1.bf16.msra.mxu0 %v12152_v35  ;;  %6458 = vmatpush1.bf16.msra.mxu1 %v12153_v49  ;;  %v5710_v35 = vld [vmem:[%s11798_s0 + $0x60] sm:$0xff]  ;;  %v5711_v49 = vld [vmem:[%s11798_s0 + $0x68] sm:$0xff] }
 0x39d   :  { %6428 = vmatprep.subr.bf16.mxu0 %v12154_v13  ;;  %6460 = vmatprep.subr.bf16.mxu1 %v12155_v16 }
 0x3a0   :  { %6430 = vmatpush1.bf16.msra.mxu0 %v12156_v12  ;;  %6462 = vmatpush1.bf16.msra.mxu1 %v12157_v63 }
 0x3a1   :  { %6432 = vmatprep.subr.bf16.mxu0 %v12158_v36  ;;  %6464 = vmatprep.subr.bf16.mxu1 %v12159_v11 }
 0x3a4   :  { %6434 = vmatpush1.bf16.msra.mxu0 %v12160_v14  ;;  %6466 = vmatpush1.bf16.msra.mxu1 %v12161_v17 }
 0x3a5   :  { %6436 = vmatprep.subr.bf16.mxu0 %v12162_v30  ;;  %6468 = vmatprep.subr.bf16.mxu1 %v12163_v33  ;;  %v5713_v33 = vld [vmem:[%s11798_s0 + $0x78] sm:$0xff] }
 0x3a8   :  { %6438 = vmatpush1.bf16.msra.mxu0 %v12164_v10  ;;  %6470 = vmatpush1.bf16.msra.mxu1 %v12165_v18  ;;  %v5712_v18 = vld [vmem:[%s11798_s0 + $0x70] sm:$0xff] }
 0x3a9   :  { %6472 = vmatprep.subr.bf16.mxu0 %v12166_v60  ;;  %6504 = vmatprep.subr.bf16.mxu1 %v12167_v61 }
 0x43e   :  { %v2014_v40 = vpop.f32.mrb[10].mxu0  ;;  %v2085_v9 = vpop.f32.mrb[10].mxu1 }
 0x43f   :  { %v2112_v45 = vadd.f32 %v2095_v19, %v2014_v40  ;;  %v2016_v46 = vpop.f32.mrb[11].mxu0  ;;  %v2087_v0 = vpop.f32.mrb[11].mxu1  ;;  %v2114_v48 = vadd.f32 %v2103_v50, %v2085_v9  ;;  %v12179_v50 = vld [vmem:[#allocation43_spill] sm:$0xff] }
 0x440   :  { %v2113_v1 = vadd.f32 %v2099_v38, %v2016_v46  ;;  %v2115_v58 = vadd.f32 %v2107_v21, %v2087_v0  ;;  %v12173_v46 = vld [vmem:[#allocation37_spill] sm:$0xff]  ;;  %v12174_v0 = vld [vmem:[#allocation38_spill] sm:$0xff] }
 0x441   :  { %v5706_v54 = vmul.f32 -1.442695, %v2112_v45  ;;  %v12177_v21 = vld [vmem:[#allocation41_spill] sm:$0xff] }
 0x442   :  { %v5707_v59 = vmul.f32 -1.442695, %v2113_v1  ;;  %v5708_v25 = vmul.f32 -1.442695, %v2115_v58  ;;  %v12178_v58 = vld [vmem:[#allocation42_spill] sm:$0xff] }
 0x443   :  { %7416 = vpow2.f32 %v5706_v54  ;;  %v12175_v54 = vld [vmem:[#allocation39_spill] sm:$0xff] }
 0x444   :  { %7418 = vpow2.f32 %v5707_v59  ;;  %v12176_v59 = vld [vmem:[#allocation40_spill] sm:$0xff] }
 0x445   :  { %7420 = vpow2.f32 %v5708_v25  ;;  %v12180_v25 = vld [vmem:[#allocation44_spill] sm:$0xff] }
 0x446   :  { %7422 = vtanh.f32 %v2114_v48  ;;  %v12181_v48 = vld [vmem:[#allocation45_spill] sm:$0xff] }
 0x44d   :  { %v7417_v29 = vpop.eup %7416 }
 0x44e   :  { %v7419_v22 = vpop.eup %7418  ;;  %v2119_v4 = vadd.f32 1.0, %v7417_v29  ;;  %v12182_v29 = vld [vmem:[#allocation46_spill] sm:$0xff] }
 0x44f   :  { %v2125_v23 = vadd.f32 1.0, %v7419_v22  ;;  %v7421_v37 = vpop.eup %7420  ;;  %v12183_v22 = vld [vmem:[#allocation47_spill] sm:$0xff] }
 0x450   :  { %7424 = vrcp.f32 %v2119_v4  ;;  %v7423_v42 = vpop.eup %7422  ;;  %v2132_v31 = vadd.f32 1.0, %v7421_v37  ;;  %v12184_v4 = vld [vmem:[#allocation48_spill] sm:$0xff] }
 0x451   :  { %7426 = vrcp.f32 %v2125_v23 }
 0x452   :  { %7428 = vrcp.f32 %v2132_v31 }
 0x45a   :  { %v7425_v52 = vpop.eup %7424 }
 0x45b   :  { %v7427_v55 = vpop.eup %7426  ;;  %v2136_v27 = vmul.f32 %v7425_v52, %v7423_v42  ;;  %v12185_v52 = vld [vmem:[#allocation49_spill] sm:$0xff] }
 0x45c   :  { %v2135_v51 = vmul.f32 %v7427_v55, %v12172_v47  ;;  %v7429_v60 = vpop.eup %7428 }
 0x45e   :  { %v9651_v13 = vadd.f32 %v2136_v27, %v2135_v51  ;;  %v2277_v16 = vpop.f32.mrb[12].mxu0  ;;  %v2348_v12 = vpop.f32.mrb[12].mxu1 }
 0x45f   :  { %v2353_v63 = vadd.f32 %v5710_v35, %v2277_v16  ;;  %v2279_v36 = vpop.f32.mrb[13].mxu0  ;;  %v2350_v11 = vpop.f32.mrb[13].mxu1  ;;  %v2355_v19 = vadd.f32 %v5712_v18, %v2348_v12  ;;  %v12186_v35 = vld [vmem:[#allocation50_spill] sm:$0xff]  ;;  %v2859_v16 = vld [vmem:[%s11795_s1 + $0x48] sm:$0xff]  ;;  %v2865_v12 = vld [vmem:[%s11795_s1 + $0x78] sm:$0xff] }
 0x460   :  { %v2354_v14 = vadd.f32 %v5711_v49, %v2279_v36  ;;  %7430 = vtanh.f32 %v9651_v13  ;;  %v2356_v10 = vadd.f32 %v5713_v33, %v2350_v11  ;;  %v2864_v18 = vld [vmem:[%s11795_s1 + $0x70] sm:$0xff] }
 0x461   :  { %v5714_v17 = vmul.f32 -1.442695, %v2353_v63 }
 0x462   :  { %v5715_v30 = vmul.f32 -1.442695, %v2354_v14  ;;  %v5716_v32 = vmul.f32 -1.442695, %v2356_v10  ;;  %v2860_v10 = vld [vmem:[%s11795_s1 + $0x50] sm:$0xff] }
 0x463   :  { %7432 = vpow2.f32 %v5714_v17  ;;  %v2858_v17 = vld [vmem:[%s11795_s1 + $0x40] sm:$0xff] }
 0x464   :  { %7434 = vpow2.f32 %v5715_v30  ;;  %v2862_v30 = vld [vmem:[%s11795_s1 + $0x60] sm:$0xff] }
 0x465   :  { %7436 = vpow2.f32 %v5716_v32  ;;  %v2869_v32 = vld [vmem:[%s11795_s1 + $0x98] sm:$0xff] }
 0x466   :  { %7438 = vtanh.f32 %v2355_v19  ;;  %v2873_v19 = vld [vmem:[%s11795_s1 + $0xb8] sm:$0xff] }
 0x46a   :  { %v7431_v61 = vpop.eup %7430 }
 0x46b   :  { %v2139_v38 = vmul.f32 %v7431_v61, %v7429_v60  ;;  %v2867_v60 = vld [vmem:[%s11795_s1 + $0x88] sm:$0xff] }
 0x46c   :  { %v2871_v61 = vld [vmem:[%s11795_s1 + $0xa8] sm:$0xff] }
 0x46d   :  { %v7433_v40 = vpop.eup %7432  ;;  %5709 = vst [vmem:[%s11800_s5 + $0x10] sm:$0xff] %v2139_v38  ;;  %2574 = vmatmul.mubr.f32.vlgmr.msra.gmra.mrb[14].mxu0 %v2139_v38  ;;  %2645 = vmatmul.mubr.f32.vlgmr.msra.gmra.mrb[14].mxu1 %v2139_v38  ;;  %v9779_v38 = vpack.c.bf16 %v2862_v30, %v2858_v17  ;;  %v2892_v17 = vld [vmem:[%s11795_s1 + $0x150] sm:$0xff] }
 0x46e   :  { %v7435_v9 = vpop.eup %7434  ;;  %v2360_v45 = vadd.f32 1.0, %v7433_v40  ;;  %6474 = vmatpush1.bf16.msra.mxu0 %v12173_v46  ;;  %6506 = vmatpush1.bf16.msra.mxu1 %v12174_v0  ;;  %v9781_v40 = vpack.c.bf16 %v2864_v18, %v2860_v10  ;;  %v9791_v46 = vpack.c.bf16 %v2871_v61, %v2867_v60  ;;  %v9793_v0 = vpack.c.bf16 %v2873_v19, %v2869_v32  ;;  %v2896_v30 = vld [vmem:[%s11795_s1 + $0x170] sm:$0xff]  ;;  %v2899_v10 = vld [vmem:[%s11795_s1 + $0x188] sm:$0xff]  ;;  %v2901_v60 = vld [vmem:[%s11795_s1 + $0x198] sm:$0xff] }
 0x46f   :  { %v2366_v1 = vadd.f32 1.0, %v7435_v9  ;;  %6476 = vmatprep.subr.bf16.mxu0 %v12175_v54  ;;  %6508 = vmatprep.subr.bf16.mxu1 %v12176_v59  ;;  %v7437_v23 = vpop.eup %7436  ;;  %v2866_v9 = vld [vmem:[%s11795_s1 + $0x80] sm:$0xff]  ;;  %v2872_v54 = vld [vmem:[%s11795_s1 + $0xb0] sm:$0xff]  ;;  %v2875_v59 = vld [vmem:[%s11795_s1 + $0xc8] sm:$0xff]  ;;  %v9927_v19 = vpack.c.bf16 %v2896_v30, %v2892_v17 }
 0x470   :  { %7440 = vrcp.f32 %v2360_v45  ;;  %2715 = vmatprep.mubr.f32.mxu0 %v12017_v5  ;;  %2786 = vmatprep.mubr.f32.mxu1 %v12017_v5  ;;  %v7439_v37 = vpop.eup %7438  ;;  %v2373_v31 = vadd.f32 1.0, %v7437_v23  ;;  %v2870_v45 = vld [vmem:[%s11795_s1 + $0xa0] sm:$0xff]  ;;  %v2903_v18 = vld [vmem:[%s11795_s1 + $0x1a8] sm:$0xff]  ;;  %v2905_v61 = vld [vmem:[%s11795_s1 + $0x1b8] sm:$0xff] }
 0x471   :  { %7442 = vrcp.f32 %v2366_v1  ;;  %v2868_v1 = vld [vmem:[%s11795_s1 + $0x90] sm:$0xff] }
 0x472   :  { %6478 = vmatpush1.bf16.msra.mxu0 %v12177_v21  ;;  %6510 = vmatpush1.bf16.msra.mxu1 %v12178_v58  ;;  %7444 = vrcp.f32 %v2373_v31  ;;  %v2879_v21 = vld [vmem:[%s11795_s1 + $0xe8] sm:$0xff]  ;;  %v2877_v58 = vld [vmem:[%s11795_s1 + $0xd8] sm:$0xff] }
 0x473   :  { %6480 = vmatprep.subr.bf16.mxu0 %v12179_v50  ;;  %6512 = vmatprep.subr.bf16.mxu1 %v12180_v25  ;;  %v2881_v50 = vld [vmem:[%s11795_s1 + $0xf8] sm:$0xff]  ;;  %v9817_v25 = vpack.c.bf16 %v2870_v45, %v2866_v9  ;;  %v2898_v9 = vld [vmem:[%s11795_s1 + $0x180] sm:$0xff] }
 0x474   :  { %v9831_v23 = vpack.c.bf16 %v2881_v50, %v2877_v58  ;;  %v2889_v31 = vld [vmem:[%s11795_s1 + $0x138] sm:$0xff]  ;;  %v2902_v45 = vld [vmem:[%s11795_s1 + $0x1a0] sm:$0xff]  ;;  %v2907_v58 = vld [vmem:[%s11795_s1 + $0x1c8] sm:$0xff] }
 0x475   :  { %v2911_v50 = vld [vmem:[%s11795_s1 + $0x1e8] sm:$0xff] }
 0x476   :  { %6482 = vmatpush1.bf16.msra.mxu0 %v12181_v48  ;;  %6514 = vmatpush1.bf16.msra.mxu1 %v12182_v29  ;;  %v9819_v48 = vpack.c.bf16 %v2872_v54, %v2868_v1  ;;  %v2874_v29 = vld [vmem:[%s11795_s1 + $0xc0] sm:$0xff]  ;;  %v9937_v1 = vpack.c.bf16 %v2903_v18, %v2899_v10  ;;  %v9939_v54 = vpack.c.bf16 %v2905_v61, %v2901_v60  ;;  %v3150_v10 = vld [vmem:[%s11796_s3 + $0x10] sm:$0xff]  ;;  %v3157_v61 = vld [vmem:[%s11796_s3 + $0x48] sm:$0xff] }
 0x477   :  { %6484 = vmatprep.subr.bf16.mxu0 %v12183_v22  ;;  %6516 = vmatprep.subr.bf16.mxu1 %v12184_v4  ;;  %v2878_v22 = vld [vmem:[%s11795_s1 + $0xe0] sm:$0xff]  ;;  %v9829_v4 = vpack.c.bf16 %v2879_v21, %v2875_v59  ;;  %v2900_v59 = vld [vmem:[%s11795_s1 + $0x190] sm:$0xff] }
 0x478   :  { %v2904_v21 = vld [vmem:[%s11795_s1 + $0x1b0] sm:$0xff] }
 0x479   :  { %v3154_v18 = vld [vmem:[%s11796_s3 + $0x30] sm:$0xff] }
 0x47a   :  { %v7441_v42 = vpop.eup %7440  ;;  %6486 = vmatpush1.bf16.msra.mxu0 %v9423_v2  ;;  %6518 = vmatpush1.bf16.msra.mxu1 %v12185_v52  ;;  %v12187_v2 = vld [vmem:[#allocation51_spill] sm:$0xff]  ;;  %v10028_v60 = vpack.c.bf16 %v3154_v18, %v3150_v10 }
 0x47b   :  { %v7443_v55 = vpop.eup %7442  ;;  %v2377_v27 = vmul.f32 %v7441_v42, %v7439_v37  ;;  %6488 = vmatprep.subr.bf16.mxu0 %v9435_v15  ;;  %6520 = vmatprep.subr.bf16.mxu1 %v9437_v20  ;;  %v12188_v15 = vld [vmem:[#allocation52_spill] sm:$0xff]  ;;  %v2851_v20 = vld [vmem:[%s11795_s1 + $0x8] sm:$0xff] }
 0x47c   :  { %v2376_v47 = vmul.f32 %v7443_v55, %v9494_v28  ;;  %v2857_v28 = vld [vmem:[%s11795_s1 + $0x38] sm:$0xff]  ;;  %v7445_v63 = vpop.eup %7444  ;;  %v2876_v37 = vld [vmem:[%s11795_s1 + $0xd0] sm:$0xff]  ;;  %v2883_v52 = vld [vmem:[%s11795_s1 + $0x108] sm:$0xff] }
 0x47d   :  { %v2880_v42 = vld [vmem:[%s11795_s1 + $0xf0] sm:$0xff]  ;;  %v2887_v55 = vld [vmem:[%s11795_s1 + $0x128] sm:$0xff] }
 0x47e   :  { %v9682_v51 = vadd.f32 %v2377_v27, %v2376_v47  ;;  %6490 = vmatpush1.bf16.msra.mxu0 %v9459_v53  ;;  %6522 = vmatpush1.bf16.msra.mxu1 %v9461_v7  ;;  %v2855_v7 = vld [vmem:[%s11795_s1 + $0x28] sm:$0xff]  ;;  %v2853_v53 = vld [vmem:[%s11795_s1 + $0x18] sm:$0xff]  ;;  %v9853_v47 = vpack.c.bf16 %v2878_v22, %v2874_v29 }
 0x47f   :  { %6492 = vmatprep.subr.bf16.mxu0 %v12186_v35  ;;  %6524 = vmatprep.subr.bf16.mxu1 %v12187_v2  ;;  %v9717_v49 = vpack.c.bf16 %v2857_v28, %v2853_v53  ;;  %v2885_v27 = vld [vmem:[%s11795_s1 + $0x118] sm:$0xff]  ;;  %v9855_v35 = vpack.c.bf16 %v2880_v42, %v2876_v37  ;;  %v2882_v2 = vld [vmem:[%s11795_s1 + $0x100] sm:$0xff]  ;;  %v2884_v53 = vld [vmem:[%s11795_s1 + $0x110] sm:$0xff]  ;;  %v9961_v37 = vpack.c.bf16 %v2902_v45, %v2898_v9 }
 0x480   :  { %7446 = vtanh.f32 %v9682_v51  ;;  %v2888_v28 = vld [vmem:[%s11795_s1 + $0x130] sm:$0xff]  ;;  %v2909_v29 = vld [vmem:[%s11795_s1 + $0x1d8] sm:$0xff]  ;;  %v9963_v42 = vpack.c.bf16 %v2904_v21, %v2900_v59  ;;  %v3161_v9 = vld [vmem:[%s11796_s3 + $0x68] sm:$0xff] }
 0x481   :  { %v2913_v22 = vld [vmem:[%s11795_s1 + $0x1f8] sm:$0xff]  ;;  %v10042_v59 = vpack.c.bf16 %v3161_v9, %v3157_v61  ;;  %v3166_v61 = vld [vmem:[%s11796_s3 + $0x90] sm:$0xff] }
 0x482   :  { %6494 = vmatpush1.bf16.msra.mxu0 %v9498_v34  ;;  %6526 = vmatpush1.bf16.msra.mxu1 %v12188_v15  ;;  %v2850_v34 = vld [vmem:[%s11795_s1] sm:$0xff]  ;;  %v3159_v45 = vld [vmem:[%s11796_s3 + $0x58] sm:$0xff]  ;;  %v3170_v9 = vld [vmem:[%s11796_s3 + $0xb0] sm:$0xff] }
 0x483   :  { %6496 = vmatprep.subr.bf16.mxu0 %v9510_v3  ;;  %6528 = vmatprep.subr.bf16.mxu1 %v9512_v6  ;;  %v2854_v3 = vld [vmem:[%s11795_s1 + $0x20] sm:$0xff]  ;;  %v9715_v6 = vpack.c.bf16 %v2855_v7, %v2851_v20  ;;  %v9865_v20 = vpack.c.bf16 %v2887_v55, %v2883_v52  ;;  %v9867_v7 = vpack.c.bf16 %v2889_v31, %v2885_v27  ;;  %v3163_v21 = vld [vmem:[%s11796_s3 + $0x78] sm:$0xff] }
 0x484   :  { %v9739_v11 = vpack.c.bf16 %v2854_v3, %v2850_v34  ;;  %v2886_v15 = vld [vmem:[%s11795_s1 + $0x120] sm:$0xff]  ;;  %v2891_v34 = vld [vmem:[%s11795_s1 + $0x148] sm:$0xff]  ;;  %v9970_v55 = vpack.c.bf16 %v2911_v50, %v2907_v58  ;;  %v9972_v27 = vpack.c.bf16 %v2913_v22, %v2909_v29  ;;  %v10053_v29 = vpack.c.bf16 %v3163_v21, %v3159_v45 }
 0x485   :  { %v2895_v3 = vld [vmem:[%s11795_s1 + $0x168] sm:$0xff]  ;;  %v2906_v52 = vld [vmem:[%s11795_s1 + $0x1c0] sm:$0xff]  ;;  %v10100_v45 = vpack.c.bf16 %v3170_v9, %v3166_v61 }
 0x486   :  { %6498 = vmatpush1.bf16.msra.mxu0 %v9535_v24  ;;  %6530 = vmatpush1.bf16.msra.mxu1 %v9537_v62  ;;  %v2852_v24 = vld [vmem:[%s11795_s1 + $0x10] sm:$0xff]  ;;  %v2910_v31 = vld [vmem:[%s11795_s1 + $0x1e0] sm:$0xff]  ;;  %v3173_v21 = vld [vmem:[%s11796_s3 + $0xc8] sm:$0xff] }
 0x487   :  { %6500 = vmatprep.subr.bf16.mxu0 %v9544_v39  ;;  %6532 = vmatprep.subr.bf16.mxu1 %v9546_v8  ;;  %v2856_v62 = vld [vmem:[%s11795_s1 + $0x30] sm:$0xff]  ;;  %v2863_v8 = vld [vmem:[%s11795_s1 + $0x68] sm:$0xff]  ;;  %v2861_v39 = vld [vmem:[%s11795_s1 + $0x58] sm:$0xff]  ;;  %12192 = vst [vmem:[#allocation12_spill] sm:$0xff] %v10100_v45 }
 0x488   :  { %v9741_v14 = vpack.c.bf16 %v2856_v62, %v2852_v24  ;;  %v2893_v24 = vld [vmem:[%s11795_s1 + $0x158] sm:$0xff]  ;;  %v3156_v58 = vld [vmem:[%s11796_s3 + $0x40] sm:$0xff]  ;;  %v3181_v9 = vld [vmem:[%s11796_s3 + $0x108] sm:$0xff] }
 0x489   :  { %v2897_v62 = vld [vmem:[%s11795_s1 + $0x178] sm:$0xff]  ;;  %v3160_v50 = vld [vmem:[%s11796_s3 + $0x60] sm:$0xff] }
 0x48a   :  { %v7447_v36 = vpop.eup %7446  ;;  %6502 = vmatpush1.bf16.msra.mxu0 %v9559_v43  ;;  %6534 = vmatpush1.bf16.msra.mxu1 %v9561_v41  ;;  %v9753_v43 = vpack.c.bf16 %v2863_v8, %v2859_v16  ;;  %v9755_v41 = vpack.c.bf16 %v2865_v12, %v2861_v39  ;;  %v9889_v16 = vpack.c.bf16 %v2886_v15, %v2882_v2  ;;  %v2890_v39 = vld [vmem:[%s11795_s1 + $0x140] sm:$0xff]  ;;  %v2908_v2 = vld [vmem:[%s11795_s1 + $0x1d0] sm:$0xff] }
 0x48b   :  { %v9749_v33 = vmul.f32 %v7447_v36, %v7445_v63  ;;  %6536 = vmatprep.subr.bf16.mxu0 %v9715_v6  ;;  %6568 = vmatprep.subr.bf16.mxu1 %v9717_v49  ;;  %v9891_v8 = vpack.c.bf16 %v2888_v28, %v2884_v53  ;;  %v2894_v12 = vld [vmem:[%s11795_s1 + $0x160] sm:$0xff]  ;;  %v9901_v63 = vpack.c.bf16 %v2895_v3, %v2891_v34  ;;  %v2912_v15 = vld [vmem:[%s11795_s1 + $0x1f0] sm:$0xff]  ;;  %v3149_v34 = vld [vmem:[%s11796_s3 + $0x8] sm:$0xff] }
 0x48c   :  { %v9903_v36 = vpack.c.bf16 %v2897_v62, %v2893_v24  ;;  %v9925_v32 = vpack.c.bf16 %v2894_v12, %v2890_v39  ;;  %v9985_v53 = vpack.c.bf16 %v2910_v31, %v2906_v52  ;;  %v9987_v28 = vpack.c.bf16 %v2912_v15, %v2908_v2  ;;  %v3153_v3 = vld [vmem:[%s11796_s3 + $0x28] sm:$0xff]  ;;  %v3151_v24 = vld [vmem:[%s11796_s3 + $0x18] sm:$0xff]  ;;  %v3148_v39 = vld [vmem:[%s11796_s3] sm:$0xff] }
 0x48d   :  { %2716 = vmatmul.mubr.f32.vlgmr.msra.gmra.mrb[14].mxu0 %v9749_v33  ;;  %2787 = vmatmul.mubr.f32.vlgmr.msra.gmra.mrb[14].mxu1 %v9749_v33  ;;  %v10006_v62 = vpack.c.bf16 %v3153_v3, %v3149_v34  ;;  %v3152_v12 = vld [vmem:[%s11796_s3 + $0x20] sm:$0xff]  ;;  %v10055_v22 = vpack.c.bf16 %v3160_v50, %v3156_v58  ;;  %v3158_v52 = vld [vmem:[%s11796_s3 + $0x50] sm:$0xff]  ;;  %v3165_v15 = vld [vmem:[%s11796_s3 + $0x88] sm:$0xff] }
 0x48e   :  { %6538 = vmatpush1.bf16.msra.mxu0 %v9739_v11  ;;  %6570 = vmatpush1.bf16.msra.mxu1 %v9741_v14  ;;  %v10019_v30 = vpack.c.bf16 %v3152_v12, %v3148_v39  ;;  %v3162_v31 = vld [vmem:[%s11796_s3 + $0x70] sm:$0xff]  ;;  %v3169_v34 = vld [vmem:[%s11796_s3 + $0xa8] sm:$0xff]  ;;  %v3167_v3 = vld [vmem:[%s11796_s3 + $0x98] sm:$0xff] }
 0x48f   :  { %6540 = vmatprep.subr.bf16.mxu0 %v9753_v43  ;;  %6572 = vmatprep.subr.bf16.mxu1 %v9755_v41  ;;  %v10064_v2 = vpack.c.bf16 %v3162_v31, %v3158_v52  ;;  %v3164_v39 = vld [vmem:[%s11796_s3 + $0x80] sm:$0xff]  ;;  %v3177_v58 = vld [vmem:[%s11796_s3 + $0xe8] sm:$0xff]  ;;  %v3175_v50 = vld [vmem:[%s11796_s3 + $0xd8] sm:$0xff] }
 0x490   :  { %2978 = vmatprep.mubr.f32.mxu0 %v12017_v5  ;;  %3049 = vmatprep.mubr.f32.mxu1 %v12017_v5  ;;  %v3168_v12 = vld [vmem:[%s11796_s3 + $0xa0] sm:$0xff]  ;;  %v10114_v52 = vpack.c.bf16 %v3177_v58, %v3173_v21  ;;  %v3179_v31 = vld [vmem:[%s11796_s3 + $0xf8] sm:$0xff]  ;;  %v3185_v21 = vld [vmem:[%s11796_s3 + $0x128] sm:$0xff] }
 0x491   :  { %v10091_v18 = vpack.c.bf16 %v3168_v12, %v3164_v39  ;;  %v3174_v39 = vld [vmem:[%s11796_s3 + $0xd0] sm:$0xff]  ;;  %v3183_v58 = vld [vmem:[%s11796_s3 + $0x118] sm:$0xff] }
 0x492   :  { %6542 = vmatpush1.bf16.msra.mxu0 %v9779_v38  ;;  %6574 = vmatpush1.bf16.msra.mxu1 %v9781_v40  ;;  %12193 = vst [vmem:[#allocation13_spill] sm:$0xff] %v10114_v52  ;;  %v3178_v12 = vld [vmem:[%s11796_s3 + $0xf0] sm:$0xff] }
 0x493   :  { %6544 = vmatprep.subr.bf16.mxu0 %v9791_v46  ;;  %6576 = vmatprep.subr.bf16.mxu1 %v9793_v0  ;;  %12191 = vst [vmem:[#allocation11_spill] sm:$0xff] %v10091_v18  ;;  %v10136_v61 = vpack.c.bf16 %v3178_v12, %v3174_v39 }
 0x495   :  { %12196 = vst [vmem:[#allocation16_spill] sm:$0xff] %v10136_v61 }
 0x496   :  { %6546 = vmatpush1.bf16.msra.mxu0 %v9817_v25  ;;  %6578 = vmatpush1.bf16.msra.mxu1 %v9819_v48 }
 0x497   :  { %6548 = vmatprep.subr.bf16.mxu0 %v9829_v4  ;;  %6580 = vmatprep.subr.bf16.mxu1 %v9831_v23 }
 0x49a   :  { %6550 = vmatpush1.bf16.msra.mxu0 %v9853_v47  ;;  %6582 = vmatpush1.bf16.msra.mxu1 %v9855_v35 }
 0x49b   :  { %6552 = vmatprep.subr.bf16.mxu0 %v9865_v20  ;;  %6584 = vmatprep.subr.bf16.mxu1 %v9867_v7 }
 0x49e   :  { %6554 = vmatpush1.bf16.msra.mxu0 %v9889_v16  ;;  %6586 = vmatpush1.bf16.msra.mxu1 %v9891_v8 }
 0x49f   :  { %6556 = vmatprep.subr.bf16.mxu0 %v9901_v63  ;;  %6588 = vmatprep.subr.bf16.mxu1 %v9903_v36 }
 0x4a2   :  { %6558 = vmatpush1.bf16.msra.mxu0 %v9925_v32  ;;  %6590 = vmatpush1.bf16.msra.mxu1 %v9927_v19 }
 0x4a3   :  { %6560 = vmatprep.subr.bf16.mxu0 %v9937_v1  ;;  %6592 = vmatprep.subr.bf16.mxu1 %v9939_v54 }
 0x4a6   :  { %6562 = vmatpush1.bf16.msra.mxu0 %v9961_v37  ;;  %6594 = vmatpush1.bf16.msra.mxu1 %v9963_v42 }
 0x4a7   :  { %6564 = vmatprep.subr.bf16.mxu0 %v9970_v55  ;;  %6596 = vmatprep.subr.bf16.mxu1 %v9972_v27 }
 0x4aa   :  { %6566 = vmatpush1.bf16.msra.mxu0 %v9985_v53  ;;  %6598 = vmatpush1.bf16.msra.mxu1 %v9987_v28 }
 0x4ab   :  { %6600 = vmatprep.subr.bf16.mxu0 %v10006_v62 }
 0x4ad   :  { %2979 = vmatmul.mubr.f32.vlgmr.msra.gmra.mrb[16].mxu0 %v9749_v33  ;;  %3050 = vmatmul.mubr.f32.vlgmr.msra.gmra.mrb[16].mxu1 %v9749_v33  ;;  %v3155_v33 = vld [vmem:[%s11796_s3 + $0x38] sm:$0xff] }
 0x4ae   :  { %3276 = vmatprep.mubr.f32.mxu0 %v12017_v5  ;;  %3347 = vmatprep.mubr.f32.mxu1 %v12017_v5  ;;  %v10017_v17 = vpack.c.bf16 %v3155_v33, %v3151_v24  ;;  %v10078_v24 = vpack.c.bf16 %v3169_v34, %v3165_v15  ;;  %v3171_v33 = vld [vmem:[%s11796_s3 + $0xb8] sm:$0xff]  ;;  %v3172_v15 = vld [vmem:[%s11796_s3 + $0xc0] sm:$0xff] }
 0x4af   :  { %6602 = vmatpush1.bf16.msra.mxu0 %v10019_v30  ;;  %v10089_v10 = vpack.c.bf16 %v3171_v33, %v3167_v3  ;;  %v3176_v34 = vld [vmem:[%s11796_s3 + $0xe0] sm:$0xff]  ;;  %v10125_v3 = vpack.c.bf16 %v3179_v31, %v3175_v50  ;;  %v10150_v50 = vpack.c.bf16 %v3185_v21, %v3181_v9  ;;  %v3187_v31 = vld [vmem:[%s11796_s3 + $0x138] sm:$0xff]  ;;  %v3182_v9 = vld [vmem:[%s11796_s3 + $0x110] sm:$0xff] }
 0x4b0   :  { %6632 = vmatprep.subr.bf16.mxu1 %v10017_v17  ;;  %6604 = vmatprep.subr.bf16.mxu0 %v10042_v59  ;;  %12189 = vst [vmem:[#allocation53_spill] sm:$0xff] %v10078_v24  ;;  %v10127_v33 = vpack.c.bf16 %v3176_v34, %v3172_v15  ;;  %v3180_v15 = vld [vmem:[%s11796_s3 + $0x100] sm:$0xff]  ;;  %v10161_v39 = vpack.c.bf16 %v3187_v31, %v3183_v58  ;;  %v3186_v21 = vld [vmem:[%s11796_s3 + $0x130] sm:$0xff]  ;;  %v3189_v58 = vld [vmem:[%s11796_s3 + $0x148] sm:$0xff] }
 0x4b1   :  { %6634 = vmatpush1.bf16.msra.mxu1 %v10028_v60  ;;  %12190 = vst [vmem:[#allocation10_spill] sm:$0xff] %v10089_v10  ;;  %12194 = vst [vmem:[#allocation14_spill] sm:$0xff] %v10125_v3  ;;  %v3184_v34 = vld [vmem:[%s11796_s3 + $0x120] sm:$0xff]  ;;  %v3193_v31 = vld [vmem:[%s11796_s3 + $0x168] sm:$0xff] }
 0x4b2   :  { %6636 = vmatprep.subr.bf16.mxu1 %v10053_v29  ;;  %12195 = vst [vmem:[#allocation15_spill] sm:$0xff] %v10127_v33  ;;  %12197 = vst [vmem:[#allocation17_spill] sm:$0xff] %v10150_v50  ;;  %v10163_v12 = vpack.c.bf16 %v3184_v34, %v3180_v15  ;;  %v10183_v15 = vpack.c.bf16 %v3193_v31, %v3189_v58  ;;  %v3191_v34 = vld [vmem:[%s11796_s3 + $0x158] sm:$0xff]  ;;  %v3192_v58 = vld [vmem:[%s11796_s3 + $0x160] sm:$0xff] }
 0x4b3   :  { %6606 = vmatpush1.bf16.msra.mxu0 %v10055_v22  ;;  %12198 = vst [vmem:[#allocation18_spill] sm:$0xff] %v10161_v39  ;;  %v3190_v31 = vld [vmem:[%s11796_s3 + $0x150] sm:$0xff] }
 0x4b4   :  { %6608 = vmatprep.subr.bf16.mxu0 %v10078_v24  ;;  %12199 = vst [vmem:[#allocation19_spill] sm:$0xff] %v10163_v12  ;;  %12201 = vst [vmem:[#allocation21_spill] sm:$0xff] %v10183_v15 }
 0x4b5   :  { %6638 = vmatpush1.bf16.msra.mxu1 %v10064_v2 }
 0x4b6   :  { %6640 = vmatprep.subr.bf16.mxu1 %v10089_v10 }
 0x4b7   :  { %6610 = vmatpush1.bf16.msra.mxu0 %v10091_v18 }
 0x4b8   :  { %6612 = vmatprep.subr.bf16.mxu0 %v10114_v52 }
 0x4b9   :  { %6642 = vmatpush1.bf16.msra.mxu1 %v10100_v45 }
 0x4ba   :  { %6644 = vmatprep.subr.bf16.mxu1 %v10125_v3 }
 0x4bb   :  { %6614 = vmatpush1.bf16.msra.mxu0 %v10127_v33 }
 0x4bc   :  { %6616 = vmatprep.subr.bf16.mxu0 %v10150_v50  ;;  %v3199_v50 = vld [vmem:[%s11796_s3 + $0x198] sm:$0xff] }
 0x4bd   :  { %6646 = vmatpush1.bf16.msra.mxu1 %v10136_v61  ;;  %v10172_v61 = vpack.c.bf16 %v3186_v21, %v3182_v9  ;;  %v3195_v9 = vld [vmem:[%s11796_s3 + $0x178] sm:$0xff] }
 0x4be   :  { %6648 = vmatprep.subr.bf16.mxu1 %v10161_v39  ;;  %v10191_v21 = vpack.c.bf16 %v3195_v9, %v3191_v34  ;;  %v3201_v39 = vld [vmem:[%s11796_s3 + $0x1a8] sm:$0xff] }
 0x4bf   :  { %12200 = vst [vmem:[#allocation20_spill] sm:$0xff] %v10172_v61  ;;  %6618 = vmatpush1.bf16.msra.mxu0 %v10163_v12  ;;  %v3188_v12 = vld [vmem:[%s11796_s3 + $0x140] sm:$0xff] }
 0x4c0   :  { %12202 = vst [vmem:[#allocation22_spill] sm:$0xff] %v10191_v21  ;;  %6620 = vmatprep.subr.bf16.mxu0 %v10183_v15  ;;  %v10207_v34 = vpack.c.bf16 %v3192_v58, %v3188_v12  ;;  %v3197_v15 = vld [vmem:[%s11796_s3 + $0x188] sm:$0xff]  ;;  %v3203_v12 = vld [vmem:[%s11796_s3 + $0x1b8] sm:$0xff]  ;;  %v3200_v58 = vld [vmem:[%s11796_s3 + $0x1a0] sm:$0xff] }
 0x4c1   :  { %6650 = vmatpush1.bf16.msra.mxu1 %v10172_v61  ;;  %v3194_v61 = vld [vmem:[%s11796_s3 + $0x170] sm:$0xff]  ;;  %v10220_v33 = vpack.c.bf16 %v3201_v39, %v3197_v15 }
 0x4c2   :  { %6652 = vmatprep.subr.bf16.mxu1 %v10191_v21  ;;  %12203 = vst [vmem:[#allocation23_spill] sm:$0xff] %v10207_v34  ;;  %v10209_v9 = vpack.c.bf16 %v3194_v61, %v3190_v31  ;;  %v3196_v61 = vld [vmem:[%s11796_s3 + $0x180] sm:$0xff]  ;;  %v10233_v31 = vpack.c.bf16 %v3203_v12, %v3199_v50  ;;  %v3198_v15 = vld [vmem:[%s11796_s3 + $0x190] sm:$0xff]  ;;  %v3205_v50 = vld [vmem:[%s11796_s3 + $0x1c8] sm:$0xff] }
 0x4c3   :  { %12205 = vst [vmem:[#allocation25_spill] sm:$0xff] %v10220_v33  ;;  %6622 = vmatpush1.bf16.msra.mxu0 %v10207_v34  ;;  %v10235_v39 = vpack.c.bf16 %v3200_v58, %v3196_v61  ;;  %v3202_v21 = vld [vmem:[%s11796_s3 + $0x1b0] sm:$0xff]  ;;  %v3209_v12 = vld [vmem:[%s11796_s3 + $0x1e8] sm:$0xff]  ;;  %v3207_v61 = vld [vmem:[%s11796_s3 + $0x1d8] sm:$0xff] }
 0x4c4   :  { %12204 = vst [vmem:[#allocation24_spill] sm:$0xff] %v10209_v9  ;;  %12206 = vst [vmem:[#allocation26_spill] sm:$0xff] %v10233_v31  ;;  %6624 = vmatprep.subr.bf16.mxu0 %v10220_v33  ;;  %v10244_v3 = vpack.c.bf16 %v3202_v21, %v3198_v15  ;;  %v10256_v58 = vpack.c.bf16 %v3209_v12, %v3205_v50  ;;  %v3211_v21 = vld [vmem:[%s11796_s3 + $0x1f8] sm:$0xff]  ;;  %v3204_v15 = vld [vmem:[%s11796_s3 + $0x1c0] sm:$0xff] }
 0x4c5   :  { %6654 = vmatpush1.bf16.msra.mxu1 %v10209_v9  ;;  %12207 = vst [vmem:[#allocation27_spill] sm:$0xff] %v10235_v39  ;;  %v10269_v33 = vpack.c.bf16 %v3211_v21, %v3207_v61  ;;  %v3206_v12 = vld [vmem:[%s11796_s3 + $0x1d0] sm:$0xff]  ;;  %v3085_v61 = vld [vmem:[%s11797_s2 + $0x8] sm:$0xff]  ;;  %v3087_v21 = vld [vmem:[%s11797_s2 + $0x18] sm:$0xff] }
 0x4c6   :  { %12208 = vst [vmem:[#allocation28_spill] sm:$0xff] %v10244_v3  ;;  %6656 = vmatprep.subr.bf16.mxu1 %v10233_v31  ;;  %12209 = vst [vmem:[#allocation29_spill] sm:$0xff] %v10256_v58  ;;  %v3208_v31 = vld [vmem:[%s11796_s3 + $0x1e0] sm:$0xff]  ;;  %v3210_v9 = vld [vmem:[%s11796_s3 + $0x1f0] sm:$0xff] }
 0x4c7   :  { %6626 = vmatpush1.bf16.msra.mxu0 %v10235_v39  ;;  %12210 = vst [vmem:[#allocation30_spill] sm:$0xff] %v10269_v33  ;;  %v10271_v50 = vpack.c.bf16 %v3208_v31, %v3204_v15  ;;  %v10280_v34 = vpack.c.bf16 %v3210_v9, %v3206_v12  ;;  %v3089_v31 = vld [vmem:[%s11797_s2 + $0x28] sm:$0xff]  ;;  %v3091_v9 = vld [vmem:[%s11797_s2 + $0x38] sm:$0xff] }
 0x4c8   :  { %6628 = vmatprep.subr.bf16.mxu0 %v10256_v58  ;;  %v10292_v15 = vpack.c.bf16 %v3089_v31, %v3085_v61  ;;  %v10299_v12 = vpack.c.bf16 %v3091_v9, %v3087_v21 }
 0x4c9   :  { %6658 = vmatpush1.bf16.msra.mxu1 %v10244_v3  ;;  %12211 = vst [vmem:[#allocation31_spill] sm:$0xff] %v10271_v50  ;;  %12212 = vst [vmem:[#allocation32_spill] sm:$0xff] %v10280_v34 }
 0x4ca   :  { %6660 = vmatprep.subr.bf16.mxu1 %v10269_v33  ;;  %12213 = vst [vmem:[#allocation33_spill] sm:$0xff] %v10292_v15  ;;  %12214 = vst [vmem:[#allocation34_spill] sm:$0xff] %v10299_v12  ;;  %v2793_v33 = vld [vmem:[%s11799_s4] sm:$0xf] }
 0x4cb   :  { %6630 = vmatpush1.bf16.msra.mxu0 %v10271_v50  ;;  %v2798_v61 = vrot.slane %v2793_v33, %v12168_v44  ;;  %v2802_v31 = vrot.slane %v2793_v33, %v12169_v56  ;;  %v2806_v45 = vrot.slane %v2793_v33, %v12171_v26 }
 0x4cc   :  { %6664 = vmatprep.subr.bf16.mxu0 %v10292_v15  ;;  %v2810_v15 = vrot.slane %v2793_v33, %v12170_v57 }
 0x4cd   :  { %6662 = vmatpush1.bf16.msra.mxu1 %v10280_v34 }
 0x4ce   :  { %6696 = vmatprep.subr.bf16.mxu1 %v10299_v12 }
 0x560   :  { %v2717_v58 = vpop.f32.mrb[14].mxu0  ;;  %v2788_v3 = vpop.f32.mrb[14].mxu1 }
 0x561   :  { %v2815_v39 = vadd.f32 %v2798_v61, %v2717_v58  ;;  %v2719_v50 = vpop.f32.mrb[15].mxu0  ;;  %v2790_v52 = vpop.f32.mrb[15].mxu1  ;;  %v2817_v10 = vadd.f32 %v2806_v45, %v2788_v3  ;;  %v5721_v45 = vld [vmem:[%s11798_s0 + $0x80] sm:$0xff] }
 0x562   :  { %v2816_v34 = vadd.f32 %v2802_v31, %v2719_v50  ;;  %v2818_v12 = vadd.f32 %v2810_v15, %v2790_v52 }
 0x563   :  { %v5717_v21 = vmul.f32 -1.442695, %v2815_v39 }
 0x564   :  { %v5718_v9 = vmul.f32 -1.442695, %v2816_v34  ;;  %v5719_v18 = vmul.f32 -1.442695, %v2818_v12 }
 0x565   :  { %7448 = vpow2.f32 %v5717_v21 }
 0x566   :  { %7450 = vpow2.f32 %v5718_v9  ;;  %v5724_v9 = vld [vmem:[%s11798_s0 + $0x98] sm:$0xff] }
 0x567   :  { %7452 = vpow2.f32 %v5719_v18 }
 0x568   :  { %7454 = vtanh.f32 %v2817_v10 }
 0x56f   :  { %v7449_v44 = vpop.eup %7448 }
 0x570   :  { %v7451_v24 = vpop.eup %7450  ;;  %v2822_v56 = vadd.f32 1.0, %v7449_v44  ;;  %v5722_v44 = vld [vmem:[%s11798_s0 + $0x88] sm:$0xff] }
 0x571   :  { %v2828_v58 = vadd.f32 1.0, %v7451_v24  ;;  %v7453_v50 = vpop.eup %7452 }
 0x572   :  { %7456 = vrcp.f32 %v2822_v56  ;;  %v7455_v39 = vpop.eup %7454  ;;  %v2835_v21 = vadd.f32 1.0, %v7453_v50 }
 0x573   :  { %7458 = vrcp.f32 %v2828_v58  ;;  %v5723_v58 = vld [vmem:[%s11798_s0 + $0x90] sm:$0xff] }
 0x574   :  { %7460 = vrcp.f32 %v2835_v21  ;;  %v3093_v21 = vld [vmem:[%s11797_s2 + $0x48] sm:$0xff] }
 0x57c   :  { %v7457_v34 = vpop.eup %7456 }
 0x57d   :  { %v7459_v61 = vpop.eup %7458  ;;  %v2839_v31 = vmul.f32 %v7457_v34, %v7455_v39  ;;  %v3084_v39 = vld [vmem:[%s11797_s2] sm:$0xff] }
 0x57e   :  { %v2838_v52 = vmul.f32 %v7459_v61, %v9651_v13  ;;  %v3088_v34 = vld [vmem:[%s11797_s2 + $0x20] sm:$0xff]  ;;  %v3086_v61 = vld [vmem:[%s11797_s2 + $0x10] sm:$0xff] }
 0x580   :  { %v10317_v10 = vadd.f32 %v2839_v31, %v2838_v52  ;;  %v2980_v56 = vpop.f32.mrb[16].mxu0  ;;  %v3051_v24 = vpop.f32.mrb[16].mxu1  ;;  %v3090_v31 = vld [vmem:[%s11797_s2 + $0x30] sm:$0xff]  ;;  %v3097_v52 = vld [vmem:[%s11797_s2 + $0x68] sm:$0xff] }
 0x581   :  { %v3056_v18 = vadd.f32 %v5721_v45, %v2980_v56  ;;  %v2982_v3 = vpop.f32.mrb[17].mxu0  ;;  %v3053_v33 = vpop.f32.mrb[17].mxu1  ;;  %v3095_v45 = vld [vmem:[%s11797_s2 + $0x58] sm:$0xff]  ;;  %v10360_v26 = vpack.c.bf16 %v3097_v52, %v3093_v21 }
 0x582   :  { %12215 = vst [vmem:[#allocation35_spill] sm:$0xff] %v10317_v10  ;;  %v3057_v15 = vadd.f32 %v5722_v44, %v2982_v3  ;;  %7462 = vtanh.f32 %v10317_v10  ;;  %v3059_v50 = vadd.f32 %v5724_v9, %v3053_v33  ;;  %v3099_v44 = vld [vmem:[%s11797_s2 + $0x78] sm:$0xff]  ;;  %v7461_v56 = vpop.eup %7460  ;;  %v10350_v33 = vpack.c.bf16 %v3088_v34, %v3084_v39  ;;  %v3098_v39 = vld [vmem:[%s11797_s2 + $0x70] sm:$0xff]  ;;  %v3101_v34 = vld [vmem:[%s11797_s2 + $0x88] sm:$0xff] }
 0x583   :  { %v5725_v13 = vmul.f32 -1.442695, %v3056_v18  ;;  %v3058_v9 = vadd.f32 %v5723_v58, %v3051_v24  ;;  %12218 = vst [vmem:[#allocation38_spill] sm:$0xff] %v10360_v26  ;;  %v10362_v57 = vpack.c.bf16 %v3099_v44, %v3095_v45  ;;  %v3105_v24 = vld [vmem:[%s11797_s2 + $0xa8] sm:$0xff]  ;;  %v3103_v58 = vld [vmem:[%s11797_s2 + $0x98] sm:$0xff] }
 0x584   :  { %v5726_v12 = vmul.f32 -1.442695, %v3057_v15  ;;  %v5727_v3 = vmul.f32 -1.442695, %v3059_v50  ;;  %12216 = vst [vmem:[#allocation36_spill] sm:$0xff] %v10350_v33  ;;  %v10352_v15 = vpack.c.bf16 %v3090_v31, %v3086_v61  ;;  %v3094_v50 = vld [vmem:[%s11797_s2 + $0x50] sm:$0xff] }
 0x585   :  { %7464 = vpow2.f32 %v5725_v13  ;;  %v3092_v13 = vld [vmem:[%s11797_s2 + $0x40] sm:$0xff]  ;;  %12219 = vst [vmem:[#allocation39_spill] sm:$0xff] %v10362_v57  ;;  %v3107_v61 = vld [vmem:[%s11797_s2 + $0xb8] sm:$0xff]  ;;  %v10389_v44 = vpack.c.bf16 %v3098_v39, %v3094_v50  ;;  %v3106_v50 = vld [vmem:[%s11797_s2 + $0xb0] sm:$0xff] }
 0x586   :  { %7466 = vpow2.f32 %v5726_v12  ;;  %12217 = vst [vmem:[#allocation37_spill] sm:$0xff] %v10352_v15  ;;  %v3096_v12 = vld [vmem:[%s11797_s2 + $0x60] sm:$0xff]  ;;  %v3113_v39 = vld [vmem:[%s11797_s2 + $0xe8] sm:$0xff] }
 0x587   :  { %7468 = vpow2.f32 %v5727_v3  ;;  %v10387_v45 = vpack.c.bf16 %v3096_v12, %v3092_v13  ;;  %12221 = vst [vmem:[#allocation41_spill] sm:$0xff] %v10389_v44  ;;  %v10399_v3 = vpack.c.bf16 %v3105_v24, %v3101_v34  ;;  %v10401_v13 = vpack.c.bf16 %v3107_v61, %v3103_v58  ;;  %v3102_v12 = vld [vmem:[%s11797_s2 + $0x90] sm:$0xff]  ;;  %v3111_v34 = vld [vmem:[%s11797_s2 + $0xd8] sm:$0xff] }
 0x588   :  { %7470 = vtanh.f32 %v3058_v9  ;;  %v3109_v9 = vld [vmem:[%s11797_s2 + $0xc8] sm:$0xff]  ;;  %v3115_v24 = vld [vmem:[%s11797_s2 + $0xf8] sm:$0xff]  ;;  %v10427_v61 = vpack.c.bf16 %v3106_v50, %v3102_v12 }
 0x589   :  { %12220 = vst [vmem:[#allocation40_spill] sm:$0xff] %v10387_v45  ;;  %12222 = vst [vmem:[#allocation42_spill] sm:$0xff] %v10399_v3  ;;  %v3117_v12 = vld [vmem:[%s11797_s2 + $0x108] sm:$0xff] }
 0x58a   :  { %12223 = vst [vmem:[#allocation43_spill] sm:$0xff] %v10401_v13  ;;  %12225 = vst [vmem:[#allocation45_spill] sm:$0xff] %v10427_v61  ;;  %v3121_v50 = vld [vmem:[%s11797_s2 + $0x128] sm:$0xff] }
 0x58c   :  { %v7463_v18 = vpop.eup %7462 }
 0x58d   :  { %v2842_v10 = vmul.f32 %v7463_v18, %v7461_v56  ;;  %v3100_v56 = vld [vmem:[%s11797_s2 + $0x80] sm:$0xff] }
 0x58e   :  { %v3104_v18 = vld [vmem:[%s11797_s2 + $0xa0] sm:$0xff] }
 0x58f   :  { %v7465_v31 = vpop.eup %7464  ;;  %5720 = vst [vmem:[%s11800_s5 + $0x18] sm:$0xff] %v2842_v10  ;;  %3277 = vmatmul.mubr.f32.vlgmr.msra.gmra.mrb[18].mxu0 %v2842_v10  ;;  %3348 = vmatmul.mubr.f32.vlgmr.msra.gmra.mrb[18].mxu1 %v2842_v10  ;;  %v10425_v58 = vpack.c.bf16 %v3104_v18, %v3100_v56  ;;  %v3110_v56 = vld [vmem:[%s11797_s2 + $0xd0] sm:$0xff] }
 0x590   :  { %v7467_v21 = vpop.eup %7466  ;;  %v3063_v52 = vadd.f32 1.0, %v7465_v31  ;;  %6666 = vmatpush1.bf16.msra.mxu0 %v10350_v33  ;;  %6698 = vmatpush1.bf16.msra.mxu1 %v10352_v15  ;;  %v3108_v31 = vld [vmem:[%s11797_s2 + $0xc0] sm:$0xff]  ;;  %v3114_v18 = vld [vmem:[%s11797_s2 + $0xf0] sm:$0xff] }
 0x591   :  { %v3069_v10 = vadd.f32 1.0, %v7467_v21  ;;  %6668 = vmatprep.subr.bf16.mxu0 %v10360_v26  ;;  %6700 = vmatprep.subr.bf16.mxu1 %v10362_v57  ;;  %12224 = vst [vmem:[#allocation44_spill] sm:$0xff] %v10425_v58  ;;  %v3112_v21 = vld [vmem:[%s11797_s2 + $0xe0] sm:$0xff] }
 0x592   :  { %7472 = vrcp.f32 %v3063_v52  ;;  %3418 = vmatprep.mubr.f32.mxu0 %v12017_v5  ;;  %3489 = vmatprep.mubr.f32.mxu1 %v12017_v5  ;;  %v10437_v52 = vpack.c.bf16 %v3113_v39, %v3109_v9  ;;  %v3119_v9 = vld [vmem:[%s11797_s2 + $0x118] sm:$0xff]  ;;  %v3128_v57 = vld [vmem:[%s11797_s2 + $0x160] sm:$0xff] }
 0x593   :  { %7474 = vrcp.f32 %v3069_v10  ;;  %v10439_v10 = vpack.c.bf16 %v3115_v24, %v3111_v34  ;;  %v3123_v39 = vld [vmem:[%s11797_s2 + $0x138] sm:$0xff]  ;;  %v10461_v34 = vpack.c.bf16 %v3112_v21, %v3108_v31  ;;  %v10463_v24 = vpack.c.bf16 %v3114_v18, %v3110_v56  ;;  %v3118_v31 = vld [vmem:[%s11797_s2 + $0x110] sm:$0xff]  ;;  %v3125_v56 = vld [vmem:[%s11797_s2 + $0x148] sm:$0xff]  ;;  %v7469_v18 = vpop.eup %7468 }
 0x594   :  { %6670 = vmatpush1.bf16.msra.mxu0 %v10387_v45  ;;  %6702 = vmatpush1.bf16.msra.mxu1 %v10389_v44  ;;  %12226 = vst [vmem:[#allocation46_spill] sm:$0xff] %v10437_v52  ;;  %v10473_v44 = vpack.c.bf16 %v3121_v50, %v3117_v12  ;;  %v3122_v21 = vld [vmem:[%s11797_s2 + $0x130] sm:$0xff]  ;;  %v3129_v12 = vld [vmem:[%s11797_s2 + $0x168] sm:$0xff]  ;;  %v3127_v50 = vld [vmem:[%s11797_s2 + $0x158] sm:$0xff]  ;;  %v3076_v33 = vadd.f32 1.0, %v7469_v18 }
 0x595   :  { %6672 = vmatprep.subr.bf16.mxu0 %v10399_v3  ;;  %6704 = vmatprep.subr.bf16.mxu1 %v10401_v13  ;;  %12227 = vst [vmem:[#allocation47_spill] sm:$0xff] %v10439_v10  ;;  %12228 = vst [vmem:[#allocation48_spill] sm:$0xff] %v10463_v24  ;;  %v3116_v13 = vld [vmem:[%s11797_s2 + $0x100] sm:$0xff]  ;;  %v3135_v18 = vld [vmem:[%s11797_s2 + $0x198] sm:$0xff] }
 0x596   :  { %v3120_v3 = vld [vmem:[%s11797_s2 + $0x120] sm:$0xff]  ;;  %7476 = vrcp.f32 %v3076_v33  ;;  %v3141_v33 = vld [vmem:[%s11797_s2 + $0x1c8] sm:$0xff] }
 0x597   :  { %v3124_v45 = vld [vmem:[%s11797_s2 + $0x140] sm:$0xff] }
 0x598   :  { %6674 = vmatpush1.bf16.msra.mxu0 %v10425_v58  ;;  %6706 = vmatpush1.bf16.msra.mxu1 %v10427_v61  ;;  %v10475_v58 = vpack.c.bf16 %v3123_v39, %v3119_v9  ;;  %v3131_v9 = vld [vmem:[%s11797_s2 + $0x178] sm:$0xff]  ;;  %v7471_v39 = vpop.eup %7470  ;;  %v10499_v61 = vpack.c.bf16 %v3122_v21, %v3118_v31  ;;  %v3130_v31 = vld [vmem:[%s11797_s2 + $0x170] sm:$0xff] }
 0x599   :  { %6676 = vmatprep.subr.bf16.mxu0 %v10437_v52  ;;  %6708 = vmatprep.subr.bf16.mxu1 %v10439_v10  ;;  %v10497_v52 = vpack.c.bf16 %v3120_v3, %v3116_v13  ;;  %v10511_v3 = vpack.c.bf16 %v3131_v9, %v3127_v50  ;;  %v3126_v13 = vld [vmem:[%s11797_s2 + $0x150] sm:$0xff]  ;;  %v10536_v9 = vpack.c.bf16 %v3128_v57, %v3124_v45 }
 0x59a   :  { %v3134_v57 = vld [vmem:[%s11797_s2 + $0x190] sm:$0xff] }
 0x59b   :  { %12230 = vst [vmem:[#allocation50_spill] sm:$0xff] %v10511_v3  ;;  %v3138_v45 = vld [vmem:[%s11797_s2 + $0x1b0] sm:$0xff] }
 0x59c   :  { %v7473_v10 = vpop.eup %7472  ;;  %6678 = vmatpush1.bf16.msra.mxu0 %v10461_v34  ;;  %6710 = vmatpush1.bf16.msra.mxu1 %v10463_v24  ;;  %v10509_v24 = vpack.c.bf16 %v3129_v12, %v3125_v56  ;;  %v3137_v56 = vld [vmem:[%s11797_s2 + $0x1a8] sm:$0xff]  ;;  %v3139_v12 = vld [vmem:[%s11797_s2 + $0x1b8] sm:$0xff] }
 0x59d   :  { %v7475_v26 = vpop.eup %7474  ;;  %v3080_v15 = vmul.f32 %v7473_v10, %v7471_v39  ;;  %6680 = vmatprep.subr.bf16.mxu0 %v10473_v44  ;;  %6712 = vmatprep.subr.bf16.mxu1 %v10475_v58  ;;  %v3133_v10 = vld [vmem:[%s11797_s2 + $0x188] sm:$0xff]  ;;  %v3136_v39 = vld [vmem:[%s11797_s2 + $0x1a0] sm:$0xff] }
 0x59e   :  { %12229 = vst [vmem:[#allocation49_spill] sm:$0xff] %v10509_v24  ;;  %v3079_v21 = vmul.f32 %v7475_v26, %v9682_v51  ;;  %v10538_v26 = vpack.c.bf16 %v3130_v31, %v3126_v13  ;;  %v3132_v51 = vld [vmem:[%s11797_s2 + $0x180] sm:$0xff]  ;;  %v3145_v13 = vld [vmem:[%s11797_s2 + $0x1e8] sm:$0xff]  ;;  %v3143_v31 = vld [vmem:[%s11797_s2 + $0x1d8] sm:$0xff] }
 0x5a0   :  { %v10532_v50 = vadd.f32 %v3080_v15, %v3079_v21  ;;  %6682 = vmatpush1.bf16.msra.mxu0 %v10497_v52  ;;  %6714 = vmatpush1.bf16.msra.mxu1 %v10499_v61  ;;  %12231 = vst [vmem:[#allocation51_spill] sm:$0xff] %v10538_v26  ;;  %v10548_v15 = vpack.c.bf16 %v3137_v56, %v3133_v10  ;;  %v3147_v10 = vld [vmem:[%s11797_s2 + $0x1f8] sm:$0xff] }
 0x5a1   :  { %6684 = vmatprep.subr.bf16.mxu0 %v10509_v24  ;;  %6716 = vmatprep.subr.bf16.mxu1 %v10511_v3  ;;  %v10550_v21 = vpack.c.bf16 %v3139_v12, %v3135_v18  ;;  %v10573_v56 = vpack.c.bf16 %v3136_v39, %v3132_v51  ;;  %v10575_v18 = vpack.c.bf16 %v3138_v45, %v3134_v57  ;;  %v3140_v12 = vld [vmem:[%s11797_s2 + $0x1c0] sm:$0xff]  ;;  %v3142_v51 = vld [vmem:[%s11797_s2 + $0x1d0] sm:$0xff] }
 0x5a2   :  { %7478 = vtanh.f32 %v10532_v50  ;;  %v10582_v3 = vpack.c.bf16 %v3145_v13, %v3141_v33  ;;  %v10584_v24 = vpack.c.bf16 %v3147_v10, %v3143_v31  ;;  %v3146_v39 = vld [vmem:[%s11797_s2 + $0x1f0] sm:$0xff]  ;;  %v7477_v33 = vpop.eup %7476 }
 0x5a3   :  { %v10599_v45 = vpack.c.bf16 %v3146_v39, %v3142_v51 }
 0x5a4   :  { %6686 = vmatpush1.bf16.msra.mxu0 %v10536_v9  ;;  %6718 = vmatpush1.bf16.msra.mxu1 %v10538_v26  ;;  %v3144_v26 = vld [vmem:[%s11797_s2 + $0x1e0] sm:$0xff] }
 0x5a5   :  { %6688 = vmatprep.subr.bf16.mxu0 %v10548_v15  ;;  %6720 = vmatprep.subr.bf16.mxu1 %v10550_v21  ;;  %v10597_v57 = vpack.c.bf16 %v3144_v26, %v3140_v12  ;;  %v12261_v12 = vld [vmem:[#allocation9_spill] sm:$0xff] }
 0x5a8   :  { %6690 = vmatpush1.bf16.msra.mxu0 %v10573_v56  ;;  %6722 = vmatpush1.bf16.msra.mxu1 %v10575_v18 }
 0x5a9   :  { %6692 = vmatprep.subr.bf16.mxu0 %v10582_v3  ;;  %6724 = vmatprep.subr.bf16.mxu1 %v10584_v24 }
 0x5ac   :  { %v7479_v13 = vpop.eup %7478  ;;  %6694 = vmatpush1.bf16.msra.mxu0 %v10597_v57  ;;  %6726 = vmatpush1.bf16.msra.mxu1 %v10599_v45 }
 0x5ad   :  { %6728 = vmatprep.subr.bf16.mxu0 %v9715_v6  ;;  %6760 = vmatprep.subr.bf16.mxu1 %v9717_v49  ;;  %v3083_v31 = vmul.f32 %v7479_v13, %v7477_v33  ;;  %v12232_v6 = vld [vmem:[#allocation53_spill] sm:$0xff]  ;;  %v12233_v49 = vld [vmem:[#allocation10_spill] sm:$0xff] }
 0x5af   :  { %3419 = vmatmul.mubr.f32.vlgmr.msra.gmra.mrb[18].mxu0 %v3083_v31  ;;  %3490 = vmatmul.mubr.f32.vlgmr.msra.gmra.mrb[18].mxu1 %v3083_v31 }
 0x5b0   :  { %6730 = vmatpush1.bf16.msra.mxu0 %v9739_v11  ;;  %6762 = vmatpush1.bf16.msra.mxu1 %v9741_v14  ;;  %v12234_v11 = vld [vmem:[#allocation11_spill] sm:$0xff]  ;;  %v12235_v14 = vld [vmem:[#allocation12_spill] sm:$0xff] }
 0x5b1   :  { %6732 = vmatprep.subr.bf16.mxu0 %v9753_v43  ;;  %6764 = vmatprep.subr.bf16.mxu1 %v9755_v41  ;;  %v12236_v43 = vld [vmem:[#allocation13_spill] sm:$0xff]  ;;  %v12237_v41 = vld [vmem:[#allocation14_spill] sm:$0xff] }
 0x5b2   :  { %3681 = vmatprep.mubr.f32.mxu0 %v12017_v5  ;;  %3752 = vmatprep.mubr.f32.mxu1 %v12017_v5 }
 0x5b4   :  { %6734 = vmatpush1.bf16.msra.mxu0 %v9779_v38  ;;  %6766 = vmatpush1.bf16.msra.mxu1 %v9781_v40  ;;  %v12238_v38 = vld [vmem:[#allocation15_spill] sm:$0xff]  ;;  %v12239_v40 = vld [vmem:[#allocation16_spill] sm:$0xff] }
 0x5b5   :  { %6736 = vmatprep.subr.bf16.mxu0 %v9791_v46  ;;  %6768 = vmatprep.subr.bf16.mxu1 %v9793_v0  ;;  %v12240_v46 = vld [vmem:[#allocation17_spill] sm:$0xff]  ;;  %v12241_v0 = vld [vmem:[#allocation18_spill] sm:$0xff] }
 0x5b8   :  { %6738 = vmatpush1.bf16.msra.mxu0 %v9817_v25  ;;  %6770 = vmatpush1.bf16.msra.mxu1 %v9819_v48  ;;  %v12242_v25 = vld [vmem:[#allocation19_spill] sm:$0xff]  ;;  %v12243_v48 = vld [vmem:[#allocation20_spill] sm:$0xff] }
 0x5b9   :  { %6740 = vmatprep.subr.bf16.mxu0 %v9829_v4  ;;  %6772 = vmatprep.subr.bf16.mxu1 %v9831_v23  ;;  %v12244_v4 = vld [vmem:[#allocation21_spill] sm:$0xff]  ;;  %v12245_v23 = vld [vmem:[#allocation22_spill] sm:$0xff] }
 0x5bc   :  { %6742 = vmatpush1.bf16.msra.mxu0 %v9853_v47  ;;  %6774 = vmatpush1.bf16.msra.mxu1 %v9855_v35  ;;  %v12246_v47 = vld [vmem:[#allocation23_spill] sm:$0xff]  ;;  %v12247_v35 = vld [vmem:[#allocation24_spill] sm:$0xff] }
 0x5bd   :  { %6744 = vmatprep.subr.bf16.mxu0 %v9865_v20  ;;  %6776 = vmatprep.subr.bf16.mxu1 %v9867_v7  ;;  %v12248_v20 = vld [vmem:[#allocation25_spill] sm:$0xff]  ;;  %v12249_v7 = vld [vmem:[#allocation26_spill] sm:$0xff] }
 0x5c0   :  { %6746 = vmatpush1.bf16.msra.mxu0 %v9889_v16  ;;  %6778 = vmatpush1.bf16.msra.mxu1 %v9891_v8  ;;  %v12250_v16 = vld [vmem:[#allocation27_spill] sm:$0xff]  ;;  %v12251_v8 = vld [vmem:[#allocation28_spill] sm:$0xff] }
 0x5c1   :  { %6748 = vmatprep.subr.bf16.mxu0 %v9901_v63  ;;  %6780 = vmatprep.subr.bf16.mxu1 %v9903_v36  ;;  %v12252_v63 = vld [vmem:[#allocation29_spill] sm:$0xff]  ;;  %v12253_v36 = vld [vmem:[#allocation30_spill] sm:$0xff] }
 0x5c4   :  { %6750 = vmatpush1.bf16.msra.mxu0 %v9925_v32  ;;  %6782 = vmatpush1.bf16.msra.mxu1 %v9927_v19  ;;  %v12254_v32 = vld [vmem:[#allocation31_spill] sm:$0xff]  ;;  %v12255_v19 = vld [vmem:[#allocation32_spill] sm:$0xff] }
 0x5c5   :  { %6752 = vmatprep.subr.bf16.mxu0 %v9937_v1  ;;  %6784 = vmatprep.subr.bf16.mxu1 %v9939_v54  ;;  %v12256_v1 = vld [vmem:[#allocation33_spill] sm:$0xff]  ;;  %v12257_v54 = vld [vmem:[#allocation34_spill] sm:$0xff] }
 0x5c8   :  { %6754 = vmatpush1.bf16.msra.mxu0 %v9961_v37  ;;  %6786 = vmatpush1.bf16.msra.mxu1 %v9963_v42  ;;  %v3496_v37 = vld [vmem:[%s11799_s4] sm:$0xf] }
 0x5c9   :  { %6756 = vmatprep.subr.bf16.mxu0 %v9970_v55  ;;  %6788 = vmatprep.subr.bf16.mxu1 %v9972_v27  ;;  %v12258_v42 = vld [vmem:[#allocation6_spill] sm:$0xff]  ;;  %v12259_v27 = vld [vmem:[#allocation8_spill] sm:$0xff]  ;;  %v3509_v51 = vrot.slane %v3496_v37, %v12261_v12 }
 0x5ca   :  { %v3501_v55 = vrot.slane %v3496_v37, %v12258_v42 }
 0x5cc   :  { %6758 = vmatpush1.bf16.msra.mxu0 %v9985_v53  ;;  %6790 = vmatpush1.bf16.msra.mxu1 %v9987_v28  ;;  %v3505_v53 = vrot.slane %v3496_v37, %v12259_v27 }
 0x5cd   :  { %6792 = vmatprep.subr.bf16.mxu0 %v10006_v62  ;;  %6824 = vmatprep.subr.bf16.mxu1 %v10017_v17 }
 0x5cf   :  { %3682 = vmatmul.mubr.f32.vlgmr.msra.gmra.mrb[20].mxu0 %v3083_v31  ;;  %3753 = vmatmul.mubr.f32.vlgmr.msra.gmra.mrb[20].mxu1 %v3083_v31 }
 0x5d0   :  { %6794 = vmatpush1.bf16.msra.mxu0 %v10019_v30  ;;  %6826 = vmatpush1.bf16.msra.mxu1 %v10028_v60 }
 0x5d1   :  { %6796 = vmatprep.subr.bf16.mxu0 %v10042_v59  ;;  %6828 = vmatprep.subr.bf16.mxu1 %v10053_v29 }
 0x5d2   :  { %3979 = vmatprep.mubr.f32.mxu0 %v12017_v5  ;;  %4050 = vmatprep.mubr.f32.mxu1 %v12017_v5 }
 0x5d4   :  { %6798 = vmatpush1.bf16.msra.mxu0 %v10055_v22  ;;  %6830 = vmatpush1.bf16.msra.mxu1 %v10064_v2  ;;  %v12260_v2 = vld [vmem:[#allocation7_spill] sm:$0xff] }
 0x5d5   :  { %6800 = vmatprep.subr.bf16.mxu0 %v12232_v6  ;;  %6832 = vmatprep.subr.bf16.mxu1 %v12233_v49  ;;  %v3513_v26 = vrot.slane %v3496_v37, %v12260_v2 }
 0x5d8   :  { %6802 = vmatpush1.bf16.msra.mxu0 %v12234_v11  ;;  %6834 = vmatpush1.bf16.msra.mxu1 %v12235_v14 }
 0x5d9   :  { %6804 = vmatprep.subr.bf16.mxu0 %v12236_v43  ;;  %6836 = vmatprep.subr.bf16.mxu1 %v12237_v41 }
 0x5dc   :  { %6806 = vmatpush1.bf16.msra.mxu0 %v12238_v38  ;;  %6838 = vmatpush1.bf16.msra.mxu1 %v12239_v40 }
 0x5dd   :  { %6808 = vmatprep.subr.bf16.mxu0 %v12240_v46  ;;  %6840 = vmatprep.subr.bf16.mxu1 %v12241_v0  ;;  %v12262_v46 = vld [vmem:[#allocation35_spill] sm:$0xff] }
 0x5e0   :  { %6810 = vmatpush1.bf16.msra.mxu0 %v12242_v25  ;;  %6842 = vmatpush1.bf16.msra.mxu1 %v12243_v48  ;;  %v5732_v25 = vld [vmem:[%s11798_s0 + $0xa0] sm:$0xff]  ;;  %v5733_v48 = vld [vmem:[%s11798_s0 + $0xa8] sm:$0xff] }
 0x5e1   :  { %6812 = vmatprep.subr.bf16.mxu0 %v12244_v4  ;;  %6844 = vmatprep.subr.bf16.mxu1 %v12245_v23 }
 0x5e4   :  { %6814 = vmatpush1.bf16.msra.mxu0 %v12246_v47  ;;  %6846 = vmatpush1.bf16.msra.mxu1 %v12247_v35 }
 0x5e5   :  { %6816 = vmatprep.subr.bf16.mxu0 %v12248_v20  ;;  %6848 = vmatprep.subr.bf16.mxu1 %v12249_v7 }
 0x5e8   :  { %6818 = vmatpush1.bf16.msra.mxu0 %v12250_v16  ;;  %6850 = vmatpush1.bf16.msra.mxu1 %v12251_v8 }
 0x5e9   :  { %6820 = vmatprep.subr.bf16.mxu0 %v12252_v63  ;;  %6852 = vmatprep.subr.bf16.mxu1 %v12253_v36  ;;  %v5735_v36 = vld [vmem:[%s11798_s0 + $0xb8] sm:$0xff] }
 0x5ec   :  { %6822 = vmatpush1.bf16.msra.mxu0 %v12254_v32  ;;  %6854 = vmatpush1.bf16.msra.mxu1 %v12255_v19  ;;  %v5734_v19 = vld [vmem:[%s11798_s0 + $0xb0] sm:$0xff] }
 0x5ed   :  { %6856 = vmatprep.subr.bf16.mxu0 %v12256_v1  ;;  %6888 = vmatprep.subr.bf16.mxu1 %v12257_v54 }
 0x682   :  { %v3420_v28 = vpop.f32.mrb[18].mxu0  ;;  %v3491_v62 = vpop.f32.mrb[18].mxu1 }
 0x683   :  { %v3518_v17 = vadd.f32 %v3501_v55, %v3420_v28  ;;  %v3422_v30 = vpop.f32.mrb[19].mxu0  ;;  %v3493_v60 = vpop.f32.mrb[19].mxu1  ;;  %v3520_v33 = vadd.f32 %v3509_v51, %v3491_v62  ;;  %v12269_v51 = vld [vmem:[#allocation42_spill] sm:$0xff] }
 0x684   :  { %v3519_v59 = vadd.f32 %v3505_v53, %v3422_v30  ;;  %v3521_v10 = vadd.f32 %v3513_v26, %v3493_v60  ;;  %v12263_v30 = vld [vmem:[#allocation36_spill] sm:$0xff]  ;;  %v12264_v60 = vld [vmem:[#allocation37_spill] sm:$0xff] }
 0x685   :  { %v5728_v29 = vmul.f32 -1.442695, %v3518_v17  ;;  %v12267_v26 = vld [vmem:[#allocation40_spill] sm:$0xff] }
 0x686   :  { %v5729_v22 = vmul.f32 -1.442695, %v3519_v59  ;;  %v5730_v39 = vmul.f32 -1.442695, %v3521_v10  ;;  %v12268_v10 = vld [vmem:[#allocation41_spill] sm:$0xff] }
 0x687   :  { %7480 = vpow2.f32 %v5728_v29  ;;  %v12265_v29 = vld [vmem:[#allocation38_spill] sm:$0xff] }
 0x688   :  { %7482 = vpow2.f32 %v5729_v22  ;;  %v12266_v22 = vld [vmem:[#allocation39_spill] sm:$0xff] }
 0x689   :  { %7484 = vpow2.f32 %v5730_v39  ;;  %v12270_v39 = vld [vmem:[#allocation43_spill] sm:$0xff] }
 0x68a   :  { %7486 = vtanh.f32 %v3520_v33  ;;  %v12271_v33 = vld [vmem:[#allocation44_spill] sm:$0xff] }
 0x691   :  { %v7481_v13 = vpop.eup %7480 }
 0x692   :  { %v7483_v31 = vpop.eup %7482  ;;  %v3525_v6 = vadd.f32 1.0, %v7481_v13  ;;  %v12272_v13 = vld [vmem:[#allocation45_spill] sm:$0xff] }
 0x693   :  { %v3531_v49 = vadd.f32 1.0, %v7483_v31  ;;  %v7485_v11 = vpop.eup %7484  ;;  %v12273_v31 = vld [vmem:[#allocation46_spill] sm:$0xff] }
 0x694   :  { %7488 = vrcp.f32 %v3525_v6  ;;  %v7487_v14 = vpop.eup %7486  ;;  %v3538_v40 = vadd.f32 1.0, %v7485_v11  ;;  %v12274_v6 = vld [vmem:[#allocation47_spill] sm:$0xff] }
 0x695   :  { %7490 = vrcp.f32 %v3531_v49 }
 0x696   :  { %7492 = vrcp.f32 %v3538_v40 }
 0x69e   :  { %v7489_v43 = vpop.eup %7488 }
 0x69f   :  { %v7491_v41 = vpop.eup %7490  ;;  %v3542_v38 = vmul.f32 %v7489_v43, %v7487_v14  ;;  %v12275_v43 = vld [vmem:[#allocation48_spill] sm:$0xff] }
 0x6a0   :  { %v3541_v0 = vmul.f32 %v7491_v41, %v12262_v46  ;;  %v7493_v1 = vpop.eup %7492 }
 0x6a2   :  { %v10689_v4 = vadd.f32 %v3542_v38, %v3541_v0  ;;  %v3683_v23 = vpop.f32.mrb[20].mxu0  ;;  %v3754_v47 = vpop.f32.mrb[20].mxu1 }
 0x6a3   :  { %v3759_v35 = vadd.f32 %v5732_v25, %v3683_v23  ;;  %v3685_v20 = vpop.f32.mrb[21].mxu0  ;;  %v3756_v7 = vpop.f32.mrb[21].mxu1  ;;  %v3761_v55 = vadd.f32 %v5734_v19, %v3754_v47  ;;  %v12276_v25 = vld [vmem:[#allocation49_spill] sm:$0xff]  ;;  %v4265_v23 = vld [vmem:[%s11795_s1 + $0x48] sm:$0xff]  ;;  %v4270_v19 = vld [vmem:[%s11795_s1 + $0x70] sm:$0xff] }
 0x6a4   :  { %v3760_v16 = vadd.f32 %v5733_v48, %v3685_v20  ;;  %7494 = vtanh.f32 %v10689_v4  ;;  %v3762_v32 = vadd.f32 %v5735_v36, %v3756_v7  ;;  %v4271_v47 = vld [vmem:[%s11795_s1 + $0x78] sm:$0xff] }
 0x6a5   :  { %v5736_v8 = vmul.f32 -1.442695, %v3759_v35 }
 0x6a6   :  { %v5737_v63 = vmul.f32 -1.442695, %v3760_v16  ;;  %v5738_v37 = vmul.f32 -1.442695, %v3762_v32  ;;  %v4266_v32 = vld [vmem:[%s11795_s1 + $0x50] sm:$0xff] }
 0x6a7   :  { %7496 = vpow2.f32 %v5736_v8  ;;  %v4264_v8 = vld [vmem:[%s11795_s1 + $0x40] sm:$0xff] }
 0x6a8   :  { %7498 = vpow2.f32 %v5737_v63  ;;  %v4268_v63 = vld [vmem:[%s11795_s1 + $0x60] sm:$0xff] }
 0x6a9   :  { %7500 = vpow2.f32 %v5738_v37  ;;  %v4275_v37 = vld [vmem:[%s11795_s1 + $0x98] sm:$0xff] }
 0x6aa   :  { %7502 = vtanh.f32 %v3761_v55  ;;  %v4279_v55 = vld [vmem:[%s11795_s1 + $0xb8] sm:$0xff] }
 0x6ae   :  { %v7495_v54 = vpop.eup %7494 }
 0x6af   :  { %v3545_v53 = vmul.f32 %v7495_v54, %v7493_v1  ;;  %v4273_v1 = vld [vmem:[%s11795_s1 + $0x88] sm:$0xff] }
 0x6b0   :  { %v4277_v54 = vld [vmem:[%s11795_s1 + $0xa8] sm:$0xff] }
 0x6b1   :  { %v7497_v28 = vpop.eup %7496  ;;  %5731 = vst [vmem:[%s11800_s5 + $0x20] sm:$0xff] %v3545_v53  ;;  %3980 = vmatmul.mubr.f32.vlgmr.msra.gmra.mrb[22].mxu0 %v3545_v53  ;;  %4051 = vmatmul.mubr.f32.vlgmr.msra.gmra.mrb[22].mxu1 %v3545_v53  ;;  %v10817_v53 = vpack.c.bf16 %v4268_v63, %v4264_v8  ;;  %v4298_v8 = vld [vmem:[%s11795_s1 + $0x150] sm:$0xff] }
 0x6b2   :  { %v7499_v62 = vpop.eup %7498  ;;  %v3766_v17 = vadd.f32 1.0, %v7497_v28  ;;  %6858 = vmatpush1.bf16.msra.mxu0 %v12263_v30  ;;  %6890 = vmatpush1.bf16.msra.mxu1 %v12264_v60  ;;  %v10819_v28 = vpack.c.bf16 %v4270_v19, %v4266_v32  ;;  %v10829_v30 = vpack.c.bf16 %v4277_v54, %v4273_v1  ;;  %v10831_v60 = vpack.c.bf16 %v4279_v55, %v4275_v37  ;;  %v4302_v63 = vld [vmem:[%s11795_s1 + $0x170] sm:$0xff]  ;;  %v4305_v32 = vld [vmem:[%s11795_s1 + $0x188] sm:$0xff]  ;;  %v4307_v1 = vld [vmem:[%s11795_s1 + $0x198] sm:$0xff] }
 0x6b3   :  { %v3772_v59 = vadd.f32 1.0, %v7499_v62  ;;  %6860 = vmatprep.subr.bf16.mxu0 %v12265_v29  ;;  %6892 = vmatprep.subr.bf16.mxu1 %v12266_v22  ;;  %v7501_v49 = vpop.eup %7500  ;;  %v4272_v62 = vld [vmem:[%s11795_s1 + $0x80] sm:$0xff]  ;;  %v4278_v29 = vld [vmem:[%s11795_s1 + $0xb0] sm:$0xff]  ;;  %v4281_v22 = vld [vmem:[%s11795_s1 + $0xc8] sm:$0xff]  ;;  %v10965_v55 = vpack.c.bf16 %v4302_v63, %v4298_v8 }
 0x6b4   :  { %7504 = vrcp.f32 %v3766_v17  ;;  %4121 = vmatprep.mubr.f32.mxu0 %v12017_v5  ;;  %4192 = vmatprep.mubr.f32.mxu1 %v12017_v5  ;;  %v7503_v11 = vpop.eup %7502  ;;  %v3779_v40 = vadd.f32 1.0, %v7501_v49  ;;  %v4276_v17 = vld [vmem:[%s11795_s1 + $0xa0] sm:$0xff]  ;;  %v4309_v19 = vld [vmem:[%s11795_s1 + $0x1a8] sm:$0xff]  ;;  %v4311_v54 = vld [vmem:[%s11795_s1 + $0x1b8] sm:$0xff] }
 0x6b5   :  { %7506 = vrcp.f32 %v3772_v59  ;;  %v4274_v59 = vld [vmem:[%s11795_s1 + $0x90] sm:$0xff] }
 0x6b6   :  { %6862 = vmatpush1.bf16.msra.mxu0 %v12267_v26  ;;  %6894 = vmatpush1.bf16.msra.mxu1 %v12268_v10  ;;  %7508 = vrcp.f32 %v3779_v40  ;;  %v4285_v26 = vld [vmem:[%s11795_s1 + $0xe8] sm:$0xff]  ;;  %v4283_v10 = vld [vmem:[%s11795_s1 + $0xd8] sm:$0xff] }
 0x6b7   :  { %6864 = vmatprep.subr.bf16.mxu0 %v12269_v51  ;;  %6896 = vmatprep.subr.bf16.mxu1 %v12270_v39  ;;  %v4287_v51 = vld [vmem:[%s11795_s1 + $0xf8] sm:$0xff]  ;;  %v10855_v39 = vpack.c.bf16 %v4276_v17, %v4272_v62  ;;  %v4304_v62 = vld [vmem:[%s11795_s1 + $0x180] sm:$0xff] }
 0x6b8   :  { %v10869_v49 = vpack.c.bf16 %v4287_v51, %v4283_v10  ;;  %v4295_v40 = vld [vmem:[%s11795_s1 + $0x138] sm:$0xff]  ;;  %v4308_v17 = vld [vmem:[%s11795_s1 + $0x1a0] sm:$0xff]  ;;  %v4313_v10 = vld [vmem:[%s11795_s1 + $0x1c8] sm:$0xff] }
 0x6b9   :  { %v4317_v51 = vld [vmem:[%s11795_s1 + $0x1e8] sm:$0xff] }
 0x6ba   :  { %6866 = vmatpush1.bf16.msra.mxu0 %v12271_v33  ;;  %6898 = vmatpush1.bf16.msra.mxu1 %v12272_v13  ;;  %v10857_v33 = vpack.c.bf16 %v4278_v29, %v4274_v59  ;;  %v4280_v13 = vld [vmem:[%s11795_s1 + $0xc0] sm:$0xff]  ;;  %v10975_v59 = vpack.c.bf16 %v4309_v19, %v4305_v32  ;;  %v10977_v29 = vpack.c.bf16 %v4311_v54, %v4307_v1  ;;  %v4556_v32 = vld [vmem:[%s11796_s3 + $0x10] sm:$0xff]  ;;  %v4563_v54 = vld [vmem:[%s11796_s3 + $0x48] sm:$0xff] }
 0x6bb   :  { %6868 = vmatprep.subr.bf16.mxu0 %v12273_v31  ;;  %6900 = vmatprep.subr.bf16.mxu1 %v12274_v6  ;;  %v4284_v31 = vld [vmem:[%s11795_s1 + $0xe0] sm:$0xff]  ;;  %v10867_v6 = vpack.c.bf16 %v4285_v26, %v4281_v22  ;;  %v4306_v22 = vld [vmem:[%s11795_s1 + $0x190] sm:$0xff] }
 0x6bc   :  { %v4310_v26 = vld [vmem:[%s11795_s1 + $0x1b0] sm:$0xff] }
 0x6bd   :  { %v4560_v19 = vld [vmem:[%s11796_s3 + $0x30] sm:$0xff] }
 0x6be   :  { %v7505_v14 = vpop.eup %7504  ;;  %6870 = vmatpush1.bf16.msra.mxu0 %v10461_v34  ;;  %6902 = vmatpush1.bf16.msra.mxu1 %v12275_v43  ;;  %v12277_v34 = vld [vmem:[#allocation50_spill] sm:$0xff]  ;;  %v4289_v43 = vld [vmem:[%s11795_s1 + $0x108] sm:$0xff]  ;;  %v11066_v1 = vpack.c.bf16 %v4560_v19, %v4556_v32 }
 0x6bf   :  { %v7507_v41 = vpop.eup %7506  ;;  %v3783_v38 = vmul.f32 %v7505_v14, %v7503_v11  ;;  %6872 = vmatprep.subr.bf16.mxu0 %v10473_v44  ;;  %6904 = vmatprep.subr.bf16.mxu1 %v10475_v58  ;;  %v12278_v44 = vld [vmem:[#allocation51_spill] sm:$0xff]  ;;  %v4282_v11 = vld [vmem:[%s11795_s1 + $0xd0] sm:$0xff] }
 0x6c0   :  { %v3782_v46 = vmul.f32 %v7507_v41, %v10532_v50  ;;  %v4257_v58 = vld [vmem:[%s11795_s1 + $0x8] sm:$0xff]  ;;  %v4263_v50 = vld [vmem:[%s11795_s1 + $0x38] sm:$0xff]  ;;  %v7509_v35 = vpop.eup %7508  ;;  %v4286_v14 = vld [vmem:[%s11795_s1 + $0xf0] sm:$0xff] }
 0x6c1   :  { %v4293_v41 = vld [vmem:[%s11795_s1 + $0x128] sm:$0xff] }
 0x6c2   :  { %v10720_v0 = vadd.f32 %v3783_v38, %v3782_v46  ;;  %6874 = vmatpush1.bf16.msra.mxu0 %v10497_v52  ;;  %6906 = vmatpush1.bf16.msra.mxu1 %v10499_v61  ;;  %v4261_v61 = vld [vmem:[%s11795_s1 + $0x28] sm:$0xff]  ;;  %v4259_v52 = vld [vmem:[%s11795_s1 + $0x18] sm:$0xff]  ;;  %v10891_v46 = vpack.c.bf16 %v4284_v31, %v4280_v13 }
 0x6c3   :  { %6876 = vmatprep.subr.bf16.mxu0 %v12276_v25  ;;  %6908 = vmatprep.subr.bf16.mxu1 %v12277_v34  ;;  %v10755_v48 = vpack.c.bf16 %v4263_v50, %v4259_v52  ;;  %v4291_v38 = vld [vmem:[%s11795_s1 + $0x118] sm:$0xff]  ;;  %v10893_v25 = vpack.c.bf16 %v4286_v14, %v4282_v11  ;;  %v4288_v34 = vld [vmem:[%s11795_s1 + $0x100] sm:$0xff]  ;;  %v4290_v52 = vld [vmem:[%s11795_s1 + $0x110] sm:$0xff]  ;;  %v10999_v11 = vpack.c.bf16 %v4308_v17, %v4304_v62 }
 0x6c4   :  { %7510 = vtanh.f32 %v10720_v0  ;;  %v4294_v50 = vld [vmem:[%s11795_s1 + $0x130] sm:$0xff]  ;;  %v4315_v13 = vld [vmem:[%s11795_s1 + $0x1d8] sm:$0xff]  ;;  %v11001_v14 = vpack.c.bf16 %v4310_v26, %v4306_v22  ;;  %v4567_v62 = vld [vmem:[%s11796_s3 + $0x68] sm:$0xff] }
 0x6c5   :  { %v4319_v31 = vld [vmem:[%s11795_s1 + $0x1f8] sm:$0xff]  ;;  %v11080_v22 = vpack.c.bf16 %v4567_v62, %v4563_v54  ;;  %v4572_v54 = vld [vmem:[%s11796_s3 + $0x90] sm:$0xff] }
 0x6c6   :  { %6878 = vmatpush1.bf16.msra.mxu0 %v10536_v9  ;;  %6910 = vmatpush1.bf16.msra.mxu1 %v12278_v44  ;;  %v4256_v9 = vld [vmem:[%s11795_s1] sm:$0xff]  ;;  %v4565_v17 = vld [vmem:[%s11796_s3 + $0x58] sm:$0xff]  ;;  %v4576_v62 = vld [vmem:[%s11796_s3 + $0xb0] sm:$0xff] }
 0x6c7   :  { %6880 = vmatprep.subr.bf16.mxu0 %v10548_v15  ;;  %6912 = vmatprep.subr.bf16.mxu1 %v10550_v21  ;;  %v4260_v15 = vld [vmem:[%s11795_s1 + $0x20] sm:$0xff]  ;;  %v10753_v21 = vpack.c.bf16 %v4261_v61, %v4257_v58  ;;  %v10903_v58 = vpack.c.bf16 %v4293_v41, %v4289_v43  ;;  %v10905_v61 = vpack.c.bf16 %v4295_v40, %v4291_v38  ;;  %v4569_v26 = vld [vmem:[%s11796_s3 + $0x78] sm:$0xff] }
 0x6c8   :  { %v10777_v7 = vpack.c.bf16 %v4260_v15, %v4256_v9  ;;  %v4292_v44 = vld [vmem:[%s11795_s1 + $0x120] sm:$0xff]  ;;  %v4297_v9 = vld [vmem:[%s11795_s1 + $0x148] sm:$0xff]  ;;  %v11008_v41 = vpack.c.bf16 %v4317_v51, %v4313_v10  ;;  %v11010_v38 = vpack.c.bf16 %v4319_v31, %v4315_v13  ;;  %v11091_v13 = vpack.c.bf16 %v4569_v26, %v4565_v17 }
 0x6c9   :  { %v4301_v15 = vld [vmem:[%s11795_s1 + $0x168] sm:$0xff]  ;;  %v4312_v43 = vld [vmem:[%s11795_s1 + $0x1c0] sm:$0xff]  ;;  %v11138_v17 = vpack.c.bf16 %v4576_v62, %v4572_v54 }
 0x6ca   :  { %6882 = vmatpush1.bf16.msra.mxu0 %v10573_v56  ;;  %6914 = vmatpush1.bf16.msra.mxu1 %v10575_v18  ;;  %v4258_v56 = vld [vmem:[%s11795_s1 + $0x10] sm:$0xff]  ;;  %v4316_v40 = vld [vmem:[%s11795_s1 + $0x1e0] sm:$0xff]  ;;  %v4579_v26 = vld [vmem:[%s11796_s3 + $0xc8] sm:$0xff] }
 0x6cb   :  { %6884 = vmatprep.subr.bf16.mxu0 %v10582_v3  ;;  %6916 = vmatprep.subr.bf16.mxu1 %v10584_v24  ;;  %v4262_v18 = vld [vmem:[%s11795_s1 + $0x30] sm:$0xff]  ;;  %v4269_v24 = vld [vmem:[%s11795_s1 + $0x68] sm:$0xff]  ;;  %v4267_v3 = vld [vmem:[%s11795_s1 + $0x58] sm:$0xff]  ;;  %12282 = vst [vmem:[#allocation11_spill] sm:$0xff] %v11138_v17 }
 0x6cc   :  { %v10779_v16 = vpack.c.bf16 %v4262_v18, %v4258_v56  ;;  %v4299_v56 = vld [vmem:[%s11795_s1 + $0x158] sm:$0xff]  ;;  %v4562_v10 = vld [vmem:[%s11796_s3 + $0x40] sm:$0xff]  ;;  %v4587_v62 = vld [vmem:[%s11796_s3 + $0x108] sm:$0xff] }
 0x6cd   :  { %v4303_v18 = vld [vmem:[%s11795_s1 + $0x178] sm:$0xff]  ;;  %v4566_v51 = vld [vmem:[%s11796_s3 + $0x60] sm:$0xff] }
 0x6ce   :  { %v7511_v20 = vpop.eup %7510  ;;  %6886 = vmatpush1.bf16.msra.mxu0 %v10597_v57  ;;  %6918 = vmatpush1.bf16.msra.mxu1 %v10599_v45  ;;  %v10791_v57 = vpack.c.bf16 %v4269_v24, %v4265_v23  ;;  %v10793_v45 = vpack.c.bf16 %v4271_v47, %v4267_v3  ;;  %v10927_v23 = vpack.c.bf16 %v4292_v44, %v4288_v34  ;;  %v4296_v3 = vld [vmem:[%s11795_s1 + $0x140] sm:$0xff]  ;;  %v4314_v34 = vld [vmem:[%s11795_s1 + $0x1d0] sm:$0xff] }
 0x6cf   :  { %v10787_v36 = vmul.f32 %v7511_v20, %v7509_v35  ;;  %6920 = vmatprep.subr.bf16.mxu0 %v10753_v21  ;;  %6952 = vmatprep.subr.bf16.mxu1 %v10755_v48  ;;  %v10929_v24 = vpack.c.bf16 %v4294_v50, %v4290_v52  ;;  %v4300_v47 = vld [vmem:[%s11795_s1 + $0x160] sm:$0xff]  ;;  %v10939_v35 = vpack.c.bf16 %v4301_v15, %v4297_v9  ;;  %v4318_v44 = vld [vmem:[%s11795_s1 + $0x1f0] sm:$0xff]  ;;  %v4555_v9 = vld [vmem:[%s11796_s3 + $0x8] sm:$0xff] }
 0x6d0   :  { %v10941_v20 = vpack.c.bf16 %v4303_v18, %v4299_v56  ;;  %v10963_v37 = vpack.c.bf16 %v4300_v47, %v4296_v3  ;;  %v11023_v52 = vpack.c.bf16 %v4316_v40, %v4312_v43  ;;  %v11025_v50 = vpack.c.bf16 %v4318_v44, %v4314_v34  ;;  %v4559_v15 = vld [vmem:[%s11796_s3 + $0x28] sm:$0xff]  ;;  %v4557_v56 = vld [vmem:[%s11796_s3 + $0x18] sm:$0xff]  ;;  %v4554_v3 = vld [vmem:[%s11796_s3] sm:$0xff] }
 0x6d1   :  { %4122 = vmatmul.mubr.f32.vlgmr.msra.gmra.mrb[22].mxu0 %v10787_v36  ;;  %4193 = vmatmul.mubr.f32.vlgmr.msra.gmra.mrb[22].mxu1 %v10787_v36  ;;  %v11044_v18 = vpack.c.bf16 %v4559_v15, %v4555_v9  ;;  %v4558_v47 = vld [vmem:[%s11796_s3 + $0x20] sm:$0xff]  ;;  %v11093_v31 = vpack.c.bf16 %v4566_v51, %v4562_v10  ;;  %v4564_v43 = vld [vmem:[%s11796_s3 + $0x50] sm:$0xff]  ;;  %v4571_v44 = vld [vmem:[%s11796_s3 + $0x88] sm:$0xff] }
 0x6d2   :  { %6922 = vmatpush1.bf16.msra.mxu0 %v10777_v7  ;;  %6954 = vmatpush1.bf16.msra.mxu1 %v10779_v16  ;;  %v11057_v63 = vpack.c.bf16 %v4558_v47, %v4554_v3  ;;  %v4568_v40 = vld [vmem:[%s11796_s3 + $0x70] sm:$0xff]  ;;  %v4575_v9 = vld [vmem:[%s11796_s3 + $0xa8] sm:$0xff]  ;;  %v4573_v15 = vld [vmem:[%s11796_s3 + $0x98] sm:$0xff] }
 0x6d3   :  { %6924 = vmatprep.subr.bf16.mxu0 %v10791_v57  ;;  %6956 = vmatprep.subr.bf16.mxu1 %v10793_v45  ;;  %v11102_v34 = vpack.c.bf16 %v4568_v40, %v4564_v43  ;;  %v4570_v3 = vld [vmem:[%s11796_s3 + $0x80] sm:$0xff]  ;;  %v4583_v10 = vld [vmem:[%s11796_s3 + $0xe8] sm:$0xff]  ;;  %v4581_v51 = vld [vmem:[%s11796_s3 + $0xd8] sm:$0xff] }
 0x6d4   :  { %4384 = vmatprep.mubr.f32.mxu0 %v12017_v5  ;;  %4455 = vmatprep.mubr.f32.mxu1 %v12017_v5  ;;  %v4574_v47 = vld [vmem:[%s11796_s3 + $0xa0] sm:$0xff]  ;;  %v11152_v43 = vpack.c.bf16 %v4583_v10, %v4579_v26  ;;  %v4585_v40 = vld [vmem:[%s11796_s3 + $0xf8] sm:$0xff]  ;;  %v4591_v26 = vld [vmem:[%s11796_s3 + $0x128] sm:$0xff] }
 0x6d5   :  { %v11129_v19 = vpack.c.bf16 %v4574_v47, %v4570_v3  ;;  %v4580_v3 = vld [vmem:[%s11796_s3 + $0xd0] sm:$0xff]  ;;  %v4589_v10 = vld [vmem:[%s11796_s3 + $0x118] sm:$0xff] }
 0x6d6   :  { %6926 = vmatpush1.bf16.msra.mxu0 %v10817_v53  ;;  %6958 = vmatpush1.bf16.msra.mxu1 %v10819_v28  ;;  %12283 = vst [vmem:[#allocation12_spill] sm:$0xff] %v11152_v43  ;;  %v4584_v47 = vld [vmem:[%s11796_s3 + $0xf0] sm:$0xff] }
 0x6d7   :  { %6928 = vmatprep.subr.bf16.mxu0 %v10829_v30  ;;  %6960 = vmatprep.subr.bf16.mxu1 %v10831_v60  ;;  %12281 = vst [vmem:[#allocation10_spill] sm:$0xff] %v11129_v19  ;;  %v11174_v54 = vpack.c.bf16 %v4584_v47, %v4580_v3 }
 0x6d9   :  { %12286 = vst [vmem:[#allocation15_spill] sm:$0xff] %v11174_v54 }
 0x6da   :  { %6930 = vmatpush1.bf16.msra.mxu0 %v10855_v39  ;;  %6962 = vmatpush1.bf16.msra.mxu1 %v10857_v33 }
 0x6db   :  { %6932 = vmatprep.subr.bf16.mxu0 %v10867_v6  ;;  %6964 = vmatprep.subr.bf16.mxu1 %v10869_v49 }
 0x6de   :  { %6934 = vmatpush1.bf16.msra.mxu0 %v10891_v46  ;;  %6966 = vmatpush1.bf16.msra.mxu1 %v10893_v25 }
 0x6df   :  { %6936 = vmatprep.subr.bf16.mxu0 %v10903_v58  ;;  %6968 = vmatprep.subr.bf16.mxu1 %v10905_v61 }
 0x6e2   :  { %6938 = vmatpush1.bf16.msra.mxu0 %v10927_v23  ;;  %6970 = vmatpush1.bf16.msra.mxu1 %v10929_v24 }
 0x6e3   :  { %6940 = vmatprep.subr.bf16.mxu0 %v10939_v35  ;;  %6972 = vmatprep.subr.bf16.mxu1 %v10941_v20 }
 0x6e6   :  { %6942 = vmatpush1.bf16.msra.mxu0 %v10963_v37  ;;  %6974 = vmatpush1.bf16.msra.mxu1 %v10965_v55 }
 0x6e7   :  { %6944 = vmatprep.subr.bf16.mxu0 %v10975_v59  ;;  %6976 = vmatprep.subr.bf16.mxu1 %v10977_v29 }
 0x6ea   :  { %6946 = vmatpush1.bf16.msra.mxu0 %v10999_v11  ;;  %6978 = vmatpush1.bf16.msra.mxu1 %v11001_v14 }
 0x6eb   :  { %6948 = vmatprep.subr.bf16.mxu0 %v11008_v41  ;;  %6980 = vmatprep.subr.bf16.mxu1 %v11010_v38 }
 0x6ee   :  { %6950 = vmatpush1.bf16.msra.mxu0 %v11023_v52  ;;  %6982 = vmatpush1.bf16.msra.mxu1 %v11025_v50 }
 0x6ef   :  { %6984 = vmatprep.subr.bf16.mxu0 %v11044_v18 }
 0x6f1   :  { %4385 = vmatmul.mubr.f32.vlgmr.msra.gmra.mrb[24].mxu0 %v10787_v36  ;;  %4456 = vmatmul.mubr.f32.vlgmr.msra.gmra.mrb[24].mxu1 %v10787_v36  ;;  %v4561_v36 = vld [vmem:[%s11796_s3 + $0x38] sm:$0xff] }
 0x6f2   :  { %4682 = vmatprep.mubr.f32.mxu0 %v12017_v5  ;;  %4753 = vmatprep.mubr.f32.mxu1 %v12017_v5  ;;  %v11055_v8 = vpack.c.bf16 %v4561_v36, %v4557_v56  ;;  %v11116_v56 = vpack.c.bf16 %v4575_v9, %v4571_v44  ;;  %v4577_v36 = vld [vmem:[%s11796_s3 + $0xb8] sm:$0xff]  ;;  %v4578_v44 = vld [vmem:[%s11796_s3 + $0xc0] sm:$0xff] }
 0x6f3   :  { %6986 = vmatpush1.bf16.msra.mxu0 %v11057_v63  ;;  %v11127_v32 = vpack.c.bf16 %v4577_v36, %v4573_v15  ;;  %v4582_v9 = vld [vmem:[%s11796_s3 + $0xe0] sm:$0xff]  ;;  %v11163_v15 = vpack.c.bf16 %v4585_v40, %v4581_v51  ;;  %v11188_v51 = vpack.c.bf16 %v4591_v26, %v4587_v62  ;;  %v4593_v40 = vld [vmem:[%s11796_s3 + $0x138] sm:$0xff]  ;;  %v4588_v62 = vld [vmem:[%s11796_s3 + $0x110] sm:$0xff] }
 0x6f4   :  { %7016 = vmatprep.subr.bf16.mxu1 %v11055_v8  ;;  %6988 = vmatprep.subr.bf16.mxu0 %v11080_v22  ;;  %12279 = vst [vmem:[#allocation52_spill] sm:$0xff] %v11116_v56  ;;  %v11165_v36 = vpack.c.bf16 %v4582_v9, %v4578_v44  ;;  %v4586_v44 = vld [vmem:[%s11796_s3 + $0x100] sm:$0xff]  ;;  %v11199_v3 = vpack.c.bf16 %v4593_v40, %v4589_v10  ;;  %v4592_v26 = vld [vmem:[%s11796_s3 + $0x130] sm:$0xff]  ;;  %v4595_v10 = vld [vmem:[%s11796_s3 + $0x148] sm:$0xff] }
 0x6f5   :  { %7018 = vmatpush1.bf16.msra.mxu1 %v11066_v1  ;;  %12280 = vst [vmem:[#allocation53_spill] sm:$0xff] %v11127_v32  ;;  %12284 = vst [vmem:[#allocation13_spill] sm:$0xff] %v11163_v15  ;;  %v4590_v9 = vld [vmem:[%s11796_s3 + $0x120] sm:$0xff]  ;;  %v4599_v40 = vld [vmem:[%s11796_s3 + $0x168] sm:$0xff] }
 0x6f6   :  { %7020 = vmatprep.subr.bf16.mxu1 %v11091_v13  ;;  %12285 = vst [vmem:[#allocation14_spill] sm:$0xff] %v11165_v36  ;;  %12287 = vst [vmem:[#allocation16_spill] sm:$0xff] %v11188_v51  ;;  %v11201_v47 = vpack.c.bf16 %v4590_v9, %v4586_v44  ;;  %v11221_v44 = vpack.c.bf16 %v4599_v40, %v4595_v10  ;;  %v4597_v9 = vld [vmem:[%s11796_s3 + $0x158] sm:$0xff]  ;;  %v4598_v10 = vld [vmem:[%s11796_s3 + $0x160] sm:$0xff] }
 0x6f7   :  { %6990 = vmatpush1.bf16.msra.mxu0 %v11093_v31  ;;  %12288 = vst [vmem:[#allocation17_spill] sm:$0xff] %v11199_v3  ;;  %v4596_v40 = vld [vmem:[%s11796_s3 + $0x150] sm:$0xff] }
 0x6f8   :  { %6992 = vmatprep.subr.bf16.mxu0 %v11116_v56  ;;  %12289 = vst [vmem:[#allocation18_spill] sm:$0xff] %v11201_v47  ;;  %12291 = vst [vmem:[#allocation20_spill] sm:$0xff] %v11221_v44 }
 0x6f9   :  { %7022 = vmatpush1.bf16.msra.mxu1 %v11102_v34 }
 0x6fa   :  { %7024 = vmatprep.subr.bf16.mxu1 %v11127_v32 }
 0x6fb   :  { %6994 = vmatpush1.bf16.msra.mxu0 %v11129_v19 }
 0x6fc   :  { %6996 = vmatprep.subr.bf16.mxu0 %v11152_v43 }
 0x6fd   :  { %7026 = vmatpush1.bf16.msra.mxu1 %v11138_v17 }
 0x6fe   :  { %7028 = vmatprep.subr.bf16.mxu1 %v11163_v15 }
 0x6ff   :  { %6998 = vmatpush1.bf16.msra.mxu0 %v11165_v36 }
 0x700   :  { %7000 = vmatprep.subr.bf16.mxu0 %v11188_v51  ;;  %v4605_v51 = vld [vmem:[%s11796_s3 + $0x198] sm:$0xff] }
 0x701   :  { %7030 = vmatpush1.bf16.msra.mxu1 %v11174_v54  ;;  %v11210_v54 = vpack.c.bf16 %v4592_v26, %v4588_v62  ;;  %v4601_v62 = vld [vmem:[%s11796_s3 + $0x178] sm:$0xff] }
 0x702   :  { %7032 = vmatprep.subr.bf16.mxu1 %v11199_v3  ;;  %v11229_v26 = vpack.c.bf16 %v4601_v62, %v4597_v9  ;;  %v4607_v3 = vld [vmem:[%s11796_s3 + $0x1a8] sm:$0xff] }
 0x703   :  { %12290 = vst [vmem:[#allocation19_spill] sm:$0xff] %v11210_v54  ;;  %7002 = vmatpush1.bf16.msra.mxu0 %v11201_v47  ;;  %v4594_v47 = vld [vmem:[%s11796_s3 + $0x140] sm:$0xff] }
 0x704   :  { %12292 = vst [vmem:[#allocation21_spill] sm:$0xff] %v11229_v26  ;;  %7004 = vmatprep.subr.bf16.mxu0 %v11221_v44  ;;  %v11245_v9 = vpack.c.bf16 %v4598_v10, %v4594_v47  ;;  %v4603_v44 = vld [vmem:[%s11796_s3 + $0x188] sm:$0xff]  ;;  %v4609_v47 = vld [vmem:[%s11796_s3 + $0x1b8] sm:$0xff]  ;;  %v4606_v10 = vld [vmem:[%s11796_s3 + $0x1a0] sm:$0xff] }
 0x705   :  { %7034 = vmatpush1.bf16.msra.mxu1 %v11210_v54  ;;  %v4600_v54 = vld [vmem:[%s11796_s3 + $0x170] sm:$0xff]  ;;  %v11258_v36 = vpack.c.bf16 %v4607_v3, %v4603_v44 }
 0x706   :  { %7036 = vmatprep.subr.bf16.mxu1 %v11229_v26  ;;  %12293 = vst [vmem:[#allocation22_spill] sm:$0xff] %v11245_v9  ;;  %v11247_v62 = vpack.c.bf16 %v4600_v54, %v4596_v40  ;;  %v4602_v54 = vld [vmem:[%s11796_s3 + $0x180] sm:$0xff]  ;;  %v11271_v40 = vpack.c.bf16 %v4609_v47, %v4605_v51  ;;  %v4604_v44 = vld [vmem:[%s11796_s3 + $0x190] sm:$0xff]  ;;  %v4611_v51 = vld [vmem:[%s11796_s3 + $0x1c8] sm:$0xff] }
 0x707   :  { %12295 = vst [vmem:[#allocation24_spill] sm:$0xff] %v11258_v36  ;;  %7006 = vmatpush1.bf16.msra.mxu0 %v11245_v9  ;;  %v11273_v3 = vpack.c.bf16 %v4606_v10, %v4602_v54  ;;  %v4608_v26 = vld [vmem:[%s11796_s3 + $0x1b0] sm:$0xff]  ;;  %v4615_v47 = vld [vmem:[%s11796_s3 + $0x1e8] sm:$0xff]  ;;  %v4613_v54 = vld [vmem:[%s11796_s3 + $0x1d8] sm:$0xff] }
 0x708   :  { %12294 = vst [vmem:[#allocation23_spill] sm:$0xff] %v11247_v62  ;;  %12296 = vst [vmem:[#allocation25_spill] sm:$0xff] %v11271_v40  ;;  %7008 = vmatprep.subr.bf16.mxu0 %v11258_v36  ;;  %v11282_v15 = vpack.c.bf16 %v4608_v26, %v4604_v44  ;;  %v11294_v10 = vpack.c.bf16 %v4615_v47, %v4611_v51  ;;  %v4617_v26 = vld [vmem:[%s11796_s3 + $0x1f8] sm:$0xff]  ;;  %v4610_v44 = vld [vmem:[%s11796_s3 + $0x1c0] sm:$0xff] }
 0x709   :  { %7038 = vmatpush1.bf16.msra.mxu1 %v11247_v62  ;;  %12297 = vst [vmem:[#allocation26_spill] sm:$0xff] %v11273_v3  ;;  %v11307_v36 = vpack.c.bf16 %v4617_v26, %v4613_v54  ;;  %v4612_v47 = vld [vmem:[%s11796_s3 + $0x1d0] sm:$0xff]  ;;  %v4491_v54 = vld [vmem:[%s11797_s2 + $0x8] sm:$0xff]  ;;  %v4493_v26 = vld [vmem:[%s11797_s2 + $0x18] sm:$0xff] }
 0x70a   :  { %12298 = vst [vmem:[#allocation27_spill] sm:$0xff] %v11282_v15  ;;  %7040 = vmatprep.subr.bf16.mxu1 %v11271_v40  ;;  %12299 = vst [vmem:[#allocation28_spill] sm:$0xff] %v11294_v10  ;;  %v4614_v40 = vld [vmem:[%s11796_s3 + $0x1e0] sm:$0xff]  ;;  %v4616_v62 = vld [vmem:[%s11796_s3 + $0x1f0] sm:$0xff] }
 0x70b   :  { %7010 = vmatpush1.bf16.msra.mxu0 %v11273_v3  ;;  %12300 = vst [vmem:[#allocation29_spill] sm:$0xff] %v11307_v36  ;;  %v11309_v51 = vpack.c.bf16 %v4614_v40, %v4610_v44  ;;  %v11318_v9 = vpack.c.bf16 %v4616_v62, %v4612_v47  ;;  %v4495_v40 = vld [vmem:[%s11797_s2 + $0x28] sm:$0xff]  ;;  %v4497_v62 = vld [vmem:[%s11797_s2 + $0x38] sm:$0xff] }
 0x70c   :  { %7012 = vmatprep.subr.bf16.mxu0 %v11294_v10  ;;  %v11330_v44 = vpack.c.bf16 %v4495_v40, %v4491_v54  ;;  %v11337_v47 = vpack.c.bf16 %v4497_v62, %v4493_v26 }
 0x70d   :  { %7042 = vmatpush1.bf16.msra.mxu1 %v11282_v15  ;;  %12301 = vst [vmem:[#allocation30_spill] sm:$0xff] %v11309_v51  ;;  %12302 = vst [vmem:[#allocation31_spill] sm:$0xff] %v11318_v9 }
 0x70e   :  { %7044 = vmatprep.subr.bf16.mxu1 %v11307_v36  ;;  %12303 = vst [vmem:[#allocation32_spill] sm:$0xff] %v11330_v44  ;;  %12304 = vst [vmem:[#allocation33_spill] sm:$0xff] %v11337_v47  ;;  %v4199_v36 = vld [vmem:[%s11799_s4] sm:$0xf] }
 0x70f   :  { %7014 = vmatpush1.bf16.msra.mxu0 %v11309_v51  ;;  %v4204_v54 = vrot.slane %v4199_v36, %v12258_v42  ;;  %v4208_v40 = vrot.slane %v4199_v36, %v12259_v27  ;;  %v4212_v17 = vrot.slane %v4199_v36, %v12261_v12 }
 0x710   :  { %7048 = vmatprep.subr.bf16.mxu0 %v11330_v44  ;;  %v4216_v44 = vrot.slane %v4199_v36, %v12260_v2 }
 0x711   :  { %7046 = vmatpush1.bf16.msra.mxu1 %v11318_v9 }
 0x712   :  { %7080 = vmatprep.subr.bf16.mxu1 %v11337_v47 }
 0x7a4   :  { %v4123_v10 = vpop.f32.mrb[22].mxu0  ;;  %v4194_v15 = vpop.f32.mrb[22].mxu1 }
 0x7a5   :  { %v4221_v3 = vadd.f32 %v4204_v54, %v4123_v10  ;;  %v4125_v51 = vpop.f32.mrb[23].mxu0  ;;  %v4196_v43 = vpop.f32.mrb[23].mxu1  ;;  %v4223_v32 = vadd.f32 %v4212_v17, %v4194_v15  ;;  %v5743_v17 = vld [vmem:[%s11798_s0 + $0xc0] sm:$0xff] }
 0x7a6   :  { %v4222_v9 = vadd.f32 %v4208_v40, %v4125_v51  ;;  %v4224_v47 = vadd.f32 %v4216_v44, %v4196_v43 }
 0x7a7   :  { %v5739_v26 = vmul.f32 -1.442695, %v4221_v3 }
 0x7a8   :  { %v5740_v62 = vmul.f32 -1.442695, %v4222_v9  ;;  %v5741_v19 = vmul.f32 -1.442695, %v4224_v47 }
 0x7a9   :  { %7512 = vpow2.f32 %v5739_v26 }
 0x7aa   :  { %7514 = vpow2.f32 %v5740_v62  ;;  %v5746_v62 = vld [vmem:[%s11798_s0 + $0xd8] sm:$0xff] }
 0x7ab   :  { %7516 = vpow2.f32 %v5741_v19 }
 0x7ac   :  { %7518 = vtanh.f32 %v4223_v32 }
 0x7b3   :  { %v7513_v42 = vpop.eup %7512 }
 0x7b4   :  { %v7515_v56 = vpop.eup %7514  ;;  %v4228_v27 = vadd.f32 1.0, %v7513_v42  ;;  %v5744_v42 = vld [vmem:[%s11798_s0 + $0xc8] sm:$0xff] }
 0x7b5   :  { %v4234_v10 = vadd.f32 1.0, %v7515_v56  ;;  %v7517_v51 = vpop.eup %7516 }
 0x7b6   :  { %7520 = vrcp.f32 %v4228_v27  ;;  %v7519_v3 = vpop.eup %7518  ;;  %v4241_v26 = vadd.f32 1.0, %v7517_v51 }
 0x7b7   :  { %7522 = vrcp.f32 %v4234_v10  ;;  %v5745_v10 = vld [vmem:[%s11798_s0 + $0xd0] sm:$0xff] }
 0x7b8   :  { %7524 = vrcp.f32 %v4241_v26  ;;  %v4499_v26 = vld [vmem:[%s11797_s2 + $0x48] sm:$0xff] }
 0x7c0   :  { %v7521_v9 = vpop.eup %7520 }
 0x7c1   :  { %v7523_v54 = vpop.eup %7522  ;;  %v4245_v40 = vmul.f32 %v7521_v9, %v7519_v3  ;;  %v4490_v3 = vld [vmem:[%s11797_s2] sm:$0xff] }
 0x7c2   :  { %v4244_v43 = vmul.f32 %v7523_v54, %v10689_v4  ;;  %v4494_v9 = vld [vmem:[%s11797_s2 + $0x20] sm:$0xff]  ;;  %v4492_v54 = vld [vmem:[%s11797_s2 + $0x10] sm:$0xff] }
 0x7c4   :  { %v11355_v32 = vadd.f32 %v4245_v40, %v4244_v43  ;;  %v4386_v27 = vpop.f32.mrb[24].mxu0  ;;  %v4457_v56 = vpop.f32.mrb[24].mxu1  ;;  %v4496_v40 = vld [vmem:[%s11797_s2 + $0x30] sm:$0xff]  ;;  %v4503_v43 = vld [vmem:[%s11797_s2 + $0x68] sm:$0xff] }
 0x7c5   :  { %v4462_v19 = vadd.f32 %v5743_v17, %v4386_v27  ;;  %v4388_v15 = vpop.f32.mrb[25].mxu0  ;;  %v4459_v36 = vpop.f32.mrb[25].mxu1  ;;  %v4501_v17 = vld [vmem:[%s11797_s2 + $0x58] sm:$0xff]  ;;  %v11398_v12 = vpack.c.bf16 %v4503_v43, %v4499_v26 }
 0x7c6   :  { %12305 = vst [vmem:[#allocation34_spill] sm:$0xff] %v11355_v32  ;;  %v4463_v44 = vadd.f32 %v5744_v42, %v4388_v15  ;;  %7526 = vtanh.f32 %v11355_v32  ;;  %v4465_v51 = vadd.f32 %v5746_v62, %v4459_v36  ;;  %v4505_v42 = vld [vmem:[%s11797_s2 + $0x78] sm:$0xff]  ;;  %v7525_v27 = vpop.eup %7524  ;;  %v11388_v36 = vpack.c.bf16 %v4494_v9, %v4490_v3  ;;  %v4504_v3 = vld [vmem:[%s11797_s2 + $0x70] sm:$0xff]  ;;  %v4507_v9 = vld [vmem:[%s11797_s2 + $0x88] sm:$0xff] }
 0x7c7   :  { %v5747_v4 = vmul.f32 -1.442695, %v4462_v19  ;;  %v4464_v62 = vadd.f32 %v5745_v10, %v4457_v56  ;;  %12308 = vst [vmem:[#allocation37_spill] sm:$0xff] %v11398_v12  ;;  %v11400_v2 = vpack.c.bf16 %v4505_v42, %v4501_v17  ;;  %v4511_v56 = vld [vmem:[%s11797_s2 + $0xa8] sm:$0xff]  ;;  %v4509_v10 = vld [vmem:[%s11797_s2 + $0x98] sm:$0xff] }
 0x7c8   :  { %v5748_v47 = vmul.f32 -1.442695, %v4463_v44  ;;  %v5749_v15 = vmul.f32 -1.442695, %v4465_v51  ;;  %12306 = vst [vmem:[#allocation35_spill] sm:$0xff] %v11388_v36  ;;  %v11390_v44 = vpack.c.bf16 %v4496_v40, %v4492_v54  ;;  %v4500_v51 = vld [vmem:[%s11797_s2 + $0x50] sm:$0xff] }
 0x7c9   :  { %7528 = vpow2.f32 %v5747_v4  ;;  %v4498_v4 = vld [vmem:[%s11797_s2 + $0x40] sm:$0xff]  ;;  %12309 = vst [vmem:[#allocation38_spill] sm:$0xff] %v11400_v2  ;;  %v4513_v54 = vld [vmem:[%s11797_s2 + $0xb8] sm:$0xff]  ;;  %v11427_v42 = vpack.c.bf16 %v4504_v3, %v4500_v51  ;;  %v4512_v51 = vld [vmem:[%s11797_s2 + $0xb0] sm:$0xff] }
 0x7ca   :  { %7530 = vpow2.f32 %v5748_v47  ;;  %12307 = vst [vmem:[#allocation36_spill] sm:$0xff] %v11390_v44  ;;  %v4502_v47 = vld [vmem:[%s11797_s2 + $0x60] sm:$0xff]  ;;  %v4519_v3 = vld [vmem:[%s11797_s2 + $0xe8] sm:$0xff] }
 0x7cb   :  { %7532 = vpow2.f32 %v5749_v15  ;;  %v11425_v17 = vpack.c.bf16 %v4502_v47, %v4498_v4  ;;  %12311 = vst [vmem:[#allocation40_spill] sm:$0xff] %v11427_v42  ;;  %v11437_v15 = vpack.c.bf16 %v4511_v56, %v4507_v9  ;;  %v11439_v4 = vpack.c.bf16 %v4513_v54, %v4509_v10  ;;  %v4508_v47 = vld [vmem:[%s11797_s2 + $0x90] sm:$0xff]  ;;  %v4517_v9 = vld [vmem:[%s11797_s2 + $0xd8] sm:$0xff] }
 0x7cc   :  { %7534 = vtanh.f32 %v4464_v62  ;;  %v4515_v62 = vld [vmem:[%s11797_s2 + $0xc8] sm:$0xff]  ;;  %v4521_v56 = vld [vmem:[%s11797_s2 + $0xf8] sm:$0xff]  ;;  %v11465_v54 = vpack.c.bf16 %v4512_v51, %v4508_v47 }
 0x7cd   :  { %12310 = vst [vmem:[#allocation39_spill] sm:$0xff] %v11425_v17  ;;  %12312 = vst [vmem:[#allocation41_spill] sm:$0xff] %v11437_v15  ;;  %v4523_v47 = vld [vmem:[%s11797_s2 + $0x108] sm:$0xff] }
 0x7ce   :  { %12313 = vst [vmem:[#allocation42_spill] sm:$0xff] %v11439_v4  ;;  %12315 = vst [vmem:[#allocation44_spill] sm:$0xff] %v11465_v54  ;;  %v4527_v51 = vld [vmem:[%s11797_s2 + $0x128] sm:$0xff] }
 0x7d0   :  { %v7527_v19 = vpop.eup %7526 }
 0x7d1   :  { %v4248_v32 = vmul.f32 %v7527_v19, %v7525_v27  ;;  %v4506_v27 = vld [vmem:[%s11797_s2 + $0x80] sm:$0xff] }
 0x7d2   :  { %v4510_v19 = vld [vmem:[%s11797_s2 + $0xa0] sm:$0xff] }
 0x7d3   :  { %v7529_v40 = vpop.eup %7528  ;;  %5742 = vst [vmem:[%s11800_s5 + $0x28] sm:$0xff] %v4248_v32  ;;  %4683 = vmatmul.mubr.f32.vlgmr.msra.gmra.mrb[26].mxu0 %v4248_v32  ;;  %4754 = vmatmul.mubr.f32.vlgmr.msra.gmra.mrb[26].mxu1 %v4248_v32  ;;  %v11463_v10 = vpack.c.bf16 %v4510_v19, %v4506_v27  ;;  %v4516_v27 = vld [vmem:[%s11797_s2 + $0xd0] sm:$0xff] }
 0x7d4   :  { %v7531_v26 = vpop.eup %7530  ;;  %v4469_v43 = vadd.f32 1.0, %v7529_v40  ;;  %7050 = vmatpush1.bf16.msra.mxu0 %v11388_v36  ;;  %7082 = vmatpush1.bf16.msra.mxu1 %v11390_v44  ;;  %v4514_v40 = vld [vmem:[%s11797_s2 + $0xc0] sm:$0xff]  ;;  %v4520_v19 = vld [vmem:[%s11797_s2 + $0xf0] sm:$0xff] }
 0x7d5   :  { %v4475_v32 = vadd.f32 1.0, %v7531_v26  ;;  %7052 = vmatprep.subr.bf16.mxu0 %v11398_v12  ;;  %7084 = vmatprep.subr.bf16.mxu1 %v11400_v2  ;;  %12314 = vst [vmem:[#allocation43_spill] sm:$0xff] %v11463_v10  ;;  %v4518_v26 = vld [vmem:[%s11797_s2 + $0xe0] sm:$0xff] }
 0x7d6   :  { %7536 = vrcp.f32 %v4469_v43  ;;  %4824 = vmatprep.mubr.f32.mxu0 %v12017_v5  ;;  %4895 = vmatprep.mubr.f32.mxu1 %v12017_v5  ;;  %v11475_v43 = vpack.c.bf16 %v4519_v3, %v4515_v62  ;;  %v4525_v62 = vld [vmem:[%s11797_s2 + $0x118] sm:$0xff]  ;;  %v4534_v2 = vld [vmem:[%s11797_s2 + $0x160] sm:$0xff] }
 0x7d7   :  { %7538 = vrcp.f32 %v4475_v32  ;;  %v11477_v32 = vpack.c.bf16 %v4521_v56, %v4517_v9  ;;  %v4529_v3 = vld [vmem:[%s11797_s2 + $0x138] sm:$0xff]  ;;  %v11499_v9 = vpack.c.bf16 %v4518_v26, %v4514_v40  ;;  %v11501_v56 = vpack.c.bf16 %v4520_v19, %v4516_v27  ;;  %v4524_v40 = vld [vmem:[%s11797_s2 + $0x110] sm:$0xff]  ;;  %v4531_v27 = vld [vmem:[%s11797_s2 + $0x148] sm:$0xff]  ;;  %v7533_v19 = vpop.eup %7532 }
 0x7d8   :  { %7054 = vmatpush1.bf16.msra.mxu0 %v11425_v17  ;;  %7086 = vmatpush1.bf16.msra.mxu1 %v11427_v42  ;;  %12316 = vst [vmem:[#allocation45_spill] sm:$0xff] %v11475_v43  ;;  %v11511_v42 = vpack.c.bf16 %v4527_v51, %v4523_v47  ;;  %v4528_v26 = vld [vmem:[%s11797_s2 + $0x130] sm:$0xff]  ;;  %v4535_v47 = vld [vmem:[%s11797_s2 + $0x168] sm:$0xff]  ;;  %v4533_v51 = vld [vmem:[%s11797_s2 + $0x158] sm:$0xff]  ;;  %v4482_v36 = vadd.f32 1.0, %v7533_v19 }
 0x7d9   :  { %7056 = vmatprep.subr.bf16.mxu0 %v11437_v15  ;;  %7088 = vmatprep.subr.bf16.mxu1 %v11439_v4  ;;  %12317 = vst [vmem:[#allocation46_spill] sm:$0xff] %v11477_v32  ;;  %12318 = vst [vmem:[#allocation47_spill] sm:$0xff] %v11501_v56  ;;  %v4522_v4 = vld [vmem:[%s11797_s2 + $0x100] sm:$0xff]  ;;  %v4541_v19 = vld [vmem:[%s11797_s2 + $0x198] sm:$0xff] }
 0x7da   :  { %v4526_v15 = vld [vmem:[%s11797_s2 + $0x120] sm:$0xff]  ;;  %7540 = vrcp.f32 %v4482_v36  ;;  %v4547_v36 = vld [vmem:[%s11797_s2 + $0x1c8] sm:$0xff] }
 0x7db   :  { %v4530_v17 = vld [vmem:[%s11797_s2 + $0x140] sm:$0xff] }
 0x7dc   :  { %7058 = vmatpush1.bf16.msra.mxu0 %v11463_v10  ;;  %7090 = vmatpush1.bf16.msra.mxu1 %v11465_v54  ;;  %v11513_v10 = vpack.c.bf16 %v4529_v3, %v4525_v62  ;;  %v4537_v62 = vld [vmem:[%s11797_s2 + $0x178] sm:$0xff]  ;;  %v7535_v3 = vpop.eup %7534  ;;  %v11537_v54 = vpack.c.bf16 %v4528_v26, %v4524_v40  ;;  %v4536_v40 = vld [vmem:[%s11797_s2 + $0x170] sm:$0xff] }
 0x7dd   :  { %7060 = vmatprep.subr.bf16.mxu0 %v11475_v43  ;;  %7092 = vmatprep.subr.bf16.mxu1 %v11477_v32  ;;  %v11535_v43 = vpack.c.bf16 %v4526_v15, %v4522_v4  ;;  %v11549_v15 = vpack.c.bf16 %v4537_v62, %v4533_v51  ;;  %v4532_v4 = vld [vmem:[%s11797_s2 + $0x150] sm:$0xff]  ;;  %v11574_v62 = vpack.c.bf16 %v4534_v2, %v4530_v17 }
 0x7de   :  { %v4540_v2 = vld [vmem:[%s11797_s2 + $0x190] sm:$0xff] }
 0x7df   :  { %12320 = vst [vmem:[#allocation49_spill] sm:$0xff] %v11549_v15  ;;  %v4544_v17 = vld [vmem:[%s11797_s2 + $0x1b0] sm:$0xff] }
 0x7e0   :  { %v7537_v32 = vpop.eup %7536  ;;  %7062 = vmatpush1.bf16.msra.mxu0 %v11499_v9  ;;  %7094 = vmatpush1.bf16.msra.mxu1 %v11501_v56  ;;  %v11547_v56 = vpack.c.bf16 %v4535_v47, %v4531_v27  ;;  %v4543_v27 = vld [vmem:[%s11797_s2 + $0x1a8] sm:$0xff]  ;;  %v4545_v47 = vld [vmem:[%s11797_s2 + $0x1b8] sm:$0xff] }
 0x7e1   :  { %v7539_v12 = vpop.eup %7538  ;;  %v4486_v44 = vmul.f32 %v7537_v32, %v7535_v3  ;;  %7064 = vmatprep.subr.bf16.mxu0 %v11511_v42  ;;  %7096 = vmatprep.subr.bf16.mxu1 %v11513_v10  ;;  %v4539_v32 = vld [vmem:[%s11797_s2 + $0x188] sm:$0xff]  ;;  %v4542_v3 = vld [vmem:[%s11797_s2 + $0x1a0] sm:$0xff] }
 0x7e2   :  { %12319 = vst [vmem:[#allocation48_spill] sm:$0xff] %v11547_v56  ;;  %v4485_v26 = vmul.f32 %v7539_v12, %v10720_v0  ;;  %v11576_v12 = vpack.c.bf16 %v4536_v40, %v4532_v4  ;;  %v4538_v0 = vld [vmem:[%s11797_s2 + $0x180] sm:$0xff]  ;;  %v4551_v4 = vld [vmem:[%s11797_s2 + $0x1e8] sm:$0xff]  ;;  %v4549_v40 = vld [vmem:[%s11797_s2 + $0x1d8] sm:$0xff] }
 0x7e4   :  { %v11570_v51 = vadd.f32 %v4486_v44, %v4485_v26  ;;  %7066 = vmatpush1.bf16.msra.mxu0 %v11535_v43  ;;  %7098 = vmatpush1.bf16.msra.mxu1 %v11537_v54  ;;  %12321 = vst [vmem:[#allocation50_spill] sm:$0xff] %v11576_v12  ;;  %v11586_v44 = vpack.c.bf16 %v4543_v27, %v4539_v32  ;;  %v4553_v32 = vld [vmem:[%s11797_s2 + $0x1f8] sm:$0xff] }
 0x7e5   :  { %7068 = vmatprep.subr.bf16.mxu0 %v11547_v56  ;;  %7100 = vmatprep.subr.bf16.mxu1 %v11549_v15  ;;  %v11588_v26 = vpack.c.bf16 %v4545_v47, %v4541_v19  ;;  %v11611_v27 = vpack.c.bf16 %v4542_v3, %v4538_v0  ;;  %v11613_v19 = vpack.c.bf16 %v4544_v17, %v4540_v2  ;;  %v4546_v47 = vld [vmem:[%s11797_s2 + $0x1c0] sm:$0xff]  ;;  %v4548_v0 = vld [vmem:[%s11797_s2 + $0x1d0] sm:$0xff] }
 0x7e6   :  { %7542 = vtanh.f32 %v11570_v51  ;;  %v11620_v15 = vpack.c.bf16 %v4551_v4, %v4547_v36  ;;  %v11622_v56 = vpack.c.bf16 %v4553_v32, %v4549_v40  ;;  %v4552_v3 = vld [vmem:[%s11797_s2 + $0x1f0] sm:$0xff]  ;;  %v7541_v36 = vpop.eup %7540 }
 0x7e7   :  { %v11637_v17 = vpack.c.bf16 %v4552_v3, %v4548_v0 }
 0x7e8   :  { %7070 = vmatpush1.bf16.msra.mxu0 %v11574_v62  ;;  %7102 = vmatpush1.bf16.msra.mxu1 %v11576_v12  ;;  %v4550_v12 = vld [vmem:[%s11797_s2 + $0x1e0] sm:$0xff] }
 0x7e9   :  { %7072 = vmatprep.subr.bf16.mxu0 %v11586_v44  ;;  %7104 = vmatprep.subr.bf16.mxu1 %v11588_v26  ;;  %v11635_v2 = vpack.c.bf16 %v4550_v12, %v4546_v47  ;;  %v12351_v47 = vld [vmem:[#allocation9_spill] sm:$0xff] }
 0x7ec   :  { %7074 = vmatpush1.bf16.msra.mxu0 %v11611_v27  ;;  %7106 = vmatpush1.bf16.msra.mxu1 %v11613_v19 }
 0x7ed   :  { %7076 = vmatprep.subr.bf16.mxu0 %v11620_v15  ;;  %7108 = vmatprep.subr.bf16.mxu1 %v11622_v56 }
 0x7f0   :  { %v7543_v4 = vpop.eup %7542  ;;  %7078 = vmatpush1.bf16.msra.mxu0 %v11635_v2  ;;  %7110 = vmatpush1.bf16.msra.mxu1 %v11637_v17 }
 0x7f1   :  { %7112 = vmatprep.subr.bf16.mxu0 %v10753_v21  ;;  %7144 = vmatprep.subr.bf16.mxu1 %v10755_v48  ;;  %v4489_v40 = vmul.f32 %v7543_v4, %v7541_v36  ;;  %v12322_v21 = vld [vmem:[#allocation52_spill] sm:$0xff]  ;;  %v12323_v48 = vld [vmem:[#allocation53_spill] sm:$0xff] }
 0x7f3   :  { %4825 = vmatmul.mubr.f32.vlgmr.msra.gmra.mrb[26].mxu0 %v4489_v40  ;;  %4896 = vmatmul.mubr.f32.vlgmr.msra.gmra.mrb[26].mxu1 %v4489_v40 }
 0x7f4   :  { %7114 = vmatpush1.bf16.msra.mxu0 %v10777_v7  ;;  %7146 = vmatpush1.bf16.msra.mxu1 %v10779_v16  ;;  %v12324_v7 = vld [vmem:[#allocation10_spill] sm:$0xff]  ;;  %v12325_v16 = vld [vmem:[#allocation11_spill] sm:$0xff] }
 0x7f5   :  { %7116 = vmatprep.subr.bf16.mxu0 %v10791_v57  ;;  %7148 = vmatprep.subr.bf16.mxu1 %v10793_v45  ;;  %v12326_v57 = vld [vmem:[#allocation12_spill] sm:$0xff]  ;;  %v12327_v45 = vld [vmem:[#allocation13_spill] sm:$0xff] }
 0x7f6   :  { %5087 = vmatprep.mubr.f32.mxu0 %v12017_v5  ;;  %5158 = vmatprep.mubr.f32.mxu1 %v12017_v5 }
 0x7f8   :  { %7118 = vmatpush1.bf16.msra.mxu0 %v10817_v53  ;;  %7150 = vmatpush1.bf16.msra.mxu1 %v10819_v28  ;;  %v12328_v53 = vld [vmem:[#allocation14_spill] sm:$0xff]  ;;  %v12329_v28 = vld [vmem:[#allocation15_spill] sm:$0xff] }
 0x7f9   :  { %7120 = vmatprep.subr.bf16.mxu0 %v10829_v30  ;;  %7152 = vmatprep.subr.bf16.mxu1 %v10831_v60  ;;  %v12330_v30 = vld [vmem:[#allocation16_spill] sm:$0xff]  ;;  %v12331_v60 = vld [vmem:[#allocation17_spill] sm:$0xff] }
 0x7fc   :  { %7122 = vmatpush1.bf16.msra.mxu0 %v10855_v39  ;;  %7154 = vmatpush1.bf16.msra.mxu1 %v10857_v33  ;;  %v12332_v39 = vld [vmem:[#allocation18_spill] sm:$0xff]  ;;  %v12333_v33 = vld [vmem:[#allocation19_spill] sm:$0xff] }
 0x7fd   :  { %7124 = vmatprep.subr.bf16.mxu0 %v10867_v6  ;;  %7156 = vmatprep.subr.bf16.mxu1 %v10869_v49  ;;  %v12334_v6 = vld [vmem:[#allocation20_spill] sm:$0xff]  ;;  %v12335_v49 = vld [vmem:[#allocation21_spill] sm:$0xff] }
 0x800   :  { %7126 = vmatpush1.bf16.msra.mxu0 %v10891_v46  ;;  %7158 = vmatpush1.bf16.msra.mxu1 %v10893_v25  ;;  %v12336_v46 = vld [vmem:[#allocation22_spill] sm:$0xff]  ;;  %v12337_v25 = vld [vmem:[#allocation23_spill] sm:$0xff] }
 0x801   :  { %7128 = vmatprep.subr.bf16.mxu0 %v10903_v58  ;;  %7160 = vmatprep.subr.bf16.mxu1 %v10905_v61  ;;  %v12338_v58 = vld [vmem:[#allocation24_spill] sm:$0xff]  ;;  %v12339_v61 = vld [vmem:[#allocation25_spill] sm:$0xff] }
 0x804   :  { %7130 = vmatpush1.bf16.msra.mxu0 %v10927_v23  ;;  %7162 = vmatpush1.bf16.msra.mxu1 %v10929_v24  ;;  %v12340_v23 = vld [vmem:[#allocation26_spill] sm:$0xff]  ;;  %v12341_v24 = vld [vmem:[#allocation27_spill] sm:$0xff] }
 0x805   :  { %7132 = vmatprep.subr.bf16.mxu0 %v10939_v35  ;;  %7164 = vmatprep.subr.bf16.mxu1 %v10941_v20  ;;  %v12342_v35 = vld [vmem:[#allocation28_spill] sm:$0xff]  ;;  %v12343_v20 = vld [vmem:[#allocation29_spill] sm:$0xff] }
 0x808   :  { %7134 = vmatpush1.bf16.msra.mxu0 %v10963_v37  ;;  %7166 = vmatpush1.bf16.msra.mxu1 %v10965_v55  ;;  %v12344_v37 = vld [vmem:[#allocation30_spill] sm:$0xff]  ;;  %v12345_v55 = vld [vmem:[#allocation31_spill] sm:$0xff] }
 0x809   :  { %7136 = vmatprep.subr.bf16.mxu0 %v10975_v59  ;;  %7168 = vmatprep.subr.bf16.mxu1 %v10977_v29  ;;  %v12346_v59 = vld [vmem:[#allocation32_spill] sm:$0xff]  ;;  %v12347_v29 = vld [vmem:[#allocation33_spill] sm:$0xff] }
 0x80c   :  { %7138 = vmatpush1.bf16.msra.mxu0 %v10999_v11  ;;  %7170 = vmatpush1.bf16.msra.mxu1 %v11001_v14  ;;  %v4902_v11 = vld [vmem:[%s11799_s4] sm:$0xf] }
 0x80d   :  { %7140 = vmatprep.subr.bf16.mxu0 %v11008_v41  ;;  %7172 = vmatprep.subr.bf16.mxu1 %v11010_v38  ;;  %v12348_v14 = vld [vmem:[#allocation6_spill] sm:$0xff]  ;;  %v12349_v38 = vld [vmem:[#allocation8_spill] sm:$0xff]  ;;  %v4915_v0 = vrot.slane %v4902_v11, %v12351_v47 }
 0x80e   :  { %v4907_v41 = vrot.slane %v4902_v11, %v12348_v14 }
 0x810   :  { %7142 = vmatpush1.bf16.msra.mxu0 %v11023_v52  ;;  %7174 = vmatpush1.bf16.msra.mxu1 %v11025_v50  ;;  %v4911_v52 = vrot.slane %v4902_v11, %v12349_v38 }
 0x811   :  { %7176 = vmatprep.subr.bf16.mxu0 %v11044_v18  ;;  %7208 = vmatprep.subr.bf16.mxu1 %v11055_v8 }
 0x813   :  { %5088 = vmatmul.mubr.f32.vlgmr.msra.gmra.mrb[28].mxu0 %v4489_v40  ;;  %5159 = vmatmul.mubr.f32.vlgmr.msra.gmra.mrb[28].mxu1 %v4489_v40 }
 0x814   :  { %7178 = vmatpush1.bf16.msra.mxu0 %v11057_v63  ;;  %7210 = vmatpush1.bf16.msra.mxu1 %v11066_v1 }
 0x815   :  { %7180 = vmatprep.subr.bf16.mxu0 %v11080_v22  ;;  %7212 = vmatprep.subr.bf16.mxu1 %v11091_v13 }
 0x816   :  { %5385 = vmatprep.mubr.f32.mxu0 %v12017_v5  ;;  %5456 = vmatprep.mubr.f32.mxu1 %v12017_v5 }
 0x818   :  { %7182 = vmatpush1.bf16.msra.mxu0 %v11093_v31  ;;  %7214 = vmatpush1.bf16.msra.mxu1 %v11102_v34  ;;  %v12350_v34 = vld [vmem:[#allocation7_spill] sm:$0xff] }
 0x819   :  { %7184 = vmatprep.subr.bf16.mxu0 %v12322_v21  ;;  %7216 = vmatprep.subr.bf16.mxu1 %v12323_v48  ;;  %v4919_v12 = vrot.slane %v4902_v11, %v12350_v34 }
 0x81c   :  { %7186 = vmatpush1.bf16.msra.mxu0 %v12324_v7  ;;  %7218 = vmatpush1.bf16.msra.mxu1 %v12325_v16 }
 0x81d   :  { %7188 = vmatprep.subr.bf16.mxu0 %v12326_v57  ;;  %7220 = vmatprep.subr.bf16.mxu1 %v12327_v45 }
 0x820   :  { %7190 = vmatpush1.bf16.msra.mxu0 %v12328_v53  ;;  %7222 = vmatpush1.bf16.msra.mxu1 %v12329_v28 }
 0x821   :  { %7192 = vmatprep.subr.bf16.mxu0 %v12330_v30  ;;  %7224 = vmatprep.subr.bf16.mxu1 %v12331_v60  ;;  %v12352_v30 = vld [vmem:[#allocation34_spill] sm:$0xff] }
 0x824   :  { %7194 = vmatpush1.bf16.msra.mxu0 %v12332_v39  ;;  %7226 = vmatpush1.bf16.msra.mxu1 %v12333_v33  ;;  %v5754_v39 = vld [vmem:[%s11798_s0 + $0xe0] sm:$0xff]  ;;  %v5755_v33 = vld [vmem:[%s11798_s0 + $0xe8] sm:$0xff] }
 0x825   :  { %7196 = vmatprep.subr.bf16.mxu0 %v12334_v6  ;;  %7228 = vmatprep.subr.bf16.mxu1 %v12335_v49 }
 0x828   :  { %7198 = vmatpush1.bf16.msra.mxu0 %v12336_v46  ;;  %7230 = vmatpush1.bf16.msra.mxu1 %v12337_v25 }
 0x829   :  { %7200 = vmatprep.subr.bf16.mxu0 %v12338_v58  ;;  %7232 = vmatprep.subr.bf16.mxu1 %v12339_v61 }
 0x82c   :  { %7202 = vmatpush1.bf16.msra.mxu0 %v12340_v23  ;;  %7234 = vmatpush1.bf16.msra.mxu1 %v12341_v24 }
 0x82d   :  { %7204 = vmatprep.subr.bf16.mxu0 %v12342_v35  ;;  %7236 = vmatprep.subr.bf16.mxu1 %v12343_v20  ;;  %v5757_v20 = vld [vmem:[%s11798_s0 + $0xf8] sm:$0xff] }
 0x830   :  { %7206 = vmatpush1.bf16.msra.mxu0 %v12344_v37  ;;  %7238 = vmatpush1.bf16.msra.mxu1 %v12345_v55  ;;  %v5756_v55 = vld [vmem:[%s11798_s0 + $0xf0] sm:$0xff] }
 0x831   :  { %7240 = vmatprep.subr.bf16.mxu0 %v12346_v59  ;;  %7272 = vmatprep.subr.bf16.mxu1 %v12347_v29 }
 0x8c6   :  { %v4826_v50 = vpop.f32.mrb[26].mxu0  ;;  %v4897_v18 = vpop.f32.mrb[26].mxu1 }
 0x8c7   :  { %v4924_v8 = vadd.f32 %v4907_v41, %v4826_v50  ;;  %v4828_v63 = vpop.f32.mrb[27].mxu0  ;;  %v4899_v1 = vpop.f32.mrb[27].mxu1  ;;  %v4926_v36 = vadd.f32 %v4915_v0, %v4897_v18  ;;  %v12359_v0 = vld [vmem:[#allocation41_spill] sm:$0xff] }
 0x8c8   :  { %v4925_v22 = vadd.f32 %v4911_v52, %v4828_v63  ;;  %v4927_v32 = vadd.f32 %v4919_v12, %v4899_v1  ;;  %v12353_v63 = vld [vmem:[#allocation35_spill] sm:$0xff]  ;;  %v12354_v1 = vld [vmem:[#allocation36_spill] sm:$0xff] }
 0x8c9   :  { %v5750_v13 = vmul.f32 -1.442695, %v4924_v8  ;;  %v12357_v12 = vld [vmem:[#allocation39_spill] sm:$0xff] }
 0x8ca   :  { %v5751_v31 = vmul.f32 -1.442695, %v4925_v22  ;;  %v5752_v3 = vmul.f32 -1.442695, %v4927_v32  ;;  %v12358_v32 = vld [vmem:[#allocation40_spill] sm:$0xff] }
 0x8cb   :  { %7544 = vpow2.f32 %v5750_v13  ;;  %v12355_v13 = vld [vmem:[#allocation37_spill] sm:$0xff] }
 0x8cc   :  { %7546 = vpow2.f32 %v5751_v31  ;;  %v12356_v31 = vld [vmem:[#allocation38_spill] sm:$0xff] }
 0x8cd   :  { %7548 = vpow2.f32 %v5752_v3  ;;  %v12360_v3 = vld [vmem:[#allocation42_spill] sm:$0xff] }
 0x8ce   :  { %7550 = vtanh.f32 %v4926_v36  ;;  %v12361_v36 = vld [vmem:[#allocation43_spill] sm:$0xff] }
 0x8d5   :  { %v7545_v4 = vpop.eup %7544 }
 0x8d6   :  { %v7547_v40 = vpop.eup %7546  ;;  %v4931_v21 = vadd.f32 1.0, %v7545_v4  ;;  %v12362_v4 = vld [vmem:[#allocation44_spill] sm:$0xff] }
 0x8d7   :  { %v4937_v48 = vadd.f32 1.0, %v7547_v40  ;;  %v7549_v7 = vpop.eup %7548  ;;  %v12363_v40 = vld [vmem:[#allocation45_spill] sm:$0xff] }
 0x8d8   :  { %7552 = vrcp.f32 %v4931_v21  ;;  %v7551_v16 = vpop.eup %7550  ;;  %v4944_v28 = vadd.f32 1.0, %v7549_v7  ;;  %v12364_v21 = vld [vmem:[#allocation46_spill] sm:$0xff] }
 0x8d9   :  { %7554 = vrcp.f32 %v4937_v48 }
 0x8da   :  { %7556 = vrcp.f32 %v4944_v28 }
 0x8e2   :  { %v7553_v57 = vpop.eup %7552 }
 0x8e3   :  { %v7555_v45 = vpop.eup %7554  ;;  %v4948_v53 = vmul.f32 %v7553_v57, %v7551_v16  ;;  %v12365_v16 = vld [vmem:[#allocation47_spill] sm:$0xff] }
 0x8e4   :  { %v4947_v60 = vmul.f32 %v7555_v45, %v12352_v30  ;;  %v7557_v59 = vpop.eup %7556 }
 0x8e6   :  { %v11727_v6 = vadd.f32 %v4948_v53, %v4947_v60  ;;  %v5089_v49 = vpop.f32.mrb[28].mxu0  ;;  %v5160_v46 = vpop.f32.mrb[28].mxu1  ;;  %v12366_v60 = vld [vmem:[#allocation48_spill] sm:$0xff] }
 0x8e7   :  { %v5165_v25 = vadd.f32 %v5754_v39, %v5089_v49  ;;  %v5091_v58 = vpop.f32.mrb[29].mxu0  ;;  %v5162_v61 = vpop.f32.mrb[29].mxu1  ;;  %v5167_v41 = vadd.f32 %v5756_v55, %v5160_v46 }
 0x8e8   :  { %v5166_v23 = vadd.f32 %v5755_v33, %v5091_v58  ;;  %7558 = vtanh.f32 %v11727_v6  ;;  %v5168_v37 = vadd.f32 %v5757_v20, %v5162_v61 }
 0x8e9   :  { %v5758_v24 = vmul.f32 -1.442695, %v5165_v25 }
 0x8ea   :  { %v5759_v35 = vmul.f32 -1.442695, %v5166_v23  ;;  %v5760_v11 = vmul.f32 -1.442695, %v5168_v37 }
 0x8eb   :  { %7560 = vpow2.f32 %v5758_v24 }
 0x8ec   :  { %7562 = vpow2.f32 %v5759_v35 }
 0x8ed   :  { %7564 = vpow2.f32 %v5760_v11 }
 0x8ee   :  { %7566 = vtanh.f32 %v5167_v41 }
 0x8f2   :  { %v7559_v29 = vpop.eup %7558 }
 0x8f3   :  { %v4951_v52 = vmul.f32 %v7559_v29, %v7557_v59 }
 0x8f5   :  { %v7561_v50 = vpop.eup %7560  ;;  %5753 = vst [vmem:[%s11800_s5 + $0x30] sm:$0xff] %v4951_v52  ;;  %5386 = vmatmul.mubr.f32.vlgmr.msra.gmra.mrb[30].mxu0 %v4951_v52  ;;  %5457 = vmatmul.mubr.f32.vlgmr.msra.gmra.mrb[30].mxu1 %v4951_v52 }
 0x8f6   :  { %v7563_v18 = vpop.eup %7562  ;;  %v5172_v8 = vadd.f32 1.0, %v7561_v50  ;;  %7242 = vmatpush1.bf16.msra.mxu0 %v12353_v63  ;;  %7274 = vmatpush1.bf16.msra.mxu1 %v12354_v1 }
 0x8f7   :  { %v5178_v22 = vadd.f32 1.0, %v7563_v18  ;;  %7244 = vmatprep.subr.bf16.mxu0 %v12355_v13  ;;  %7276 = vmatprep.subr.bf16.mxu1 %v12356_v31  ;;  %v7565_v48 = vpop.eup %7564 }
 0x8f8   :  { %7568 = vrcp.f32 %v5172_v8  ;;  %5527 = vmatprep.mubr.f32.mxu0 %v12017_v5  ;;  %5598 = vmatprep.mubr.f32.mxu1 %v12017_v5  ;;  %v7567_v7 = vpop.eup %7566  ;;  %v5185_v53 = vadd.f32 1.0, %v7565_v48 }
 0x8f9   :  { %7570 = vrcp.f32 %v5178_v22 }
 0x8fa   :  { %7246 = vmatpush1.bf16.msra.mxu0 %v12357_v12  ;;  %7278 = vmatpush1.bf16.msra.mxu1 %v12358_v32  ;;  %7572 = vrcp.f32 %v5185_v53 }
 0x8fb   :  { %7248 = vmatprep.subr.bf16.mxu0 %v12359_v0  ;;  %7280 = vmatprep.subr.bf16.mxu1 %v12360_v3 }
 0x8fe   :  { %7250 = vmatpush1.bf16.msra.mxu0 %v12361_v36  ;;  %7282 = vmatpush1.bf16.msra.mxu1 %v12362_v4 }
 0x8ff   :  { %7252 = vmatprep.subr.bf16.mxu0 %v12363_v40  ;;  %7284 = vmatprep.subr.bf16.mxu1 %v12364_v21 }
 0x902   :  { %v7569_v5 = vpop.eup %7568  ;;  %7254 = vmatpush1.bf16.msra.mxu0 %v11499_v9  ;;  %7286 = vmatpush1.bf16.msra.mxu1 %v12365_v16  ;;  %v12367_v9 = vld [vmem:[#allocation49_spill] sm:$0xff] }
 0x903   :  { %v7571_v57 = vpop.eup %7570  ;;  %v5189_v45 = vmul.f32 %v7569_v5, %v7567_v7  ;;  %7256 = vmatprep.subr.bf16.mxu0 %v11511_v42  ;;  %7288 = vmatprep.subr.bf16.mxu1 %v11513_v10  ;;  %v12368_v42 = vld [vmem:[#allocation50_spill] sm:$0xff] }
 0x904   :  { %v5188_v28 = vmul.f32 %v7571_v57, %v11570_v51  ;;  %v7573_v10 = vpop.eup %7572  ;;  %v5605_v51 = vld [vmem:[%s11799_s4] sm:$0xf] }
 0x905   :  { %v5622_v33 = vrot.slane %v5605_v51, %v12350_v34  ;;  %v5618_v46 = vrot.slane %v5605_v51, %v12351_v47 }
 0x906   :  { %v5190_v30 = vadd.f32 %v5189_v45, %v5188_v28  ;;  %7258 = vmatpush1.bf16.msra.mxu0 %v11535_v43  ;;  %7290 = vmatpush1.bf16.msra.mxu1 %v11537_v54 }
 0x907   :  { %7260 = vmatprep.subr.bf16.mxu0 %v12366_v60  ;;  %7292 = vmatprep.subr.bf16.mxu1 %v12367_v9 }
 0x908   :  { %5667 = vst [vmem:[%s11801_s7] sm:$0xff] %v5190_v30  ;;  %7574 = vtanh.f32 %v5190_v30 }
 0x90a   :  { %7262 = vmatpush1.bf16.msra.mxu0 %v11574_v62  ;;  %7294 = vmatpush1.bf16.msra.mxu1 %v12368_v42 }
 0x90b   :  { %7264 = vmatprep.subr.bf16.mxu0 %v11586_v44  ;;  %7296 = vmatprep.subr.bf16.mxu1 %v11588_v26 }
 0x90e   :  { %7266 = vmatpush1.bf16.msra.mxu0 %v11611_v27  ;;  %7298 = vmatpush1.bf16.msra.mxu1 %v11613_v19 }
 0x90f   :  { %7268 = vmatprep.subr.bf16.mxu0 %v11620_v15  ;;  %7300 = vmatprep.subr.bf16.mxu1 %v11622_v56  ;;  %v5610_v15 = vrot.slane %v5605_v51, %v12348_v14  ;;  %v5614_v56 = vrot.slane %v5605_v51, %v12349_v38 }
 0x912   :  { %v7575_v54 = vpop.eup %7574  ;;  %7270 = vmatpush1.bf16.msra.mxu0 %v11635_v2  ;;  %7302 = vmatpush1.bf16.msra.mxu1 %v11637_v17 }
 0x913   :  { %v5192_v43 = vmul.f32 %v7575_v54, %v7573_v10 }
 0x915   :  { %5528 = vmatmul.mubr.f32.vlgmr.msra.gmra.mrb[30].mxu0 %v5192_v43  ;;  %5664 = vst [vmem:[%s11802_s6] sm:$0xff] %v5192_v43  ;;  %5599 = vmatmul.mubr.f32.vlgmr.msra.gmra.mrb[30].mxu1 %v5192_v43 }
 0x9e8   :  { %v5529_v62 = vpop.f32.mrb[30].mxu0  ;;  %v5600_v44 = vpop.f32.mrb[30].mxu1 }
 0x9e9   :  { %v5627_v26 = vadd.f32 %v5610_v15, %v5529_v62  ;;  %v5531_v27 = vpop.f32.mrb[31].mxu0  ;;  %v5602_v19 = vpop.f32.mrb[31].mxu1  ;;  %v5629_v58 = vadd.f32 %v5618_v46, %v5600_v44 }
 0x9ea   :  { %v5628_v2 = vadd.f32 %v5614_v56, %v5531_v27  ;;  %v5630_v49 = vadd.f32 %v5622_v33, %v5602_v19 }
 0x9eb   :  { %v5761_v17 = vmul.f32 -1.442695, %v5627_v26 }
 0x9ec   :  { %v5762_v39 = vmul.f32 -1.442695, %v5628_v2  ;;  %v5763_v25 = vmul.f32 -1.442695, %v5630_v49 }
 0x9ed   :  { %7576 = vpow2.f32 %v5761_v17 }
 0x9ee   :  { %7578 = vpow2.f32 %v5762_v39 }
 0x9ef   :  { %7580 = vpow2.f32 %v5763_v25 }
 0x9f0   :  { %7582 = vtanh.f32 %v5629_v58 }
 0x9f7   :  { %v7577_v14 = vpop.eup %7576 }
 0x9f8   :  { %v7579_v61 = vpop.eup %7578  ;;  %v5634_v38 = vadd.f32 1.0, %v7577_v14 }
 0x9f9   :  { %v5640_v23 = vadd.f32 1.0, %v7579_v61  ;;  %v7581_v24 = vpop.eup %7580 }
 0x9fa   :  { %7584 = vrcp.f32 %v5634_v38  ;;  %v7583_v35 = vpop.eup %7582  ;;  %v5647_v55 = vadd.f32 1.0, %v7581_v24 }
 0x9fb   :  { %7586 = vrcp.f32 %v5640_v23 }
 0x9fc   :  { %7588 = vrcp.f32 %v5647_v55 }
 0xa04   :  { %v7585_v20 = vpop.eup %7584 }
 0xa05   :  { %v7587_v37 = vpop.eup %7586  ;;  %v5651_v34 = vmul.f32 %v7585_v20, %v7583_v35 }
 0xa06   :  { %v5650_v59 = vmul.f32 %v7587_v37, %v11727_v6  ;;  %v7589_v47 = vpop.eup %7588 }
 0xa08   :  { %v5652_v29 = vadd.f32 %v5651_v34, %v5650_v59 }
 0xa0a   :  { %7590 = vtanh.f32 %v5652_v29  ;;  %5766 = vst [vmem:[%s11801_s7 + $0x8] sm:$0xff] %v5652_v29 }
 0xa14   :  { %v7591_v11 = vpop.eup %7590 }
 0xa15   :  { %v5654_v41 = vmul.f32 %v7591_v11, %v7589_v47 }
 0xa17   :  { %5764 = vst [vmem:[%s11800_s5 + $0x38] sm:$0xff] %v5654_v41  ;;  %5765 = vst [vmem:[%s11802_s6 + $0x8] sm:$0xff] %v5654_v41 }

</bundles_post_ra>
